<compile_context>
chip_gen: v5e
topology: v5e:2x2
jax: 0.10.0
libtpu: 0.0.40
codegen_flags: <defaults>
</compile_context>

<pallas_src>
import functools
import math

import jax
import jax.numpy as jnp
from jax.experimental import pallas as pl
from jax.experimental.pallas import tpu as pltpu


def gat_layer_kernel(x_ref, mask_ref, waug_ref, hmask_ref, scale_ref, shift_ref,
                     o_ref, *, num_heads, hidden):
    Bt, N, F_in = x_ref.shape
    H = num_heads
    HF = hidden
    Fout = HF // H

    x = x_ref[...]                                   # (Bt, N, F_in) f32 (kept for residual)
    x_flat = x.reshape(Bt * N, F_in)

    # One augmented feature transform on the MXU:
    #   [Bt*N, F_in] @ [F_in, 256] -> xw | a_src | a_dst | zero padding
    xw_aug = jnp.dot(x_flat, waug_ref[...], preferred_element_type=jnp.float32)
    xw = xw_aug[:, :HF]                              # (Bt*N, HF)
    a_src = xw_aug[:, HF:HF + H]                     # (Bt*N, H)
    a_dst = xw_aug[:, HF + H:HF + 2 * H]             # (Bt*N, H)
    a_srcT = a_src.T                                 # (H, Bt*N)

    hmask = hmask_ref[...]                           # (H*N, HF) block-diag structure mask
    scale = scale_ref[...]                           # (1, HF)  folded BN scale
    shift = shift_ref[...]                           # (1, HF)  folded bias + BN shift

    for g in range(Bt):                              # static unroll over graphs in the block
        lo = g * N
        xw_g = xw[lo:lo + N]                         # (N, HF)
        adst_g = a_dst[lo:lo + N]                    # (N, H)
        asrc_gT = a_srcT[:, lo:lo + N]               # (H, N)
        bias_g = mask_ref[g]                         # (N, N) additive mask (0 / -1e30)

        # Head-batched logits, softmax axis (sources) on lanes:
        #   logits[i, h, j] = a_dst[i, h] + a_src[j, h]
        logits = adst_g[:, :, None] + asrc_gT[None, :, :]        # (N, H, N)
        logits = jnp.where(logits > 0, logits, 0.2 * logits)     # LeakyReLU(0.2)
        logits = logits + bias_g[:, None, :]                     # mask non-edges
        m = jnp.max(logits, axis=-1, keepdims=True)              # (N, H, 1)
        p = jnp.exp(logits - m)                                  # un-normalized weights
        s = jnp.sum(p, axis=-1, keepdims=True)                   # (N, H, 1)  (>= 1, self loop)

        # Block-diagonal aggregation: one [N, H*N] @ [H*N, HF] MXU matmul.
        P = p.reshape(N, H * N)
        V = jnp.concatenate([xw_g] * H, axis=0) * hmask           # (H*N, HF)
        agg = jnp.dot(P, V, preferred_element_type=jnp.float32)   # (N, HF)

        # Deferred softmax normalization on the small [N, HF] result.
        inv = jnp.broadcast_to(1.0 / s, (N, H, Fout)).reshape(N, HF)
        agg = agg * inv

        # Folded epilogue: (agg + bias) through BatchNorm(eval) == agg*scale + shift,
        # then ReLU and residual.
        h = agg * scale + shift
        h = jnp.maximum(h, 0.0) + x[g]
        o_ref[g] = h.astype(o_ref.dtype)


def gat_layer(x, adj_mask, weight, att_src, att_dst, bias,
              bn_gamma, bn_beta, bn_mean, bn_var, num_heads,
              eps=1e-5, graphs_per_block=2):
    """x: [B, N, F_in], adj_mask: [B, N, N] (adj[b, tgt, src] = 1, self loops included),
    weight: [H*Fout, F_in], att_src/att_dst: [H, Fout], bias: [H*Fout]."""
    B, N, F_in = x.shape
    HF = weight.shape[0]
    H = num_heads
    Fout = HF // H
    Bt = graphs_per_block if B % graphs_per_block == 0 else 1

    # Fold BatchNorm1d (eval) + GATConv bias into one per-channel scale/shift.
    bn_scale = bn_gamma / jnp.sqrt(bn_var + eps)                  # [HF]
    shift = bias * bn_scale + (bn_beta - bn_mean * bn_scale)      # [HF]

    # Augmented weight: W_aug^T = [W^T | W^T @ asrc_blk | W^T @ adst_blk], padded to 256.
    wT = weight.T.astype(jnp.float32)                             # [F_in, HF]
    wT3 = wT.reshape(F_in, H, Fout)
    w_src = jnp.einsum('fhd,hd->fh', wT3, att_src.astype(jnp.float32))   # [F_in, H]
    w_dst = jnp.einsum('fhd,hd->fh', wT3, att_dst.astype(jnp.float32))   # [F_in, H]
    waug_raw = jnp.concatenate([wT, w_src, w_dst], axis=1)        # [F_in, HF + 2H]
    waug_w = HF + 2 * H
    waug_pad = int(math.ceil(waug_w / 128.0) * 128)
    w_aug = jnp.zeros((F_in, waug_pad), jnp.float32).at[:, :waug_w].set(waug_raw)

    # Additive f32 mask: 0 on edges, -1e30 elsewhere.
    mask_bias = jnp.where(adj_mask > 0, jnp.float32(0.0), jnp.float32(-1e30))

    # Block-diagonal structure mask for the single aggregation matmul.
    hmask = jnp.kron(jnp.eye(H, dtype=jnp.float32),
                     jnp.ones((N, Fout), jnp.float32))            # [H*N, HF]

    scale2 = bn_scale.reshape(1, HF).astype(jnp.float32)
    shift2 = shift.reshape(1, HF).astype(jnp.float32)

    kernel = functools.partial(gat_layer_kernel, num_heads=H, hidden=HF)

    flops = int(B * (2 * N * F_in * waug_pad          # augmented feature transform
                     + 2 * N * (H * N) * HF))         # block-diagonal aggregation
    bytes_accessed = int(B * (N * F_in * 4 + N * N * 4 + N * HF * 4)
                         + F_in * waug_pad * 4 + H * N * HF * 4 + 2 * HF * 4)

    grid_spec = pltpu.PrefetchScalarGridSpec(
        num_scalar_prefetch=0,
        grid=(B // Bt,),
        in_specs=[
            pl.BlockSpec((Bt, N, F_in), lambda b: (b, 0, 0)),     # x (f32, residual)
            pl.BlockSpec((Bt, N, N), lambda b: (b, 0, 0)),        # additive adjacency mask
            pl.BlockSpec((F_in, waug_pad), lambda b: (0, 0)),     # augmented W^T (resident)
            pl.BlockSpec((H * N, HF), lambda b: (0, 0)),          # block-diag head mask
            pl.BlockSpec((1, HF), lambda b: (0, 0)),              # folded BN scale
            pl.BlockSpec((1, HF), lambda b: (0, 0)),              # folded bias + BN shift
        ],
        out_specs=pl.BlockSpec((Bt, N, HF), lambda b: (b, 0, 0)),
    )

    return pl.pallas_call(
        kernel,
        out_shape=jax.ShapeDtypeStruct((B, N, HF), jnp.float32),
        grid_spec=grid_spec,
        compiler_params=pltpu.CompilerParams(dimension_semantics=("parallel",)),
        cost_estimate=pl.CostEstimate(flops=flops,
                                      transcendentals=int(B * H * N * N),
                                      bytes_accessed=bytes_accessed),
    )(x.astype(jnp.float32), mask_bias, w_aug, hmask, scale2, shift2)


def build_adjacency_mask(edge_index, num_nodes):
    """Dense mask with adj[b, tgt, src] = 1 for each edge, plus self loops
    (GATConv default add_self_loops=True). edge_index: [B, 2, E] int32."""
    B, _, E = edge_index.shape
    src = edge_index[:, 0, :]
    tgt = edge_index[:, 1, :]
    b_idx = jnp.broadcast_to(jnp.arange(B, dtype=jnp.int32)[:, None], src.shape)
    adj = jnp.zeros((B, num_nodes, num_nodes), jnp.float32)
    adj = adj.at[b_idx, tgt, src].set(1.0)
    adj = jnp.maximum(adj, jnp.eye(num_nodes, dtype=jnp.float32)[None])
    return adj


def gat_layer_ref(x, adj_mask, weight, att_src, att_dst, bias,
                  bn_gamma, bn_beta, bn_mean, bn_var, num_heads, eps=1e-5):
    """Pure-JAX f32 reference."""
    B, N, F_in = x.shape
    HF = weight.shape[0]
    H = num_heads
    Fout = HF // H

    xw = jnp.einsum('bnf,fo->bno', x, weight.T)                       # [B, N, HF]
    xw_h = xw.reshape(B, N, H, Fout)
    a_src = jnp.einsum('bnhf,hf->bnh', xw_h, att_src)                 # [B, N, H]
    a_dst = jnp.einsum('bnhf,hf->bnh', xw_h, att_dst)                 # [B, N, H]

    logits = a_dst[:, :, None, :] + a_src[:, None, :, :]              # [B, tgt, src, H]
    logits = jnp.where(logits > 0, logits, 0.2 * logits)              # LeakyReLU(0.2)
    mask = adj_mask[..., None] > 0
    logits = jnp.where(mask, logits, -1e30)
    logits = logits - jnp.max(logits, axis=2, keepdims=True)
    p = jnp.exp(logits)
    p = jnp.where(mask, p, 0.0)
    p = p / jnp.sum(p, axis=2, keepdims=True)

    agg = jnp.einsum('bijh,bjhf->bihf', p, xw_h).reshape(B, N, HF)
    h = agg + bias
    h = (h - bn_mean) / jnp.sqrt(bn_var + eps) * bn_gamma + bn_beta
    h = jnp.maximum(h, 0.0)
    h = h + x
    return h


if __name__ == "__main__":
    key = jax.random.PRNGKey(0)
    B, N = 4, 64                       # graphs per batch, nodes per graph
    heads, out_per_head = 4, 32        # heads * out_per_head == in_features (residual)
    F_in = heads * out_per_head        # 128 -> lane-dense output
    E = 512                            # directed edges per graph

    ks = jax.random.split(key, 10)
    x = jax.random.normal(ks[0], (B, N, F_in), jnp.float32)
    src = jax.random.randint(ks[1], (B, E), 0, N, dtype=jnp.int32)
    tgt = jax.random.randint(ks[2], (B, E), 0, N, dtype=jnp.int32)
    edge_index = jnp.stack([src, tgt], axis=1)                 # [B, 2, E]
    adj_mask = build_adjacency_mask(edge_index, N)             # [B, N, N]

    # GATConv parameters (glorot-style init like PyG), bias small, non-trivial BN stats.
    limit_w = math.sqrt(6.0 / (F_in + heads * out_per_head))
    weight = jax.random.uniform(ks[3], (heads * out_per_head, F_in), jnp.float32,
                                -limit_w, limit_w)
    limit_a = math.sqrt(6.0 / (heads + out_per_head))
    att_src = jax.random.uniform(ks[4], (heads, out_per_head), jnp.float32, -limit_a, limit_a)
    att_dst = jax.random.uniform(ks[5], (heads, out_per_head), jnp.float32, -limit_a, limit_a)
    bias = 0.1 * jax.random.normal(ks[6], (heads * out_per_head,), jnp.float32)
    bn_gamma = jax.random.uniform(ks[7], (heads * out_per_head,), jnp.float32, 0.5, 1.5)
    bn_beta = 0.1 * jax.random.normal(ks[8], (heads * out_per_head,), jnp.float32)
    bn_mean = 0.1 * jax.random.normal(ks[9], (heads * out_per_head,), jnp.float32)
    bn_var = jnp.ones((heads * out_per_head,), jnp.float32)

    out = gat_layer(x, adj_mask, weight, att_src, att_dst, bias,
                    bn_gamma, bn_beta, bn_mean, bn_var,
                    num_heads=heads, graphs_per_block=2)
    out = jax.block_until_ready(out)

    ref = gat_layer_ref(x, adj_mask, weight, att_src, att_dst, bias,
                        bn_gamma, bn_beta, bn_mean, bn_var, num_heads=heads)
    ref = jax.block_until_ready(ref)

    assert out.shape == (B, N, heads * out_per_head)
    assert jnp.allclose(out, ref, atol=2e-3, rtol=2e-3), \
        f"max abs err = {jnp.max(jnp.abs(out - ref))}"

    print("KERNEL_OK")
</pallas_src>

<mosaic_0001>
module attributes {stable_mosaic.version = 11 : i64} {
  func.func @gat_layer_kernel(%arg0: i32, %arg1: memref<2x64x128xf32, #tpu.memory_space<vmem>>, %arg2: memref<2x64x64xf32, #tpu.memory_space<vmem>>, %arg3: memref<128x256xf32, #tpu.memory_space<vmem>>, %arg4: memref<256x128xf32, #tpu.memory_space<vmem>>, %arg5: memref<1x128xf32, #tpu.memory_space<vmem>>, %arg6: memref<1x128xf32, #tpu.memory_space<vmem>>, %arg7: memref<2x64x128xf32, #tpu.memory_space<vmem>>) attributes {dimension_semantics = [#tpu.dimension_semantics<parallel>], iteration_bounds = array<i64: 2>, scalar_prefetch = 0 : i64, scratch_operands = 0 : i64, tpu.core_type = #tpu.core_type<tc>, window_params = [{transform_indices = @transform_0, window_bounds = array<i64: 2, 64, 128>}, {transform_indices = @transform_1, window_bounds = array<i64: 2, 64, 64>}, {pipeline_mode = #tpu.pipeline_mode<synchronous>, transform_indices = @transform_2, window_bounds = array<i64: 128, 256>}, {pipeline_mode = #tpu.pipeline_mode<synchronous>, transform_indices = @transform_3, window_bounds = array<i64: 256, 128>}, {pipeline_mode = #tpu.pipeline_mode<synchronous>, transform_indices = @transform_4, window_bounds = array<i64: 1, 128>}, {pipeline_mode = #tpu.pipeline_mode<synchronous>, transform_indices = @transform_5, window_bounds = array<i64: 1, 128>}, {transform_indices = @transform_6, window_bounds = array<i64: 2, 64, 128>}]} {
    %c0 = arith.constant 0 : index
    %c0_0 = arith.constant 0 : index
    %c0_1 = arith.constant 0 : index
    %0 = vector.load %arg1[%c0, %c0_0, %c0_1] : memref<2x64x128xf32, #tpu.memory_space<vmem>>, vector<2x64x128xf32>
    %1 = vector.shape_cast %0 : vector<2x64x128xf32> to vector<128x128xf32>
    %c0_2 = arith.constant 0 : index
    %c0_3 = arith.constant 0 : index
    %2 = vector.load %arg3[%c0_2, %c0_3] : memref<128x256xf32, #tpu.memory_space<vmem>>, vector<128x256xf32>
    %cst = arith.constant dense<0.000000e+00> : vector<128x256xf32>
    %3 = tpu.matmul %1, %2, %cst {dimension_numbers = #tpu.dot_dimension_numbers<[1], [0], [0], [1], [0, 0, 1, 1], [], []>} : vector<128x128xf32>, vector<128x256xf32>, vector<128x256xf32> -> vector<128x256xf32>
    %4 = vector.extract_strided_slice %3 {offsets = [0, 0], sizes = [128, 128], strides = [1, 1]} : vector<128x256xf32> to vector<128x128xf32>
    %5 = vector.extract_strided_slice %3 {offsets = [0, 128], sizes = [128, 4], strides = [1, 1]} : vector<128x256xf32> to vector<128x4xf32>
    %6 = vector.extract_strided_slice %3 {offsets = [0, 132], sizes = [128, 4], strides = [1, 1]} : vector<128x256xf32> to vector<128x4xf32>
    %7 = tpu.transpose %5, [1, 0] : vector<128x4xf32> -> vector<4x128xf32>
    %c0_4 = arith.constant 0 : index
    %c0_5 = arith.constant 0 : index
    %8 = vector.load %arg4[%c0_4, %c0_5] : memref<256x128xf32, #tpu.memory_space<vmem>>, vector<256x128xf32>
    %c0_6 = arith.constant 0 : index
    %c0_7 = arith.constant 0 : index
    %9 = vector.load %arg5[%c0_6, %c0_7] : memref<1x128xf32, #tpu.memory_space<vmem>>, vector<1x128xf32>
    %c0_8 = arith.constant 0 : index
    %c0_9 = arith.constant 0 : index
    %10 = vector.load %arg6[%c0_8, %c0_9] : memref<1x128xf32, #tpu.memory_space<vmem>>, vector<1x128xf32>
    %11 = vector.extract_strided_slice %4 {offsets = [0, 0], sizes = [64, 128], strides = [1, 1]} : vector<128x128xf32> to vector<64x128xf32>
    %12 = vector.extract_strided_slice %6 {offsets = [0, 0], sizes = [64, 4], strides = [1, 1]} : vector<128x4xf32> to vector<64x4xf32>
    %13 = vector.extract_strided_slice %7 {offsets = [0, 0], sizes = [4, 64], strides = [1, 1]} : vector<4x128xf32> to vector<4x64xf32>
    %c0_10 = arith.constant 0 : index
    %c0_11 = arith.constant 0 : index
    %c0_12 = arith.constant 0 : index
    %14 = vector.load %arg2[%c0_10, %c0_11, %c0_12] : memref<2x64x64xf32, #tpu.memory_space<vmem>>, vector<1x64x64xf32>
    %15 = vector.shape_cast %14 : vector<1x64x64xf32> to vector<64x64xf32>
    %16 = vector.shape_cast %12 : vector<64x4xf32> to vector<64x4x1xf32>
    %17 = vector.shape_cast %13 : vector<4x64xf32> to vector<1x4x64xf32>
    %18 = vector.broadcast %16 : vector<64x4x1xf32> to vector<64x4x64xf32>
    %19 = vector.broadcast %17 : vector<1x4x64xf32> to vector<64x4x64xf32>
    %20 = arith.addf %18, %19 : vector<64x4x64xf32>
    %cst_13 = arith.constant 0.000000e+00 : f32
    %21 = vector.broadcast %cst_13 : f32 to vector<64x4x64xf32>
    %22 = arith.cmpf ogt, %20, %21 : vector<64x4x64xf32>
    %cst_14 = arith.constant 2.000000e-01 : f32
    %23 = vector.broadcast %cst_14 : f32 to vector<64x4x64xf32>
    %24 = arith.mulf %23, %20 : vector<64x4x64xf32>
    %25 = arith.select %22, %20, %24 : vector<64x4x64xi1>, vector<64x4x64xf32>
    %26 = vector.shape_cast %15 : vector<64x64xf32> to vector<64x1x64xf32>
    %27 = vector.broadcast %26 : vector<64x1x64xf32> to vector<64x4x64xf32>
    %28 = arith.addf %25, %27 : vector<64x4x64xf32>
    %cst_15 = arith.constant dense<0xFF800000> : vector<64x4xf32>
    %29 = vector.multi_reduction <maximumf>, %28, %cst_15 [2] : vector<64x4x64xf32> to vector<64x4xf32>
    %30 = vector.shape_cast %29 : vector<64x4xf32> to vector<64x4x1xf32>
    %31 = vector.broadcast %30 : vector<64x4x1xf32> to vector<64x4x64xf32>
    %32 = arith.subf %28, %31 : vector<64x4x64xf32>
    %33 = math.exp %32 : vector<64x4x64xf32>
    %cst_16 = arith.constant dense<0.000000e+00> : vector<64x4xf32>
    %34 = vector.multi_reduction <add>, %33, %cst_16 [2] : vector<64x4x64xf32> to vector<64x4xf32>
    %35 = vector.shape_cast %34 : vector<64x4xf32> to vector<64x4x1xf32>
    %36 = vector.shape_cast %33 : vector<64x4x64xf32> to vector<64x256xf32>
    %37 = tpu.concatenate %11, %11, %11, %11 in 0 : vector<64x128xf32>, vector<64x128xf32>, vector<64x128xf32>, vector<64x128xf32> -> vector<256x128xf32>
    %38 = arith.mulf %37, %8 : vector<256x128xf32>
    %cst_17 = arith.constant dense<0.000000e+00> : vector<64x128xf32>
    %39 = tpu.matmul %36, %38, %cst_17 {dimension_numbers = #tpu.dot_dimension_numbers<[1], [0], [0], [1], [0, 0, 1, 1], [], []>} : vector<64x256xf32>, vector<256x128xf32>, vector<64x128xf32> -> vector<64x128xf32>
    %cst_18 = arith.constant 1.000000e+00 : f32
    %40 = vector.broadcast %cst_18 : f32 to vector<64x4x1xf32>
    %41 = arith.divf %40, %35 : vector<64x4x1xf32>
    %42 = vector.shape_cast %41 : vector<64x4x1xf32> to vector<64x4x1xf32>
    %43 = vector.broadcast %42 : vector<64x4x1xf32> to vector<64x4x32xf32>
    %44 = vector.shape_cast %43 : vector<64x4x32xf32> to vector<64x128xf32>
    %45 = arith.mulf %39, %44 : vector<64x128xf32>
    %46 = vector.broadcast %9 : vector<1x128xf32> to vector<64x128xf32>
    %47 = arith.mulf %45, %46 : vector<64x128xf32>
    %48 = vector.broadcast %10 : vector<1x128xf32> to vector<64x128xf32>
    %49 = arith.addf %47, %48 : vector<64x128xf32>
    %cst_19 = arith.constant 0.000000e+00 : f32
    %50 = vector.broadcast %cst_19 : f32 to vector<64x128xf32>
    %51 = arith.maximumf %49, %50 : vector<64x128xf32>
    %52 = vector.extract_strided_slice %0 {offsets = [0, 0, 0], sizes = [1, 64, 128], strides = [1, 1, 1]} : vector<2x64x128xf32> to vector<1x64x128xf32>
    %53 = vector.shape_cast %52 : vector<1x64x128xf32> to vector<64x128xf32>
    %54 = arith.addf %51, %53 : vector<64x128xf32>
    %c0_20 = arith.constant 0 : index
    %c0_21 = arith.constant 0 : index
    %c0_22 = arith.constant 0 : index
    %55 = vector.load %arg7[%c0_20, %c0_21, %c0_22] : memref<2x64x128xf32, #tpu.memory_space<vmem>>, vector<1x64x128xf32>
    %56 = vector.shape_cast %55 : vector<1x64x128xf32> to vector<64x128xf32>
    %57 = vector.shape_cast %54 : vector<64x128xf32> to vector<1x64x128xf32>
    tpu.vector_store %arg7[%c0_20, %c0_21, %c0_22], %57 {strides = array<i32>} : memref<2x64x128xf32, #tpu.memory_space<vmem>>, vector<1x64x128xf32>,
    %58 = vector.extract_strided_slice %4 {offsets = [64, 0], sizes = [64, 128], strides = [1, 1]} : vector<128x128xf32> to vector<64x128xf32>
    %59 = vector.extract_strided_slice %6 {offsets = [64, 0], sizes = [64, 4], strides = [1, 1]} : vector<128x4xf32> to vector<64x4xf32>
    %60 = vector.extract_strided_slice %7 {offsets = [0, 64], sizes = [4, 64], strides = [1, 1]} : vector<4x128xf32> to vector<4x64xf32>
    %c1 = arith.constant 1 : index
    %c0_23 = arith.constant 0 : index
    %c0_24 = arith.constant 0 : index
    %61 = vector.load %arg2[%c1, %c0_23, %c0_24] : memref<2x64x64xf32, #tpu.memory_space<vmem>>, vector<1x64x64xf32>
    %62 = vector.shape_cast %61 : vector<1x64x64xf32> to vector<64x64xf32>
    %63 = vector.shape_cast %59 : vector<64x4xf32> to vector<64x4x1xf32>
    %64 = vector.shape_cast %60 : vector<4x64xf32> to vector<1x4x64xf32>
    %65 = vector.broadcast %63 : vector<64x4x1xf32> to vector<64x4x64xf32>
    %66 = vector.broadcast %64 : vector<1x4x64xf32> to vector<64x4x64xf32>
    %67 = arith.addf %65, %66 : vector<64x4x64xf32>
    %cst_25 = arith.constant 0.000000e+00 : f32
    %68 = vector.broadcast %cst_25 : f32 to vector<64x4x64xf32>
    %69 = arith.cmpf ogt, %67, %68 : vector<64x4x64xf32>
    %cst_26 = arith.constant 2.000000e-01 : f32
    %70 = vector.broadcast %cst_26 : f32 to vector<64x4x64xf32>
    %71 = arith.mulf %70, %67 : vector<64x4x64xf32>
    %72 = arith.select %69, %67, %71 : vector<64x4x64xi1>, vector<64x4x64xf32>
    %73 = vector.shape_cast %62 : vector<64x64xf32> to vector<64x1x64xf32>
    %74 = vector.broadcast %73 : vector<64x1x64xf32> to vector<64x4x64xf32>
    %75 = arith.addf %72, %74 : vector<64x4x64xf32>
    %cst_27 = arith.constant dense<0xFF800000> : vector<64x4xf32>
    %76 = vector.multi_reduction <maximumf>, %75, %cst_27 [2] : vector<64x4x64xf32> to vector<64x4xf32>
    %77 = vector.shape_cast %76 : vector<64x4xf32> to vector<64x4x1xf32>
    %78 = vector.broadcast %77 : vector<64x4x1xf32> to vector<64x4x64xf32>
    %79 = arith.subf %75, %78 : vector<64x4x64xf32>
    %80 = math.exp %79 : vector<64x4x64xf32>
    %cst_28 = arith.constant dense<0.000000e+00> : vector<64x4xf32>
    %81 = vector.multi_reduction <add>, %80, %cst_28 [2] : vector<64x4x64xf32> to vector<64x4xf32>
    %82 = vector.shape_cast %81 : vector<64x4xf32> to vector<64x4x1xf32>
    %83 = vector.shape_cast %80 : vector<64x4x64xf32> to vector<64x256xf32>
    %84 = tpu.concatenate %58, %58, %58, %58 in 0 : vector<64x128xf32>, vector<64x128xf32>, vector<64x128xf32>, vector<64x128xf32> -> vector<256x128xf32>
    %85 = arith.mulf %84, %8 : vector<256x128xf32>
    %cst_29 = arith.constant dense<0.000000e+00> : vector<64x128xf32>
    %86 = tpu.matmul %83, %85, %cst_29 {dimension_numbers = #tpu.dot_dimension_numbers<[1], [0], [0], [1], [0, 0, 1, 1], [], []>} : vector<64x256xf32>, vector<256x128xf32>, vector<64x128xf32> -> vector<64x128xf32>
    %cst_30 = arith.constant 1.000000e+00 : f32
    %87 = vector.broadcast %cst_30 : f32 to vector<64x4x1xf32>
    %88 = arith.divf %87, %82 : vector<64x4x1xf32>
    %89 = vector.shape_cast %88 : vector<64x4x1xf32> to vector<64x4x1xf32>
    %90 = vector.broadcast %89 : vector<64x4x1xf32> to vector<64x4x32xf32>
    %91 = vector.shape_cast %90 : vector<64x4x32xf32> to vector<64x128xf32>
    %92 = arith.mulf %86, %91 : vector<64x128xf32>
    %93 = vector.broadcast %9 : vector<1x128xf32> to vector<64x128xf32>
    %94 = arith.mulf %92, %93 : vector<64x128xf32>
    %95 = vector.broadcast %10 : vector<1x128xf32> to vector<64x128xf32>
    %96 = arith.addf %94, %95 : vector<64x128xf32>
    %cst_31 = arith.constant 0.000000e+00 : f32
    %97 = vector.broadcast %cst_31 : f32 to vector<64x128xf32>
    %98 = arith.maximumf %96, %97 : vector<64x128xf32>
    %99 = vector.extract_strided_slice %0 {offsets = [1, 0, 0], sizes = [1, 64, 128], strides = [1, 1, 1]} : vector<2x64x128xf32> to vector<1x64x128xf32>
    %100 = vector.shape_cast %99 : vector<1x64x128xf32> to vector<64x128xf32>
    %101 = arith.addf %98, %100 : vector<64x128xf32>
    %c1_32 = arith.constant 1 : index
    %c0_33 = arith.constant 0 : index
    %c0_34 = arith.constant 0 : index
    %102 = vector.load %arg7[%c1_32, %c0_33, %c0_34] : memref<2x64x128xf32, #tpu.memory_space<vmem>>, vector<1x64x128xf32>
    %103 = vector.shape_cast %102 : vector<1x64x128xf32> to vector<64x128xf32>
    %104 = vector.shape_cast %101 : vector<64x128xf32> to vector<1x64x128xf32>
    tpu.vector_store %arg7[%c1_32, %c0_33, %c0_34], %104 {strides = array<i32>} : memref<2x64x128xf32, #tpu.memory_space<vmem>>, vector<1x64x128xf32>,
    return
  }
  func.func @transform_0(%arg0: i32) -> (i32, i32, i32) {
    %c0_i32 = arith.constant 0 : i32
    %c0_i32_0 = arith.constant 0 : i32
    %c0_i32_1 = arith.constant 0 : i32
    return %arg0, %c0_i32, %c0_i32_0 : i32, i32, i32
  }
  func.func @transform_1(%arg0: i32) -> (i32, i32, i32) {
    %c0_i32 = arith.constant 0 : i32
    %c0_i32_0 = arith.constant 0 : i32
    %c0_i32_1 = arith.constant 0 : i32
    return %arg0, %c0_i32, %c0_i32_0 : i32, i32, i32
  }
  func.func @transform_2(%arg0: i32) -> (i32, i32) {
    %c0_i32 = arith.constant 0 : i32
    %c0_i32_0 = arith.constant 0 : i32
    %c0_i32_1 = arith.constant 0 : i32
    return %c0_i32, %c0_i32_0 : i32, i32
  }
  func.func @transform_3(%arg0: i32) -> (i32, i32) {
    %c0_i32 = arith.constant 0 : i32
    %c0_i32_0 = arith.constant 0 : i32
    %c0_i32_1 = arith.constant 0 : i32
    return %c0_i32, %c0_i32_0 : i32, i32
  }
  func.func @transform_4(%arg0: i32) -> (i32, i32) {
    %c0_i32 = arith.constant 0 : i32
    %c0_i32_0 = arith.constant 0 : i32
    %c0_i32_1 = arith.constant 0 : i32
    return %c0_i32, %c0_i32_0 : i32, i32
  }
  func.func @transform_5(%arg0: i32) -> (i32, i32) {
    %c0_i32 = arith.constant 0 : i32
    %c0_i32_0 = arith.constant 0 : i32
    %c0_i32_1 = arith.constant 0 : i32
    return %c0_i32, %c0_i32_0 : i32, i32
  }
  func.func @transform_6(%arg0: i32) -> (i32, i32, i32) {
    %c0_i32 = arith.constant 0 : i32
    %c0_i32_0 = arith.constant 0 : i32
    %c0_i32_1 = arith.constant 0 : i32
    return %arg0, %c0_i32, %c0_i32_0 : i32, i32, i32
  }
}

</mosaic_0001>

<bundles_post_ra>
// kernel: tpu_custom_call.1
= control target key start
LH: loop header
LB: loop body
LE: loop exit
PB: predicated region body
PF: predicated region fallthrough
CT: control target
= control target key end

     0   :  { %s18591_s0 = inlined_call_operand.hbm [shape: f32[4,64,128], index: 0, kind: input, shape index: {}]   ;;  %s18592_s1 = inlined_call_operand.hbm [shape: f32[4,64,64], index: 1, kind: input, shape index: {}]   ;;  %s18593_s2 = inlined_call_operand.hbm [shape: f32[128,256], index: 2, kind: input, shape index: {}]   ;;  %s18594_s3 = inlined_call_operand.hbm [shape: f32[256,128], index: 3, kind: input, shape index: {}]   ;;  %s18595_s4 = inlined_call_operand.vmem [shape: f32[1,128], index: 4, kind: input, shape index: {}]   ;;  %s18596_s5 = inlined_call_operand.vmem [shape: f32[1,128], index: 5, kind: input, shape index: {}]   ;;  %s18597_s6 = inlined_call_operand.hbm [shape: f32[4,64,128], index: 6, kind: output, shape index: {}]  }
   0x1   :  { %18829 = sst [smem:[#allocation87_spill]] %s18591_s0 }
   0x2   :  { %18830 = sst [smem:[#allocation88_spill]] %s18593_s2 }
   0x3   :  { %18831 = sst [smem:[#allocation89_spill]] %s18594_s3 }
   0x4   :  { %11 = vsyncpa [#allocation3], 0 }
   0x5   :  { %13 = vsyncpa [#allocation3 + $0x1], 0 }
   0x6   :  { %14 = vsyncpa [#allocation6], 0 }
   0x7   :  { %16 = vsyncpa [#allocation6 + $0x1], 0 }
   0x8   :  { %17 = vsyncpa [#allocation9], 0 }
   0x9   :  { %18 = vsyncpa [#allocation4], 0 }
   0xa   :  { %20 = vsyncpa [#allocation4 + $0x1], 0  ;;  %s9691_s21 = smov 0   ;;  %s9693_s22 = smov 0  }
   0xb   :  { %s9695_s23 = smov 0   ;;  %s9697_s24 = smov 0  }
   0xc LB: > { %18832 = sst [smem:[#allocation16_spill]] %s9637_s23  ;;  %s9712_s25 = sadd.s32 4294967295, %s9641_s24   ;;  %s9641_s24 = sphi %s9697_s24, %s19896_s24   ;;  %s9637_s23 = sphi %s9695_s23, %s19893_s23   ;;  %s9633_s22 = sphi %s9693_s22, %s19895_s22   ;;  %s9629_s21 = sphi %s9691_s21, %s19894_s21  }
   0xd   : > { %s8650_s26 = sadd.s32 4294967294, %s9641_s24   ;;  %p46_p0 = scmp.ne.s32.totalorder %s9633_s22, %s9629_s21 }
   0xe   : > { %p47_p1 = scmp.eq.s32.totalorder %s9712_s25, 0  ;;  %p180_p2 = scmp.eq.s32.totalorder %s9712_s25, 1 }
   0xf   : > { %p186_p3 = scmp.eq.s32.totalorder %s8650_s26, 1  ;;  %p8651_p5 = scmp.ge.s32.totalorder %s9641_s24, 1 }
  0x10   : > { %p9721_p4 = por %p47_p1, %p46_p0  ;;  %p193_p7 = scmp.lt.s32.totalorder %s9641_s24, 3 }
  0x11   : > { %p9726_p6 = por %p186_p3, %p46_p0  ;;  %s18835_s2 = sld [smem:[#allocation88_spill]] }
  0x12   : > { %p9734_p8 = pnand %p8651_p5, %p193_p7  ;;  %s9643_s9 = smov [#allocation7]  }
  0x13   : > { %s206_s10 = sshll.u32 %s9643_s9, 4  ;;  %s18837_s3 = sld [smem:[#allocation89_spill]]  ;;  %s207_s10 = int_to_ptr.vmem [resolvable:$true] %s206_s10 }
  0x14   : > { %p8711_p9 = pneg %p9734_p8  ;;  %s9644_s14 = smov 256  }
  0x15   : > { %s9645_s15 = smov 16   ;;  %s9646_s16 = smov [#allocation8]  }
  0x16   : > { %p8712_p10 = pnand %p8711_p9, %p47_p1  ;;  %s220_s17 = sshll.u32 %s9646_s16, 4  ;;  %s221_s17 = int_to_ptr.vmem [resolvable:$true] %s220_s17 }
  0x17   : > { %s204_s7 = sshll.u32 %s18835_s2, 4  ;;  %s18598_s18 = smov 128   ;;  %s205_s7 = int_to_ptr.hbm [resolvable:$true] %s204_s7 }
  0x18   : > { %8714 = dma.hbm_to_vmem [thread:$0]  (!%p8712_p10), %s205_s7, 4096, %s207_s10, [#allocation6], %s9644_s14, %s9644_s14, %s9645_s15  }
  0x19   : > { %s218_s13 = sshll.u32 %s18837_s3, 4  ;;  %s18600_s19 = smov 8   ;;  %s219_s13 = int_to_ptr.hbm [resolvable:$true] %s218_s13 }
  0x1a   : > { %8717 = dma.hbm_to_vmem [thread:$0]  (!%p8712_p10), %s219_s13, 4096, %s221_s17, [#allocation9], %s18598_s18, %s18598_s18, %s18600_s19  }
  0x1b   : > { %s9750_s20 = sadd.s32 1, %s9641_s24   ;;  %s33_s29 = sadd.s32 1, %s9637_s23 }
  0x1c   : > { %s30_s26 = ssub.s32 %s9641_s24, %s9750_s20  ;;  %p40_p13 = scmp.ne.s32.totalorder %s9637_s23, %s9633_s22 }
  0x1d   : > { %p31_p12 = scmp.eq.s32.totalorder %s30_s26, 0  ;;  %p41_p0 = scmp.eq.s32.totalorder %s9641_s24, 0 }
  0x1e   : > { %p9763_p5 = por %p180_p2, %p40_p13  ;;  %p8731_p7 = scmp.lt.s32.totalorder %s9641_s24, 2 }
  0x1f   : > { %s9759_s30 = scalar_select %p31_p12, %s9637_s23, %s33_s29  }
  0x20   : > { %p42_p3 = por %p41_p0, %p40_p13  ;;  %s240_s9 = sand.u32 1, %s9637_s23  }
  0x21   : > { %18838 = sst [smem:[#allocation17_spill]] %s9759_s30  ;;  %s9769_s10 = sshll.u32 %s240_s9, 7 }
  0x22   : > { %s8692_s11 = sshll.u32 %s9641_s24, 7  ;;  %s18840_s0 = sld [smem:[#allocation87_spill]] }
  0x23   : > { %s244_s15 = scalar_lea.vmem [#allocation2], %s9769_s10  ;;  %p9776_p9 = pnand %p8731_p7, %p42_p3 }
  0x24   : > { %s253_s16 = sshll.u32 %s244_s15, 4  ;;  %s273_s19 = scalar_lea.hbm %s18592_s1, %s8692_s11  ;;  %s254_s16 = int_to_ptr.vmem [resolvable:$true] %s253_s16 }
  0x25   : > { %s274_s2 = sshll.u32 %s273_s19, 4  ;;  %s241_s3 = scalar_lea.sflag [#allocation3], %s240_s9  ;;  %s275_s2 = int_to_ptr.hbm [resolvable:$true] %s274_s2 }
  0x26   : > { %p9507_p10 = pneg %p9776_p9 }
  0x28   : > { %s250_s14 = scalar_lea.hbm %s18840_s0, %s8692_s11  ;;  %s9510_s15 = scalar_lea.hbm %s18840_s0, 256 }
  0x29   : > { %s251_s17 = sshll.u32 %s250_s14, 4  ;;  %s252_s17 = int_to_ptr.hbm [resolvable:$true] %s251_s17 }
  0x2a   : > { %s9503_s30 = sshra.s32 %s252_s17, 4  ;;  %s9504_s30 = int_to_ptr.hbm [resolvable:$true] %s9503_s30 }
  0x2b   : > { %s9505_s12 = scalar_lea.hbm %s9504_s30, 128  ;;  %p9511_p0 = scmp.lt.s32.totalorder %s9504_s30, %s18840_s0 }
  0x2c   : > { %p9506_p2 = scmp.ne.s32.totalorder %s9504_s30, %s9505_s12  ;;  %p9512_p3 = scmp.lt.s32.totalorder %s9510_s15, %s9505_s12 }
  0x2e   : > { %p9508_p12 = pnand %p9507_p10, %p9506_p2  ;;  %p9513_p7 = por %p9512_p3, %p9511_p0 }
  0x30   : > { %p9509_p13 = pneg %p9508_p12 }
  0x32   : > { %p9514_p11 = pnand %p9513_p7, %p9509_p13 }
  0x34   : > { %9517 = shalt.err (!%p9514_p11)
}
  0x35   : > { %s18842_s19 = smov 8   ;;  %s18843_s9 = smov 128  }
  0x36   : > { %8721 = dma.hbm_to_vmem [thread:$0]  (!%p9776_p9), %s252_s17, 2048, %s254_s16, %s241_s3, %s18843_s9, %s18843_s9, %s18842_s19  }
  0x37   : > { %s267_s11 = scalar_lea.vmem [#allocation5], %s9769_s10  ;;  %s263_s14 = sand.u32 1, %s9641_s24  }
  0x38   : > { %s276_s13 = sshll.u32 %s267_s11, 4  ;;  %s264_s18 = scalar_lea.sflag [#allocation6], %s263_s14  ;;  %s277_s13 = int_to_ptr.vmem [resolvable:$true] %s276_s13 }
  0x39   : > { %s9533_s30 = sshra.s32 %s275_s2, 4  ;;  %s9540_s0 = scalar_lea.hbm %s18592_s1, 256  ;;  %s9534_s30 = int_to_ptr.hbm [resolvable:$true] %s9533_s30 }
  0x3a   : > { %s9535_s12 = scalar_lea.hbm %s9534_s30, 128  ;;  %p9541_p13 = scmp.lt.s32.totalorder %s9534_s30, %s18592_s1 }
  0x3b   : > { %p9536_p2 = scmp.ne.s32.totalorder %s9534_s30, %s9535_s12  ;;  %p9542_p0 = scmp.lt.s32.totalorder %s9540_s0, %s9535_s12 }
  0x3d   : > { %p9538_p11 = pnand %p9536_p2, %p9507_p10  ;;  %p9543_p3 = por %p9542_p0, %p9541_p13 }
  0x3f   : > { %p9539_p12 = pneg %p9538_p11 }
  0x41   : > { %p9544_p7 = pnand %p9543_p3, %p9539_p12 }
  0x43   : > { %9547 = shalt.err (!%p9544_p7)
}
  0x44   : > { %8724 = dma.hbm_to_vmem [thread:$0]  (!%p9776_p9), %s275_s2, 2048, %s277_s13, %s264_s18, %s18843_s9, %s18843_s9, %s18842_s19  }
  0x45   : > { %288 = sbr.rel (%p9734_p8) target bundleno = 2542 (0x9ee), region = 44 }
  0x4a   : > { %s9818_s10 = sand.u32 1, %s9633_s22  }
  0x4b   : > { %s9821_s23 = sshll.u32 %s9818_s10, 7  ;;  %s291_s0 = scalar_lea.sflag [#allocation3], %s9818_s10 }
  0x4c   : > { %s9825_s16 = scalar_lea.vmem [#allocation2], %s9821_s23 }
  0x4d   : > { %9608 = dma.done.wait (%p9721_p4), %s291_s0, 2048  }
  0x4e   : > { %9610 = vsyncadd (%p9721_p4), %s291_s0, 4294965248  ;;  %s300_s2 = sand.u32 1, %s9712_s25   ;;  %s9833_s17 = scalar_lea.vmem [#allocation5], %s9821_s23 }
  0x4f   : > { %s301_s8 = scalar_lea.sflag [#allocation6], %s300_s2 }
  0x50   : > { %9612 = dma.done.wait (%p9721_p4), %s301_s8, 2048  }
  0x51   : > { %9614 = vsyncadd (%p9721_p4), %s301_s8, 4294965248 }
  0x52   : > { %9616 = dma.done.wait (%p47_p1), [#allocation6], 4096  }
  0x53   : > { %9618 = vsyncadd (%p47_p1), [#allocation6], 4294963200 }
  0x54   : > { %9620 = dma.done.wait (%p47_p1), [#allocation9], 4096  }
  0x55   : > { %9622 = vsyncadd (%p47_p1), [#allocation9], 4294963200  ;;  %v399_v0 = vld [vmem:[#allocation7 + $0xf8] sm:$0xff]  ;;  %v397_v1 = vld [vmem:[#allocation7 + $0xe8] sm:$0xff]  ;;  %v605_v20 = vlaneseq  ;;  %vm1564_vm2 = vcmask 519168   ;;  %s9651_s27 = smov 64  }
  0x56   : > { %465 = vmatpush.msra.mxu1 %v399_v0  ;;  %v395_v2 = vld [vmem:[#allocation7 + $0xd8] sm:$0xff]  ;;  %v393_v3 = vld [vmem:[#allocation7 + $0xc8] sm:$0xff]  ;;  %v352_v16 = vld [vmem:[%s9825_s16] sm:$0xff]  ;;  %s9652_s26 = smov 32   ;;  %s9653_s19 = smov 96  }
  0x57   : > { %v391_v4 = vld [vmem:[#allocation7 + $0xb8] sm:$0xff]  ;;  %v389_v5 = vld [vmem:[#allocation7 + $0xa8] sm:$0xff]  ;;  %v354_v18 = vld [vmem:[%s9825_s16 + $0x10] sm:$0xff]  ;;  %v606_v21 = vshrl.u32 %v605_v20, 7  ;;  %s14246_s18 = scalar_lea.vmem [#allocation10], %s9821_s23  ;;  %s8696_s3 = sshll.u32 %s9712_s25, 7 }
  0x58   : > { %466 = vmatpush.msra.mxu1 %v397_v1  ;;  %v387_v6 = vld [vmem:[#allocation7 + $0x98] sm:$0xff]  ;;  %v385_v7 = vld [vmem:[#allocation7 + $0x88] sm:$0xff]  ;;  %v356_v23 = vld [vmem:[%s9825_s16 + $0x20] sm:$0xff]  ;;  %s8531_s2 = scalar_lea.hbm %s18597_s6, %s8696_s3  ;;  %s8532_s8 = sshll.u32 %s14246_s18, 4  ;;  %s8533_s8 = int_to_ptr.vmem [resolvable:$true] %s8532_s8 }
  0x59   : > { %v383_v8 = vld [vmem:[#allocation7 + $0x78] sm:$0xff]  ;;  %v381_v9 = vld [vmem:[#allocation7 + $0x68] sm:$0xff]  ;;  %v607_v22 = vadd.s32 4, %v606_v21  ;;  %v358_v25 = vld [vmem:[%s9825_s16 + $0x30] sm:$0xff]  ;;  %s8519_s25 = scalar_lea.sflag [#allocation4], %s9818_s10  ;;  %s9583_s11 = scalar_lea.hbm %s18597_s6, 256 }
  0x5a   : > { %467 = vmatpush.msra.mxu1 %v395_v2  ;;  %v379_v10 = vld [vmem:[#allocation7 + $0x58] sm:$0xff]  ;;  %v377_v11 = vld [vmem:[#allocation7 + $0x48] sm:$0xff]  ;;  %v360_v27 = vld [vmem:[%s9825_s16 + $0x40] sm:$0xff] }
  0x5b   : > { %v375_v12 = vld [vmem:[#allocation7 + $0x38] sm:$0xff]  ;;  %v373_v13 = vld [vmem:[#allocation7 + $0x28] sm:$0xff]  ;;  %8781 = vset.pattern.permute.xlu2 %v607_v22  ;;  %8780 = vset.pattern.permute.xlu1 %v607_v22  ;;  %v362_v35 = vld [vmem:[%s9825_s16 + $0x50] sm:$0xff] }
  0x5c   : > { %468 = vmatpush.msra.mxu1 %v393_v3  ;;  %v371_v14 = vld [vmem:[#allocation7 + $0x18] sm:$0xff]  ;;  %v369_v15 = vld [vmem:[#allocation7 + $0x8] sm:$0xff]  ;;  %8782 = vset.pattern.permute.xlu0 %v607_v22  ;;  %v364_v43 = vld [vmem:[%s9825_s16 + $0x60] sm:$0xff] }
  0x5d   : > { %v353_v17 = vld [vmem:[%s9825_s16 + $0x8] sm:$0xff]  ;;  %v355_v19 = vld [vmem:[%s9825_s16 + $0x18] sm:$0xff]  ;;  %v366_v52 = vld [vmem:[%s9825_s16 + $0x70] sm:$0xff] }
  0x5e   : > { %469 = vmatpush.msra.mxu1 %v391_v4  ;;  %v357_v24 = vld [vmem:[%s9825_s16 + $0x28] sm:$0xff]  ;;  %v359_v26 = vld [vmem:[%s9825_s16 + $0x38] sm:$0xff] }
  0x5f   : > { %v361_v31 = vld [vmem:[%s9825_s16 + $0x48] sm:$0xff]  ;;  %v363_v39 = vld [vmem:[%s9825_s16 + $0x58] sm:$0xff] }
  0x60   : > { %470 = vmatpush.msra.mxu1 %v389_v5  ;;  %v365_v48 = vld [vmem:[%s9825_s16 + $0x68] sm:$0xff]  ;;  %v367_v56 = vld [vmem:[%s9825_s16 + $0x78] sm:$0xff] }
  0x62   : > { %471 = vmatpush.msra.mxu1 %v387_v6 }
  0x64   : > { %472 = vmatpush.msra.mxu1 %v385_v7 }
  0x66   : > { %473 = vmatpush.msra.mxu1 %v383_v8 }
  0x68   : > { %474 = vmatpush.msra.mxu1 %v381_v9 }
  0x6a   : > { %475 = vmatpush.msra.mxu1 %v379_v10 }
  0x6c   : > { %476 = vmatpush.msra.mxu1 %v377_v11 }
  0x6e   : > { %477 = vmatpush.msra.mxu1 %v375_v12 }
  0x70   : > { %478 = vmatpush.msra.mxu1 %v373_v13 }
  0x72   : > { %479 = vmatpush.msra.mxu1 %v371_v14 }
  0x74   : > { %480 = vmatpush.msra.mxu1 %v369_v15 }
  0x75   : > { %481 = vmatmul.f32.vlgmr.msra.gmra.mxu1 %v352_v16 }
  0x7d   : > { %484 = vmatmul.f32.gmra.mxu1 %v353_v17 }
  0x85   : > { %487 = vmatmul.f32.gmra.mxu1 %v354_v18 }
  0x8d   : > { %490 = vmatmul.f32.gmra.mxu1 %v355_v19 }
  0x95   : > { %493 = vmatmul.f32.gmra.mxu1 %v356_v23 }
  0x9d   : > { %496 = vmatmul.f32.gmra.mxu1 %v357_v24 }
  0xa5   : > { %499 = vmatmul.f32.gmra.mxu1 %v358_v25 }
  0xad   : > { %502 = vmatmul.f32.gmra.mxu1 %v359_v26 }
  0xb5   : > { %505 = vmatmul.f32.gmra.mxu1 %v360_v27 }
  0xbd   : > { %508 = vmatmul.f32.gmra.mxu1 %v361_v31 }
  0xc5   : > { %511 = vmatmul.f32.gmra.mxu1 %v362_v35 }
  0xcd   : > { %514 = vmatmul.f32.gmra.mxu1 %v363_v39 }
  0xd5   : > { %517 = vmatmul.f32.gmra.mxu1 %v364_v43 }
  0xdd   : > { %520 = vmatmul.f32.gmra.mxu1 %v365_v48 }
  0xe5   : > { %523 = vmatmul.f32.gmra.mxu1 %v366_v52 }
  0xed   : > { %526 = vmatmul.f32.gmra.mxu1 %v367_v56 }
  0xf2   : > { %v9856_v28 = vpop.f32.mrf.mxu1 }
  0xf3   : > { %v618_v29 = vperm.slane %v9856_v28, 2  ;;  %v604_v30 = vperm.slane %v9856_v28, 0  ;;  %v625_v33 = vperm.slane %v9856_v28, 3  ;;  %v611_v34 = vperm.slane %v9856_v28, 1 }
  0xf4   : > { %v639_v37 = vperm.slane %v9856_v28, 5  ;;  %v632_v38 = vperm.slane %v9856_v28, 4  ;;  %v653_v41 = vperm.slane %v9856_v28, 7  ;;  %v646_v42 = vperm.slane %v9856_v28, 6 }
  0xf5   : > { %623 = vperm.xlu2 %8781, %v618_v29   ;;  %609 = vperm.xlu1 %8780, %v604_v30  }
  0xfa   : > { %v9861_v32 = vpop.f32.mrf.mxu1 }
  0xfb   : > { %v667_v45 = vperm.slane %v9861_v32, 1  ;;  %v660_v46 = vperm.slane %v9861_v32, 0  ;;  %v681_v50 = vperm.slane %v9861_v32, 3  ;;  %v674_v51 = vperm.slane %v9861_v32, 2 }
  0xfc   : > { %v695_v54 = vperm.slane %v9861_v32, 5  ;;  %v688_v55 = vperm.slane %v9861_v32, 4  ;;  %v709_v58 = vperm.slane %v9861_v32, 7  ;;  %v702_v59 = vperm.slane %v9861_v32, 6 }
  0xfd   : > { %630 = vperm.xlu2 %8781, %v625_v33   ;;  %616 = vperm.xlu1 %8780, %v611_v34  }
 0x102   : > { %v9866_v36 = vpop.f32.mrf.mxu1 }
 0x103   : > { %v723_v61 = vperm.slane %v9866_v36, 1  ;;  %v716_v62 = vperm.slane %v9866_v36, 0  ;;  %v737_v63 = vperm.slane %v9866_v36, 3  ;;  %v730_v0 = vperm.slane %v9866_v36, 2 }
 0x104   : > { %v751_v1 = vperm.slane %v9866_v36, 5  ;;  %v744_v2 = vperm.slane %v9866_v36, 4  ;;  %v765_v3 = vperm.slane %v9866_v36, 7  ;;  %v758_v4 = vperm.slane %v9866_v36, 6 }
 0x105   : > { %644 = vperm.xlu2 %8781, %v639_v37   ;;  %637 = vperm.xlu1 %8780, %v632_v38  }
 0x10a   : > { %v9871_v40 = vpop.f32.mrf.mxu1 }
 0x10b   : > { %v779_v6 = vperm.slane %v9871_v40, 1  ;;  %v772_v7 = vperm.slane %v9871_v40, 0  ;;  %v793_v9 = vperm.slane %v9871_v40, 3  ;;  %v786_v10 = vperm.slane %v9871_v40, 2 }
 0x10c   : > { %v807_v12 = vperm.slane %v9871_v40, 5  ;;  %v800_v13 = vperm.slane %v9871_v40, 4  ;;  %v821_v16 = vperm.slane %v9871_v40, 7  ;;  %v814_v17 = vperm.slane %v9871_v40, 6 }
 0x10d   : > { %658 = vperm.xlu2 %8781, %v653_v41   ;;  %651 = vperm.xlu1 %8780, %v646_v42  }
 0x112   : > { %v9876_v44 = vpop.f32.mrf.mxu1 }
 0x113   : > { %v828_v47 = vperm.slane %v9876_v44, 0  ;;  %v842_v19 = vperm.slane %v9876_v44, 2  ;;  %v835_v20 = vperm.slane %v9876_v44, 1  ;;  %v856_v23 = vperm.slane %v9876_v44, 4 }
 0x114   : > { %v849_v24 = vperm.slane %v9876_v44, 3  ;;  %v863_v29 = vperm.slane %v9876_v44, 5  ;;  %v877_v33 = vperm.slane %v9876_v44, 7 }
 0x115   : > { %672 = vperm.xlu2 %8781, %v667_v45   ;;  %665 = vperm.xlu1 %8780, %v660_v46  }
 0x116   : > { %833 = vperm.xlu0 %8782, %v828_v47  }
 0x11a   : > { %v9882_v49 = vpop.f32.mrf.mxu1 }
 0x11b   : > { %v884_v34 = vperm.slane %v9882_v49, 0  ;;  %v891_v38 = vperm.slane %v9882_v49, 1  ;;  %v898_v39 = vperm.slane %v9882_v49, 2  ;;  %v905_v41 = vperm.slane %v9882_v49, 3 }
 0x11c   : > { %v912_v42 = vperm.slane %v9882_v49, 4  ;;  %v919_v46 = vperm.slane %v9882_v49, 5  ;;  %v926_v47 = vperm.slane %v9882_v49, 6  ;;  %v933_v52 = vperm.slane %v9882_v49, 7 }
 0x11d   : > { %686 = vperm.xlu2 %8781, %v681_v50   ;;  %679 = vperm.xlu1 %8780, %v674_v51  }
 0x122   : > { %v9887_v53 = vpop.f32.mrf.mxu1 }
 0x125   : > { %700 = vperm.xlu2 %8781, %v695_v54   ;;  %693 = vperm.xlu1 %8780, %v688_v55   ;;  %v940_v54 = vperm.slane %v9887_v53, 0 }
 0x12a   : > { %v9892_v57 = vpop.f32.mrf.mxu1 }
 0x12b   : > { %v1031_v60 = vperm.slane %v9892_v57, 5 }
 0x12d   : > { %714 = vperm.xlu2 %8781, %v709_v58   ;;  %707 = vperm.xlu1 %8780, %v702_v59   ;;  %v947_v59 = vperm.slane %v9887_v53, 1 }
 0x12e   : > { %1036 = vperm.xlu0 %8782, %v1031_v60   ;;  %v954_v60 = vperm.slane %v9887_v53, 2 }
 0x132   : > { %v9939_v25 = vpop.f32.mrf.mxu1 }
 0x133   : > { %18844 = vst [vmem:[#allocation18_spill] sm:$0xff] %v9939_v25 }
 0x135   : > { %728 = vperm.xlu2 %8781, %v723_v61   ;;  %721 = vperm.xlu1 %8780, %v716_v62   ;;  %v961_v62 = vperm.slane %v9887_v53, 3 }
 0x13a   : > { %v9951_v31 = vpop.f32.mrf.mxu1 }
 0x13b   : > { %18845 = vst [vmem:[#allocation19_spill] sm:$0xff] %v9951_v31 }
 0x13d   : > { %742 = vperm.xlu2 %8781, %v737_v63   ;;  %735 = vperm.xlu1 %8780, %v730_v0   ;;  %v968_v63 = vperm.slane %v9887_v53, 4 }
 0x145   : > { %756 = vperm.xlu2 %8781, %v751_v1   ;;  %749 = vperm.xlu1 %8780, %v744_v2   ;;  %v975_v2 = vperm.slane %v9887_v53, 5 }
 0x14d   : > { %770 = vperm.xlu2 %8781, %v765_v3   ;;  %763 = vperm.xlu1 %8780, %v758_v4   ;;  %v982_v3 = vperm.slane %v9887_v53, 6 }
 0x14f   : > { %v9905_v5 = vpop.permute.xlu2 %623 }
 0x150   : > { %530 = vxpose.xlu0.b32.start [1/16] (narrow) %v9856_v28, 8  ;;  %v870_v28 = vperm.slane %v9876_v44, 6 }
 0x155   : > { %784 = vperm.xlu2 %8781, %v779_v6   ;;  %777 = vperm.xlu1 %8780, %v772_v7  }
 0x157   : > { %v9910_v8 = vpop.permute.xlu2 %630 }
 0x158   : > { %531 = vxpose.xlu0.b32.cont [2/16] (narrow) %v9861_v32, 8 }
 0x15d   : > { %798 = vperm.xlu2 %8781, %v793_v9   ;;  %791 = vperm.xlu1 %8780, %v786_v10   ;;  %v989_v9 = vperm.slane %v9887_v53, 7  ;;  %v996_v10 = vperm.slane %v9892_v57, 0 }
 0x15f   : > { %v9916_v11 = vpop.permute.xlu2 %644 }
 0x160   : > { %532 = vxpose.xlu0.b32.cont [3/16] (narrow) %v9866_v36, 8  ;;  %v9960_v36 = vpop.f32.mrf.mxu1 }
 0x161   : > { %18846 = vst [vmem:[#allocation20_spill] sm:$0xff] %v9960_v36 }
 0x165   : > { %812 = vperm.xlu2 %8781, %v807_v12   ;;  %805 = vperm.xlu1 %8780, %v800_v13  }
 0x167   : > { %v9920_v14 = vpop.permute.xlu1 %609  ;;  %v9923_v15 = vpop.permute.xlu2 %658 }
 0x168   : > { %533 = vxpose.xlu0.b32.cont [4/16] (narrow) %v9871_v40, 8  ;;  %v9971_v43 = vpop.f32.mrf.mxu1 }
 0x169   : > { %18847 = vst [vmem:[#allocation21_spill] sm:$0xff] %v9971_v43 }
 0x16d   : > { %826 = vperm.xlu2 %8781, %v821_v16   ;;  %819 = vperm.xlu1 %8780, %v814_v17   ;;  %v1003_v16 = vperm.slane %v9892_v57, 1  ;;  %v1010_v17 = vperm.slane %v9892_v57, 2 }
 0x16f   : > { %v9927_v18 = vpop.permute.xlu1 %616  ;;  %v9932_v21 = vpop.permute.xlu2 %672 }
 0x170   : > { %534 = vxpose.xlu0.b32.cont [5/16] (narrow) %v9876_v44, 8  ;;  %v9980_v48 = vpop.f32.mrf.mxu1 }
 0x171   : > { %18848 = vst [vmem:[#allocation22_spill] sm:$0xff] %v9980_v48 }
 0x175   : > { %847 = vperm.xlu2 %8781, %v842_v19   ;;  %840 = vperm.xlu1 %8780, %v835_v20  }
 0x177   : > { %v9934_v22 = vpop.permute.xlu1 %637  ;;  %v9941_v26 = vpop.permute.xlu2 %686 }
 0x178   : > { %535 = vxpose.xlu0.b32.cont [6/16] (narrow) %v9882_v49, 8  ;;  %v9994_v58 = vpop.f32.mrf.mxu1 }
 0x179   : > { %18849 = vst [vmem:[#allocation23_spill] sm:$0xff] %v9994_v58 }
 0x17d   : > { %861 = vperm.xlu2 %8781, %v856_v23   ;;  %854 = vperm.xlu1 %8780, %v849_v24   ;;  %v1024_v23 = vperm.slane %v9892_v57, 4 }
 0x17f   : > { %v9943_v27 = vpop.permute.xlu1 %651  ;;  %v9953_v32 = vpop.permute.xlu2 %700 }
 0x180   : > { %536 = vxpose.xlu0.b32.cont [7/16] (narrow) %v9887_v53, 8  ;;  %v10005_v0 = vpop.f32.mrf.mxu1  ;;  %v1017_v53 = vperm.slane %v9892_v57, 3 }
 0x181   : > { %18850 = vst [vmem:[#allocation24_spill] sm:$0xff] %v10005_v0 }
 0x185   : > { %875 = vperm.xlu2 %8781, %v870_v28   ;;  %868 = vperm.xlu1 %8780, %v863_v29   ;;  %v1038_v28 = vperm.slane %v9892_v57, 6  ;;  %v1045_v29 = vperm.slane %v9892_v57, 7 }
 0x187   : > { %v9948_v30 = vpop.permute.xlu1 %665  ;;  %v9962_v37 = vpop.permute.xlu2 %714 }
 0x188   : > { %537 = vxpose.xlu0.b32.cont [8/16] (narrow) %v9892_v57, 8  ;;  %v10014_v6 = vpop.f32.mrf.mxu1 }
 0x189   : > { %18851 = vst [vmem:[#allocation25_spill] sm:$0xff] %v10014_v6 }
 0x18d   : > { %882 = vperm.xlu1 %8780, %v877_v33   ;;  %889 = vperm.xlu2 %8781, %v884_v34   ;;  %v10039_v34 = vpop.permute.xlu0 %833 }
 0x18f   : > { %v9957_v35 = vpop.permute.xlu1 %679  ;;  %v9973_v44 = vpop.permute.xlu2 %728 }
 0x190   : > { %538 = vxpose.xlu0.b32.cont [9/16] (narrow) %v9939_v25, 8 }
 0x195   : > { %896 = vperm.xlu1 %8780, %v891_v38   ;;  %903 = vperm.xlu2 %8781, %v898_v39  }
 0x197   : > { %v9966_v40 = vpop.permute.xlu1 %693  ;;  %v9982_v50 = vpop.permute.xlu2 %742 }
 0x198   : > { %539 = vxpose.xlu0.b32.cont [10/16] (narrow) %v9951_v31, 8 }
 0x19d   : > { %910 = vperm.xlu1 %8780, %v905_v41   ;;  %917 = vperm.xlu2 %8781, %v912_v42  }
 0x19f   : > { %v9975_v45 = vpop.permute.xlu1 %707  ;;  %v9992_v56 = vpop.permute.xlu2 %756 }
 0x1a0   : > { %540 = vxpose.xlu0.b32.cont [11/16] (narrow) %v9960_v36, 8  ;;  %v10045_v41 = vpop.permute.xlu0 %1036 }
 0x1a5   : > { %924 = vperm.xlu1 %8780, %v919_v46   ;;  %931 = vperm.xlu2 %8781, %v926_v47  }
 0x1a7   : > { %v9984_v51 = vpop.permute.xlu1 %721  ;;  %v10001_v49 = vpop.permute.xlu2 %770 }
 0x1a8   : > { %541 = vxpose.xlu0.b32.cont [12/16] (narrow) %v9971_v43, 8 }
 0x1ad   : > { %938 = vperm.xlu1 %8780, %v933_v52   ;;  %945 = vperm.xlu2 %8781, %v940_v54   ;;  %v10054_v52 = vld [vmem:[%s9833_s17] sm:$0xff] }
 0x1af   : > { %v9989_v55 = vpop.permute.xlu1 %735  ;;  %v10012_v4 = vpop.permute.xlu2 %784 }
 0x1b0   : > { %542 = vxpose.xlu0.b32.cont [13/16] (narrow) %v9980_v48, 8 }
 0x1b5   : > { %952 = vperm.xlu1 %8780, %v947_v59   ;;  %959 = vperm.xlu2 %8781, %v954_v60   ;;  %v1317_v60 = vrot.slane %v10054_v52, 2 }
 0x1b7   : > { %v9998_v61 = vpop.permute.xlu1 %749  ;;  %v10021_v12 = vpop.permute.xlu2 %798 }
 0x1b8   : > { %543 = vxpose.xlu0.b32.cont [14/16] (narrow) %v9994_v58, 8 }
 0x1bd   : > { %966 = vperm.xlu1 %8780, %v961_v62   ;;  %973 = vperm.xlu2 %8781, %v968_v63  }
 0x1bf   : > { %v10007_v1 = vpop.permute.xlu1 %763  ;;  %v10027_v19 = vpop.permute.xlu2 %812 }
 0x1c0   : > { %544 = vxpose.xlu0.b32.cont [15/16] (narrow) %v10005_v0, 8  ;;  %v1322_v0 = vrot.slane %v10054_v52, 7 }
 0x1c5   : > { %980 = vperm.xlu1 %8780, %v975_v2   ;;  %987 = vperm.xlu2 %8781, %v982_v3   ;;  %v1316_v2 = vrot.slane %v10054_v52, 1 }
 0x1c7   : > { %v10016_v7 = vpop.permute.xlu1 %777  ;;  %v10033_v24 = vpop.permute.xlu2 %826 }
 0x1c8   : > { %545 = vxpose.xlu0.b32.end [16/16] (narrow) %v10014_v6, 8  ;;  %v1320_v6 = vrot.slane %v10054_v52, 5 }
 0x1cd   : > { %994 = vperm.xlu1 %8780, %v989_v9   ;;  %1001 = vperm.xlu2 %8781, %v996_v10   ;;  %v1374_v9 = vperm.slane %v1317_v60, 0 }
 0x1cf   : > { %v10023_v13 = vpop.permute.xlu1 %791  ;;  %v10041_v38 = vpop.permute.xlu2 %847 }
 0x1d5   : > { %1008 = vperm.xlu1 %8780, %v1003_v16   ;;  %1015 = vperm.xlu2 %8781, %v1010_v17   ;;  %v1373_v16 = vperm.slane %v1316_v2, 0 }
 0x1d7   : > { %v10029_v20 = vpop.permute.xlu1 %805  ;;  %v10047_v42 = vpop.permute.xlu2 %861 }
 0x1dd   : > { %1022 = vperm.xlu1 %8780, %v1017_v53   ;;  %1029 = vperm.xlu2 %8781, %v1024_v23   ;;  %v1319_v23 = vrot.slane %v10054_v52, 4 }
 0x1df   : > { %v10037_v33 = vpop.permute.xlu1 %819  ;;  %v10060_v59 = vpop.permute.xlu2 %875 }
 0x1e5   : > { %1043 = vperm.xlu1 %8780, %v1038_v28   ;;  %1050 = vperm.xlu2 %8781, %v1045_v29  }
 0x1e7   : > { %v10043_v39 = vpop.permute.xlu1 %840  ;;  %v10076_v60 = vpop.permute.xlu2 %889 }
 0x1ef   : > { %v10049_v46 = vpop.permute.xlu1 %854 }
 0x1f4   : > { %v10051_v47 = vpop.trf.xlu0 }
 0x1f5   : > { %18852 = vst [vmem:[#allocation26_spill] sm:$0xff] %v10051_v47  ;;  %v1054_v57 = vadd.f32 %v9905_v5, %v10051_v47  ;;  %v1053_v54 = vadd.f32 %v9927_v18, %v10051_v47  ;;  %v1056_v5 = vadd.f32 %v9934_v22, %v10051_v47  ;;  %v1057_v18 = vadd.f32 %v9916_v11, %v10051_v47 }
 0x1f6   : > { %v1376_v22 = vperm.slane %v1319_v23, 0 }
 0x1f7   : > { %v10063_v62 = vpop.permute.xlu1 %868  ;;  %v1182_v63 = vmul.f32 0.2, %v1054_v57  ;;  %vm1118_vm0 = vcmp.gt.f32.partialorder %v1054_v57, 0.0  ;;  %v1181_v3 = vmul.f32 0.2, %v1053_v54  ;;  %vm1117_vm1 = vcmp.gt.f32.partialorder %v1053_v54, 0.0 }
 0x1f8   : > { %v1184_v29 = vmul.f32 0.2, %v1056_v5  ;;  %vm1120_vm3 = vcmp.gt.f32.partialorder %v1056_v5, 0.0  ;;  %vm1121_vm4 = vcmp.gt.f32.partialorder %v1057_v18, 0.0 }
 0x1f9   : > { %v1246_v10 = vsel %vm1118_vm0, %v1054_v57, %v1182_v63  ;;  %v1245_v17 = vsel %vm1117_vm1, %v1053_v54, %v1181_v3  ;;  %v1185_v57 = vmul.f32 0.2, %v1057_v18  ;;  %v1377_v3 = vperm.slane %v1320_v6, 0 }
 0x1fa   : > { %v10070_v53 = vadd.f32 %v1374_v9, %v1246_v10  ;;  %v10073_v28 = vadd.f32 %v1373_v16, %v1245_v17  ;;  %v1248_v2 = vsel %vm1120_vm3, %v1056_v5, %v1184_v29  ;;  %v1059_v9 = vadd.f32 %v9923_v15, %v10051_v47  ;;  %v10093_v5 = vpop.permute.xlu2 %903 }
 0x1fb   : > { %v1249_v10 = vsel %vm1121_vm4, %v1057_v18, %v1185_v57  ;;  %v1060_v16 = vadd.f32 %v9948_v30, %v10051_v47  ;;  %v10088_v17 = vadd.f32 %v1376_v22, %v1248_v2  ;;  %v1379_v6 = vperm.slane %v1322_v0, 0  ;;  %v10098_v18 = vld [vmem:[%s9833_s17 + $0x8] sm:$0xff] }
 0x1fc   : > { %v1571_v11 = vsel %vm1564_vm2, %v10070_v53, -inf  ;;  %v1568_v54 = vsel %vm1564_vm2, %v10073_v28, -inf  ;;  %v10091_v23 = vadd.f32 %v1377_v3, %v1249_v10  ;;  %vm1123_vm5 = vcmp.gt.f32.partialorder %v1059_v9, 0.0 }
 0x1fd   : > { %18853 = vst [vmem:[#allocation27_spill] sm:$0xff] %v10088_v17  ;;  %v1188_v58 = vmul.f32 0.2, %v1060_v16  ;;  %vm1124_vm6 = vcmp.gt.f32.partialorder %v1060_v16, 0.0  ;;  %v1577_v15 = vsel %vm1564_vm2, %v10088_v17, -inf  ;;  %v1380_v22 = vperm.slane %v10098_v18, 0 }
 0x1fe   : > { %v1580_v30 = vsel %vm1564_vm2, %v10091_v23, -inf  ;;  %v1063_v3 = vadd.f32 %v9941_v26, %v10051_v47  ;;  %v1324_v10 = vrot.slane %v10098_v18, 2  ;;  %v1325_v43 = vrot.slane %v10098_v18, 3 }
 0x1ff   : > { %v10078_v63 = vpop.permute.xlu1 %882  ;;  %v1252_v2 = vsel %vm1124_vm6, %v1060_v16, %v1188_v58 }
 0x200   : > { %v10112_v48 = vadd.f32 %v1380_v22, %v1252_v2  ;;  %vm1127_vm8 = vcmp.gt.f32.partialorder %v1063_v3, 0.0  ;;  %v1383_v16 = vperm.slane %v1325_v43, 0  ;;  %v1066_v22 = vadd.f32 %v9975_v45, %v10051_v47 }
 0x202   : > { %v1589_v26 = vsel %vm1564_vm2, %v10112_v48, -inf  ;;  %vm1130_vm10 = vcmp.gt.f32.partialorder %v1066_v22, 0.0 }
 0x207   : > { %v10100_v29 = vpop.permute.xlu1 %896 }
 0x20e   : > { %1572 = vmax.xlane.f32.xlu2 %v1571_v11  ;;  %v1187_v11 = vmul.f32 0.2, %v1059_v9 }
 0x20f   : > { %1569 = vmax.xlane.f32.xlu1 %v1568_v54  ;;  %v1062_v54 = vadd.f32 %v9957_v35, %v10051_v47  ;;  %v10125_v2 = vpop.permute.xlu1 %910 }
 0x210   : > { %v1251_v57 = vsel %vm1123_vm5, %v1059_v9, %v1187_v11  ;;  %v1191_v9 = vmul.f32 0.2, %v1063_v3  ;;  %v1382_v11 = vperm.slane %v1324_v10, 0 }
 0x211   : > { %v10109_v0 = vadd.f32 %v1379_v6, %v1251_v57  ;;  %vm1126_vm7 = vcmp.gt.f32.partialorder %v1062_v54, 0.0  ;;  %v1065_v6 = vadd.f32 %v9953_v32, %v10051_v47  ;;  %v1194_v32 = vmul.f32 0.2, %v1066_v22 }
 0x212   : > { %v1255_v57 = vsel %vm1127_vm8, %v1063_v3, %v1191_v9 }
 0x213   : > { %v1586_v35 = vsel %vm1564_vm2, %v10109_v0, -inf  ;;  %v10130_v36 = vadd.f32 %v1383_v16, %v1255_v57  ;;  %v1193_v43 = vmul.f32 0.2, %v1065_v6  ;;  %vm1129_vm9 = vcmp.gt.f32.partialorder %v1065_v6, 0.0 }
 0x214   : > { %v1258_v16 = vsel %vm1130_vm10, %v1066_v22, %v1194_v32  ;;  %v1069_v57 = vadd.f32 %v9973_v44, %v10051_v47 }
 0x215   : > { %18854 = vst [vmem:[#allocation28_spill] sm:$0xff] %v10130_v36  ;;  %v1598_v45 = vsel %vm1564_vm2, %v10130_v36, -inf  ;;  %v1257_v9 = vsel %vm1129_vm9, %v1065_v6, %v1193_v43  ;;  %v1052_v6 = vadd.f32 %v9920_v14, %v10051_v47 }
 0x216   : > { %1578 = vmax.xlane.f32.xlu2 %v1577_v15  ;;  %v1190_v15 = vmul.f32 0.2, %v1062_v54  ;;  %vm1133_vm12 = vcmp.gt.f32.partialorder %v1069_v57, 0.0 }
 0x217   : > { %1581 = vmax.xlane.f32.xlu1 %v1580_v30  ;;  %v10121_v30 = vpop.permute.xlu2 %917  ;;  %v10151_v43 = vpop.permute.xlu1 %924  ;;  %vm1116_vm13 = vcmp.gt.f32.partialorder %v1052_v6, 0.0 }
 0x218   : > { %v1254_v58 = vsel %vm1126_vm7, %v1062_v54, %v1190_v15  ;;  %v1328_v54 = vrot.slane %v10098_v18, 6 }
 0x219   : > { %v10127_v10 = vadd.f32 %v1382_v11, %v1254_v58  ;;  %v1068_v58 = vadd.f32 %v9984_v51, %v10051_v47  ;;  %v1197_v51 = vmul.f32 0.2, %v1069_v57 }
 0x21a   : > { %v1386_v11 = vperm.slane %v1328_v54, 0 }
 0x21b   : > { %v1595_v3 = vsel %vm1564_vm2, %v10127_v10, -inf  ;;  %vm1132_vm11 = vcmp.gt.f32.partialorder %v1068_v58, 0.0 }
 0x21c   : > { %v10153_v54 = vadd.f32 %v1386_v11, %v1258_v16  ;;  %v1261_v11 = vsel %vm1133_vm12, %v1069_v57, %v1197_v51  ;;  %v1072_v16 = vadd.f32 %v9998_v61, %v10051_v47 }
 0x21e   : > { %1587 = vmax.xlane.f32.xlu2 %v1586_v35  ;;  %v1327_v35 = vrot.slane %v10098_v18, 5  ;;  %18856 = vst [vmem:[#allocation30_spill] sm:$0xff] %v10153_v54  ;;  %v1200_v57 = vmul.f32 0.2, %v1072_v16  ;;  %vm1136_vm15 = vcmp.gt.f32.partialorder %v1072_v16, 0.0 }
 0x21f   : > { %1590 = vmax.xlane.f32.xlu1 %v1589_v26  ;;  %v10138_v26 = vld [vmem:[%s9833_s17 + $0x10] sm:$0xff]  ;;  %v10144_v31 = vpop.permute.xlu2 %931  ;;  %v10175_v61 = vpop.permute.xlu1 %938 }
 0x220   : > { %v1385_v15 = vperm.slane %v1327_v35, 0  ;;  %v1330_v35 = vrot.slane %v10138_v26, 1  ;;  %v1388_v22 = vperm.slane %v10138_v26, 0  ;;  %v1332_v36 = vrot.slane %v10138_v26, 3 }
 0x221   : > { %v1333_v17 = vrot.slane %v10138_v26, 4 }
 0x222   : > { %v10146_v25 = vadd.f32 %v1385_v15, %v1257_v9  ;;  %v1389_v32 = vperm.slane %v1330_v35, 0  ;;  %v1180_v15 = vmul.f32 0.2, %v1052_v6  ;;  %v1071_v9 = vadd.f32 %v9982_v50, %v10051_v47 }
 0x224   : > { %18855 = vst [vmem:[#allocation29_spill] sm:$0xff] %v10146_v25  ;;  %v1604_v44 = vsel %vm1564_vm2, %v10146_v25, -inf  ;;  %v1372_v25 = vperm.slane %v10054_v52, 0  ;;  %v1199_v50 = vmul.f32 0.2, %v1071_v9  ;;  %vm1135_vm14 = vcmp.gt.f32.partialorder %v1071_v9, 0.0 }
 0x226   : > { %1596 = vmax.xlane.f32.xlu2 %v1595_v3  ;;  %v1196_v3 = vmul.f32 0.2, %v1068_v58 }
 0x227   : > { %1599 = vmax.xlane.f32.xlu1 %v1598_v45  ;;  %v1607_v45 = vsel %vm1564_vm2, %v10153_v54, -inf  ;;  %v1074_v54 = vadd.f32 %v10007_v1, %v10051_v47 }
 0x228   : > { %v1260_v14 = vsel %vm1132_vm11, %v1068_v58, %v1196_v3  ;;  %v1055_v58 = vadd.f32 %v9910_v8, %v10051_v47  ;;  %v10171_v3 = vadd.f32 %v1389_v32, %v1261_v11  ;;  %v1263_v11 = vsel %vm1135_vm14, %v1071_v9, %v1199_v50 }
 0x229   : > { %v10166_v35 = vadd.f32 %v1388_v22, %v1260_v14  ;;  %v1318_v22 = vrot.slane %v10054_v52, 3  ;;  %v1392_v14 = vperm.slane %v1333_v17, 0  ;;  %v1335_v9 = vrot.slane %v10138_v26, 6 }
 0x22a   : > { %18858 = vst [vmem:[#allocation32_spill] sm:$0xff] %v10171_v3  ;;  %v1183_v8 = vmul.f32 0.2, %v1055_v58  ;;  %v1616_v32 = vsel %vm1564_vm2, %v10171_v3, -inf  ;;  %vm1119_vm0 = vcmp.gt.f32.partialorder %v1055_v58, 0.0  ;;  %v1058_v50 = vadd.f32 %v9943_v27, %v10051_v47  ;;  %v10206_v27 = vld [vmem:[%s9833_s17 + $0x18] sm:$0xff] }
 0x22b   : > { %18857 = vst [vmem:[#allocation31_spill] sm:$0xff] %v10166_v35  ;;  %vm1138_vm1 = vcmp.gt.f32.partialorder %v1074_v54, 0.0 }
 0x22c   : > { %vm1122_vm4 = vcmp.gt.f32.partialorder %v1058_v50, 0.0 }
 0x22e   : > { %1605 = vmax.xlane.f32.xlu2 %v1604_v44  ;;  %v1244_v44 = vsel %vm1116_vm13, %v1052_v6, %v1180_v15  ;;  %v1613_v6 = vsel %vm1564_vm2, %v10166_v35, -inf  ;;  %v1391_v15 = vperm.slane %v1332_v36, 0  ;;  %v1375_v36 = vperm.slane %v1318_v22, 0 }
 0x22f   : > { %1608 = vmax.xlane.f32.xlu1 %v1607_v45  ;;  %v10173_v45 = vpop.permute.xlu2 %945  ;;  %v10177_v51 = vadd.f32 %v1372_v25, %v1244_v44  ;;  %v1264_v25 = vsel %vm1136_vm15, %v1072_v16, %v1200_v57  ;;  %v1075_v44 = vadd.f32 %v10001_v49, %v10051_v47  ;;  %v1202_v16 = vmul.f32 0.2, %v1074_v54 }
 0x230   : > { %18859 = vst [vmem:[#allocation33_spill] sm:$0xff] %v10173_v45  ;;  %v10190_v17 = vadd.f32 %v1391_v15, %v1263_v11  ;;  %v10195_v1 = vadd.f32 %v1392_v14, %v1264_v25  ;;  %v1336_v57 = vrot.slane %v10138_v26, 7  ;;  %v1394_v15 = vperm.slane %v1335_v9, 0  ;;  %v10210_v11 = vpop.permute.xlu1 %952 }
 0x231   : > { %18860 = vst [vmem:[#allocation34_spill] sm:$0xff] %v10177_v51  ;;  %v1565_v35 = vsel %vm1564_vm2, %v10177_v51, -inf  ;;  %v1203_v49 = vmul.f32 0.2, %v1075_v44  ;;  %vm1139_vm3 = vcmp.gt.f32.partialorder %v1075_v44, 0.0  ;;  %v1077_v14 = vadd.f32 %v10012_v4, %v10051_v47 }
 0x232   : > { %18861 = vst [vmem:[#allocation35_spill] sm:$0xff] %v10190_v17  ;;  %v1625_v25 = vsel %vm1564_vm2, %v10195_v1, -inf  ;;  %v1078_v9 = vadd.f32 %v10023_v13, %v10051_v47  ;;  %v1337_v4 = vrot.slane %v10206_v27, 1 }
 0x233   : > { %v1205_v45 = vmul.f32 0.2, %v1077_v14  ;;  %vm1141_vm5 = vcmp.gt.f32.partialorder %v1077_v14, 0.0 }
 0x234   : > { %v1206_v13 = vmul.f32 0.2, %v1078_v9  ;;  %vm1142_vm6 = vcmp.gt.f32.partialorder %v1078_v9, 0.0 }
 0x236   : > { %1614 = vmax.xlane.f32.xlu2 %v1613_v6  ;;  %v1247_v6 = vsel %vm1119_vm0, %v1055_v58, %v1183_v8  ;;  %v1622_v58 = vsel %vm1564_vm2, %v10190_v17, -inf  ;;  %v1186_v8 = vmul.f32 0.2, %v1058_v50 }
 0x237   : > { %1617 = vmax.xlane.f32.xlu1 %v1616_v32  ;;  %v10198_v32 = vadd.f32 %v1375_v36, %v1247_v6  ;;  %v10201_v22 = vpop.permute.xlu2 %959  ;;  %v1266_v36 = vsel %vm1138_vm1, %v1074_v54, %v1202_v16  ;;  %v1267_v6 = vsel %vm1139_vm3, %v1075_v44, %v1203_v49  ;;  %v1061_v54 = vadd.f32 %v9932_v21, %v10051_v47 }
 0x238   : > { %v10219_v51 = vadd.f32 %v1394_v15, %v1266_v36  ;;  %v1338_v44 = vrot.slane %v10206_v27, 2  ;;  %v1397_v49 = vperm.slane %v1337_v4, 0  ;;  %v1080_v21 = vadd.f32 %v10029_v20, %v10051_v47 }
 0x239   : > { %1566 = vmax.xlane.f32.xlu0 %v1565_v35  ;;  %v1321_v35 = vrot.slane %v10054_v52, 6  ;;  %v1395_v52 = vperm.slane %v1336_v57, 0  ;;  %v1574_v17 = vsel %vm1564_vm2, %v10198_v32, -inf  ;;  %v1189_v15 = vmul.f32 0.2, %v1061_v54 }
 0x23a   : > { %vm1125_vm7 = vcmp.gt.f32.partialorder %v1061_v54, 0.0  ;;  %v1340_v4 = vrot.slane %v10206_v27, 4  ;;  %vm1144_vm8 = vcmp.gt.f32.partialorder %v1080_v21, 0.0 }
 0x23b   : > { %v1378_v3 = vperm.slane %v1321_v35, 0  ;;  %v10223_v16 = vadd.f32 %v1395_v52, %v1267_v6  ;;  %v1323_v35 = vrot.slane %v10098_v18, 1  ;;  %v1270_v52 = vsel %vm1142_vm6, %v1078_v9, %v1206_v13  ;;  %v10239_v6 = vpop.permute.xlu1 %966 }
 0x23d   : > { %18862 = vst [vmem:[#allocation36_spill] sm:$0xff] %v10223_v16  ;;  %v1381_v20 = vperm.slane %v1323_v35, 0  ;;  %v1326_v35 = vrot.slane %v10098_v18, 4 }
 0x23e   : > { %1623 = vmax.xlane.f32.xlu2 %v1622_v58  ;;  %v1250_v58 = vsel %vm1122_vm4, %v1058_v50, %v1186_v8  ;;  %v1269_v50 = vsel %vm1141_vm5, %v1077_v14, %v1205_v45  ;;  %v1634_v8 = vsel %vm1564_vm2, %v10223_v16, -inf }
 0x23f   : > { %1626 = vmax.xlane.f32.xlu1 %v1625_v25  ;;  %v10226_v57 = vadd.f32 %v1378_v3, %v1250_v58  ;;  %v1398_v25 = vperm.slane %v1338_v44, 0  ;;  %v1081_v3 = vadd.f32 %v10027_v19, %v10051_v47  ;;  %v10237_v36 = vpop.permute.xlu2 %973  ;;  %v10243_v14 = vadd.f32 %v1397_v49, %v1269_v50 }
 0x240   : > { %v1253_v58 = vsel %vm1125_vm7, %v1061_v54, %v1189_v15  ;;  %v1208_v44 = vmul.f32 0.2, %v1080_v21  ;;  %v1064_v19 = vadd.f32 %v9966_v40, %v10051_v47  ;;  %v1400_v49 = vperm.slane %v1340_v4, 0 }
 0x241   : > { %1575 = vmax.xlane.f32.xlu0 %v1574_v17  ;;  %v1631_v17 = vsel %vm1564_vm2, %v10219_v51, -inf  ;;  %v1583_v45 = vsel %vm1564_vm2, %v10226_v57, -inf  ;;  %18863 = vst [vmem:[#allocation37_spill] sm:$0xff] %v10243_v14  ;;  %v1209_v9 = vmul.f32 0.2, %v1081_v3  ;;  %vm1145_vm9 = vcmp.gt.f32.partialorder %v1081_v3, 0.0 }
 0x242   : > { %v10251_v13 = vadd.f32 %v1381_v20, %v1253_v58  ;;  %v1640_v50 = vsel %vm1564_vm2, %v10243_v14, -inf  ;;  %v1272_v54 = vsel %vm1144_vm8, %v1080_v21, %v1208_v44  ;;  %vm1128_vm10 = vcmp.gt.f32.partialorder %v1064_v19, 0.0 }
 0x243   : > { %v1084_v20 = vadd.f32 %v10039_v34, %v10051_v47  ;;  %v10264_v58 = vadd.f32 %v1400_v49, %v1272_v54  ;;  %v1384_v21 = vperm.slane %v1326_v35, 0  ;;  %v1329_v35 = vrot.slane %v10098_v18, 7 }
 0x244   : > { %v1592_v4 = vsel %vm1564_vm2, %v10251_v13, -inf }
 0x245   : > { %18865 = vst [vmem:[#allocation39_spill] sm:$0xff] %v10264_v58  ;;  %vm1148_vm12 = vcmp.gt.f32.partialorder %v1084_v20, 0.0  ;;  %v1649_v54 = vsel %vm1564_vm2, %v10264_v58, -inf }
 0x246   : > { %1632 = vmax.xlane.f32.xlu2 %v1631_v17  ;;  %v1341_v17 = vrot.slane %v10206_v27, 5 }
 0x247   : > { %1635 = vmax.xlane.f32.xlu1 %v1634_v8  ;;  %v10249_v8 = vadd.f32 %v1398_v25, %v1270_v52  ;;  %v1273_v25 = vsel %vm1145_vm9, %v1081_v3, %v1209_v9  ;;  %v1083_v52 = vadd.f32 %v10033_v24, %v10051_v47  ;;  %v10266_v44 = vpop.permute.xlu2 %987  ;;  %v1343_v9 = vrot.slane %v10206_v27, 7 }
 0x248   : > { %v1401_v15 = vperm.slane %v1341_v17, 0  ;;  %v1067_v24 = vadd.f32 %v9962_v37, %v10051_v47 }
 0x249   : > { %1584 = vmax.xlane.f32.xlu0 %v1583_v45  ;;  %18864 = vst [vmem:[#allocation38_spill] sm:$0xff] %v10249_v8  ;;  %v1192_v45 = vmul.f32 0.2, %v1064_v19  ;;  %v1643_v40 = vsel %vm1564_vm2, %v10249_v8, -inf  ;;  %v1211_v34 = vmul.f32 0.2, %v1083_v52 }
 0x24a   : > { %v10268_v17 = vadd.f32 %v1401_v15, %v1273_v25  ;;  %vm1147_vm11 = vcmp.gt.f32.partialorder %v1083_v52, 0.0  ;;  %v1403_v15 = vperm.slane %v1343_v9, 0  ;;  %v1195_v37 = vmul.f32 0.2, %v1067_v24 }
 0x24b   : > { %v1256_v3 = vsel %vm1128_vm10, %v1064_v19, %v1192_v45  ;;  %v10283_v45 = vld [vmem:[%s9833_s17 + $0x20] sm:$0xff]  ;;  %v1275_v25 = vsel %vm1147_vm11, %v1083_v52, %v1211_v34  ;;  %vm1131_vm13 = vcmp.gt.f32.partialorder %v1067_v24, 0.0  ;;  %v1387_v9 = vperm.slane %v1329_v35, 0 }
 0x24c   : > { %18866 = vst [vmem:[#allocation40_spill] sm:$0xff] %v10268_v17  ;;  %v10275_v49 = vadd.f32 %v1384_v21, %v1256_v3  ;;  %v1652_v19 = vsel %vm1564_vm2, %v10268_v17, -inf  ;;  %v1086_v21 = vadd.f32 %v10041_v38, %v10051_v47  ;;  %v1087_v3 = vadd.f32 %v10049_v46, %v10051_v47 }
 0x24d   : > { %v10292_v8 = vadd.f32 %v1403_v15, %v1275_v25  ;;  %v1345_v52 = vrot.slane %v10283_v45, 2  ;;  %v1070_v34 = vadd.f32 %v9989_v55, %v10051_v47 }
 0x24e   : > { %1641 = vmax.xlane.f32.xlu2 %v1640_v50  ;;  %v10273_v50 = vpop.permute.xlu1 %980  ;;  %v1601_v58 = vsel %vm1564_vm2, %v10275_v49, -inf  ;;  %v1214_v38 = vmul.f32 0.2, %v1086_v21  ;;  %vm1150_vm14 = vcmp.gt.f32.partialorder %v1086_v21, 0.0  ;;  %v1215_v46 = vmul.f32 0.2, %v1087_v3 }
 0x24f   : > { %1644 = vmax.xlane.f32.xlu1 %v1643_v40  ;;  %v1212_v40 = vmul.f32 0.2, %v1084_v20  ;;  %18867 = vst [vmem:[#allocation41_spill] sm:$0xff] %v10292_v8  ;;  %vm1151_vm15 = vcmp.gt.f32.partialorder %v1087_v3, 0.0  ;;  %v1658_v55 = vsel %vm1564_vm2, %v10292_v8, -inf  ;;  %v1406_v15 = vperm.slane %v1345_v52, 0 }
 0x250   : > { %vm1134_vm0 = vcmp.gt.f32.partialorder %v1070_v34, 0.0  ;;  %v1348_v8 = vrot.slane %v10283_v45, 5 }
 0x251   : > { %1593 = vmax.xlane.f32.xlu0 %v1592_v4  ;;  %v1404_v4 = vperm.slane %v10283_v45, 0  ;;  %v1276_v18 = vsel %vm1148_vm12, %v1084_v20, %v1212_v40  ;;  %v1346_v20 = vrot.slane %v10283_v45, 3  ;;  %v10300_v40 = vpop.permute.xlu2 %1001 }
 0x253   : > { %v10297_v14 = vadd.f32 %v1404_v4, %v1276_v18  ;;  %v1278_v4 = vsel %vm1150_vm14, %v1086_v21, %v1214_v38  ;;  %v1407_v18 = vperm.slane %v1346_v20, 0  ;;  %v1073_v21 = vadd.f32 %v9992_v56, %v10051_v47 }
 0x254   : > { %v10317_v52 = vadd.f32 %v1406_v15, %v1278_v4  ;;  %v1409_v15 = vperm.slane %v1348_v8, 0  ;;  %v1093_v4 = vadd.f32 %v10100_v29, %v10051_v47 }
 0x255   : > { %v1661_v25 = vsel %vm1564_vm2, %v10297_v14, -inf  ;;  %v1201_v56 = vmul.f32 0.2, %v1073_v21  ;;  %vm1137_vm4 = vcmp.gt.f32.partialorder %v1073_v21, 0.0 }
 0x256   : > { %1650 = vmax.xlane.f32.xlu2 %v1649_v54  ;;  %v1259_v54 = vsel %vm1131_vm13, %v1067_v24, %v1195_v37  ;;  %v10304_v35 = vpop.permute.xlu1 %994  ;;  %v1198_v37 = vmul.f32 0.2, %v1070_v34  ;;  %vm1157_vm6 = vcmp.gt.f32.partialorder %v1093_v4, 0.0 }
 0x257   : > { %1653 = vmax.xlane.f32.xlu1 %v1652_v19  ;;  %v10306_v24 = vadd.f32 %v1387_v9, %v1259_v54  ;;  %v1331_v19 = vrot.slane %v10138_v26, 2  ;;  %v1090_v9 = vadd.f32 %v10060_v59, %v10051_v47 }
 0x259   : > { %1602 = vmax.xlane.f32.xlu0 %v1601_v58  ;;  %v1089_v58 = vadd.f32 %v10063_v62, %v10051_v47  ;;  %v1279_v62 = vsel %vm1151_vm15, %v1087_v3, %v1215_v46  ;;  %v1610_v16 = vsel %vm1564_vm2, %v10306_v24, -inf  ;;  %v1390_v17 = vperm.slane %v1331_v19, 0 }
 0x25a   : > { %v10322_v38 = vadd.f32 %v1407_v18, %v1279_v62  ;;  %v1349_v3 = vrot.slane %v10283_v45, 6  ;;  %v1218_v59 = vmul.f32 0.2, %v1090_v9  ;;  %vm1154_vm3 = vcmp.gt.f32.partialorder %v1090_v9, 0.0 }
 0x25b   : > { %v1217_v54 = vmul.f32 0.2, %v1089_v58  ;;  %vm1153_vm1 = vcmp.gt.f32.partialorder %v1089_v58, 0.0  ;;  %v1334_v46 = vrot.slane %v10138_v26, 5  ;;  %v1092_v26 = vadd.f32 %v10076_v60, %v10051_v47 }
 0x25c   : > { %18868 = vst [vmem:[#allocation42_spill] sm:$0xff] %v10322_v38  ;;  %v1282_v18 = vsel %vm1154_vm3, %v1090_v9, %v1218_v59  ;;  %v1095_v59 = vadd.f32 %v10125_v2, %v10051_v47 }
 0x25d   : > { %v1281_v19 = vsel %vm1153_vm1, %v1089_v58, %v1217_v54  ;;  %v1393_v58 = vperm.slane %v1334_v46, 0  ;;  %v1265_v54 = vsel %vm1137_vm4, %v1073_v21, %v1201_v56  ;;  %v1220_v60 = vmul.f32 0.2, %v1092_v26 }
 0x25e   : > { %1659 = vmax.xlane.f32.xlu2 %v1658_v55  ;;  %v1262_v55 = vsel %vm1134_vm0, %v1070_v34, %v1198_v37  ;;  %v1667_v34 = vsel %vm1564_vm2, %v10317_v52, -inf  ;;  %v10332_v37 = vpop.permute.xlu1 %1008  ;;  %v10342_v62 = vadd.f32 %v1409_v15, %v1281_v19  ;;  %vm1156_vm5 = vcmp.gt.f32.partialorder %v1092_v26, 0.0 }
 0x25f   : > { %1662 = vmax.xlane.f32.xlu1 %v1661_v25  ;;  %v10325_v20 = vadd.f32 %v1390_v17, %v1262_v55  ;;  %v1670_v25 = vsel %vm1564_vm2, %v10322_v38, -inf  ;;  %v1410_v17 = vperm.slane %v1349_v3, 0  ;;  %v10345_v55 = vld [vmem:[%s9833_s17 + $0x28] sm:$0xff]  ;;  %v1076_v3 = vadd.f32 %v10016_v7, %v10051_v47 }
 0x260   : > { %18869 = vst [vmem:[#allocation43_spill] sm:$0xff] %v10342_v62  ;;  %v1351_v29 = vrot.slane %v10345_v55, 1  ;;  %v10352_v9 = vadd.f32 %v1393_v58, %v1265_v54  ;;  %v1676_v21 = vsel %vm1564_vm2, %v10342_v62, -inf  ;;  %v1412_v46 = vperm.slane %v10345_v55, 0 }
 0x261   : > { %1611 = vmax.xlane.f32.xlu0 %v1610_v16  ;;  %v10328_v16 = vpop.permute.xlu2 %1015  ;;  %v1619_v8 = vsel %vm1564_vm2, %v10325_v20, -inf  ;;  %v1204_v19 = vmul.f32 0.2, %v1076_v3  ;;  %v1284_v15 = vsel %vm1156_vm5, %v1092_v26, %v1220_v60  ;;  %vm1140_vm7 = vcmp.gt.f32.partialorder %v1076_v3, 0.0 }
 0x262   : > { %v1413_v56 = vperm.slane %v1351_v29, 0  ;;  %v1628_v58 = vsel %vm1564_vm2, %v10352_v9, -inf  ;;  %v1396_v54 = vperm.slane %v10206_v27, 0  ;;  %v1353_v60 = vrot.slane %v10345_v55, 3 }
 0x263   : > { %v1268_v26 = vsel %vm1140_vm7, %v1076_v3, %v1204_v19  ;;  %v1223_v29 = vmul.f32 0.2, %v1095_v59  ;;  %vm1159_vm8 = vcmp.gt.f32.partialorder %v1095_v59, 0.0  ;;  %v1098_v3 = vadd.f32 %v10144_v31, %v10051_v47 }
 0x264   : > { %v1415_v19 = vperm.slane %v1353_v60, 0 }
 0x265   : > { %vm1162_vm11 = vcmp.gt.f32.partialorder %v1098_v3, 0.0 }
 0x266   : > { %1668 = vmax.xlane.f32.xlu2 %v1667_v34  ;;  %v10349_v34 = vadd.f32 %v1410_v17, %v1282_v18  ;;  %v1096_v17 = vadd.f32 %v10121_v30, %v10051_v47  ;;  %v1079_v30 = vadd.f32 %v10021_v12, %v10051_v47 }
 0x267   : > { %1671 = vmax.xlane.f32.xlu1 %v1670_v25  ;;  %v1221_v25 = vmul.f32 0.2, %v1093_v4 }
 0x268   : > { %18870 = vst [vmem:[#allocation44_spill] sm:$0xff] %v10349_v34  ;;  %v1679_v7 = vsel %vm1564_vm2, %v10349_v34, -inf  ;;  %vm1160_vm9 = vcmp.gt.f32.partialorder %v1096_v17, 0.0  ;;  %v1207_v12 = vmul.f32 0.2, %v1079_v30  ;;  %vm1143_vm10 = vcmp.gt.f32.partialorder %v1079_v30, 0.0 }
 0x269   : > { %1620 = vmax.xlane.f32.xlu0 %v1619_v8  ;;  %v10363_v18 = vpop.permute.xlu2 %1029  ;;  %v1285_v2 = vsel %vm1157_vm6, %v1093_v4, %v1221_v25  ;;  %v10365_v8 = vpop.permute.xlu1 %1022  ;;  %v1354_v4 = vrot.slane %v10345_v55, 4  ;;  %v1224_v25 = vmul.f32 0.2, %v1096_v17 }
 0x26a   : > { %v10375_v34 = vadd.f32 %v1413_v56, %v1285_v2  ;;  %v1287_v56 = vsel %vm1159_vm8, %v1095_v59, %v1223_v29  ;;  %v1082_v59 = vadd.f32 %v10037_v33, %v10051_v47  ;;  %v1226_v29 = vmul.f32 0.2, %v1098_v3 }
 0x26b   : > { %v1416_v2 = vperm.slane %v1354_v4, 0  ;;  %v10393_v60 = vadd.f32 %v1415_v19, %v1287_v56  ;;  %v1101_v19 = vadd.f32 %v10210_v11, %v10051_v47 }
 0x26c   : > { %vm1146_vm13 = vcmp.gt.f32.partialorder %v1082_v59, 0.0 }
 0x26d   : > { %v1694_v33 = vsel %vm1564_vm2, %v10393_v60, -inf  ;;  %vm1165_vm14 = vcmp.gt.f32.partialorder %v1101_v19, 0.0 }
 0x26e   : > { %1677 = vmax.xlane.f32.xlu2 %v1676_v21  ;;  %v10370_v21 = vadd.f32 %v1412_v46, %v1284_v15  ;;  %v1688_v15 = vsel %vm1564_vm2, %v10375_v34, -inf }
 0x26f   : > { %1680 = vmax.xlane.f32.xlu1 %v1679_v7  ;;  %v10378_v7 = vadd.f32 %v1396_v54, %v1268_v26  ;;  %v1099_v54 = vadd.f32 %v10175_v61, %v10051_v47  ;;  %v1288_v26 = vsel %vm1160_vm9, %v1096_v17, %v1224_v25  ;;  %v1357_v17 = vrot.slane %v10345_v55, 7 }
 0x270   : > { %18871 = vst [vmem:[#allocation45_spill] sm:$0xff] %v10370_v21  ;;  %v1685_v46 = vsel %vm1564_vm2, %v10370_v21, -inf  ;;  %v1356_v21 = vrot.slane %v10345_v55, 6  ;;  %v10400_v61 = vadd.f32 %v1416_v2, %v1288_v26  ;;  %v1290_v2 = vsel %vm1162_vm11, %v1098_v3, %v1226_v29 }
 0x271   : > { %1629 = vmax.xlane.f32.xlu0 %v1628_v58  ;;  %v1339_v58 = vrot.slane %v10206_v27, 3  ;;  %v1637_v31 = vsel %vm1564_vm2, %v10378_v7, -inf  ;;  %v10391_v38 = vpop.permute.xlu2 %1050  ;;  %v10398_v4 = vpop.permute.xlu1 %1043  ;;  %v1227_v25 = vmul.f32 0.2, %v1099_v54  ;;  %vm1163_vm12 = vcmp.gt.f32.partialorder %v1099_v54, 0.0 }
 0x272   : > { %18872 = vst [vmem:[#allocation46_spill] sm:$0xff] %v10400_v61  ;;  %v1697_v56 = vsel %vm1564_vm2, %v10400_v61, -inf  ;;  %v1419_v26 = vperm.slane %v1357_v17, 0  ;;  %v1085_v29 = vadd.f32 %v10043_v39, %v10051_v47  ;;  %vm2142_vm11 = vcmask 1047556  }
 0x273   : > { %v1399_v62 = vperm.slane %v1339_v58, 0 }
 0x274   : > { %vm1149_vm0 = vcmp.gt.f32.partialorder %v1085_v29, 0.0 }
 0x276   : > { %1686 = vmax.xlane.f32.xlu2 %v1685_v46  ;;  %v1271_v46 = vsel %vm1143_vm10, %v1079_v30, %v1207_v12  ;;  %v1342_v30 = vrot.slane %v10206_v27, 6  ;;  %v1418_v12 = vperm.slane %v1356_v21, 0  ;;  %v1291_v27 = vsel %vm1163_vm12, %v1099_v54, %v1227_v25 }
 0x277   : > { %1689 = vmax.xlane.f32.xlu1 %v1688_v15  ;;  %v10403_v58 = vadd.f32 %v1399_v62, %v1271_v46  ;;  %v1210_v15 = vmul.f32 0.2, %v1082_v59  ;;  %v1102_v62 = vadd.f32 %v10201_v22, %v10051_v47  ;;  %v10417_v46 = vld [vmem:[%s9833_s17 + $0x30] sm:$0xff]  ;;  %v1229_v22 = vmul.f32 0.2, %v1101_v19 }
 0x278   : > { %v1358_v3 = vrot.slane %v10417_v46, 1  ;;  %v10428_v54 = vadd.f32 %v1419_v26, %v1291_v27  ;;  %v1359_v25 = vrot.slane %v10417_v46, 2 }
 0x279   : > { %1638 = vmax.xlane.f32.xlu0 %v1637_v31  ;;  %18873 = vst [vmem:[#allocation47_spill] sm:$0xff] %v10403_v58  ;;  %v1646_v11 = vsel %vm1564_vm2, %v10403_v58, -inf  ;;  %v1402_v31 = vperm.slane %v1342_v30, 0  ;;  %v1274_v61 = vsel %vm1146_vm13, %v1082_v59, %v1210_v15  ;;  %v1230_v30 = vmul.f32 0.2, %v1102_v62 }
 0x27a   : > { %18875 = vst [vmem:[#allocation49_spill] sm:$0xff] %v10428_v54  ;;  %vm1166_vm15 = vcmp.gt.f32.partialorder %v1102_v62, 0.0  ;;  %v1104_v59 = vadd.f32 %v10237_v36, %v10051_v47  ;;  %v1421_v15 = vperm.slane %v1358_v3, 0  ;;  %v1706_v26 = vsel %vm1564_vm2, %v10428_v54, -inf }
 0x27b   : > { %v1293_v27 = vsel %vm1165_vm14, %v1101_v19, %v1229_v22  ;;  %v1361_v54 = vrot.slane %v10417_v46, 4  ;;  %v1088_v19 = vadd.f32 %v10047_v42, %v10051_v47 }
 0x27c   : > { %v10446_v3 = vadd.f32 %v1421_v15, %v1293_v27  ;;  %v1232_v22 = vmul.f32 0.2, %v1104_v59  ;;  %vm1168_vm1 = vcmp.gt.f32.partialorder %v1104_v59, 0.0  ;;  %v1107_v15 = vadd.f32 %v10304_v35, %v10051_v47 }
 0x27d   : > { %v1216_v27 = vmul.f32 0.2, %v1088_v19  ;;  %vm1152_vm4 = vcmp.gt.f32.partialorder %v1088_v19, 0.0 }
 0x27e   : > { %1695 = vmax.xlane.f32.xlu2 %v1694_v33  ;;  %v10421_v33 = vadd.f32 %v1418_v12, %v1290_v2  ;;  %v1344_v12 = vrot.slane %v10283_v45, 1  ;;  %v1213_v2 = vmul.f32 0.2, %v1085_v29  ;;  %18877 = vst [vmem:[#allocation51_spill] sm:$0xff] %v10446_v3  ;;  %v1712_v42 = vsel %vm1564_vm2, %v10446_v3, -inf }
 0x27f   : > { %1698 = vmax.xlane.f32.xlu1 %v1697_v56  ;;  %v10431_v56 = vadd.f32 %v1402_v31, %v1274_v61  ;;  %v1105_v61 = vadd.f32 %v10273_v50, %v10051_v47  ;;  %v1294_v31 = vsel %vm1166_vm15, %v1102_v62, %v1230_v30  ;;  %v1362_v62 = vrot.slane %v10417_v46, 5 }
 0x280   : > { %18874 = vst [vmem:[#allocation48_spill] sm:$0xff] %v10421_v33  ;;  %v1703_v39 = vsel %vm1564_vm2, %v10421_v33, -inf  ;;  %v1405_v58 = vperm.slane %v1344_v12, 0  ;;  %v1091_v12 = vadd.f32 %v10078_v63, %v10051_v47  ;;  %v1108_v63 = vadd.f32 %v10300_v40, %v10051_v47 }
 0x281   : > { %1647 = vmax.xlane.f32.xlu0 %v1646_v11  ;;  %v10419_v21 = vpop.xlane.xlu2 %1572  ;;  %18876 = vst [vmem:[#allocation50_spill] sm:$0xff] %v10431_v56  ;;  %v1422_v11 = vperm.slane %v1359_v25, 0  ;;  %v1655_v36 = vsel %vm1564_vm2, %v10431_v56, -inf  ;;  %v1233_v30 = vmul.f32 0.2, %v1105_v61  ;;  %vm1169_vm3 = vcmp.gt.f32.partialorder %v1105_v61, 0.0 }
 0x282   : > { %v10426_v17 = vpop.xlane.xlu1 %1569  ;;  %v1280_v56 = vsel %vm1152_vm4, %v1088_v19, %v1216_v27  ;;  %vm1172_vm5 = vcmp.gt.f32.partialorder %v1108_v63, 0.0  ;;  %vm1171_vm6 = vcmp.gt.f32.partialorder %v1107_v15, 0.0  ;;  %v1350_v19 = vrot.slane %v10283_v45, 7 }
 0x283   : > { %v10451_v50 = vadd.f32 %v1422_v11, %v1294_v31  ;;  %v1296_v31 = vsel %vm1168_vm1, %v1104_v59, %v1232_v22  ;;  %v1364_v59 = vrot.slane %v10417_v46, 7  ;;  %v1219_v22 = vmul.f32 0.2, %v1091_v12 }
 0x284   : > { %vm1155_vm7 = vcmp.gt.f32.partialorder %v1091_v12, 0.0 }
 0x285   : > { %v1715_v11 = vsel %vm1564_vm2, %v10451_v50, -inf }
 0x286   : > { %1704 = vmax.xlane.f32.xlu2 %v1703_v39  ;;  %v1277_v39 = vsel %vm1149_vm0, %v1085_v29, %v1213_v2  ;;  %v1347_v29 = vrot.slane %v10283_v45, 4  ;;  %v1424_v2 = vperm.slane %v1361_v54, 0  ;;  %v1111_v45 = vadd.f32 %v10365_v8, %v10051_v47 }
 0x287   : > { %1707 = vmax.xlane.f32.xlu1 %v1706_v26  ;;  %v10456_v26 = vadd.f32 %v1405_v58, %v1277_v39  ;;  %v1297_v58 = vsel %vm1169_vm3, %v1105_v61, %v1233_v30 }
 0x288   : > { %v1408_v3 = vperm.slane %v1347_v29, 0  ;;  %vm1175_vm10 = vcmp.gt.f32.partialorder %v1111_v45, 0.0 }
 0x289   : > { %1656 = vmax.xlane.f32.xlu0 %v1655_v36  ;;  %v10444_v33 = vpop.xlane.xlu2 %1578  ;;  %v1425_v36 = vperm.slane %v1362_v62, 0  ;;  %v1664_v35 = vsel %vm1564_vm2, %v10456_v26, -inf  ;;  %v1235_v62 = vmul.f32 0.2, %v1107_v15 }
 0x28a   : > { %v1582_v25 = vpop.xlane.xlu1 %1581 }
 0x28b   : > { %v1762_v39 = vsub.f32 %v10091_v23, %v1582_v25  ;;  %v10474_v61 = vadd.f32 %v1425_v36, %v1297_v58  ;;  %v1236_v23 = vmul.f32 0.2, %v1108_v63  ;;  %v1110_v25 = vadd.f32 %v10328_v16, %v10051_v47 }
 0x28c   : > { %v1094_v36 = vadd.f32 %v10093_v5, %v10051_v47  ;;  %v1299_v58 = vsel %vm1171_vm6, %v1107_v15, %v1235_v62  ;;  %v1283_v62 = vsel %vm1155_vm7, %v1091_v12, %v1219_v22 }
 0x28d   : > { %v1831_v30 = vmul.f32 1.442695, %v1762_v39  ;;  %v1724_v16 = vsel %vm1564_vm2, %v10474_v61, -inf  ;;  %vm1174_vm8 = vcmp.gt.f32.partialorder %v1110_v25, 0.0 }
 0x28e   : > { %1713 = vmax.xlane.f32.xlu2 %v1712_v42  ;;  %v10470_v42 = vadd.f32 %v1424_v2, %v1296_v31  ;;  %v10478_v2 = vadd.f32 %v1408_v3, %v1280_v56  ;;  %v1427_v31 = vperm.slane %v1364_v59, 0  ;;  %v1300_v3 = vsel %vm1172_vm5, %v1108_v63, %v1236_v23 }
 0x28f   : > { %1716 = vmax.xlane.f32.xlu1 %v1715_v11  ;;  %vm1158_vm9 = vcmp.gt.f32.partialorder %v1094_v36, 0.0  ;;  %v1222_v23 = vmul.f32 0.2, %v1094_v36 }
 0x290   : > { %v1721_v27 = vsel %vm1564_vm2, %v10470_v42, -inf  ;;  %v1673_v5 = vsel %vm1564_vm2, %v10478_v2, -inf  ;;  %v10497_v15 = vadd.f32 %v1427_v31, %v1299_v58  ;;  %v1113_v58 = vadd.f32 %v10045_v41, %v10051_v47 }
 0x291   : > { %1665 = vmax.xlane.f32.xlu0 %v1664_v35  ;;  %v1588_v54 = vpop.xlane.xlu2 %1587  ;;  %v1411_v35 = vperm.slane %v1350_v19, 0 }
 0x292   : > { %v1764_v40 = vsub.f32 %v10109_v0, %v1588_v54  ;;  %v1591_v11 = vpop.xlane.xlu1 %1590  ;;  %v10484_v0 = vld [vmem:[%s9833_s17 + $0x38] sm:$0xff]  ;;  %v1238_v54 = vmul.f32 0.2, %v1110_v25  ;;  %v1730_v31 = vsel %vm1564_vm2, %v10497_v15, -inf  ;;  %vm1177_vm12 = vcmp.gt.f32.partialorder %v1113_v58, 0.0 }
 0x293   : > { %v1428_v56 = vperm.slane %v10484_v0, 0  ;;  %v1765_v39 = vsub.f32 %v10112_v48, %v1591_v11  ;;  %v1367_v48 = vrot.slane %v10484_v0, 3  ;;  %v1239_v11 = vmul.f32 0.2, %v1111_v45 }
 0x294   : > { %v1835_v29 = vmul.f32 1.442695, %v1764_v40  ;;  %v1366_v40 = vrot.slane %v10484_v0, 2 }
 0x295   : > { %v10504_v63 = vadd.f32 %v1428_v56, %v1300_v3  ;;  %v1837_v12 = vmul.f32 1.442695, %v1765_v39  ;;  %v1302_v39 = vsel %vm1174_vm8, %v1110_v25, %v1238_v54  ;;  %v1303_v41 = vsel %vm1175_vm10, %v1111_v45, %v1239_v11 }
 0x296   : > { %8865 = vpow2.f32 %v1835_v29  ;;  %1722 = vmax.xlane.f32.xlu2 %v1721_v27  ;;  %v10510_v27 = vadd.f32 %v1411_v35, %v1283_v62  ;;  %v1097_v35 = vadd.f32 %v10151_v43, %v10051_v47  ;;  %v1286_v43 = vsel %vm1158_vm9, %v1094_v36, %v1222_v23 }
 0x297   : > { %1725 = vmax.xlane.f32.xlu1 %v1724_v16  ;;  %8867 = vpow2.f32 %v1831_v30  ;;  %18878 = vst [vmem:[#allocation52_spill] sm:$0xff] %v10504_v63  ;;  %v1352_v30 = vrot.slane %v10345_v55, 2  ;;  %v1430_v16 = vperm.slane %v1366_v40, 0  ;;  %v1733_v3 = vsel %vm1564_vm2, %v10504_v63, -inf }
 0x298   : > { %v1682_v40 = vsel %vm1564_vm2, %v10510_v27, -inf  ;;  %v1370_v45 = vrot.slane %v10484_v0, 6  ;;  %v1225_v11 = vmul.f32 0.2, %v1097_v35  ;;  %v1355_v36 = vrot.slane %v10345_v55, 5 }
 0x299   : > { %1674 = vmax.xlane.f32.xlu0 %v1673_v5  ;;  %v1597_v59 = vpop.xlane.xlu2 %1596  ;;  %v1431_v5 = vperm.slane %v1367_v48, 0  ;;  %v10535_v54 = vadd.f32 %v1430_v16, %v1302_v39  ;;  %v1758_v23 = vsub.f32 %v10073_v28, %v10426_v17  ;;  %vm1161_vm14 = vcmp.gt.f32.partialorder %v1097_v35, 0.0  ;;  %v18880_v17 = vld [vmem:[#allocation33_spill] sm:$0xff] }
 0x29a   : > { %v1767_v8 = vsub.f32 %v10127_v10, %v1597_v59  ;;  %v10502_v29 = vpop.xlane.xlu1 %1599  ;;  %v1114_v59 = vadd.f32 %v10398_v4, %v10051_v47  ;;  %v1369_v4 = vrot.slane %v10484_v0, 5 }
 0x29b   : > { %v1739_v39 = vsel %vm1564_vm2, %v10535_v54, -inf  ;;  %v1823_v63 = vmul.f32 1.442695, %v1758_v23  ;;  %v18883_v23 = vld [vmem:[#allocation34_spill] sm:$0xff] }
 0x29c   : > { %v10508_v19 = vpop.eup %8865  ;;  %v1841_v22 = vmul.f32 1.442695, %v1767_v8  ;;  %v1414_v8 = vperm.slane %v1352_v30, 0  ;;  %vm1178_vm13 = vcmp.gt.f32.partialorder %v1114_v59, 0.0 }
 0x29d   : > { %v2160_v10 = vrot.slane %v10508_v19, 4  ;;  %v10517_v56 = vpop.eup %8867 }
 0x29e   : > { %8869 = vpow2.f32 %v1841_v22  ;;  %1731 = vmax.xlane.f32.xlu2 %v1730_v31  ;;  %v10541_v22 = vadd.f32 %v1431_v5, %v1303_v41  ;;  %v1759_v31 = vsub.f32 %v10070_v53, %v10419_v21  ;;  %v10548_v16 = vadd.f32 %v1414_v8, %v1286_v43 }
 0x29f   : > { %v10528_v62 = vsel %vm2142_vm11, %v2160_v10, %v10517_v56  ;;  %1734 = vmax.xlane.f32.xlu1 %v1733_v3  ;;  %8871 = vpow2.f32 %v1837_v12  ;;  %v1241_v10 = vmul.f32 0.2, %v1113_v58  ;;  %v1242_v12 = vmul.f32 0.2, %v1114_v59 }
 0x2a0   : > { %18879 = vst [vmem:[#allocation53_spill] sm:$0xff] %v10541_v22  ;;  %v1433_v5 = vperm.slane %v1369_v4, 0  ;;  %v1434_v21 = vperm.slane %v1370_v45, 0  ;;  %v1100_v8 = vadd.f32 %v18880_v17, %v10051_v47  ;;  %v1825_v43 = vmul.f32 1.442695, %v1759_v31  ;;  %v18882_v31 = vld [vmem:[#allocation27_spill] sm:$0xff] }
 0x2a1   : > { %1683 = vmax.xlane.f32.xlu0 %v1682_v40  ;;  %v10533_v25 = vpop.xlane.xlu2 %1605  ;;  %v1742_v40 = vsel %vm1564_vm2, %v10541_v22, -inf  ;;  %v1305_v53 = vsel %vm1177_vm12, %v1113_v58, %v1241_v10  ;;  %v1306_v28 = vsel %vm1178_vm13, %v1114_v59, %v1242_v12  ;;  %v1691_v4 = vsel %vm1564_vm2, %v10548_v16, -inf }
 0x2a2   : > { %v10539_v48 = vpop.xlane.xlu1 %1608  ;;  %v10571_v10 = vadd.f32 %v1433_v5, %v1305_v53  ;;  %v1289_v45 = vsel %vm1161_vm14, %v1097_v35, %v1225_v11  ;;  %v10573_v22 = vadd.f32 %v1434_v21, %v1306_v28  ;;  %8873 = vpow2.f32 %v1825_v43  ;;  %v18884_v21 = vld [vmem:[#allocation32_spill] sm:$0xff] }
 0x2a3   : > { %vm1164_vm15 = vcmp.gt.f32.partialorder %v1100_v8, 0.0  ;;  %8875 = vpow2.f32 %v1823_v63  ;;  %v1420_v53 = vperm.slane %v10417_v46, 0 }
 0x2a4   : > { %v10544_v30 = vpop.eup %8869  ;;  %18881 = vst [vmem:[#allocation33_spill] sm:$0xff] %v10571_v10  ;;  %v1748_v5 = vsel %vm1564_vm2, %v10571_v10, -inf  ;;  %v1751_v35 = vsel %vm1564_vm2, %v10573_v22, -inf }
 0x2a5   : > { %v2198_v3 = vrot.slane %v10544_v30, 4  ;;  %v10556_v41 = vpop.eup %8871 }
 0x2a6   : > { %1740 = vmax.xlane.f32.xlu2 %v1739_v39  ;;  %v1417_v39 = vperm.slane %v1355_v36, 0  ;;  %v1761_v36 = vsub.f32 %v18882_v31, %v10444_v33  ;;  %v1103_v33 = vadd.f32 %v10239_v6, %v10051_v47 }
 0x2a7   : > { %v10562_v55 = vsel %vm2142_vm11, %v2198_v3, %v10556_v41  ;;  %1743 = vmax.xlane.f32.xlu1 %v1742_v40  ;;  %v1228_v40 = vmul.f32 0.2, %v1100_v8 }
 0x2a8   : > { %v10575_v12 = vadd.f32 %v1417_v39, %v1289_v45  ;;  %v10590_v45 = vpop.eup %8873  ;;  %vm1167_vm0 = vcmp.gt.f32.partialorder %v1103_v33, 0.0 }
 0x2a9   : > { %1692 = vmax.xlane.f32.xlu0 %v1691_v4  ;;  %v10569_v58 = vpop.xlane.xlu2 %1614  ;;  %v1292_v43 = vsel %vm1164_vm15, %v1100_v8, %v1228_v40  ;;  %v1829_v4 = vmul.f32 1.442695, %v1761_v36  ;;  %v1231_v40 = vmul.f32 0.2, %v1103_v33  ;;  %v2141_v36 = vrot.slane %v10590_v45, 4 }
 0x2aa   : > { %v1618_v3 = vpop.xlane.xlu1 %1617  ;;  %v1700_v63 = vsel %vm1564_vm2, %v10575_v12, -inf }
 0x2ab   : > { %v1774_v28 = vsub.f32 %v18884_v21, %v1618_v3  ;;  %v1360_v3 = vrot.slane %v10417_v46, 3 }
 0x2ac   : > { %v1567_v59 = vpop.xlane.xlu0 %1566 }
 0x2ad   : > { %v1757_v17 = vsub.f32 %v18883_v23, %v1567_v59  ;;  %v18885_v59 = vld [vmem:[#allocation35_spill] sm:$0xff] }
 0x2ae   : > { %1749 = vmax.xlane.f32.xlu2 %v1748_v5  ;;  %v10593_v5 = vadd.f32 %v1420_v53, %v1292_v43  ;;  %v1106_v53 = vadd.f32 %v10266_v44, %v10051_v47 }
 0x2af   : > { %v1821_v11 = vmul.f32 1.442695, %v1757_v17  ;;  %1752 = vmax.xlane.f32.xlu1 %v1751_v35  ;;  %v8876_v17 = vpop.eup %8875  ;;  %v1855_v35 = vmul.f32 1.442695, %v1774_v28 }
 0x2b0   : > { %v1709_v28 = vsel %vm1564_vm2, %v10593_v5, -inf  ;;  %vm1170_vm1 = vcmp.gt.f32.partialorder %v1106_v53, 0.0 }
 0x2b1   : > { %8877 = vpow2.f32 %v1821_v11  ;;  %1701 = vmax.xlane.f32.xlu0 %v1700_v63  ;;  %v1624_v39 = vpop.xlane.xlu2 %1623  ;;  %v1952_v11 = vsel %vm1564_vm2, %v8876_v17, 0.0 }
 0x2b2   : > { %v1776_v31 = vsub.f32 %v18885_v59, %v1624_v39  ;;  %v1627_v23 = vpop.xlane.xlu1 %1626  ;;  %8879 = vpow2.f32 %v1829_v4  ;;  %v1423_v39 = vperm.slane %v1360_v3, 0  ;;  %v1234_v3 = vmul.f32 0.2, %v1106_v53 }
 0x2b4   : > { %v1859_v21 = vmul.f32 1.442695, %v1776_v31  ;;  %v1576_v8 = vpop.xlane.xlu0 %1575 }
 0x2b5   : > { %v1760_v6 = vsub.f32 %v10198_v32, %v1576_v8  ;;  %v1777_v32 = vsub.f32 %v10195_v1, %v1627_v23 }
 0x2b6   : > { %8881 = vpow2.f32 %v1859_v21  ;;  %v1295_v21 = vsel %vm1167_vm0, %v1103_v33, %v1231_v40 }
 0x2b7   : > { %v8878_v63 = vpop.eup %8877  ;;  %v1827_v43 = vmul.f32 1.442695, %v1760_v6  ;;  %1953 = vadd.xlane.f32.xlu1 %v1952_v11  ;;  %8883 = vpow2.f32 %v1855_v35  ;;  %v1363_v35 = vrot.slane %v10417_v46, 6  ;;  %v1861_v11 = vmul.f32 1.442695, %v1777_v32 }
 0x2b8   : > { %v10604_v4 = vsel %vm2142_vm11, %v2141_v36, %v8878_v63  ;;  %v1949_v59 = vsel %vm1564_vm2, %v8878_v63, 0.0  ;;  %v10611_v6 = vpop.eup %8879  ;;  %v10616_v63 = vadd.f32 %v1423_v39, %v1295_v21  ;;  %v1109_v46 = vadd.f32 %v10332_v37, %v10051_v47 }
 0x2b9   : > { %8885 = vpow2.f32 %v1827_v43  ;;  %1710 = vmax.xlane.f32.xlu0 %v1709_v28  ;;  %1950 = vadd.xlane.f32.xlu2 %v1949_v59  ;;  %v1633_v31 = vpop.xlane.xlu2 %1632  ;;  %v18887_v43 = vld [vmem:[#allocation28_spill] sm:$0xff]  ;;  %v1961_v32 = vsel %vm1564_vm2, %v10611_v6, 0.0  ;;  %v1426_v21 = vperm.slane %v1363_v35, 0 }
 0x2ba   : > { %v1779_v44 = vsub.f32 %v10219_v51, %v1633_v31  ;;  %v10609_v8 = vpop.xlane.xlu1 %1635  ;;  %18886 = vst [vmem:[#allocation27_spill] sm:$0xff] %v10616_v63  ;;  %v1768_v33 = vsub.f32 %v18887_v43, %v10502_v29  ;;  %v1298_v29 = vsel %vm1170_vm1, %v1106_v53, %v1234_v3  ;;  %v1237_v35 = vmul.f32 0.2, %v1109_v46 }
 0x2bb   : > { %v10642_v53 = vadd.f32 %v1426_v21, %v1298_v29  ;;  %v1970_v29 = vsel %vm1564_vm2, %v10508_v19, 0.0  ;;  %vm1173_vm3 = vcmp.gt.f32.partialorder %v1109_v46, 0.0 }
 0x2bc   : > { %v10614_v36 = vpop.eup %8881  ;;  %v1865_v1 = vmul.f32 1.442695, %v1779_v44  ;;  %v1585_v23 = vpop.xlane.xlu0 %1584  ;;  %v1718_v44 = vsel %vm1564_vm2, %v10616_v63, -inf }
 0x2bd   : > { %v2260_v51 = vrot.slane %v10614_v36, 4  ;;  %v1763_v40 = vsub.f32 %v10226_v57, %v1585_v23  ;;  %v10622_v28 = vpop.eup %8883  ;;  %18888 = vst [vmem:[#allocation34_spill] sm:$0xff] %v10642_v53 }
 0x2be   : > { %8887 = vpow2.f32 %v1865_v1  ;;  %v1843_v1 = vmul.f32 1.442695, %v1768_v33  ;;  %v1365_v33 = vrot.slane %v10484_v0, 1 }
 0x2bf   : > { %v8886_v59 = vpop.eup %8885  ;;  %v10630_v39 = vsel %vm2142_vm11, %v2260_v51, %v10622_v28  ;;  %v1833_v31 = vmul.f32 1.442695, %v1763_v40  ;;  %1962 = vadd.xlane.f32.xlu1 %v1961_v32  ;;  %8889 = vpow2.f32 %v1861_v11  ;;  %v18889_v11 = vld [vmem:[#allocation29_spill] sm:$0xff] }
 0x2c0   : > { %v2148_v57 = vrot.slane %v8886_v59, 4  ;;  %v1958_v37 = vsel %vm1564_vm2, %v8886_v59, 0.0  ;;  %v1770_v40 = vsub.f32 %v18889_v11, %v10533_v25  ;;  %v18890_v59 = vld [vmem:[#allocation30_spill] sm:$0xff]  ;;  %v1112_v25 = vadd.f32 %v10363_v18, %v10051_v47 }
 0x2c1   : > { %8891 = vpow2.f32 %v1833_v31  ;;  %1719 = vmax.xlane.f32.xlu0 %v1718_v44  ;;  %1959 = vadd.xlane.f32.xlu2 %v1958_v37  ;;  %v10635_v23 = vpop.xlane.xlu2 %1641  ;;  %v1771_v31 = vsub.f32 %v18890_v59, %v10539_v48  ;;  %v1727_v48 = vsel %vm1564_vm2, %v10642_v53, -inf  ;;  %v1429_v59 = vperm.slane %v1365_v33, 0 }
 0x2c2   : > { %v10638_v43 = vsel %vm2142_vm11, %v2148_v57, %v8876_v17  ;;  %v10640_v51 = vpop.xlane.xlu1 %1644  ;;  %8893 = vpow2.f32 %v1843_v1  ;;  %v1301_v18 = vsel %vm1173_vm3, %v1109_v46, %v1237_v35  ;;  %v1368_v53 = vrot.slane %v10484_v0, 4 }
 0x2c3   : > { %v1849_v19 = vmul.f32 1.442695, %v1771_v31  ;;  %v10676_v31 = vadd.f32 %v1429_v59, %v1301_v18  ;;  %vm1176_vm4 = vcmp.gt.f32.partialorder %v1112_v25, 0.0  ;;  %v1979_v35 = vsel %vm1564_vm2, %v10544_v30, 0.0  ;;  %v18893_v18 = vld [vmem:[#allocation40_spill] sm:$0xff] }
 0x2c4   : > { %v10644_v3 = vpop.eup %8887  ;;  %v1594_v32 = vpop.xlane.xlu0 %1593 }
 0x2c5   : > { %v2266_v17 = vrot.slane %v10644_v3, 4  ;;  %v1766_v57 = vsub.f32 %v10251_v13, %v1594_v32  ;;  %v10653_v44 = vpop.eup %8889  ;;  %v1847_v13 = vmul.f32 1.442695, %v1770_v40  ;;  %v1240_v40 = vmul.f32 0.2, %v1112_v25  ;;  %18891 = vst [vmem:[#allocation32_spill] sm:$0xff] %v10676_v31 }
 0x2c7   : > { %v8892_v21 = vpop.eup %8891  ;;  %v10661_v37 = vsel %vm2142_vm11, %v2266_v17, %v10653_v44  ;;  %v1839_v1 = vmul.f32 1.442695, %v1766_v57  ;;  %1971 = vadd.xlane.f32.xlu1 %v1970_v29 }
 0x2c8   : > { %v2154_v11 = vrot.slane %v8892_v21, 4  ;;  %v1967_v32 = vsel %vm1564_vm2, %v8892_v21, 0.0  ;;  %v10673_v29 = vpop.eup %8893  ;;  %v18892_v21 = vld [vmem:[#allocation31_spill] sm:$0xff] }
 0x2c9   : > { %8895 = vpow2.f32 %v1839_v1  ;;  %1728 = vmax.xlane.f32.xlu0 %v1727_v48  ;;  %1968 = vadd.xlane.f32.xlu2 %v1967_v32  ;;  %v10666_v10 = vpop.xlane.xlu2 %1650  ;;  %v1773_v1 = vsub.f32 %v18892_v21, %v10569_v58  ;;  %v1304_v32 = vsel %vm1176_vm4, %v1112_v25, %v1240_v40  ;;  %v1736_v58 = vsel %vm1564_vm2, %v10676_v31, -inf }
 0x2ca   : > { %v10671_v17 = vsel %vm2142_vm11, %v2154_v11, %v10611_v6  ;;  %v1654_v57 = vpop.xlane.xlu1 %1653  ;;  %8897 = vpow2.f32 %v1847_v13  ;;  %v2204_v6 = vrot.slane %v10673_v29, 4  ;;  %v1432_v13 = vperm.slane %v1368_v53, 0  ;;  %v18894_v53 = vld [vmem:[#allocation41_spill] sm:$0xff] }
 0x2cb   : > { %8899 = vpow2.f32 %v1849_v19  ;;  %v1786_v19 = vsub.f32 %v18893_v18, %v1654_v57  ;;  %v1853_v21 = vmul.f32 1.442695, %v1773_v1 }
 0x2cc   : > { %v1603_v33 = vpop.xlane.xlu0 %1602  ;;  %v10696_v57 = vadd.f32 %v1432_v13, %v1304_v32 }
 0x2cd   : > { %v1769_v46 = vsub.f32 %v10275_v49, %v1603_v33  ;;  %v1115_v33 = vadd.f32 %v10391_v38, %v10051_v47  ;;  %v1879_v18 = vmul.f32 1.442695, %v1786_v19 }
 0x2ce   : > { %v1745_v32 = vsel %vm1564_vm2, %v10696_v57, -inf }
 0x2cf   : > { %v8896_v48 = vpop.eup %8895  ;;  %v1845_v11 = vmul.f32 1.442695, %v1769_v46  ;;  %1980 = vadd.xlane.f32.xlu1 %v1979_v35  ;;  %v1371_v35 = vrot.slane %v10484_v0, 7  ;;  %v1243_v63 = vmul.f32 0.2, %v1115_v33  ;;  %vm1179_vm5 = vcmp.gt.f32.partialorder %v1115_v33, 0.0 }
 0x2d0   : > { %v10685_v59 = vsel %vm2142_vm11, %v2204_v6, %v8896_v48  ;;  %v1976_v49 = vsel %vm1564_vm2, %v8896_v48, 0.0  ;;  %v8898_v25 = vpop.eup %8897 }
 0x2d1   : > { %8901 = vpow2.f32 %v1845_v11  ;;  %1737 = vmax.xlane.f32.xlu0 %v1736_v58  ;;  %1977 = vadd.xlane.f32.xlu2 %v1976_v49  ;;  %v1660_v30 = vpop.xlane.xlu2 %1659  ;;  %v10694_v6 = vpop.eup %8899  ;;  %v1988_v11 = vsel %vm1564_vm2, %v8898_v25, 0.0  ;;  %v1435_v0 = vperm.slane %v1371_v35, 0 }
 0x2d2   : > { %v1788_v40 = vsub.f32 %v18894_v53, %v1660_v30  ;;  %v1663_v46 = vpop.xlane.xlu1 %1662  ;;  %8903 = vpow2.f32 %v1853_v21  ;;  %v2210_v1 = vrot.slane %v10694_v6, 4  ;;  %v1307_v21 = vsel %vm1179_vm5, %v1115_v33, %v1243_v63  ;;  %v398_v30 = vld [vmem:[#allocation7 + $0xf0] sm:$0xff] }
 0x2d3   : > { %v1789_v19 = vsub.f32 %v10297_v14, %v1663_v46  ;;  %400 = vmatpush.msra.mxu0 %v398_v30  ;;  %v10714_v14 = vadd.f32 %v1435_v0, %v1307_v21  ;;  %v18895_v46 = vld [vmem:[#allocation36_spill] sm:$0xff] }
 0x2d4   : > { %v1883_v48 = vmul.f32 1.442695, %v1788_v40  ;;  %v1612_v31 = vpop.xlane.xlu0 %1611 }
 0x2d5   : > { %v1772_v38 = vsub.f32 %v10306_v24, %v1612_v31 }
 0x2d6   : > { %8905 = vpow2.f32 %v1883_v48  ;;  %v1885_v48 = vmul.f32 1.442695, %v1789_v19 }
 0x2d7   : > { %v8902_v58 = vpop.eup %8901  ;;  %v1851_v49 = vmul.f32 1.442695, %v1772_v38  ;;  %1989 = vadd.xlane.f32.xlu1 %v1988_v11  ;;  %8907 = vpow2.f32 %v1879_v18  ;;  %v1780_v11 = vsub.f32 %v18895_v46, %v10609_v8  ;;  %v1754_v8 = vsel %vm1564_vm2, %v10714_v14, -inf }
 0x2d8   : > { %v10705_v13 = vsel %vm2142_vm11, %v2210_v1, %v8902_v58  ;;  %v1985_v24 = vsel %vm1564_vm2, %v8902_v58, 0.0  ;;  %v8904_v35 = vpop.eup %8903 }
 0x2d9   : > { %8909 = vpow2.f32 %v1851_v49  ;;  %1746 = vmax.xlane.f32.xlu0 %v1745_v32  ;;  %1986 = vadd.xlane.f32.xlu2 %v1985_v24  ;;  %v1669_v31 = vpop.xlane.xlu2 %1668 }
 0x2da   : > { %v1791_v53 = vsub.f32 %v10317_v52, %v1669_v31  ;;  %v10710_v40 = vpop.xlane.xlu1 %1671  ;;  %v1997_v52 = vsel %vm1564_vm2, %v8904_v35, 0.0 }
 0x2dc   : > { %v10712_v18 = vpop.eup %8905  ;;  %v1889_v38 = vmul.f32 1.442695, %v1791_v53  ;;  %v1621_v1 = vpop.xlane.xlu0 %1620  ;;  %v396_v53 = vld [vmem:[#allocation7 + $0xe0] sm:$0xff] }
 0x2dd   : > { %v2328_v58 = vrot.slane %v10712_v18, 4  ;;  %v1775_v63 = vsub.f32 %v10325_v20, %v1621_v1  ;;  %v10720_v33 = vpop.eup %8907  ;;  %v1867_v20 = vmul.f32 1.442695, %v1780_v11  ;;  %401 = vmatpush.msra.mxu0 %v396_v53  ;;  %v18896_v1 = vld [vmem:[#allocation37_spill] sm:$0xff]  ;;  %v392_v11 = vld [vmem:[#allocation7 + $0xc0] sm:$0xff] }
 0x2de   : > { %8911 = vpow2.f32 %v1889_v38  ;;  %v1782_v46 = vsub.f32 %v18896_v1, %v10635_v23 }
 0x2df   : > { %v8910_v49 = vpop.eup %8909  ;;  %v10725_v32 = vsel %vm2142_vm11, %v2328_v58, %v10720_v33  ;;  %v1857_v19 = vmul.f32 1.442695, %v1775_v63  ;;  %1998 = vadd.xlane.f32.xlu1 %v1997_v52  ;;  %8913 = vpow2.f32 %v1885_v48  ;;  %v394_v48 = vld [vmem:[#allocation7 + $0xd0] sm:$0xff]  ;;  %v18897_v63 = vld [vmem:[#allocation38_spill] sm:$0xff] }
 0x2e0   : > { %v2216_v0 = vrot.slane %v8910_v49, 4  ;;  %v1994_v24 = vsel %vm1564_vm2, %v8910_v49, 0.0  ;;  %v1783_v52 = vsub.f32 %v18897_v63, %v10640_v51  ;;  %402 = vmatpush.msra.mxu0 %v394_v48  ;;  %v1871_v51 = vmul.f32 1.442695, %v1782_v46 }
 0x2e1   : > { %8915 = vpow2.f32 %v1857_v19  ;;  %1755 = vmax.xlane.f32.xlu0 %v1754_v8  ;;  %1995 = vadd.xlane.f32.xlu2 %v1994_v24  ;;  %v10730_v31 = vpop.xlane.xlu2 %1677 }
 0x2e2   : > { %v10733_v21 = vsel %vm2142_vm11, %v2216_v0, %v8898_v25  ;;  %v10735_v30 = vpop.xlane.xlu1 %1680  ;;  %8917 = vpow2.f32 %v1867_v20  ;;  %v2006_v0 = vsel %vm1564_vm2, %v10614_v36, 0.0  ;;  %403 = vmatpush.msra.mxu0 %v392_v11  ;;  %v390_v20 = vld [vmem:[#allocation7 + $0xb0] sm:$0xff]  ;;  %v1873_v1 = vmul.f32 1.442695, %v1783_v52  ;;  %v388_v11 = vld [vmem:[#allocation7 + $0xa0] sm:$0xff] }
 0x2e4   : > { %v10737_v38 = vpop.eup %8911  ;;  %v1630_v58 = vpop.xlane.xlu0 %1629  ;;  %404 = vmatpush.msra.mxu0 %v390_v20 }
 0x2e5   : > { %v2366_v49 = vrot.slane %v10737_v38, 4  ;;  %v1778_v25 = vsub.f32 %v10352_v9, %v1630_v58  ;;  %v10745_v19 = vpop.eup %8913  ;;  %v1955_v9 = vsel %vm1564_vm2, %v10590_v45, 0.0  ;;  %v18898_v45 = vld [vmem:[#allocation39_spill] sm:$0xff] }
 0x2e6   : > { %405 = vmatpush.msra.mxu0 %v388_v11  ;;  %v1785_v52 = vsub.f32 %v18898_v45, %v10666_v10  ;;  %v380_v11 = vld [vmem:[#allocation7 + $0x60] sm:$0xff] }
 0x2e7   : > { %v8916_v8 = vpop.eup %8915  ;;  %v10751_v23 = vsel %vm2142_vm11, %v2366_v49, %v10745_v19  ;;  %v1863_v24 = vmul.f32 1.442695, %v1778_v25  ;;  %2007 = vadd.xlane.f32.xlu1 %v2006_v0  ;;  %v386_v0 = vld [vmem:[#allocation7 + $0x90] sm:$0xff] }
 0x2e8   : > { %v2254_v53 = vrot.slane %v8916_v8, 4  ;;  %v2003_v48 = vsel %vm1564_vm2, %v8916_v8, 0.0  ;;  %v10761_v49 = vpop.eup %8917  ;;  %v384_v8 = vld [vmem:[#allocation7 + $0x80] sm:$0xff]  ;;  %406 = vmatpush.msra.mxu0 %v386_v0 }
 0x2e9   : > { %8919 = vpow2.f32 %v1863_v24  ;;  %1956 = vadd.xlane.f32.xlu0 %v1955_v9  ;;  %2004 = vadd.xlane.f32.xlu2 %v2003_v48  ;;  %v10756_v36 = vpop.xlane.xlu2 %1686  ;;  %v2272_v24 = vrot.slane %v10761_v49, 4 }
 0x2ea   : > { %v10759_v58 = vsel %vm2142_vm11, %v2254_v53, %v8904_v35  ;;  %v1690_v63 = vpop.xlane.xlu1 %1689  ;;  %8921 = vpow2.f32 %v1871_v51  ;;  %v2015_v35 = vsel %vm1564_vm2, %v10644_v3, 0.0  ;;  %v382_v51 = vld [vmem:[#allocation7 + $0x70] sm:$0xff]  ;;  %407 = vmatpush.msra.mxu0 %v384_v8 }
 0x2eb   : > { %8923 = vpow2.f32 %v1873_v1  ;;  %v1798_v48 = vsub.f32 %v10375_v34, %v1690_v63  ;;  %v1877_v1 = vmul.f32 1.442695, %v1785_v52  ;;  %v378_v34 = vld [vmem:[#allocation7 + $0x50] sm:$0xff]  ;;  %v18900_v52 = vld [vmem:[#allocation47_spill] sm:$0xff] }
 0x2ec   : > { %v1639_v46 = vpop.xlane.xlu0 %1638  ;;  %408 = vmatpush.msra.mxu0 %v382_v51  ;;  %v374_v51 = vld [vmem:[#allocation7 + $0x30] sm:$0xff] }
 0x2ed   : > { %v1781_v25 = vsub.f32 %v10378_v7, %v1639_v46  ;;  %v1964_v7 = vsel %vm1564_vm2, %v10517_v56, 0.0  ;;  %v1903_v63 = vmul.f32 1.442695, %v1798_v48 }
 0x2ee   : > { %409 = vmatpush.msra.mxu0 %v380_v11  ;;  %v372_v11 = vld [vmem:[#allocation7 + $0x20] sm:$0xff] }
 0x2ef   : > { %v8920_v20 = vpop.eup %8919  ;;  %v1869_v53 = vmul.f32 1.442695, %v1781_v25  ;;  %2016 = vadd.xlane.f32.xlu1 %v2015_v35  ;;  %v376_v35 = vld [vmem:[#allocation7 + $0x40] sm:$0xff] }
 0x2f0   : > { %v10770_v9 = vsel %vm2142_vm11, %v2272_v24, %v8920_v20  ;;  %v2012_v10 = vsel %vm1564_vm2, %v8920_v20, 0.0  ;;  %v8922_v46 = vpop.eup %8921  ;;  %410 = vmatpush.msra.mxu0 %v378_v34 }
 0x2f1   : > { %18899 = vst [vmem:[#allocation35_spill] sm:$0xff] %v10770_v9  ;;  %8925 = vpow2.f32 %v1869_v53  ;;  %1965 = vadd.xlane.f32.xlu0 %v1964_v7  ;;  %2013 = vadd.xlane.f32.xlu2 %v2012_v10  ;;  %v1696_v3 = vpop.xlane.xlu2 %1695  ;;  %v10779_v0 = vpop.eup %8923  ;;  %v2024_v53 = vsel %vm1564_vm2, %v8922_v46, 0.0  ;;  %v1973_v10 = vsel %vm1564_vm2, %v10556_v41, 0.0  ;;  %v18901_v41 = vld [vmem:[#allocation42_spill] sm:$0xff] }
 0x2f2   : > { %v1800_v45 = vsub.f32 %v10393_v60, %v1696_v3  ;;  %v10777_v25 = vpop.xlane.xlu1 %1698  ;;  %8927 = vpow2.f32 %v1877_v1  ;;  %v2310_v20 = vrot.slane %v10779_v0, 4  ;;  %411 = vmatpush.msra.mxu0 %v376_v35  ;;  %v18902_v35 = vld [vmem:[#allocation50_spill] sm:$0xff] }
 0x2f4   : > { %v1907_v56 = vmul.f32 1.442695, %v1800_v45  ;;  %v1648_v24 = vpop.xlane.xlu0 %1647  ;;  %412 = vmatpush.msra.mxu0 %v374_v51 }
 0x2f5   : > { %v1784_v8 = vsub.f32 %v18900_v52, %v1648_v24  ;;  %v1792_v52 = vsub.f32 %v18901_v41, %v10710_v40  ;;  %v1982_v40 = vsel %vm1564_vm2, %v10673_v29, 0.0  ;;  %v18903_v29 = vld [vmem:[#allocation43_spill] sm:$0xff] }
 0x2f6   : > { %8929 = vpow2.f32 %v1907_v56  ;;  %413 = vmatpush.msra.mxu0 %v372_v11  ;;  %v1794_v47 = vsub.f32 %v18903_v29, %v10730_v31 }
 0x2f7   : > { %v8926_v60 = vpop.eup %8925  ;;  %v1875_v7 = vmul.f32 1.442695, %v1784_v8  ;;  %2025 = vadd.xlane.f32.xlu1 %v2024_v53  ;;  %8931 = vpow2.f32 %v1903_v63  ;;  %v370_v63 = vld [vmem:[#allocation7 + $0x10] sm:$0xff]  ;;  %v368_v53 = vld [vmem:[#allocation7] sm:$0xff]  ;;  %v1891_v41 = vmul.f32 1.442695, %v1792_v52 }
 0x2f8   : > { %v10785_v48 = vsel %vm2142_vm11, %v2310_v20, %v8926_v60  ;;  %v2021_v1 = vsel %vm1564_vm2, %v8926_v60, 0.0  ;;  %v8928_v34 = vpop.eup %8927  ;;  %414 = vmatpush.msra.mxu0 %v370_v63 }
 0x2f9   : > { %8933 = vpow2.f32 %v1875_v7  ;;  %1974 = vadd.xlane.f32.xlu0 %v1973_v10  ;;  %2022 = vadd.xlane.f32.xlu2 %v2021_v1  ;;  %v10790_v3 = vpop.xlane.xlu2 %1704  ;;  %v2033_v7 = vsel %vm1564_vm2, %v8928_v34, 0.0 }
 0x2fa   : > { %v10792_v45 = vpop.xlane.xlu1 %1707  ;;  %415 = vmatpush.msra.mxu0 %v368_v53  ;;  %v2042_v53 = vsel %vm1564_vm2, %v10712_v18, 0.0  ;;  %v9378_v18 = vld [vmem:[%s9825_s16 + $0x8] sm:$0xff] }
 0x2fc   : > { %v10794_v56 = vpop.eup %8929  ;;  %v1657_v24 = vpop.xlane.xlu0 %1656 }
 0x2fd   : > { %v2428_v8 = vrot.slane %v10794_v56, 4  ;;  %v1787_v20 = vsub.f32 %v18902_v35, %v1657_v24  ;;  %v10800_v60 = vpop.eup %8931 }
 0x2ff   : > { %v8934_v51 = vpop.eup %8933  ;;  %v10805_v10 = vsel %vm2142_vm11, %v2428_v8, %v10800_v60  ;;  %v1881_v1 = vmul.f32 1.442695, %v1787_v20  ;;  %2034 = vadd.xlane.f32.xlu1 %v2033_v7  ;;  %v9377_v20 = vld [vmem:[%s9825_s16] sm:$0xff] }
 0x300   : > { %v2316_v11 = vrot.slane %v8934_v51, 4  ;;  %v2030_v24 = vsel %vm1564_vm2, %v8934_v51, 0.0  ;;  %416 = vmatmul.f32.vlgmr.msra.gmra.mxu0 %v9377_v20 }
 0x301   : > { %8935 = vpow2.f32 %v1881_v1  ;;  %1983 = vadd.xlane.f32.xlu0 %v1982_v40  ;;  %2031 = vadd.xlane.f32.xlu2 %v2030_v24  ;;  %v10810_v63 = vpop.xlane.xlu2 %1713  ;;  %v1895_v24 = vmul.f32 1.442695, %v1794_v47 }
 0x302   : > { %v10813_v35 = vsel %vm2142_vm11, %v2316_v11, %v8922_v46  ;;  %v10815_v8 = vpop.xlane.xlu1 %1716  ;;  %8937 = vpow2.f32 %v1891_v41  ;;  %v1991_v11 = vsel %vm1564_vm2, %v10694_v6, 0.0  ;;  %v18904_v6 = vld [vmem:[#allocation45_spill] sm:$0xff] }
 0x303   : > { %v1797_v29 = vsub.f32 %v18904_v6, %v10756_v36 }
 0x304   : > { %v1666_v7 = vpop.xlane.xlu0 %1665 }
 0x305   : > { %v1790_v52 = vsub.f32 %v10456_v26, %v1666_v7  ;;  %v1901_v36 = vmul.f32 1.442695, %v1797_v29 }
 0x307   : > { %v8936_v51 = vpop.eup %8935  ;;  %v1887_v1 = vmul.f32 1.442695, %v1790_v52  ;;  %2043 = vadd.xlane.f32.xlu1 %v2042_v53 }
 0x308   : > { %v2322_v46 = vrot.slane %v8936_v51, 4  ;;  %v2039_v40 = vsel %vm1564_vm2, %v8936_v51, 0.0  ;;  %419 = vmatmul.f32.gmra.mxu0 %v9378_v18  ;;  %v10834_v20 = vpop.eup %8937 }
 0x309   : > { %8939 = vpow2.f32 %v1887_v1  ;;  %1992 = vadd.xlane.f32.xlu0 %v1991_v11  ;;  %2040 = vadd.xlane.f32.xlu2 %v2039_v40  ;;  %v10826_v31 = vpop.xlane.xlu2 %1722  ;;  %v2372_v52 = vrot.slane %v10834_v20, 4 }
 0x30a   : > { %v10829_v26 = vsel %vm2142_vm11, %v2322_v46, %v8928_v34  ;;  %v10831_v41 = vpop.xlane.xlu1 %1725  ;;  %8941 = vpow2.f32 %v1895_v24  ;;  %v2051_v34 = vsel %vm1564_vm2, %v10737_v38, 0.0  ;;  %v2000_v46 = vsel %vm1564_vm2, %v10622_v28, 0.0  ;;  %v9379_v38 = vld [vmem:[%s9825_s16 + $0x10] sm:$0xff] }
 0x30c   : > { %v1675_v7 = vpop.xlane.xlu0 %1674 }
 0x30d   : > { %v1793_v47 = vsub.f32 %v10478_v2, %v1675_v7 }
 0x30f   : > { %v8940_v53 = vpop.eup %8939  ;;  %v1893_v51 = vmul.f32 1.442695, %v1793_v47  ;;  %2052 = vadd.xlane.f32.xlu1 %v2051_v34  ;;  %v2009_v47 = vsel %vm1564_vm2, %v10653_v44, 0.0  ;;  %v9649_v34 = vmov 1983009808   ;;  %v18906_v44 = vld [vmem:[#allocation48_spill] sm:$0xff] }
 0x310   : > { %v10843_v1 = vsel %vm2142_vm11, %v2372_v52, %v8940_v53  ;;  %v2048_v11 = vsel %vm1564_vm2, %v8940_v53, 0.0  ;;  %422 = vmatmul.f32.gmra.mxu0 %v9379_v38  ;;  %v8942_v24 = vpop.eup %8941  ;;  %v2145_v53 = vunpack.c.l.s4 %v9649_v34  ;;  %v2018_v34 = vsel %vm1564_vm2, %v10761_v49, 0.0  ;;  %v18909_v49 = vld [vmem:[#allocation46_spill] sm:$0xff] }
 0x311   : > { %8943 = vpow2.f32 %v1893_v51  ;;  %2001 = vadd.xlane.f32.xlu0 %v2000_v46  ;;  %2049 = vadd.xlane.f32.xlu2 %v2048_v11  ;;  %v10848_v2 = vpop.xlane.xlu2 %1731  ;;  %v2060_v28 = vsel %vm1564_vm2, %v8942_v24, 0.0  ;;  %v9380_v46 = vld [vmem:[%s9825_s16 + $0x18] sm:$0xff] }
 0x312   : > { %v10850_v40 = vpop.xlane.xlu1 %1734  ;;  %8945 = vpow2.f32 %v1901_v36  ;;  %v10866_v38 = vunpack.c.0.s8 %v2145_v53 }
 0x314   : > { %v1684_v18 = vpop.xlane.xlu0 %1683  ;;  %18905 = vst [vmem:[#allocation28_spill] sm:$0xff] %v10866_v38  ;;  %v10877_v53 = vperm.slane %v10528_v62, %v10866_v38  ;;  %v18910_v62 = vld [vmem:[#allocation51_spill] sm:$0xff] }
 0x315   : > { %v1796_v7 = vsub.f32 %v10510_v27, %v1684_v18  ;;  %v1803_v18 = vsub.f32 %v18906_v44, %v10790_v3 }
 0x316   : > { %18907 = vst [vmem:[#allocation29_spill] sm:$0xff] %v10877_v53 }
 0x317   : > { %v10855_v6 = vpop.eup %8943  ;;  %v1899_v29 = vmul.f32 1.442695, %v1796_v7  ;;  %2061 = vadd.xlane.f32.xlu1 %v2060_v28  ;;  %v1913_v9 = vmul.f32 1.442695, %v1803_v18 }
 0x318   : > { %v2057_v52 = vsel %vm1564_vm2, %v10855_v6, 0.0  ;;  %425 = vmatmul.f32.gmra.mxu0 %v9380_v46  ;;  %v8946_v11 = vpop.eup %8945 }
 0x319   : > { %8947 = vpow2.f32 %v1899_v29  ;;  %2010 = vadd.xlane.f32.xlu0 %v2009_v47  ;;  %2058 = vadd.xlane.f32.xlu2 %v2057_v52  ;;  %v10861_v51 = vpop.xlane.xlu2 %1740  ;;  %v2069_v28 = vsel %vm1564_vm2, %v8946_v11, 0.0 }
 0x31a   : > { %v10863_v27 = vpop.xlane.xlu1 %1743 }
 0x31c   : > { %v1693_v36 = vpop.xlane.xlu0 %1692 }
 0x31d   : > { %v1799_v7 = vsub.f32 %v10548_v16, %v1693_v36  ;;  %v18908_v16 = vld [vmem:[#allocation44_spill] sm:$0xff] }
 0x31e   : > { %v1795_v3 = vsub.f32 %v18908_v16, %v10735_v30  ;;  %v1812_v30 = vsub.f32 %v10497_v15, %v10848_v2  ;;  %v10913_v15 = vperm.slane %v10661_v37, %v10866_v38 }
 0x31f   : > { %v8948_v29 = vpop.eup %8947  ;;  %v1905_v47 = vmul.f32 1.442695, %v1799_v7  ;;  %2070 = vadd.xlane.f32.xlu1 %v2069_v28  ;;  %v9381_v7 = vld [vmem:[%s9825_s16 + $0x20] sm:$0xff]  ;;  %v1801_v28 = vsub.f32 %v18909_v49, %v10777_v25  ;;  %v10903_v25 = vperm.slane %v10638_v43, %v10866_v38 }
 0x320   : > { %v2384_v52 = vrot.slane %v8948_v29, 4  ;;  %v2066_v46 = vsel %vm1564_vm2, %v8948_v29, 0.0  ;;  %428 = vmatmul.f32.gmra.mxu0 %v9381_v7  ;;  %v1806_v29 = vsub.f32 %v18910_v62, %v10810_v63  ;;  %v1897_v63 = vmul.f32 1.442695, %v1795_v3  ;;  %18914 = vst [vmem:[#allocation41_spill] sm:$0xff] %v10913_v15 }
 0x321   : > { %8949 = vpow2.f32 %v1905_v47  ;;  %2019 = vadd.xlane.f32.xlu0 %v2018_v34  ;;  %2067 = vadd.xlane.f32.xlu2 %v2066_v46  ;;  %v10891_v18 = vpop.xlane.xlu2 %1749  ;;  %v2178_v34 = vrot.slane %v10877_v53, 4  ;;  %18912 = vst [vmem:[#allocation31_spill] sm:$0xff] %v10903_v25  ;;  %v2078_v46 = vsel %vm1564_vm2, %v10794_v56, 0.0  ;;  %v2027_v3 = vsel %vm1564_vm2, %v10779_v0, 0.0 }
 0x322   : > { %v10882_v36 = vsel %vm2142_vm11, %v2384_v52, %v8942_v24  ;;  %v10884_v44 = vpop.xlane.xlu1 %1752  ;;  %8951 = vpow2.f32 %v1913_v9  ;;  %v10899_v52 = vperm.slane %v10562_v55, %v10866_v38  ;;  %v10909_v9 = vperm.slane %v10604_v4, %v10866_v38  ;;  %v18916_v4 = vld [vmem:[#allocation49_spill] sm:$0xff] }
 0x323   : > { %v1919_v2 = vmul.f32 1.442695, %v1806_v29  ;;  %v10920_v7 = vperm.slane %v10630_v39, %v10866_v38  ;;  %v1804_v49 = vsub.f32 %v18916_v4, %v10792_v45  ;;  %v1931_v37 = vmul.f32 1.442695, %v1812_v30  ;;  %v9382_v39 = vld [vmem:[%s9825_s16 + $0x28] sm:$0xff] }
 0x324   : > { %v1702_v47 = vpop.xlane.xlu0 %1701  ;;  %18911 = vst [vmem:[#allocation30_spill] sm:$0xff] %v10899_v52  ;;  %v1810_v62 = vsub.f32 %v10474_v61, %v10831_v41  ;;  %v10936_v30 = vperm.slane %v10671_v17, %v10866_v38  ;;  %v10944_v61 = vperm.slane %v10685_v59, %v10866_v38  ;;  %v10948_v41 = vperm.slane %v10751_v23, %v10866_v38 }
 0x325   : > { %v1802_v24 = vsub.f32 %v10575_v12, %v1702_v47  ;;  %18913 = vst [vmem:[#allocation40_spill] sm:$0xff] %v10909_v9  ;;  %v1909_v12 = vmul.f32 1.442695, %v1801_v28  ;;  %v2166_v28 = vrot.slane %v10903_v25, 4  ;;  %v10958_v59 = vperm.slane %v10759_v58, %v10866_v38 }
 0x326   : > { %18915 = vst [vmem:[#allocation36_spill] sm:$0xff] %v10920_v7  ;;  %v1815_v23 = vsub.f32 %v10535_v54, %v10861_v51  ;;  %v2036_v54 = vsel %vm1564_vm2, %v10720_v33, 0.0 }
 0x327   : > { %v8950_v16 = vpop.eup %8949  ;;  %v1911_v55 = vmul.f32 1.442695, %v1802_v24  ;;  %2079 = vadd.xlane.f32.xlu1 %v2078_v46  ;;  %18917 = vst [vmem:[#allocation37_spill] sm:$0xff] %v10936_v30  ;;  %v10940_v24 = vperm.slane %v10733_v21, %v10866_v38  ;;  %v1915_v46 = vmul.f32 1.442695, %v1804_v49  ;;  %v1809_v21 = vsub.f32 %v10470_v42, %v10826_v31 }
 0x328   : > { %v2422_v43 = vrot.slane %v8950_v16, 4  ;;  %v2075_v56 = vsel %vm1564_vm2, %v8950_v16, 0.0  ;;  %431 = vmatmul.f32.gmra.mxu0 %v9382_v39  ;;  %v8952_v47 = vpop.eup %8951  ;;  %18919 = vst [vmem:[#allocation39_spill] sm:$0xff] %v10944_v61  ;;  %v1927_v16 = vmul.f32 1.442695, %v1810_v62  ;;  %v18922_v62 = vld [vmem:[#allocation53_spill] sm:$0xff] }
 0x329   : > { %8953 = vpow2.f32 %v1911_v55  ;;  %2028 = vadd.xlane.f32.xlu0 %v2027_v3  ;;  %2076 = vadd.xlane.f32.xlu2 %v2075_v56  ;;  %18918 = vst [vmem:[#allocation38_spill] sm:$0xff] %v10940_v24  ;;  %v2434_v42 = vrot.slane %v8952_v47, 4  ;;  %v1925_v4 = vmul.f32 1.442695, %v1809_v21  ;;  %v1937_v33 = vmul.f32 1.442695, %v1815_v23 }
 0x32a   : > { %8955 = vpow2.f32 %v1897_v63  ;;  %v10928_v0 = vsel %vm2142_vm11, %v2422_v43, %v8946_v11  ;;  %v10930_v29 = vpop.xlane.xlu1 %1953  ;;  %v1807_v11 = vsub.f32 %v10451_v50, %v10815_v8  ;;  %18920 = vst [vmem:[#allocation47_spill] sm:$0xff] %v10958_v59  ;;  %v10967_v50 = vperm.slane %v10725_v32, %v10866_v38 }
 0x32b   : > { %8957 = vpow2.f32 %v1909_v12  ;;  %v2087_v12 = vsel %vm1564_vm2, %v8952_v47, 0.0  ;;  %v9650_v43 = vmov 1934713408   ;;  %v1816_v39 = vsub.f32 %v18922_v62, %v10863_v27 }
 0x32c   : > { %8959 = vpow2.f32 %v1919_v2  ;;  %v10952_v63 = vpop.xlane.xlu2 %1950  ;;  %v1711_v17 = vpop.xlane.xlu0 %1710  ;;  %18921 = vst [vmem:[#allocation42_spill] sm:$0xff] %v10967_v50  ;;  %v1921_v2 = vmul.f32 1.442695, %v1807_v11  ;;  %v2171_v3 = vunpack.c.l.s4 %v9650_v43  ;;  %v9383_v11 = vld [vmem:[%s9825_s16 + $0x30] sm:$0xff]  ;;  %v10993_v21 = vperm.slane %v10785_v48, %v10866_v38 }
 0x32d   : > { %8961 = vpow2.f32 %v1931_v37  ;;  %v1805_v31 = vsub.f32 %v10593_v5, %v1711_v17  ;;  %v2167_v48 = vsel %vm2142_vm11, %v2166_v28, %v10909_v9  ;;  %v1819_v28 = vsub.f32 %v10573_v22, %v10884_v44 }
 0x32e   : > { %8963 = vpow2.f32 %v1915_v46  ;;  %18923 = vst [vmem:[#allocation50_spill] sm:$0xff] %v10993_v21  ;;  %vm2805_vm6 = vweird.f32 %v10930_v29  ;;  %vm2790_vm7 = vweird.f32 %v10952_v63 }
 0x32f   : > { %v10963_v55 = vpop.eup %8953  ;;  %2088 = vadd.xlane.f32.xlu1 %v2087_v12  ;;  %v1917_v5 = vmul.f32 1.442695, %v1805_v31  ;;  %8965 = vpow2.f32 %v1927_v16  ;;  %v18924_v12 = vld [vmem:[#allocation52_spill] sm:$0xff]  ;;  %v10999_v16 = vperm.slane %v10805_v10, %v10866_v38  ;;  %v2179_v10 = vsel %vm2142_vm11, %v2178_v34, %v10936_v30 }
 0x330   : > { %v10971_v58 = vpop.eup %8955  ;;  %v2084_v51 = vsel %vm1564_vm2, %v10963_v55, 0.0  ;;  %434 = vmatmul.f32.gmra.mxu0 %v9383_v11  ;;  %v1813_v31 = vsub.f32 %v18924_v12, %v10850_v40  ;;  %v2222_v40 = vrot.slane %v10944_v61, 4  ;;  %v2045_v11 = vsel %vm1564_vm2, %v10745_v19, 0.0 }
 0x331   : > { %v10977_v32 = vpop.eup %8957  ;;  %2037 = vadd.xlane.f32.xlu0 %v2036_v54  ;;  %2085 = vadd.xlane.f32.xlu2 %v2084_v51  ;;  %v2378_v46 = vrot.slane %v10971_v58, 4  ;;  %8967 = vpow2.f32 %v1917_v5  ;;  %18925 = vst [vmem:[#allocation43_spill] sm:$0xff] %v10999_v16  ;;  %v11005_v51 = vunpack.c.0.s8 %v2171_v3  ;;  %v18927_v5 = vld [vmem:[#allocation27_spill] sm:$0xff] }
 0x332   : > { %v10980_v49 = vpop.eup %8959  ;;  %v10985_v47 = vpop.xlane.xlu1 %1962  ;;  %v2435_v27 = vsel %vm2142_vm11, %v2434_v42, %v10977_v32  ;;  %8969 = vpow2.f32 %v1921_v2  ;;  %v1939_v2 = vmul.f32 1.442695, %v1816_v39  ;;  %v11032_v39 = vperm.slane %v10829_v26, %v10866_v38 }
 0x333   : > { %v10988_v17 = vpop.eup %8961  ;;  %18926 = vst [vmem:[#allocation45_spill] sm:$0xff] %v11005_v51  ;;  %8971 = vpow2.f32 %v1925_v4  ;;  %v2096_v43 = vsel %vm1564_vm2, %v10980_v49, 0.0  ;;  %v1933_v4 = vmul.f32 1.442695, %v1813_v31  ;;  %v11037_v22 = vperm.slane %v2167_v48, %v11005_v51 }
 0x334   : > { %v11003_v23 = vpop.xlane.xlu2 %1959  ;;  %v1720_v54 = vpop.xlane.xlu0 %1719  ;;  %v2496_v42 = vrot.slane %v10988_v17, 4  ;;  %8973 = vpow2.f32 %v1937_v33  ;;  %v11028_v33 = vperm.slane %v2435_v27, %v10866_v38  ;;  %18929 = vst [vmem:[#allocation44_spill] sm:$0xff] %v11032_v39  ;;  %v11044_v27 = vperm.slane %v2179_v10, %v11005_v51 }
 0x335   : > { %v11019_v3 = vpop.eup %8963  ;;  %8975 = vrcp.f32 %v10930_v29  ;;  %v1808_v62 = vsub.f32 %v18927_v5, %v1720_v54  ;;  %18930 = vst [vmem:[#allocation46_spill] sm:$0xff] %v11037_v22  ;;  %v2223_v5 = vsel %vm2142_vm11, %v2222_v40, %v10899_v52  ;;  %v11061_v10 = vperm.slane %v10813_v35, %v10866_v38 }
 0x336   : > { %v11025_v34 = vpop.eup %8965  ;;  %18928 = vst [vmem:[#allocation48_spill] sm:$0xff] %v11028_v33  ;;  %8977 = vrcp.f32 %v10952_v63  ;;  %v2192_v56 = vrot.slane %v11037_v22, 4  ;;  %v2114_v53 = vsel %vm1564_vm2, %v10988_v17, 0.0  ;;  %v2063_v17 = vsel %vm1564_vm2, %v10971_v58, 0.0 }
 0x337   : > { %2097 = vadd.xlane.f32.xlu1 %v2096_v43  ;;  %v11039_v44 = vpop.eup %8967  ;;  %v1923_v31 = vmul.f32 1.442695, %v1808_v62  ;;  %18931 = vst [vmem:[#allocation51_spill] sm:$0xff] %v11044_v27  ;;  %v2497_v26 = vsel %vm2142_vm11, %v2496_v42, %v11025_v34  ;;  %8979 = vpow2.f32 %v1939_v2  ;;  %v9384_v43 = vld [vmem:[%s9825_s16 + $0x38] sm:$0xff]  ;;  %v1945_v42 = vmul.f32 1.442695, %v1819_v28 }
 0x338   : > { %v11046_v54 = vpop.eup %8969  ;;  %v2093_v19 = vsel %vm1564_vm2, %v11039_v44, 0.0  ;;  %437 = vmatmul.f32.gmra.mxu0 %v9384_v43  ;;  %18932 = vst [vmem:[#allocation49_spill] sm:$0xff] %v11061_v10  ;;  %8981 = vpow2.f32 %v1933_v4  ;;  %v11076_v4 = vperm.slane %v10843_v1, %v10866_v38  ;;  %v11079_v28 = vperm.slane %v2497_v26, %v10866_v38  ;;  %v18935_v43 = vld [vmem:[#allocation33_spill] sm:$0xff] }
 0x339   : > { %2046 = vadd.xlane.f32.xlu0 %v2045_v11  ;;  %v11057_v62 = vpop.eup %8971  ;;  %2094 = vadd.xlane.f32.xlu2 %v2093_v19  ;;  %8983 = vpow2.f32 %v1923_v31  ;;  %v11082_v19 = vperm.slane %v2223_v5, %v11005_v51  ;;  %v11086_v31 = vperm.slane %v10882_v36, %v10866_v38  ;;  %v1818_v45 = vsub.f32 %v18935_v43, %v10891_v18  ;;  %v18937_v43 = vld [vmem:[#allocation34_spill] sm:$0xff] }
 0x33a   : > { %v11052_v48 = vpop.xlane.xlu1 %1971  ;;  %v11064_v2 = vpop.eup %8973  ;;  %18933 = vst [vmem:[#allocation53_spill] sm:$0xff] %v11079_v28  ;;  %v2105_v35 = vsel %vm1564_vm2, %v11057_v62, 0.0  ;;  %v11094_v1 = vsel %vm2142_vm11, %v11044_v27, %v2192_v56  ;;  %v11102_v26 = vsel %vm2142_vm11, %v2378_v46, %v10855_v6  ;;  %8985 = vpow2.f32 %v1945_v42  ;;  %v9385_v42 = vld [vmem:[%s9825_s16 + $0x40] sm:$0xff] }
 0x33b   : > { %v11071_v12 = vpop.eup %8975  ;;  %18934 = vst [vmem:[#allocation52_spill] sm:$0xff] %v11082_v19  ;;  %v2534_v36 = vrot.slane %v11064_v2, 4  ;;  %v11107_v18 = vperm.slane %v10705_v13, %v10866_v38  ;;  %8987 = vrcp.f32 %v10985_v47  ;;  %v2054_v6 = vsel %vm1564_vm2, %v10834_v20, 0.0 }
 0x33c   : > { %v11068_v37 = vpop.xlane.xlu2 %1968  ;;  %v1729_v40 = vpop.xlane.xlu0 %1728  ;;  %v2801_v56 = vmul.f32 %v11071_v12, %v10930_v29  ;;  %8989 = vrcp.f32 %v11003_v23  ;;  %v18938_v13 = vrot.slane %v10940_v24, 4  ;;  %v2248_v22 = vrot.slane %v11082_v19, 4 }
 0x33d   : > { %v11096_v11 = vpop.eup %8977  ;;  %18936 = vst [vmem:[#allocation27_spill] sm:$0xff] %v11107_v18  ;;  %v1811_v8 = vsub.f32 %v18937_v43, %v1729_v40  ;;  %v1943_v43 = vmul.f32 1.442695, %v1818_v45  ;;  %v11138_v40 = vperm.slane %v10928_v0, %v10866_v38  ;;  %8991 = vrcp.f32 %v11052_v48 }
 0x33e   : > { %v11109_v5 = vpop.eup %8979  ;;  %v2786_v20 = vmul.f32 %v11096_v11, %v10952_v63  ;;  %v2802_v45 = vsub.f32 1.0, %v2801_v56  ;;  %v2811_v24 = vand.u32 2147483648, %v10930_v29  ;;  %8993 = vrcp.f32 %v11068_v37 }
 0x33f   : > { %2106 = vadd.xlane.f32.xlu1 %v2105_v35  ;;  %v11117_v46 = vpop.eup %8981  ;;  %v2235_v35 = vsel %vm2142_vm11, %v18938_v13, %v11107_v18  ;;  %v1929_v61 = vmul.f32 1.442695, %v1811_v8  ;;  %vm2806_vm9 = vweird.f32 %v11071_v12  ;;  %v2856_v21 = vand.u32 2147483648, %v10985_v47 }
 0x340   : > { %v8984_v27 = vpop.eup %8983  ;;  %440 = vmatmul.f32.gmra.mxu0 %v9385_v42  ;;  %v11142_v18 = vperm.slane %v2235_v35, %v11005_v51  ;;  %v2787_v56 = vsub.f32 1.0, %v2786_v20  ;;  %v18940_v20 = vrot.slane %v11019_v3, 4  ;;  %v2812_v58 = vor.u32 1.1754944e-38, %v2811_v24  ;;  %vm11225_vm13 = vmor %vm2805_vm6, %vm2806_vm9 }
 0x341   : > { %2055 = vadd.xlane.f32.xlu0 %v2054_v6  ;;  %v2535_v6 = vsel %vm2142_vm11, %v2534_v36, %v11117_v46  ;;  %v2484_v13 = vrot.slane %v8984_v27, 4  ;;  %v2102_v19 = vsel %vm1564_vm2, %v8984_v27, 0.0  ;;  %v11144_v42 = vpop.eup %8985  ;;  %v2809_v36 = vand.u32 2147483647, %v10930_v29 }
 0x342   : > { %v11129_v52 = vpop.xlane.xlu1 %1980  ;;  %2103 = vadd.xlane.f32.xlu2 %v2102_v19  ;;  %18939 = vst [vmem:[#allocation33_spill] sm:$0xff] %v11142_v18  ;;  %v11153_v0 = vpop.eup %8987  ;;  %v2796_v19 = vand.u32 2147483648, %v10952_v63  ;;  %8995 = vpow2.f32 %v1929_v61  ;;  %v11163_v30 = vperm.slane %v2535_v6, %v10866_v38  ;;  %v2441_v61 = vsel %vm2142_vm11, %v18940_v20, %v10963_v55 }
 0x343   : > { %v11150_v27 = vsel %vm2142_vm11, %v2484_v13, %v10980_v49  ;;  %v11160_v25 = vpop.eup %8989  ;;  %8997 = vpow2.f32 %v1943_v43  ;;  %v2794_v49 = vand.u32 2147483647, %v10952_v63  ;;  %v2803_v13 = vmul.f32 %v11071_v12, %v2802_v45 }
 0x344   : > { %v1738_v8 = vpop.xlane.xlu0 %1737  ;;  %v11156_v35 = vpop.xlane.xlu2 %1977  ;;  %v11176_v6 = vsel %vm2142_vm11, %v11142_v18, %v2248_v22  ;;  %vm11185_vm8 = vcmp.eq.f32.partialorder %v2809_v36, 8.507059e+37  ;;  %v2788_v22 = vmul.f32 %v11096_v11, %v2787_v56  ;;  %v11190_v20 = vor.u32 1.1754944e-38, %v2796_v19  ;;  %v9386_v18 = vld [vmem:[%s9825_s16 + $0x48] sm:$0xff]  ;;  %v18944_v36 = vld [vmem:[#allocation32_spill] sm:$0xff] }
 0x345   : > { %v11183_v55 = vpop.eup %8991  ;;  %v2831_v43 = vmul.f32 %v11160_v25, %v11003_v23  ;;  %v1814_v24 = vsub.f32 %v18944_v36, %v1738_v8  ;;  %v2804_v50 = vadd.f32 %v11071_v12, %v2803_v13  ;;  %vm11207_vm10 = vcmp.eq.f32.partialorder %v2794_v49, 8.507059e+37 }
 0x346   : > { %v11197_v10 = vpop.eup %8993  ;;  %8999 = vrcp.f32 %v11129_v52  ;;  %vm2791_vm12 = vweird.f32 %v11096_v11  ;;  %v2789_v15 = vadd.f32 %v11096_v11, %v2788_v22  ;;  %v2123_v59 = vsel %vm1564_vm2, %v11064_v2, 0.0 }
 0x347   : > { %2115 = vadd.xlane.f32.xlu1 %v2114_v53  ;;  %v2846_v53 = vmul.f32 %v11153_v0, %v10985_v47  ;;  %v1935_v56 = vmul.f32 1.442695, %v1814_v24  ;;  %v2832_v13 = vsub.f32 1.0, %v2831_v43  ;;  %v2891_v22 = vmul.f32 %v11183_v55, %v11052_v48  ;;  %vm11250_vm14 = vmor %vm2790_vm7, %vm2791_vm12 }
 0x348   : > { %443 = vmatmul.f32.gmra.mxu0 %v9386_v18  ;;  %v8996_v19 = vpop.eup %8995  ;;  %v2854_v18 = vand.u32 2147483647, %v10985_v47  ;;  %v2876_v43 = vmul.f32 %v11197_v10, %v11068_v37  ;;  %v2808_v29 = vsel %vm11225_vm13, %v11071_v12, %v2804_v50  ;;  %v2839_v2 = vand.u32 2147483647, %v11003_v23 }
 0x349   : > { %2064 = vadd.xlane.f32.xlu0 %v2063_v17  ;;  %v11200_v17 = vperm.slane %v2441_v61, %v10866_v38  ;;  %v11214_v61 = vpop.eup %8997  ;;  %v2847_v8 = vsub.f32 1.0, %v2846_v53  ;;  %v2490_v36 = vrot.slane %v8996_v19, 4  ;;  %v2111_v49 = vsel %vm1564_vm2, %v8996_v19, 0.0 }
 0x34a   : > { %v11194_v9 = vpop.xlane.xlu1 %1989  ;;  %v2841_v53 = vand.u32 2147483648, %v11003_v23  ;;  %2112 = vadd.xlane.f32.xlu2 %v2111_v49  ;;  %9001 = vpow2.f32 %v1935_v56  ;;  %vm2850_vm15 = vweird.f32 %v10985_v47  ;;  %v2793_v63 = vsel %vm11250_vm14, %v11096_v11, %v2789_v15 }
 0x34b   : > { %18943 = vst [vmem:[#allocation34_spill] sm:$0xff] %v11200_v17  ;;  %v11236_v24 = vsel %vm2142_vm11, %v2490_v36, %v11057_v62  ;;  %v2072_v17 = vsel %vm1564_vm2, %v10800_v60, 0.0  ;;  %v2848_v33 = vmul.f32 %v11153_v0, %v2847_v8  ;;  %9003 = vrcp.f32 %v11156_v35 }
 0x34c   : > { %v1747_v7 = vpop.xlane.xlu0 %1746  ;;  %v11242_v19 = vpop.xlane.xlu2 %1986  ;;  %v2857_v12 = vor.u32 1.1754944e-38, %v2856_v21  ;;  %v2833_v56 = vmul.f32 %v11160_v25, %v2832_v13  ;;  %vm2835_vm0 = vweird.f32 %v11003_v23  ;;  %v11273_v8 = vsel %vm11185_vm8, %v2812_v58, %v2808_v29 }
 0x34d   : > { %v11261_v60 = vpop.eup %8999  ;;  %v2892_v49 = vsub.f32 1.0, %v2891_v22  ;;  %vm2851_vm1 = vweird.f32 %v11153_v0  ;;  %vm11279_vm3 = vcmp.eq.f32.partialorder %v2854_v18, 8.507059e+37  ;;  %vm2836_vm4 = vweird.f32 %v11160_v25 }
 0x34e   : > { %vm11284_vm5 = vcmp.eq.f32.partialorder %v2839_v2, 8.507059e+37  ;;  %v1817_v11 = vsub.f32 %v10696_v57, %v1747_v7  ;;  %v11292_v45 = vsel %vm11207_vm10, %v11190_v20, %v2793_v63  ;;  %v2849_v58 = vadd.f32 %v11153_v0, %v2848_v33  ;;  %vm11314_vm7 = vmor %vm2850_vm15, %vm2851_vm1 }
 0x34f   : > { %2124 = vadd.xlane.f32.xlu1 %v2123_v59  ;;  %v18951_v59 = vrot.slane %v11046_v54, 4  ;;  %v2899_v18 = vand.u32 2147483647, %v11052_v48  ;;  %v2936_v13 = vmul.f32 %v11261_v60, %v11129_v52  ;;  %v2834_v22 = vadd.f32 %v11160_v25, %v2833_v56  ;;  %vm11330_vm9 = vmor %vm2835_vm0, %vm2836_vm4 }
 0x350   : > { %vm2895_vm6 = vweird.f32 %v11052_v48  ;;  %9005 = vrcp.f32 %v11194_v9  ;;  %v1941_v57 = vmul.f32 1.442695, %v1817_v11  ;;  %v2893_v39 = vmul.f32 %v11183_v55, %v2892_v49 }
 0x351   : > { %v2479_v50 = vsel %vm2142_vm11, %v18951_v59, %v11039_v44  ;;  %2073 = vadd.xlane.f32.xlu0 %v2072_v17  ;;  %v9387_v44 = vld [vmem:[%s9825_s16 + $0x50] sm:$0xff]  ;;  %v2842_v17 = vor.u32 1.1754944e-38, %v2841_v53  ;;  %v2877_v59 = vsub.f32 1.0, %v2876_v43  ;;  %v11298_v53 = vpop.eup %9001  ;;  %v2901_v20 = vand.u32 2147483648, %v11052_v48 }
 0x352   : > { %v11268_v36 = vpop.xlane.xlu1 %1998  ;;  %446 = vmatmul.f32.gmra.mxu0 %v9387_v44  ;;  %v11276_v16 = vperm.slane %v2479_v50, %v10866_v38  ;;  %v11303_v7 = vpop.eup %9003  ;;  %v2120_v29 = vsel %vm1564_vm2, %v11298_v53, 0.0  ;;  %vm2880_vm8 = vweird.f32 %v11068_v37  ;;  %v2884_v62 = vand.u32 2147483647, %v11068_v37 }
 0x353   : > { %v2878_v43 = vmul.f32 %v11197_v10, %v2877_v59  ;;  %v2886_v50 = vand.u32 2147483648, %v11068_v37  ;;  %2121 = vadd.xlane.f32.xlu2 %v2120_v29  ;;  %v2081_v63 = vsel %vm1564_vm2, %v10977_v32, 0.0  ;;  %v2853_v47 = vsel %vm11314_vm7, %v11153_v0, %v2849_v58  ;;  %v9388_v59 = vld [vmem:[%s9825_s16 + $0x58] sm:$0xff] }
 0x354   : > { %v1756_v33 = vpop.xlane.xlu0 %1755  ;;  %vm11334_vm10 = vcmp.eq.f32.partialorder %v2899_v18, 8.507059e+37  ;;  %v2937_v49 = vsub.f32 1.0, %v2936_v13  ;;  %9007 = vpow2.f32 %v1941_v57  ;;  %v2838_v32 = vsel %vm11330_vm9, %v11160_v25, %v2834_v22  ;;  %v11345_v0 = vpop.xlane.xlu2 %1995 }
 0x355   : > { %vm2896_vm12 = vweird.f32 %v11183_v55  ;;  %v2921_v23 = vmul.f32 %v11303_v7, %v11156_v35  ;;  %9009 = vrcp.f32 %v11242_v19  ;;  %v2894_v11 = vadd.f32 %v11183_v55, %v2893_v39 }
 0x356   : > { %v2879_v58 = vadd.f32 %v11197_v10, %v2878_v43  ;;  %vm2881_vm13 = vweird.f32 %v11197_v10  ;;  %v1820_v18 = vsub.f32 %v10714_v14, %v1756_v33  ;;  %v11352_v25 = vpop.eup %9005  ;;  %v2902_v13 = vor.u32 1.1754944e-38, %v2901_v20  ;;  %vm11374_vm15 = vmor %vm2895_vm6, %vm2896_vm12 }
 0x357   : > { %vm11354_vm14 = vcmp.eq.f32.partialorder %v2884_v62, 8.507059e+37  ;;  %v2887_v57 = vor.u32 1.1754944e-38, %v2886_v50  ;;  %v2132_v29 = vsel %vm1564_vm2, %v11214_v61, 0.0  ;;  %v11364_v39 = vsel %vm11279_vm3, %v2857_v12, %v2853_v47  ;;  %vm11387_vm0 = vmor %vm2880_vm8, %vm2881_vm13 }
 0x358   : > { %18964 = vst [vmem:[#allocation32_spill] sm:$0xff] %v11364_v39  ;;  %v11368_v14 = vsel %vm11284_vm5, %v2842_v17, %v2838_v32  ;;  %v2938_v43 = vmul.f32 %v11261_v60, %v2937_v49  ;;  %v1947_v62 = vmul.f32 1.442695, %v1820_v18  ;;  %2133 = vadd.xlane.f32.xlu1 %v2132_v29  ;;  %v11381_v12 = vperm.slane %v11150_v27, %v10866_v38 }
 0x359   : > { %2082 = vadd.xlane.f32.xlu0 %v2081_v63  ;;  %v2944_v48 = vand.u32 2147483647, %v11129_v52  ;;  %v2922_v15 = vsub.f32 1.0, %v2921_v23  ;;  %9011 = vrcp.f32 %v11268_v36  ;;  %v2898_v27 = vsel %vm11374_vm15, %v11183_v55, %v2894_v11  ;;  %v9389_v11 = vld [vmem:[%s9825_s16 + $0x60] sm:$0xff] }
 0x35a   : > { %449 = vmatmul.f32.gmra.mxu0 %v9388_v59  ;;  %v11360_v2 = vpop.xlane.xlu1 %2007  ;;  %18967 = vst [vmem:[#allocation54_spill] sm:$0xff] %v11381_v12  ;;  %v11393_v21 = vpop.eup %9007  ;;  %v2883_v50 = vsel %vm11387_vm0, %v11197_v10, %v2879_v58  ;;  %v2981_v37 = vmul.f32 %v11352_v25, %v11194_v9  ;;  %9013 = vpow2.f32 %v1947_v62  ;;  %v2946_v63 = vand.u32 2147483648, %v11129_v52 }
 0x35b   : > { %v11403_v33 = vpop.eup %9009  ;;  %v2931_v47 = vand.u32 2147483648, %v11156_v35  ;;  %9015 = vrcp.f32 %v11345_v0  ;;  %v2129_v55 = vsel %vm1564_vm2, %v11393_v21, 0.0  ;;  %v2939_v10 = vadd.f32 %v11261_v60, %v2938_v43 }
 0x35c   : > { %vm2941_vm1 = vweird.f32 %v11261_v60  ;;  %v2929_v49 = vand.u32 2147483647, %v11156_v35  ;;  %2130 = vadd.xlane.f32.xlu2 %v2129_v55  ;;  %v11416_v32 = vsel %vm11334_vm10, %v2902_v13, %v2898_v27  ;;  %v11420_v23 = vsel %vm11354_vm14, %v2887_v57, %v2883_v50  ;;  %v11440_v20 = vpop.xlane.xlu2 %2004  ;;  %v11454_v27 = vpop.xlane.xlu0 %1956 }
 0x35d   : > { %18970 = vst [vmem:[#allocation55_spill] sm:$0xff] %v11420_v23  ;;  %vm2940_vm3 = vweird.f32 %v11129_v52  ;;  %v2923_v59 = vmul.f32 %v11303_v7, %v2922_v15  ;;  %vm2925_vm4 = vweird.f32 %v11156_v35  ;;  %v2982_v18 = vsub.f32 1.0, %v2981_v37 }
 0x35e   : > { %v2966_v44 = vmul.f32 %v11403_v33, %v11242_v19  ;;  %vm11431_vm5 = vmor %vm2940_vm3, %vm2941_vm1  ;;  %vm11435_vm6 = vcmp.eq.f32.partialorder %v2944_v48, 8.507059e+37  ;;  %v2947_v57 = vor.u32 1.1754944e-38, %v2946_v63  ;;  %v2932_v29 = vor.u32 1.1754944e-38, %v2931_v47 }
 0x35f   : > { %v11429_v13 = vpop.eup %9011  ;;  %9017 = vrcp.f32 %v11360_v2  ;;  %v2943_v15 = vsel %vm11431_vm5, %v11261_v60, %v2939_v10  ;;  %vm11449_vm7 = vcmp.eq.f32.partialorder %v2929_v49, 8.507059e+37  ;;  %vm2985_vm8 = vweird.f32 %v11194_v9 }
 0x360   : > { %v11442_v43 = vpop.eup %9013  ;;  %v2924_v37 = vadd.f32 %v11303_v7, %v2923_v59  ;;  %vm2926_vm9 = vweird.f32 %v11303_v7  ;;  %v2989_v63 = vand.u32 2147483647, %v11194_v9  ;;  %v2090_v47 = vsel %vm1564_vm2, %v11019_v3, 0.0 }
 0x361   : > { %v11456_v50 = vpop.eup %9015  ;;  %v2983_v55 = vmul.f32 %v11352_v25, %v2982_v18  ;;  %v2967_v10 = vsub.f32 1.0, %v2966_v44  ;;  %9019 = vrcp.f32 %v11440_v20  ;;  %2091 = vadd.xlane.f32.xlu0 %v2090_v47  ;;  %v2138_v49 = vsel %vm1564_vm2, %v11442_v43, 0.0  ;;  %vm11492_vm10 = vmor %vm2925_vm4, %vm2926_vm9  ;;  %v9391_v47 = vld [vmem:[%s9825_s16 + $0x70] sm:$0xff] }
 0x362   : > { %452 = vmatmul.f32.gmra.mxu0 %v9389_v11  ;;  %v11463_v60 = vpop.xlane.xlu1 %2016  ;;  %v11471_v59 = vsel %vm11435_vm6, %v2947_v57, %v2943_v15  ;;  %v2991_v11 = vand.u32 2147483648, %v11194_v9  ;;  %v3026_v3 = vmul.f32 %v11429_v13, %v11268_v36  ;;  %9021 = vrcp.f32 %v11454_v27 }
 0x363   : > { %18977 = vst [vmem:[#allocation56_spill] sm:$0xff] %v11471_v59  ;;  %v2974_v18 = vand.u32 2147483647, %v11242_v19  ;;  %v2976_v44 = vand.u32 2147483648, %v11242_v19  ;;  %v3011_v22 = vmul.f32 %v11456_v50, %v11345_v0  ;;  %9023 = vrcp.f32 %v11463_v60 }
 0x364   : > { %2139 = vadd.xlane.f32.xlu2 %v2138_v49  ;;  %v11486_v57 = vperm.slane %v11236_v24, %v10866_v38  ;;  %vm2986_vm12 = vweird.f32 %v11352_v25  ;;  %vm11497_vm13 = vcmp.eq.f32.partialorder %v2989_v63, 8.507059e+37  ;;  %vm2970_vm14 = vweird.f32 %v11242_v19  ;;  %v9390_v49 = vld [vmem:[%s9825_s16 + $0x68] sm:$0xff]  ;;  %v11542_v48 = vpop.xlane.xlu2 %2013 }
 0x365   : > { %v11482_v52 = vpop.eup %9017  ;;  %v2928_v24 = vsel %vm11492_vm10, %v11303_v7, %v2924_v37  ;;  %v18982_v35 = vrot.slane %v11109_v5, 4  ;;  %v2984_v62 = vadd.f32 %v11352_v25, %v2983_v55  ;;  %v2968_v63 = vmul.f32 %v11403_v33, %v2967_v10  ;;  %vm11535_vm0 = vmor %vm2985_vm8, %vm2986_vm12 }
 0x366   : > { %v2992_v58 = vor.u32 1.1754944e-38, %v2991_v11  ;;  %v3027_v23 = vsub.f32 1.0, %v3026_v3  ;;  %v3036_v39 = vand.u32 2147483648, %v11268_v36  ;;  %vm11516_vm15 = vcmp.eq.f32.partialorder %v2974_v18, 8.507059e+37 }
 0x367   : > { %v2541_v17 = vsel %vm2142_vm11, %v18982_v35, %v11298_v53  ;;  %v2977_v7 = vor.u32 1.1754944e-38, %v2976_v44  ;;  %v3012_v37 = vsub.f32 1.0, %v3011_v22  ;;  %v3071_v53 = vmul.f32 %v11482_v52, %v11360_v2 }
 0x368   : > { %v11526_v10 = vsel %vm11449_vm7, %v2932_v29, %v2928_v24  ;;  %v11529_v11 = vperm.slane %v2541_v17, %v10866_v38  ;;  %vm2971_vm1 = vweird.f32 %v11403_v33  ;;  %vm3030_vm3 = vweird.f32 %v11268_v36 }
 0x369   : > { %18985 = vst [vmem:[#allocation57_spill] sm:$0xff] %v11526_v10  ;;  %v3034_v18 = vand.u32 2147483647, %v11268_v36  ;;  %v2988_v17 = vsel %vm11535_vm0, %v11352_v25, %v2984_v62  ;;  %v2969_v9 = vadd.f32 %v11403_v33, %v2968_v63  ;;  %v3019_v44 = vand.u32 2147483647, %v11345_v0  ;;  %vm11568_vm5 = vmor %vm2970_vm14, %vm2971_vm1 }
 0x36a   : > { %455 = vmatmul.f32.gmra.mxu0 %v9390_v49  ;;  %v11514_v49 = vpop.eup %9019  ;;  %18986 = vst [vmem:[#allocation58_spill] sm:$0xff] %v11529_v11  ;;  %v3021_v22 = vand.u32 2147483648, %v11345_v0  ;;  %v3028_v24 = vmul.f32 %v11429_v13, %v3027_v23  ;;  %v3037_v35 = vor.u32 1.1754944e-38, %v3036_v39  ;;  %vm3015_vm4 = vweird.f32 %v11345_v0 }
 0x36b   : > { %v11522_v55 = vpop.eup %9021  ;;  %v3056_v56 = vmul.f32 %v11514_v49, %v11440_v20  ;;  %v3013_v10 = vmul.f32 %v11456_v50, %v3012_v37  ;;  %v3072_v59 = vsub.f32 1.0, %v3071_v53  ;;  %9025 = vrcp.f32 %v11542_v48 }
 0x36c   : > { %v11544_v29 = vpop.eup %9023  ;;  %v2816_v25 = vmul.f32 %v11522_v55, %v11454_v27  ;;  %v11562_v62 = vsel %vm11497_vm13, %v2992_v58, %v2988_v17  ;;  %vm3031_vm6 = vweird.f32 %v11429_v13  ;;  %vm11573_vm7 = vcmp.eq.f32.partialorder %v3034_v18, 8.507059e+37 }
 0x36d   : > { %v3116_v63 = vmul.f32 %v11544_v29, %v11463_v60  ;;  %v2099_v58 = vsel %vm1564_vm2, %v11046_v54, 0.0  ;;  %v2973_v19 = vsel %vm11568_vm5, %v11403_v33, %v2969_v9  ;;  %vm11585_vm8 = vcmp.eq.f32.partialorder %v3019_v44, 8.507059e+37  ;;  %vm11621_vm13 = vmor %vm3030_vm3, %vm3031_vm6 }
 0x36e   : > { %v3022_v53 = vor.u32 1.1754944e-38, %v3021_v22  ;;  %v3079_v3 = vand.u32 2147483647, %v11360_v2  ;;  %v3081_v18 = vand.u32 2147483648, %v11360_v2  ;;  %2100 = vadd.xlane.f32.xlu0 %v2099_v58  ;;  %v3029_v17 = vadd.f32 %v11429_v13, %v3028_v24 }
 0x36f   : > { %vm3016_vm9 = vweird.f32 %v11456_v50  ;;  %vm3075_vm10 = vweird.f32 %v11360_v2  ;;  %v3057_v54 = vsub.f32 1.0, %v3056_v56  ;;  %v3014_v33 = vadd.f32 %v11456_v50, %v3013_v10 }
 0x370   : > { %v2552_v9 = vrot.slane %v11442_v43, 4  ;;  %v3073_v44 = vmul.f32 %v11482_v52, %v3072_v59  ;;  %v2817_v22 = vsub.f32 1.0, %v2816_v25  ;;  %v11601_v39 = vsel %vm11516_vm15, %v2977_v7, %v2973_v19  ;;  %vm11638_vm15 = vmor %vm3015_vm4, %vm3016_vm9 }
 0x371   : > { %v18995_v24 = vrot.slane %v11144_v42, 4  ;;  %vm3060_vm12 = vweird.f32 %v11440_v20  ;;  %v3064_v56 = vand.u32 2147483647, %v11440_v20  ;;  %v3117_v10 = vsub.f32 1.0, %v3116_v63  ;;  %v11615_v59 = vpop.eup %9025 }
 0x372   : > { %458 = vmatmul.f32.gmra.mxu0 %v9391_v47  ;;  %v11594_v47 = vpop.xlane.xlu0 %1965  ;;  %v18996_v43 = vpack.i.bf16 %v11176_v6, %v11094_v1  ;;  %vm11625_vm14 = vcmp.eq.f32.partialorder %v3079_v3, 8.507059e+37  ;;  %v3082_v7 = vor.u32 1.1754944e-38, %v3081_v18  ;;  %v3066_v25 = vand.u32 2147483648, %v11440_v20 }
 0x373   : > { %v11607_v58 = vsel %vm2142_vm11, %v18995_v24, %v11393_v21  ;;  %9027 = vrcp.f32 %v11594_v47  ;;  %v3033_v1 = vsel %vm11621_vm13, %v11429_v13, %v3029_v17  ;;  %vm3076_vm0 = vweird.f32 %v11482_v52  ;;  %v9392_v24 = vld [vmem:[%s9825_s16 + $0x78] sm:$0xff]  ;;  %v11699_v21 = vpop.xlane.xlu1 %2025 }
 0x374   : > { %8784 = vrot.lane.b32.xlu1 %v18996_v43, %s9651_s27  ;;  %v3058_v36 = vmul.f32 %v11514_v49, %v3057_v54  ;;  %v2824_v63 = vand.u32 2147483647, %v11454_v27  ;;  %v3018_v19 = vsel %vm11638_vm15, %v11456_v50, %v3014_v33  ;;  %v2553_v13 = vsel %vm2142_vm11, %v2552_v9, %v11214_v61  ;;  %vm11679_vm4 = vmor %vm3075_vm10, %vm3076_vm0 }
 0x375   : > { %v3074_v3 = vadd.f32 %v11482_v52, %v3073_v44  ;;  %v2818_v0 = vmul.f32 %v11522_v55, %v2817_v22  ;;  %vm11652_vm1 = vcmp.eq.f32.partialorder %v3064_v56, 8.507059e+37  ;;  %vm2820_vm3 = vweird.f32 %v11454_v27 }
 0x376   : > { %v3118_v17 = vmul.f32 %v11544_v29, %v3117_v10  ;;  %v3101_v54 = vmul.f32 %v11615_v59, %v11542_v48  ;;  %v11663_v61 = vsel %vm11573_vm7, %v3037_v35, %v3033_v1  ;;  %v3067_v50 = vor.u32 1.1754944e-38, %v3066_v25 }
 0x377   : > { %19005 = vst [vmem:[#allocation59_spill] sm:$0xff] %v11663_v61  ;;  %v2826_v33 = vand.u32 2147483648, %v11454_v27  ;;  %v2108_v9 = vsel %vm1564_vm2, %v11025_v34, 0.0  ;;  %v11670_v44 = vsel %vm11585_vm8, %v3022_v53, %v3018_v19  ;;  %v11673_v22 = vperm.slane %v2553_v13, %v10866_v38  ;;  %v19042_v61 = vld [vmem:[#allocation48_spill] sm:$0xff] }
 0x378   : > { %v3059_v23 = vadd.f32 %v11514_v49, %v3058_v36  ;;  %vm3061_vm5 = vweird.f32 %v11514_v49  ;;  %2109 = vadd.xlane.f32.xlu0 %v2108_v9  ;;  %v3078_v37 = vsel %vm11679_vm4, %v11482_v52, %v3074_v3  ;;  %v2819_v53 = vadd.f32 %v11522_v55, %v2818_v0  ;;  %v11710_v36 = vpop.xlane.xlu2 %2022 }
 0x379   : > { %19006 = vst [vmem:[#allocation60_spill] sm:$0xff] %v11673_v22  ;;  %v11685_v34 = vpop.eup %9027  ;;  %vm2821_vm6 = vweird.f32 %v11522_v55  ;;  %vm11692_vm7 = vcmp.eq.f32.partialorder %v2824_v63, 8.507059e+37  ;;  %v3119_v56 = vadd.f32 %v11544_v29, %v3118_v17  ;;  %vm3121_vm8 = vweird.f32 %v11544_v29  ;;  %vm11704_vm9 = vmor %vm3060_vm12, %vm3061_vm5 }
 0x37a   : > { %461 = vmatmul.f32.gmra.mxu0 %v9392_v24  ;;  %v3124_v10 = vand.u32 2147483647, %v11463_v60  ;;  %v3102_v43 = vsub.f32 1.0, %v3101_v54  ;;  %v2827_v1 = vor.u32 1.1754944e-38, %v2826_v33  ;;  %vm3120_vm10 = vweird.f32 %v11463_v60  ;;  %vm11724_vm12 = vmor %vm2820_vm3, %vm2821_vm6 }
 0x37b   : > { %v3126_v6 = vand.u32 2147483648, %v11463_v60  ;;  %v2570_v63 = vrot.slane %v11673_v22, 4  ;;  %v11715_v19 = vsel %vm11625_vm14, %v3082_v7, %v3078_v37  ;;  %v3063_v20 = vsel %vm11704_vm9, %v11514_v49, %v3059_v23  ;;  %vm11735_vm13 = vmor %vm3120_vm10, %vm3121_vm8 }
 0x37c   : > { %v2861_v60 = vmul.f32 %v11685_v34, %v11594_v47  ;;  %v2823_v15 = vsel %vm11724_vm12, %v11522_v55, %v2819_v53  ;;  %v3109_v49 = vand.u32 2147483647, %v11542_v48  ;;  %v3111_v27 = vand.u32 2147483648, %v11542_v48  ;;  %v11747_v55 = vpop.xlane.xlu0 %1974 }
 0x37d   : > { %9029 = vrcp.f32 %v11699_v21  ;;  %v3123_v3 = vsel %vm11735_vm13, %v11544_v29, %v3119_v56  ;;  %vm3125_vm14 = vcmp.eq.f32.partialorder %v3124_v10, 8.507059e+37  ;;  %v3103_v0 = vmul.f32 %v11615_v59, %v3102_v43 }
 0x37e   : > { %vm3105_vm15 = vweird.f32 %v11542_v48  ;;  %v11752_v54 = vsel %vm11652_vm1, %v3067_v50, %v3063_v20  ;;  %v3127_v24 = vor.u32 1.1754944e-38, %v3126_v6  ;;  %v2871_v33 = vand.u32 2147483648, %v11594_v47 }
 0x37f   : > { %19017 = vst [vmem:[#allocation61_spill] sm:$0xff] %v11752_v54  ;;  %v11757_v9 = vsel %vm11692_vm7, %v2827_v1, %v2823_v15  ;;  %v2862_v29 = vsub.f32 1.0, %v2861_v60  ;;  %v3171_v35 = vand.u32 2147483648, %v11699_v21  ;;  %9031 = vrcp.f32 %v11710_v36  ;;  %v11786_v15 = vpop.xlane.xlu1 %2034  ;;  %v19037_v1 = vld [vmem:[#allocation43_spill] sm:$0xff] }
 0x380   : > { %v11761_v23 = vsel %vm3125_vm14, %v3127_v24, %v3123_v3  ;;  %vm11763_vm0 = vcmp.eq.f32.partialorder %v3109_v49, 8.507059e+37  ;;  %v3112_v18 = vor.u32 1.1754944e-38, %v3111_v27  ;;  %v2869_v50 = vand.u32 2147483647, %v11594_v47  ;;  %v11797_v27 = vpop.xlane.xlu2 %2031 }
 0x381   : > { %19018 = vst [vmem:[#allocation62_spill] sm:$0xff] %v11761_v23  ;;  %v3104_v2 = vadd.f32 %v11615_v59, %v3103_v0  ;;  %vm3106_vm1 = vweird.f32 %v11615_v59  ;;  %vm2865_vm3 = vweird.f32 %v11594_v47  ;;  %v3156_v56 = vand.u32 2147483648, %v11710_v36 }
 0x382   : > { %v11776_v52 = vor.u32 1.1754944e-38, %v2871_v33  ;;  %v2117_v6 = vsel %vm1564_vm2, %v11117_v46, 0.0  ;;  %v2863_v13 = vmul.f32 %v11685_v34, %v2862_v29  ;;  %vm2866_vm4 = vweird.f32 %v11685_v34  ;;  %vm11790_vm5 = vmor %vm3105_vm15, %vm3106_vm1 }
 0x383   : > { %v11773_v10 = vpop.eup %9029  ;;  %v11784_v60 = vor.u32 1.1754944e-38, %v3171_v35  ;;  %2118 = vadd.xlane.f32.xlu0 %v2117_v6  ;;  %9033 = vrcp.f32 %v11747_v55  ;;  %v19023_v3 = vrot.slane %v11381_v12, 4  ;;  %v3108_v48 = vsel %vm11790_vm5, %v11615_v59, %v3104_v2  ;;  %vm11863_vm7 = vmor %vm2865_vm3, %vm2866_vm4 }
 0x384   : > { %v3161_v33 = vmul.f32 %v11773_v10, %v11699_v21  ;;  %v11810_v29 = vor.u32 1.1754944e-38, %v3156_v56  ;;  %v2916_v35 = vand.u32 2147483648, %v11747_v55  ;;  %9035 = vrcp.f32 %v11786_v15  ;;  %v11825_v56 = vpop.xlane.xlu0 %1983 }
 0x385   : > { %v2503_v0 = vsel %vm2142_vm11, %v19023_v3, %v11276_v16  ;;  %v11803_v24 = vpop.eup %9031  ;;  %v19024_v6 = vrot.slane %v11079_v28, 4  ;;  %v11820_v20 = vperm.slane %v11607_v58, %v10866_v38  ;;  %v2558_v59 = vrot.slane %v11529_v11, 4  ;;  %v19081_v28 = vld [vmem:[#allocation42_spill] sm:$0xff] }
 0x386   : > { %v2864_v2 = vadd.f32 %v11685_v34, %v2863_v13  ;;  %9037 = vrcp.f32 %v11797_v27  ;;  %v11828_v7 = vperm.slane %v2503_v0, %v11005_v51  ;;  %v2390_v53 = vrot.slane %v11076_v4, 4 }
 0x387   : > { %v2515_v3 = vsel %vm2142_vm11, %v19024_v6, %v11486_v57  ;;  %19025 = vst [vmem:[#allocation63_spill] sm:$0xff] %v11820_v20  ;;  %vm11831_vm6 = vcmp.eq.f32.partialorder %v2869_v50, 8.507059e+37  ;;  %v3146_v58 = vmul.f32 %v11803_v24, %v11710_v36  ;;  %v2559_v6 = vsel %vm2142_vm11, %v2558_v59, %v11163_v30 }
 0x388   : > { %19026 = vst [vmem:[#allocation64_spill] sm:$0xff] %v11828_v7  ;;  %v2571_v13 = vsel %vm2142_vm11, %v2570_v63, %v11820_v20  ;;  %v11845_v0 = vperm.slane %v11102_v26, %v10866_v38  ;;  %v11849_v50 = vsel %vm11763_vm0, %v3112_v18, %v3108_v48  ;;  %v3162_v25 = vsub.f32 1.0, %v3161_v33 }
 0x389   : > { %19029 = vst [vmem:[#allocation65_spill] sm:$0xff] %v11849_v50  ;;  %v11852_v43 = vperm.slane %v2515_v3, %v11005_v51  ;;  %v11855_v46 = vperm.slane %v2559_v6, %v11005_v51  ;;  %v11857_v59 = vpop.eup %9033  ;;  %9039 = vrcp.f32 %v11825_v56  ;;  %v11869_v63 = vperm.slane %v2571_v13, %v11005_v51  ;;  %v19039_v50 = vld [vmem:[#allocation34_spill] sm:$0xff] }
 0x38a   : > { %v2391_v37 = vsel %vm2142_vm11, %v2390_v53, %v10948_v41  ;;  %v19035_v18 = vrot.slane %v11086_v31, 4  ;;  %v2868_v47 = vsel %vm11863_vm7, %v11685_v34, %v2864_v2  ;;  %v2528_v33 = vrot.slane %v11828_v7, 4  ;;  %v11885_v13 = vpop.eup %9035 }
 0x38b   : > { %19030 = vst [vmem:[#allocation66_spill] sm:$0xff] %v11852_v43  ;;  %v2584_v3 = vrot.slane %v11855_v46, 4  ;;  %v11883_v6 = vperm.slane %v2391_v37, %v11005_v51  ;;  %v3147_v49 = vsub.f32 1.0, %v3146_v58  ;;  %v3216_v53 = vand.u32 2147483648, %v11786_v15 }
 0x38c   : > { %19031 = vst [vmem:[#allocation67_spill] sm:$0xff] %v11855_v46  ;;  %v2403_v48 = vsel %vm2142_vm11, %v19035_v18, %v11845_v0  ;;  %v19038_v23 = vrot.slane %v19037_v1, 4  ;;  %v2458_v26 = vrot.slane %v19039_v50, 4  ;;  %v11893_v34 = vpop.eup %9037  ;;  %v2529_v2 = vsel %vm2142_vm11, %v11852_v43, %v2528_v33 }
 0x38d   : > { %19034 = vst [vmem:[#allocation68_spill] sm:$0xff] %v11869_v63  ;;  %v2585_v37 = vsel %vm2142_vm11, %v11869_v63, %v2584_v3  ;;  %v11900_v46 = vperm.slane %v2403_v48, %v11005_v51  ;;  %v3163_v7 = vmul.f32 %v11773_v10, %v3162_v25  ;;  %vm3165_vm8 = vweird.f32 %v11699_v21 }
 0x38e   : > { %19036 = vst [vmem:[#allocation69_spill] sm:$0xff] %v11883_v6  ;;  %v2447_v18 = vsel %vm2142_vm11, %v19038_v23, %v11138_v40  ;;  %v2906_v23 = vmul.f32 %v11857_v59, %v11747_v55  ;;  %v8798_v54 = vpack.i.bf16 %v2585_v37, %v2529_v2  ;;  %v2459_v22 = vsel %vm2142_vm11, %v2458_v26, %v19042_v61 }
 0x38f   : > { %19040 = vst [vmem:[#allocation43_spill] sm:$0xff] %v11900_v46  ;;  %v11903_v58 = vperm.slane %v2447_v18, %v11005_v51  ;;  %v3206_v33 = vmul.f32 %v11885_v13, %v11786_v15  ;;  %v2416_v48 = vrot.slane %v11883_v6, 4  ;;  %v11915_v3 = vperm.slane %v2459_v22, %v11005_v51  ;;  %v11918_v25 = vpop.eup %9039 }
 0x390   : > { %vm3166_vm9 = vweird.f32 %v11773_v10  ;;  %v11921_v2 = vor.u32 1.1754944e-38, %v2916_v35  ;;  %v3214_v26 = vand.u32 2147483647, %v11786_v15  ;;  %v3191_v37 = vmul.f32 %v11893_v34, %v11797_v27  ;;  %8799 = vrot.lane.b32.xlu1 %v8798_v54, %s9651_s27 }
 0x391   : > { %19041 = vst [vmem:[#allocation34_spill] sm:$0xff] %v11903_v58  ;;  %v2472_v18 = vrot.slane %v11903_v58, 4  ;;  %v11930_v22 = vsel %vm11831_vm6, %v11776_v52, %v2868_v47  ;;  %v3148_v63 = vmul.f32 %v11803_v24, %v3147_v49  ;;  %vm3151_vm10 = vweird.f32 %v11803_v24  ;;  %vm11993_vm1 = vmor %vm3165_vm8, %vm3166_vm9 }
 0x392   : > { %19043 = vst [vmem:[#allocation48_spill] sm:$0xff] %v11915_v3  ;;  %v2417_v35 = vsel %vm2142_vm11, %v11900_v46, %v2416_v48  ;;  %v2907_v58 = vsub.f32 1.0, %v2906_v23  ;;  %vm2911_vm12 = vweird.f32 %v11857_v59  ;;  %v11939_v6 = vor.u32 1.1754944e-38, %v3216_v53  ;;  %v11948_v48 = vpop.xlane.xlu1 %2043 }
 0x393   : > { %v2473_v43 = vsel %vm2142_vm11, %v11915_v3, %v2472_v18  ;;  %v11942_v17 = vadd.f32 %v11773_v10, %v3163_v7  ;;  %vm3150_vm13 = vweird.f32 %v11710_v36  ;;  %v3207_v52 = vsub.f32 1.0, %v3206_v33 }
 0x394   : > { %v8793_v54 = vpack.i.bf16 %v2473_v43, %v2417_v35  ;;  %v3199_v49 = vand.u32 2147483647, %v11797_v27  ;;  %v2951_v47 = vmul.f32 %v11918_v25, %v11825_v56  ;;  %vm2910_vm14 = vweird.f32 %v11747_v55  ;;  %v11953_v43 = vpop.xlane.xlu2 %2040  ;;  %vm12057_vm9 = vmor %vm3150_vm13, %vm3151_vm10 }
 0x395   : > { %v3192_v23 = vsub.f32 1.0, %v3191_v37  ;;  %v3201_v53 = vand.u32 2147483648, %v11797_v27  ;;  %v2126_v7 = vsel %vm1564_vm2, %v11109_v5, 0.0  ;;  %v19044_v33 = vrot.slane %v10948_v41, 4  ;;  %v11965_v37 = vpop.xlane.xlu0 %1992  ;;  %vm12077_vm10 = vmor %vm2910_vm14, %vm2911_vm12 }
 0x396   : > { %8794 = vrot.lane.b32.xlu2 %v8793_v54, %s9651_s27  ;;  %v11962_v35 = vadd.f32 %v11803_v24, %v3148_v63  ;;  %vm3210_vm15 = vweird.f32 %v11786_v15  ;;  %2127 = vadd.xlane.f32.xlu0 %v2126_v7  ;;  %v2404_v3 = vrot.slane %v11845_v0, 4  ;;  %v19046_v5 = vrot.slane %v11138_v40, 4 }
 0x397   : > { %v2393_v18 = vsel %vm2142_vm11, %v11076_v4, %v19044_v33  ;;  %v2908_v4 = vmul.f32 %v11857_v59, %v2907_v58  ;;  %vm3195_vm0 = vweird.f32 %v11797_v27  ;;  %9041 = vrcp.f32 %v11948_v48  ;;  %v19085_v27 = vld [vmem:[#allocation49_spill] sm:$0xff] }
 0x398   : > { %v11968_v54 = vperm.slane %v2393_v18, %v11005_v51  ;;  %v2449_v41 = vsel %vm2142_vm11, %v19037_v1, %v19046_v5  ;;  %v19048_v7 = vrot.slane %v19042_v61, 4  ;;  %v3208_v0 = vmul.f32 %v11885_v13, %v3207_v52 }
 0x399   : > { %v11979_v63 = vperm.slane %v2449_v41, %v11005_v51  ;;  %v2952_v40 = vsub.f32 1.0, %v2951_v47  ;;  %9043 = vrcp.f32 %v11953_v43  ;;  %v2405_v1 = vsel %vm2142_vm11, %v11086_v31, %v2404_v3 }
 0x39a   : > { %19045 = vst [vmem:[#allocation70_spill] sm:$0xff] %v11968_v54  ;;  %v2461_v33 = vsel %vm2142_vm11, %v19039_v50, %v19048_v7  ;;  %v3193_v61 = vmul.f32 %v11893_v34, %v3192_v23  ;;  %v2959_v50 = vand.u32 2147483647, %v11825_v56  ;;  %9045 = vrcp.f32 %v11965_v37 }
 0x39b   : > { %19047 = vst [vmem:[#allocation71_spill] sm:$0xff] %v11979_v63  ;;  %v12001_v52 = vperm.slane %v2405_v1, %v11005_v51  ;;  %v3168_v31 = vsel %vm11993_vm1, %v11773_v10, %v11942_v17  ;;  %v19052_v3 = vand.u32 2147483647, %v11699_v21  ;;  %v19055_v23 = vand.u32 2147483647, %v11710_v36  ;;  %v19062_v1 = vld [vmem:[#allocation35_spill] sm:$0xff] }
 0x39c   : > { %v19058_v5 = vand.u32 2147483647, %v11747_v55  ;;  %vm2955_vm6 = vweird.f32 %v11825_v56  ;;  %v2420_v21 = vrot.slane %v11968_v54, 4  ;;  %v12028_v10 = vperm.slane %v2461_v33, %v11005_v51 }
 0x39d   : > { %19051 = vst [vmem:[#allocation72_spill] sm:$0xff] %v12001_v52  ;;  %vm12009_vm3 = vcmp.eq.f32.partialorder %v19052_v3, 8.507059e+37  ;;  %vm12015_vm4 = vcmp.eq.f32.partialorder %v19055_v23, 8.507059e+37  ;;  %v2476_v17 = vrot.slane %v11979_v63, 4  ;;  %v2909_v7 = vadd.f32 %v11857_v59, %v2908_v4  ;;  %v19063_v3 = vld [vmem:[#allocation47_spill] sm:$0xff]  ;;  %v12051_v20 = vpop.eup %9041 }
 0x39e   : > { %vm12021_vm5 = vcmp.eq.f32.partialorder %v19058_v5, 8.507059e+37  ;;  %19061 = vst [vmem:[#allocation73_spill] sm:$0xff] %v12028_v10  ;;  %vm3211_vm7 = vweird.f32 %v11885_v13  ;;  %v12035_v58 = vperm.slane %v19062_v1, %v10866_v38  ;;  %v19064_v23 = vrot.slane %v19063_v3, 4  ;;  %v19065_v5 = vld [vmem:[#allocation36_spill] sm:$0xff] }
 0x39f   : > { %v3209_v54 = vadd.f32 %v11885_v13, %v3208_v0  ;;  %vm12042_vm8 = vcmp.eq.f32.partialorder %v3214_v26, 8.507059e+37  ;;  %v2953_v63 = vmul.f32 %v11918_v25, %v2952_v40  ;;  %v2421_v4 = vsel %vm2142_vm11, %v12001_v52, %v2420_v21  ;;  %v12086_v52 = vpop.xlane.xlu1 %2052  ;;  %vm12097_vm12 = vmor %vm3210_vm15, %vm3211_vm7 }
 0x3a0   : > { %v2281_v46 = vsel %vm2142_vm11, %v19065_v5, %v19064_v23  ;;  %v2477_v1 = vsel %vm2142_vm11, %v12028_v10, %v2476_v17  ;;  %v3194_v26 = vadd.f32 %v11893_v34, %v3193_v61  ;;  %vm3196_vm1 = vweird.f32 %v11893_v34  ;;  %v19070_v23 = vld [vmem:[#allocation41_spill] sm:$0xff]  ;;  %v12067_v10 = vpop.eup %9043 }
 0x3a1   : > { %v8813_v40 = vpack.i.bf16 %v2477_v1, %v2421_v4  ;;  %v19071_v21 = vrot.slane %v19070_v23, 4  ;;  %v3153_v36 = vsel %vm12057_vm9, %v11803_v24, %v11962_v35  ;;  %vm12081_vm13 = vcmp.eq.f32.partialorder %v3199_v49, 8.507059e+37  ;;  %v12088_v11 = vpop.eup %9045  ;;  %v19078_v49 = vld [vmem:[#allocation50_spill] sm:$0xff]  ;;  %v19079_v35 = vld [vmem:[#allocation44_spill] sm:$0xff]  ;;  %vm12115_vm15 = vmor %vm3195_vm0, %vm3196_vm1 }
 0x3a2   : > { %v3202_v1 = vor.u32 1.1754944e-38, %v3201_v53  ;;  %v2913_v24 = vsel %vm12077_vm10, %v11857_v59, %v2909_v7  ;;  %vm2956_vm14 = vweird.f32 %v11918_v25  ;;  %v2336_v53 = vrot.slane %v19078_v49, 4 }
 0x3a3   : > { %v2293_v17 = vsel %vm2142_vm11, %v12035_v58, %v19071_v21  ;;  %v2961_v21 = vand.u32 2147483648, %v11825_v56  ;;  %8814 = vrot.lane.b32.xlu1 %v8813_v40, %s9651_s27  ;;  %v19080_v0 = vrot.slane %v19079_v35, 4  ;;  %v3213_v59 = vsel %vm12097_vm12, %v11885_v13, %v3209_v54  ;;  %vm12163_vm0 = vmor %vm2955_vm6, %vm2956_vm14  ;;  %v12178_v56 = vpop.xlane.xlu2 %2049 }
 0x3a4   : > { %v2954_v7 = vadd.f32 %v11918_v25, %v2953_v63  ;;  %v3251_v40 = vmul.f32 %v12051_v20, %v11948_v48  ;;  %v12123_v12 = vperm.slane %v2281_v46, %v11005_v51  ;;  %v3198_v13 = vsel %vm12115_vm15, %v11893_v34, %v3194_v26 }
 0x3a5   : > { %v2349_v61 = vsel %vm2142_vm11, %v19081_v28, %v19080_v0  ;;  %v3236_v54 = vmul.f32 %v12067_v10, %v11953_v43  ;;  %v2337_v55 = vsel %vm2142_vm11, %v19085_v27, %v2336_v53  ;;  %9047 = vrcp.f32 %v12086_v52 }
 0x3a6   : > { %19084 = vst [vmem:[#allocation35_spill] sm:$0xff] %v12123_v12  ;;  %v2996_v63 = vmul.f32 %v12088_v11, %v11965_v37  ;;  %v12136_v0 = vperm.slane %v2293_v17, %v11005_v51  ;;  %v12139_v46 = vperm.slane %v2337_v55, %v11005_v51  ;;  %v12142_v15 = vperm.slane %v2349_v61, %v11005_v51 }
 0x3a7   : > { %v12147_v34 = vsel %vm12009_vm3, %v11784_v60, %v3168_v31  ;;  %v12152_v26 = vsel %vm12015_vm4, %v11810_v29, %v3153_v36  ;;  %v12157_v17 = vsel %vm12021_vm5, %v11921_v2, %v2913_v24  ;;  %vm12167_vm3 = vcmp.eq.f32.partialorder %v2959_v50, 8.507059e+37  ;;  %v12171_v31 = vpop.xlane.xlu0 %2001 }
 0x3a8   : > { %19086 = vst [vmem:[#allocation47_spill] sm:$0xff] %v12136_v0  ;;  %v2958_v29 = vsel %vm12163_vm0, %v11918_v25, %v2954_v7  ;;  %v3252_v2 = vsub.f32 1.0, %v3251_v40  ;;  %v2308_v47 = vrot.slane %v12123_v12, 4  ;;  %v2364_v18 = vrot.slane %v12139_v46, 4 }
 0x3a9   : > { %19087 = vst [vmem:[#allocation36_spill] sm:$0xff] %v12139_v46  ;;  %v12183_v50 = vsel %vm12042_vm8, %v11939_v6, %v3213_v59  ;;  %v12187_v41 = vsel %vm12081_vm13, %v3202_v1, %v3198_v13  ;;  %v2962_v36 = vor.u32 1.1754944e-38, %v2961_v21  ;;  %v3237_v24 = vsub.f32 1.0, %v3236_v54 }
 0x3aa   : > { %19088 = vst [vmem:[#allocation41_spill] sm:$0xff] %v12142_v15  ;;  %v2997_v61 = vsub.f32 1.0, %v2996_v63  ;;  %v2309_v25 = vsel %vm2142_vm11, %v12136_v0, %v2308_v47  ;;  %v2365_v7 = vsel %vm2142_vm11, %v12142_v15, %v2364_v18  ;;  %9049 = vrcp.f32 %v12171_v31 }
 0x3ab   : > { %v12194_v40 = vpop.eup %9047  ;;  %v12198_v6 = vsel %vm12167_vm3, %v2962_v36, %v2958_v29  ;;  %vm3255_vm4 = vweird.f32 %v11948_v48  ;;  %v8808_v33 = vpack.i.bf16 %v2365_v7, %v2309_v25  ;;  %9051 = vrcp.f32 %v12178_v56 }
 0x3ac   : > { %v3253_v4 = vmul.f32 %v12051_v20, %v3252_v2  ;;  %v2135_v1 = vsel %vm1564_vm2, %v11144_v42, 0.0  ;;  %v19093_v21 = vrot.slane %v11757_v9, 4  ;;  %v19094_v13 = vrot.slane %v11368_v14, 4 }
 0x3ad   : > { %v3259_v55 = vand.u32 2147483647, %v11948_v48  ;;  %v3238_v63 = vmul.f32 %v12067_v10, %v3237_v24  ;;  %8809 = vrot.lane.b32.xlu2 %v8808_v33, %s9651_s27  ;;  %2136 = vadd.xlane.f32.xlu0 %v2135_v1  ;;  %vm3240_vm5 = vweird.f32 %v11953_v43  ;;  %v2998_v14 = vmul.f32 %v12088_v11, %v2997_v61  ;;  %v19096_v24 = vld [vmem:[#allocation32_spill] sm:$0xff]  ;;  %v19097_v61 = vld [vmem:[#allocation55_spill] sm:$0xff]  ;;  %v12243_v33 = vpop.xlane.xlu1 %2061 }
 0x3ae   : > { %v3746_v59 = vsel %vm2142_vm11, %v19093_v21, %v11292_v45  ;;  %v3752_v54 = vsel %vm2142_vm11, %v19094_v13, %v11273_v8  ;;  %v3261_v45 = vand.u32 2147483648, %v11948_v48  ;;  %v3296_v8 = vmul.f32 %v12194_v40, %v12086_v52 }
 0x3af   : > { %v12217_v53 = vperm.slane %v3746_v59, %v10866_v38  ;;  %v12220_v42 = vperm.slane %v3752_v54, %v10866_v38  ;;  %v3244_v9 = vand.u32 2147483647, %v11953_v43  ;;  %v3246_v60 = vand.u32 2147483648, %v11953_v43 }
 0x3b0   : > { %v19095_v29 = vrot.slane %v11416_v32, 4  ;;  %v12234_v18 = vpop.eup %9049  ;;  %vm3256_vm6 = vweird.f32 %v12051_v20  ;;  %vm3241_vm7 = vweird.f32 %v12067_v10  ;;  %v3006_v36 = vand.u32 2147483648, %v11965_v37 }
 0x3b1   : > { %v3769_v47 = vrot.slane %v12220_v42, 4  ;;  %v19098_v25 = vrot.slane %v19097_v61, 4  ;;  %v12245_v32 = vpop.eup %9051  ;;  %v3239_v1 = vadd.f32 %v12067_v10, %v3238_v63  ;;  %v2999_v13 = vadd.f32 %v12088_v11, %v2998_v14  ;;  %vm12261_vm9 = vmor %vm3255_vm4, %vm3256_vm6 }
 0x3b2   : > { %v3764_v2 = vsel %vm2142_vm11, %v19095_v29, %v11930_v22  ;;  %v3254_v22 = vadd.f32 %v12051_v20, %v3253_v4  ;;  %vm3001_vm8 = vweird.f32 %v12088_v11  ;;  %v3297_v54 = vsub.f32 1.0, %v3296_v8  ;;  %v12272_v8 = vpop.xlane.xlu2 %2058  ;;  %vm12282_vm10 = vmor %vm3240_vm5, %vm3241_vm7 }
 0x3b3   : > { %v3758_v7 = vsel %vm2142_vm11, %v19098_v25, %v19096_v24  ;;  %v12250_v21 = vperm.slane %v3764_v2, %v10866_v38  ;;  %v3770_v59 = vsel %vm2142_vm11, %v3769_v47, %v12217_v53  ;;  %v3041_v63 = vmul.f32 %v12234_v18, %v12171_v31 }
 0x3b4   : > { %v12257_v29 = vperm.slane %v3770_v59, %v11005_v51  ;;  %v12268_v2 = vperm.slane %v3758_v7, %v10866_v38  ;;  %9053 = vrcp.f32 %v12243_v33  ;;  %vm12274_vm1 = vcmp.eq.f32.partialorder %v3259_v55, 8.507059e+37  ;;  %v12304_v59 = vpop.xlane.xlu0 %2010 }
 0x3b5   : > { %v3781_v14 = vrot.slane %v12250_v21, 4  ;;  %vm3000_vm13 = vweird.f32 %v11965_v37  ;;  %v3004_v24 = vand.u32 2147483647, %v11965_v37  ;;  %v3281_v61 = vmul.f32 %v12245_v32, %v12178_v56 }
 0x3b6   : > { %19099 = vst [vmem:[#allocation50_spill] sm:$0xff] %v12257_v29  ;;  %v3258_v55 = vsel %vm12261_vm9, %v12051_v20, %v3254_v22  ;;  %v3262_v25 = vor.u32 1.1754944e-38, %v3261_v45  ;;  %v3243_v43 = vsel %vm12282_vm10, %v12067_v10, %v3239_v1  ;;  %vm12298_vm12 = vmor %vm3000_vm13, %vm3001_vm8  ;;  %v3298_v45 = vmul.f32 %v12194_v40, %v3297_v54 }
 0x3b7   : > { %v3782_v37 = vsel %vm2142_vm11, %v3781_v14, %v12268_v2  ;;  %v3003_v20 = vsel %vm12298_vm12, %v12088_v11, %v2999_v13  ;;  %v3795_v10 = vrot.slane %v12257_v29, 4  ;;  %vm3245_vm14 = vcmp.eq.f32.partialorder %v3244_v9, 8.507059e+37 }
 0x3b8   : > { %v12311_v22 = vperm.slane %v3782_v37, %v11005_v51  ;;  %v3247_v1 = vor.u32 1.1754944e-38, %v3246_v60  ;;  %v3007_v4 = vor.u32 1.1754944e-38, %v3006_v36  ;;  %v3042_v48 = vsub.f32 1.0, %v3041_v63 }
 0x3b9   : > { %v12316_v14 = vsel %vm12274_vm1, %v3262_v25, %v3258_v55  ;;  %vm3005_vm15 = vcmp.eq.f32.partialorder %v3004_v24, 8.507059e+37  ;;  %v3282_v46 = vsub.f32 1.0, %v3281_v61  ;;  %v3304_v37 = vand.u32 2147483647, %v12086_v52 }
 0x3ba   : > { %19108 = vst [vmem:[#allocation44_spill] sm:$0xff] %v12311_v22  ;;  %v3796_v11 = vsel %vm2142_vm11, %v12311_v22, %v3795_v10  ;;  %v12320_v13 = vpop.eup %9053  ;;  %v12322_v54 = vsel %vm3245_vm14, %v3247_v1, %v3243_v43  ;;  %v3008_v7 = vsel %vm3005_vm15, %v3007_v4, %v3003_v20  ;;  %9055 = vrcp.f32 %v12272_v8  ;;  %v12350_v10 = vpop.xlane.xlu2 %2067  ;;  %v19123_v22 = vld [vmem:[#allocation57_spill] sm:$0xff] }
 0x3bb   : > { %4201 = vrot.lane.b32.xlu2 %v3796_v11, %s9652_s26  ;;  %v3807_v60 = vrot.slane %v12198_v6, 4  ;;  %v3299_v36 = vadd.f32 %v12194_v40, %v3298_v45  ;;  %vm3301_vm0 = vweird.f32 %v12194_v40  ;;  %vm3300_vm3 = vweird.f32 %v12086_v52 }
 0x3bc   : > { %v3306_v47 = vand.u32 2147483648, %v12086_v52  ;;  %v3043_v24 = vmul.f32 %v12234_v18, %v3042_v48  ;;  %v3813_v55 = vrot.slane %v3008_v7, 4  ;;  %v3283_v25 = vmul.f32 %v12245_v32, %v3282_v46  ;;  %vm12339_vm4 = vmor %vm3300_vm3, %vm3301_vm0  ;;  %v12358_v48 = vpop.xlane.xlu1 %2070  ;;  %v12365_v61 = vpop.xlane.xlu0 %2019 }
 0x3bd   : > { %v3341_v6 = vmul.f32 %v12320_v13, %v12243_v33  ;;  %vm12343_vm5 = vcmp.eq.f32.partialorder %v3304_v37, 8.507059e+37  ;;  %vm3285_vm6 = vweird.f32 %v12178_v56  ;;  %v3289_v52 = vand.u32 2147483647, %v12178_v56 }
 0x3be   : > { %v3291_v45 = vand.u32 2147483648, %v12178_v56  ;;  %v3303_v46 = vsel %vm12339_vm4, %v12194_v40, %v3299_v36  ;;  %v3049_v1 = vand.u32 2147483647, %v12171_v31  ;;  %v3051_v4 = vand.u32 2147483648, %v12171_v31 }
 0x3bf   : > { %9057 = vrcp.f32 %v12304_v59  ;;  %v3307_v7 = vor.u32 1.1754944e-38, %v3306_v47  ;;  %vm3286_vm7 = vweird.f32 %v12245_v32  ;;  %v3044_v37 = vadd.f32 %v12234_v18, %v3043_v24 }
 0x3c0   : > { %v12360_v11 = vpop.eup %9055  ;;  %vm3046_vm8 = vweird.f32 %v12234_v18  ;;  %v3284_v40 = vadd.f32 %v12245_v32, %v3283_v25  ;;  %v3342_v36 = vsub.f32 1.0, %v3341_v6  ;;  %v3351_v43 = vand.u32 2147483648, %v12243_v33  ;;  %vm12394_vm12 = vmor %vm3285_vm6, %vm3286_vm7 }
 0x3c1   : > { %9059 = vrcp.f32 %v12350_v10  ;;  %v12372_v63 = vsel %vm12343_vm5, %v3307_v7, %v3303_v46  ;;  %vm12374_vm9 = vcmp.eq.f32.partialorder %v3289_v52, 8.507059e+37  ;;  %v3292_v24 = vor.u32 1.1754944e-38, %v3291_v45 }
 0x3c2   : > { %vm3045_vm1 = vweird.f32 %v12171_v31  ;;  %vm12383_vm13 = vcmp.eq.f32.partialorder %v3049_v1, 8.507059e+37  ;;  %v3052_v6 = vor.u32 1.1754944e-38, %v3051_v4  ;;  %v3326_v20 = vmul.f32 %v12360_v11, %v12272_v8 }
 0x3c3   : > { %vm12379_vm10 = vmor %vm3045_vm1, %vm3046_vm8  ;;  %9061 = vrcp.f32 %v12365_v61  ;;  %vm3345_vm14 = vweird.f32 %v12243_v33  ;;  %v3349_v45 = vand.u32 2147483647, %v12243_v33  ;;  %v3336_v46 = vand.u32 2147483648, %v12272_v8 }
 0x3c4   : > { %v3048_v52 = vsel %vm12379_vm10, %v12234_v18, %v3044_v37  ;;  %9063 = vrcp.f32 %v12358_v48  ;;  %v3288_v4 = vsel %vm12394_vm12, %v12245_v32, %v3284_v40  ;;  %v3343_v7 = vmul.f32 %v12320_v13, %v3342_v36  ;;  %v19121_v18 = vld [vmem:[#allocation56_spill] sm:$0xff]  ;;  %v12458_v25 = vpop.xlane.xlu1 %2079 }
 0x3c5   : > { %v12405_v1 = vpop.eup %9057  ;;  %v3352_v9 = vor.u32 1.1754944e-38, %v3351_v43  ;;  %v19122_v37 = vrot.slane %v19121_v18, 4  ;;  %v3808_v15 = vsel %vm2142_vm11, %v3807_v60, %v19123_v22  ;;  %v3814_v12 = vsel %vm2142_vm11, %v3813_v55, %v11601_v39 }
 0x3c6   : > { %v19124_v56 = vrot.slane %v11670_v44, 4  ;;  %v3053_v40 = vsel %vm12383_vm13, %v3052_v6, %v3048_v52  ;;  %vm3346_vm15 = vweird.f32 %v12320_v13  ;;  %v3327_v36 = vsub.f32 1.0, %v3326_v20 }
 0x3c7   : > { %v3802_v29 = vsel %vm2142_vm11, %v19122_v37, %v12157_v17  ;;  %v12424_v32 = vpop.eup %9059  ;;  %v12430_v17 = vperm.slane %v3808_v15, %v10866_v38  ;;  %v12434_v22 = vsel %vm12374_vm9, %v3292_v24, %v3288_v4  ;;  %vm12436_vm0 = vcmp.eq.f32.partialorder %v3349_v45, 8.507059e+37  ;;  %vm12488_vm5 = vmor %vm3345_vm14, %vm3346_vm15 }
 0x3c8   : > { %v3820_v31 = vsel %vm2142_vm11, %v19124_v56, %v11562_v62  ;;  %v3334_v62 = vand.u32 2147483647, %v12272_v8  ;;  %v12441_v44 = vor.u32 1.1754944e-38, %v3336_v46  ;;  %v3086_v60 = vmul.f32 %v12405_v1, %v12304_v59 }
 0x3c9   : > { %19125 = vst [vmem:[#allocation42_spill] sm:$0xff] %v12430_v17  ;;  %v12445_v55 = vpop.eup %9061  ;;  %vm3330_vm3 = vweird.f32 %v12272_v8  ;;  %v12449_v15 = vperm.slane %v3802_v29, %v10866_v38  ;;  %v12452_v43 = vperm.slane %v3814_v12, %v10866_v38  ;;  %v12455_v47 = vperm.slane %v3820_v31, %v10866_v38  ;;  %v12482_v31 = vpop.xlane.xlu2 %2076 }
 0x3ca   : > { %v3825_v24 = vrot.slane %v12430_v17, 4  ;;  %v12460_v6 = vpop.eup %9063  ;;  %v19131_v20 = vrot.slane %v11715_v19, 4  ;;  %v3344_v29 = vadd.f32 %v12320_v13, %v3343_v7  ;;  %v3094_v45 = vand.u32 2147483647, %v12304_v59 }
 0x3cb   : > { %19128 = vst [vmem:[#allocation49_spill] sm:$0xff] %v12449_v15  ;;  %v3371_v12 = vmul.f32 %v12424_v32, %v12350_v10  ;;  %v3328_v46 = vmul.f32 %v12360_v11, %v3327_v36  ;;  %v3096_v56 = vand.u32 2147483648, %v12304_v59  ;;  %v3837_v18 = vrot.slane %v12455_v47, 4 }
 0x3cc   : > { %19129 = vst [vmem:[#allocation32_spill] sm:$0xff] %v12452_v43  ;;  %v12465_v52 = vsel %vm2142_vm11, %v19131_v20, %v3053_v40  ;;  %v3826_v4 = vsel %vm2142_vm11, %v3825_v24, %v12449_v15  ;;  %vm3331_vm4 = vweird.f32 %v12360_v11  ;;  %v3087_v19 = vsub.f32 1.0, %v3086_v60 }
 0x3cd   : > { %19130 = vst [vmem:[#allocation55_spill] sm:$0xff] %v12455_v47  ;;  %v3131_v7 = vmul.f32 %v12445_v55, %v12365_v61  ;;  %v12480_v37 = vperm.slane %v3826_v4, %v11005_v51  ;;  %v3386_v36 = vmul.f32 %v12460_v6, %v12358_v48  ;;  %v3396_v60 = vand.u32 2147483648, %v12358_v48  ;;  %vm12534_vm1 = vmor %vm3330_vm3, %vm3331_vm4 }
 0x3ce   : > { %v3838_v24 = vsel %vm2142_vm11, %v3837_v18, %v12452_v43  ;;  %9065 = vrcp.f32 %v12458_v25  ;;  %v3348_v20 = vsel %vm12488_vm5, %v12320_v13, %v3344_v29  ;;  %vm3090_vm6 = vweird.f32 %v12304_v59 }
 0x3cf   : > { %19132 = vst [vmem:[#allocation56_spill] sm:$0xff] %v12480_v37  ;;  %v3372_v33 = vsub.f32 1.0, %v3371_v12  ;;  %v12503_v4 = vperm.slane %v3838_v24, %v11005_v51  ;;  %v3851_v0 = vrot.slane %v12480_v37, 4  ;;  %v3329_v17 = vadd.f32 %v12360_v11, %v3328_v46 }
 0x3d0   : > { %v12507_v47 = vor.u32 1.1754944e-38, %v3096_v56  ;;  %v3394_v18 = vand.u32 2147483647, %v12358_v48  ;;  %9067 = vrcp.f32 %v12482_v31  ;;  %v3088_v43 = vmul.f32 %v12405_v1, %v3087_v19  ;;  %v12524_v56 = vpop.f32.mrf.mxu0 }
 0x3d1   : > { %19135 = vst [vmem:[#allocation57_spill] sm:$0xff] %v12503_v4  ;;  %v3379_v13 = vand.u32 2147483647, %v12350_v10  ;;  %v3132_v29 = vsub.f32 1.0, %v3131_v7  ;;  %v3852_v12 = vsel %vm2142_vm11, %v12503_v4, %v3851_v0  ;;  %v12517_v40 = vsel %vm12436_vm0, %v3352_v9, %v3348_v20  ;;  %v12542_v7 = vpop.xlane.xlu0 %2028 }
 0x3d2   : > { %vm12519_vm7 = vcmp.eq.f32.partialorder %v3334_v62, 8.507059e+37  ;;  %vm3091_vm8 = vweird.f32 %v12405_v1  ;;  %v3387_v24 = vsub.f32 1.0, %v3386_v36  ;;  %v12526_v19 = vor.u32 1.1754944e-38, %v3396_v60  ;;  %4203 = vrot.lane.b32.xlu1 %v3852_v12, %s9652_s26  ;;  %v12557_v12 = vpop.xlane.xlu1 %2088 }
 0x3d3   : > { %vm3375_vm9 = vweird.f32 %v12350_v10  ;;  %v3373_v9 = vmul.f32 %v12424_v32, %v3372_v33  ;;  %v3381_v39 = vand.u32 2147483648, %v12350_v10  ;;  %vm3135_vm10 = vweird.f32 %v12365_v61  ;;  %vm12583_vm3 = vmor %vm3090_vm6, %vm3091_vm8 }
 0x3d4   : > { %v3139_v62 = vand.u32 2147483647, %v12365_v61  ;;  %v12544_v36 = vpop.eup %9065  ;;  %v3333_v8 = vsel %vm12534_vm1, %v12360_v11, %v3329_v17  ;;  %vm12549_vm13 = vcmp.eq.f32.partialorder %v3094_v45, 8.507059e+37  ;;  %vm3390_vm12 = vweird.f32 %v12358_v48 }
 0x3d5   : > { %vm3391_vm14 = vweird.f32 %v12460_v6  ;;  %v3141_v20 = vand.u32 2147483648, %v12365_v61  ;;  %v2278_v33 = vrot.slane %v19065_v5, 4  ;;  %v3089_v37 = vadd.f32 %v12405_v1, %v3088_v43  ;;  %v19165_v61 = vld [vmem:[#allocation37_spill] sm:$0xff] }
 0x3d6   : > { %v3133_v4 = vmul.f32 %v12445_v55, %v3132_v29  ;;  %v2290_v11 = vrot.slane %v12035_v58, 4  ;;  %v2334_v17 = vrot.slane %v19085_v27, 4  ;;  %v12563_v45 = vpop.eup %9067  ;;  %v3388_v0 = vmul.f32 %v12460_v6, %v3387_v24  ;;  %v12668_v27 = vpop.xlane.xlu2 %2085 }
 0x3d7   : > { %vm12566_vm15 = vcmp.eq.f32.partialorder %v3379_v13, 8.507059e+37  ;;  %9069 = vrcp.f32 %v12542_v7  ;;  %v2279_v5 = vsel %vm2142_vm11, %v2278_v33, %v19063_v3  ;;  %v2346_v43 = vrot.slane %v19081_v28, 4 }
 0x3d8   : > { %v3374_v29 = vadd.f32 %v12424_v32, %v3373_v9  ;;  %vm3376_vm0 = vweird.f32 %v12424_v32  ;;  %v3431_v58 = vmul.f32 %v12544_v36, %v12458_v25  ;;  %9071 = vrcp.f32 %v12557_v12 }
 0x3d9   : > { %vm12587_vm4 = vcmp.eq.f32.partialorder %v3394_v18, 8.507059e+37  ;;  %v12592_v28 = vperm.slane %v2279_v5, %v11005_v51  ;;  %v2291_v13 = vsel %vm2142_vm11, %v2290_v11, %v19070_v23  ;;  %v2335_v24 = vsel %vm2142_vm11, %v2334_v17, %v19078_v49  ;;  %vm12626_vm6 = vmor %vm3375_vm9, %vm3376_vm0 }
 0x3da   : > { %v2347_v59 = vsel %vm2142_vm11, %v2346_v43, %v19079_v35  ;;  %v3093_v9 = vsel %vm12583_vm3, %v12405_v1, %v3089_v37  ;;  %v3134_v18 = vadd.f32 %v12445_v55, %v3133_v4  ;;  %vm3136_vm5 = vweird.f32 %v12445_v55  ;;  %vm12660_vm9 = vmor %vm3390_vm12, %vm3391_vm14 }
 0x3db   : > { %19148 = vst [vmem:[#allocation74_spill] sm:$0xff] %v12592_v28  ;;  %v3416_v33 = vmul.f32 %v12563_v45, %v12482_v31  ;;  %v3389_v5 = vadd.f32 %v12460_v6, %v3388_v0  ;;  %v12609_v23 = vperm.slane %v2291_v13, %v11005_v51  ;;  %v12612_v49 = vperm.slane %v2335_v24, %v11005_v51  ;;  %v12678_v24 = vpop.xlane.xlu0 %2037 }
 0x3dc   : > { %v12615_v35 = vperm.slane %v2347_v59, %v11005_v51  ;;  %v12620_v1 = vsel %vm12519_vm7, %v12441_v44, %v3333_v8  ;;  %v3382_v4 = vor.u32 1.1754944e-38, %v3381_v39  ;;  %vm12630_vm8 = vcmp.eq.f32.partialorder %v3139_v62, 8.507059e+37  ;;  %vm12641_vm7 = vmor %vm3135_vm10, %vm3136_vm5  ;;  %v12645_v8 = vpop.f32.mrf.mxu0 }
 0x3dd   : > { %19149 = vst [vmem:[#allocation75_spill] sm:$0xff] %v12609_v23  ;;  %v3432_v17 = vsub.f32 1.0, %v3431_v58  ;;  %v12634_v0 = vpop.eup %9069  ;;  %v3378_v44 = vsel %vm12626_vm6, %v12424_v32, %v3374_v29  ;;  %v3142_v46 = vor.u32 1.1754944e-38, %v3141_v20  ;;  %v2304_v39 = vrot.slane %v12592_v28, 4 }
 0x3de   : > { %19150 = vst [vmem:[#allocation76_spill] sm:$0xff] %v12612_v49  ;;  %v2360_v62 = vrot.slane %v12612_v49, 4  ;;  %v12649_v43 = vpop.eup %9071  ;;  %v12654_v58 = vsel %vm12549_vm13, %v12507_v47, %v3093_v9  ;;  %v3138_v32 = vsel %vm12641_vm7, %v12445_v55, %v3134_v18  ;;  %v3439_v20 = vand.u32 2147483647, %v12458_v25 }
 0x3df   : > { %19151 = vst [vmem:[#allocation77_spill] sm:$0xff] %v12615_v35  ;;  %v3417_v29 = vsub.f32 1.0, %v3416_v33  ;;  %v3393_v47 = vsel %vm12660_vm9, %v12460_v6, %v3389_v5  ;;  %v3441_v60 = vand.u32 2147483648, %v12458_v25  ;;  %v2305_v48 = vsel %vm2142_vm11, %v12609_v23, %v2304_v39  ;;  %v19164_v39 = vld [vmem:[#allocation40_spill] sm:$0xff] }
 0x3e0   : > { %v2361_v13 = vsel %vm2142_vm11, %v12615_v35, %v2360_v62  ;;  %v12682_v55 = vsel %vm12566_vm15, %v3382_v4, %v3378_v44  ;;  %v3433_v59 = vmul.f32 %v12544_v36, %v3432_v17  ;;  %vm3435_vm1 = vweird.f32 %v12458_v25  ;;  %v12748_v35 = vpop.xlane.xlu1 %2097 }
 0x3e1   : > { %v8788_v9 = vpack.i.bf16 %v2361_v13, %v2305_v48  ;;  %v12688_v6 = vsel %vm12630_vm8, %v3142_v46, %v3138_v32  ;;  %v3424_v18 = vand.u32 2147483647, %v12482_v31  ;;  %v3176_v33 = vmul.f32 %v12634_v0, %v12542_v7 }
 0x3e2   : > { %9073 = vrcp.f32 %v12668_v27  ;;  %v12697_v15 = vsel %vm12587_vm4, %v12526_v19, %v3393_v47  ;;  %v3418_v5 = vmul.f32 %v12563_v45, %v3417_v29  ;;  %v3476_v37 = vmul.f32 %v12649_v43, %v12557_v12 }
 0x3e3   : > { %8789 = vrot.lane.b32.xlu0 %v8788_v9, %s9651_s27  ;;  %9075 = vrcp.f32 %v12678_v24  ;;  %vm3436_vm10 = vweird.f32 %v12544_v36  ;;  %vm12706_vm13 = vcmp.eq.f32.partialorder %v3439_v20, 8.507059e+37  ;;  %v3442_v3 = vor.u32 1.1754944e-38, %v3441_v60 }
 0x3e4   : > { %v3434_v17 = vadd.f32 %v12544_v36, %v3433_v59  ;;  %vm3420_vm12 = vweird.f32 %v12482_v31  ;;  %v3426_v44 = vand.u32 2147483648, %v12482_v31  ;;  %vm12714_vm14 = vcmp.eq.f32.partialorder %v3424_v18, 8.507059e+37  ;;  %vm12729_vm0 = vmor %vm3435_vm1, %vm3436_vm10  ;;  %v12733_v13 = vpop.f32.mrf.mxu0  ;;  %v19168_v59 = vld [vmem:[#allocation31_spill] sm:$0xff]  ;;  %v19169_v18 = vld [vmem:[#allocation29_spill] sm:$0xff] }
 0x3e5   : > { %v3177_v46 = vsub.f32 1.0, %v3176_v33  ;;  %v2168_v62 = vrot.slane %v19164_v39, 4  ;;  %v2180_v32 = vrot.slane %v19165_v61, 4  ;;  %v3419_v20 = vadd.f32 %v12563_v45, %v3418_v5  ;;  %v19170_v5 = vld [vmem:[#allocation30_spill] sm:$0xff]  ;;  %v19171_v39 = vld [vmem:[#allocation27_spill] sm:$0xff] }
 0x3e6   : > { %vm3421_vm15 = vweird.f32 %v12563_v45  ;;  %v3184_v29 = vand.u32 2147483647, %v12542_v7  ;;  %v3477_v47 = vsub.f32 1.0, %v3476_v37  ;;  %v2224_v37 = vrot.slane %v19170_v5, 4  ;;  %v19174_v5 = vld [vmem:[#allocation38_spill] sm:$0xff] }
 0x3e7   : > { %v2169_v9 = vsel %vm2142_vm11, %v19168_v59, %v2168_v62  ;;  %v2181_v33 = vsel %vm2142_vm11, %v19169_v18, %v2180_v32  ;;  %v2236_v61 = vrot.slane %v19171_v39, 4  ;;  %v3438_v25 = vsel %vm12729_vm0, %v12544_v36, %v3434_v17  ;;  %v19173_v59 = vld [vmem:[#allocation39_spill] sm:$0xff]  ;;  %vm12762_vm4 = vmor %vm3420_vm12, %vm3421_vm15 }
 0x3e8   : > { %v12723_v60 = vpop.eup %9073  ;;  %v3427_v19 = vor.u32 1.1754944e-38, %v3426_v44  ;;  %vm3180_vm3 = vweird.f32 %v12542_v7  ;;  %v3186_v49 = vand.u32 2147483648, %v12542_v7  ;;  %v3178_v62 = vmul.f32 %v12634_v0, %v3177_v46 }
 0x3e9   : > { %v12741_v4 = vpop.eup %9075  ;;  %v12752_v32 = vperm.slane %v2169_v9, %v11005_v51  ;;  %v2225_v18 = vsel %vm2142_vm11, %v19173_v59, %v2224_v37  ;;  %v2237_v39 = vsel %vm2142_vm11, %v19174_v5, %v2236_v61  ;;  %v3478_v17 = vmul.f32 %v12649_v43, %v3477_v47  ;;  %v12776_v9 = vpop.xlane.xlu0 %2046 }
 0x3ea   : > { %v12768_v44 = vperm.slane %v2181_v33, %v11005_v51  ;;  %v12771_v46 = vperm.slane %v2225_v18, %v11005_v51  ;;  %v12774_v48 = vperm.slane %v2237_v39, %v11005_v51  ;;  %v3423_v31 = vsel %vm12762_vm4, %v12563_v45, %v3419_v20 }
 0x3eb   : > { %19172 = vst [vmem:[#allocation40_spill] sm:$0xff] %v12752_v32  ;;  %vm12781_vm5 = vcmp.eq.f32.partialorder %v3184_v29, 8.507059e+37  ;;  %v3461_v47 = vmul.f32 %v12723_v60, %v12668_v27  ;;  %v3221_v33 = vmul.f32 %v12741_v4, %v12678_v24  ;;  %9077 = vrcp.f32 %v12748_v35  ;;  %v12797_v29 = vpop.xlane.xlu2 %2094 }
 0x3ec   : > { %19177 = vst [vmem:[#allocation37_spill] sm:$0xff] %v12768_v44  ;;  %v12792_v61 = vsel %vm12706_vm13, %v3442_v3, %v3438_v25  ;;  %vm3181_vm6 = vweird.f32 %v12634_v0  ;;  %v2196_v45 = vrot.slane %v12752_v32, 4  ;;  %v2252_v20 = vrot.slane %v12771_v46, 4 }
 0x3ed   : > { %19178 = vst [vmem:[#allocation31_spill] sm:$0xff] %v12771_v46  ;;  %v3179_v59 = vadd.f32 %v12634_v0, %v3178_v62  ;;  %vm3481_vm8 = vweird.f32 %v12649_v43  ;;  %v3484_v18 = vand.u32 2147483647, %v12557_v12  ;;  %v3486_v5 = vand.u32 2147483648, %v12557_v12  ;;  %vm12818_vm7 = vmor %vm3180_vm3, %vm3181_vm6 }
 0x3ee   : > { %19179 = vst [vmem:[#allocation29_spill] sm:$0xff] %v12774_v48  ;;  %v12805_v11 = vsel %vm12714_vm14, %v3427_v19, %v3423_v31  ;;  %v3479_v3 = vadd.f32 %v12649_v43, %v3478_v17  ;;  %v2197_v25 = vsel %vm2142_vm11, %v12768_v44, %v2196_v45  ;;  %v2253_v39 = vsel %vm2142_vm11, %v12774_v48, %v2252_v20 }
 0x3ef   : > { %v3462_v36 = vsub.f32 1.0, %v3461_v47  ;;  %v3222_v62 = vsub.f32 1.0, %v3221_v33  ;;  %v8803_v46 = vpack.i.bf16 %v2253_v39, %v2197_v25  ;;  %9079 = vrcp.f32 %v12797_v29 }
 0x3f0   : > { %v3187_v10 = vor.u32 1.1754944e-38, %v3186_v49  ;;  %vm3480_vm9 = vweird.f32 %v12557_v12  ;;  %9081 = vrcp.f32 %v12776_v9  ;;  %v3183_v31 = vsel %vm12818_vm7, %v12634_v0, %v3179_v59  ;;  %v12836_v12 = vpop.f32.mrf.mxu0  ;;  %v19189_v49 = vld [vmem:[#allocation53_spill] sm:$0xff] }
 0x3f1   : > { %v12824_v17 = vpop.eup %9077  ;;  %vm12829_vm1 = vcmp.eq.f32.partialorder %v3484_v18, 8.507059e+37  ;;  %v3487_v7 = vor.u32 1.1754944e-38, %v3486_v5  ;;  %vm3465_vm10 = vweird.f32 %v12668_v27  ;;  %v3469_v33 = vand.u32 2147483647, %v12668_v27  ;;  %8804 = vrot.lane.b32.xlu0 %v8803_v46, %s9651_s27  ;;  %vm12841_vm13 = vmor %vm3480_vm9, %vm3481_vm8 }
 0x3f2   : > { %v3471_v0 = vand.u32 2147483648, %v12668_v27  ;;  %v2504_v20 = vrot.slane %v11276_v16, 4  ;;  %v2516_v59 = vrot.slane %v11486_v57, 4  ;;  %v3483_v46 = vsel %vm12841_vm13, %v12649_v43, %v3479_v3  ;;  %v19188_v16 = vld [vmem:[#allocation54_spill] sm:$0xff]  ;;  %v12864_v43 = vpop.xlane.xlu0 %2055 }
 0x3f3   : > { %v3463_v18 = vmul.f32 %v12723_v60, %v3462_v36  ;;  %v3223_v5 = vmul.f32 %v12741_v4, %v3222_v62  ;;  %v2560_v25 = vrot.slane %v11163_v30, 4  ;;  %v12856_v39 = vsel %vm12781_vm5, %v3187_v10, %v3183_v31  ;;  %v19193_v10 = vld [vmem:[#allocation58_spill] sm:$0xff] }
 0x3f4   : > { %v3521_v19 = vmul.f32 %v12824_v17, %v12748_v35  ;;  %v2505_v57 = vsel %vm2142_vm11, %v19188_v16, %v2504_v20  ;;  %v2517_v45 = vsel %vm2142_vm11, %v19189_v49, %v2516_v59  ;;  %vm12868_vm12 = vcmp.eq.f32.partialorder %v3469_v33, 8.507059e+37  ;;  %v12879_v20 = vpop.xlane.xlu1 %2106  ;;  %v19195_v16 = vld [vmem:[#allocation63_spill] sm:$0xff] }
 0x3f5   : > { %v12866_v3 = vpop.eup %9079  ;;  %v3229_v30 = vand.u32 2147483647, %v12678_v24  ;;  %v3231_v37 = vand.u32 2147483648, %v12678_v24  ;;  %v12875_v62 = vperm.slane %v2505_v57, %v11005_v51  ;;  %v2561_v31 = vsel %vm2142_vm11, %v19193_v10, %v2560_v25 }
 0x3f6   : > { %v12881_v49 = vpop.eup %9081  ;;  %v12885_v33 = vsel %vm12829_vm1, %v3487_v7, %v3483_v46  ;;  %vm3466_vm14 = vweird.f32 %v12723_v60  ;;  %v12889_v59 = vperm.slane %v2561_v31, %v11005_v51  ;;  %v2572_v32 = vrot.slane %v19195_v16, 4  ;;  %v19197_v7 = vld [vmem:[#allocation60_spill] sm:$0xff] }
 0x3f7   : > { %19192 = vst [vmem:[#allocation30_spill] sm:$0xff] %v12875_v62  ;;  %v3464_v57 = vadd.f32 %v12723_v60, %v3463_v18  ;;  %v3224_v48 = vadd.f32 %v12741_v4, %v3223_v5  ;;  %vm3226_vm15 = vweird.f32 %v12741_v4  ;;  %v12896_v25 = vperm.slane %v2517_v45, %v11005_v51  ;;  %vm12915_vm0 = vmor %vm3465_vm10, %vm3466_vm14 }
 0x3f8   : > { %19194 = vst [vmem:[#allocation27_spill] sm:$0xff] %v12889_v59  ;;  %v3522_v10 = vsub.f32 1.0, %v3521_v19  ;;  %v3506_v47 = vmul.f32 %v12866_v3, %v12797_v29  ;;  %v2573_v46 = vsel %vm2142_vm11, %v19197_v7, %v2572_v32  ;;  %9083 = vrcp.f32 %v12879_v20  ;;  %v12931_v44 = vpop.f32.mrf.mxu0 }
 0x3f9   : > { %19196 = vst [vmem:[#allocation39_spill] sm:$0xff] %v12896_v25  ;;  %v3266_v31 = vmul.f32 %v12881_v49, %v12776_v9  ;;  %v2532_v18 = vrot.slane %v12875_v62, 4  ;;  %v12907_v5 = vperm.slane %v2573_v46, %v11005_v51  ;;  %v2588_v45 = vrot.slane %v12889_v59, 4  ;;  %v12921_v62 = vpop.xlane.xlu2 %2103 }
 0x3fa   : > { %v3472_v16 = vor.u32 1.1754944e-38, %v3471_v0  ;;  %vm3225_vm3 = vweird.f32 %v12678_v24  ;;  %v3531_v7 = vand.u32 2147483648, %v12748_v35  ;;  %v3468_v46 = vsel %vm12915_vm0, %v12723_v60, %v3464_v57 }
 0x3fb   : > { %19198 = vst [vmem:[#allocation38_spill] sm:$0xff] %v12907_v5  ;;  %v3529_v19 = vand.u32 2147483647, %v12748_v35  ;;  %v2533_v27 = vsel %vm2142_vm11, %v12896_v25, %v2532_v18  ;;  %v2589_v59 = vsel %vm2142_vm11, %v12907_v5, %v2588_v45  ;;  %vm12936_vm4 = vmor %vm3225_vm3, %vm3226_vm15  ;;  %vm12940_vm5 = vcmp.eq.f32.partialorder %v3229_v30, 8.507059e+37 }
 0x3fc   : > { %v3232_v57 = vor.u32 1.1754944e-38, %v3231_v37  ;;  %v8818_v32 = vpack.i.bf16 %v2589_v59, %v2533_v27  ;;  %v3228_v18 = vsel %vm12936_vm4, %v12741_v4, %v3224_v48  ;;  %v3523_v45 = vmul.f32 %v12824_v17, %v3522_v10  ;;  %v12957_v37 = vpop.xlane.xlu0 %2064  ;;  %v19207_v10 = vld [vmem:[#allocation59_spill] sm:$0xff]  ;;  %v12985_v60 = vpop.xlane.xlu1 %2115 }
 0x3fd   : > { %v3507_v5 = vsub.f32 1.0, %v3506_v47  ;;  %v3267_v24 = vsub.f32 1.0, %v3266_v31  ;;  %v12952_v28 = vsel %vm12868_vm12, %v3472_v16, %v3468_v46  ;;  %vm3525_vm6 = vweird.f32 %v12748_v35  ;;  %v19208_v47 = vld [vmem:[#allocation61_spill] sm:$0xff] }
 0x3fe   : > { %v12948_v25 = vpop.eup %9083  ;;  %v3532_v30 = vor.u32 1.1754944e-38, %v3531_v7  ;;  %8819 = vrot.lane.b32.xlu0 %v8818_v32, %s9651_s27  ;;  %9085 = vrcp.f32 %v12921_v62  ;;  %vm3526_vm8 = vweird.f32 %v12824_v17  ;;  %vm12960_vm7 = vcmp.eq.f32.partialorder %v3529_v19, 8.507059e+37  ;;  %v19212_v32 = vld [vmem:[#allocation65_spill] sm:$0xff] }
 0x3ff   : > { %vm3510_vm9 = vweird.f32 %v12797_v29  ;;  %v3514_v48 = vand.u32 2147483647, %v12797_v29  ;;  %v3516_v36 = vand.u32 2147483648, %v12797_v29  ;;  %v12969_v59 = vsel %vm12940_vm5, %v3232_v57, %v3228_v18  ;;  %vm13015_vm13 = vmor %vm3525_vm6, %vm3526_vm8 }
 0x400   : > { %vm3270_vm1 = vweird.f32 %v12776_v9  ;;  %v19209_v31 = vrot.slane %v19208_v47, 4  ;;  %v12978_v16 = vperm.slane %v12465_v52, %v10866_v38  ;;  %v3524_v7 = vadd.f32 %v12824_v17, %v3523_v45  ;;  %v19216_v47 = vld [vmem:[#allocation62_spill] sm:$0xff] }
 0x401   : > { %v3508_v46 = vmul.f32 %v12866_v3, %v3507_v5  ;;  %v3268_v27 = vmul.f32 %v12881_v49, %v3267_v24  ;;  %v3566_v0 = vmul.f32 %v12948_v25, %v12879_v20  ;;  %9087 = vrcp.f32 %v12864_v43 }
 0x402   : > { %v3858_v19 = vsel %vm2142_vm11, %v19209_v31, %v19207_v10  ;;  %19210 = vst [vmem:[#allocation54_spill] sm:$0xff] %v12978_v16  ;;  %v19213_v52 = vrot.slane %v12688_v6, 4  ;;  %v3881_v45 = vrot.slane %v12978_v16, 4  ;;  %vm12996_vm10 = vcmp.eq.f32.partialorder %v3514_v48, 8.507059e+37 }
 0x403   : > { %v12989_v57 = vperm.slane %v3858_v19, %v10866_v38  ;;  %v3274_v24 = vand.u32 2147483647, %v12776_v9  ;;  %v3276_v10 = vand.u32 2147483648, %v12776_v9  ;;  %v19217_v31 = vrot.slane %v19216_v47, 4 }
 0x404   : > { %v3876_v18 = vsel %vm2142_vm11, %v19213_v52, %v19212_v32  ;;  %v13009_v6 = vpop.eup %9085  ;;  %vm3511_vm12 = vweird.f32 %v12866_v3  ;;  %v3517_v32 = vor.u32 1.1754944e-38, %v3516_v36  ;;  %9089 = vrcp.f32 %v12985_v60 }
 0x405   : > { %19211 = vst [vmem:[#allocation53_spill] sm:$0xff] %v12989_v57  ;;  %v3870_v19 = vsel %vm2142_vm11, %v19217_v31, %v12654_v58  ;;  %v13007_v23 = vperm.slane %v3876_v18, %v10866_v38  ;;  %v3882_v52 = vsel %vm2142_vm11, %v3881_v45, %v12989_v57  ;;  %v13023_v58 = vpop.xlane.xlu2 %2112  ;;  %v3528_v18 = vsel %vm13015_vm13, %v12824_v17, %v3524_v7  ;;  %v13031_v31 = vpop.f32.mrf.mxu0  ;;  %vm13057_vm0 = vmor %vm3510_vm9, %vm3511_vm12 }
 0x406   : > { %v3509_v35 = vadd.f32 %v12866_v3, %v3508_v46  ;;  %v3269_v47 = vadd.f32 %v12881_v49, %v3268_v27  ;;  %vm3271_vm14 = vweird.f32 %v12881_v49  ;;  %v3567_v36 = vsub.f32 1.0, %v3566_v0 }
 0x407   : > { %19218 = vst [vmem:[#allocation58_spill] sm:$0xff] %v13007_v23  ;;  %v13034_v16 = vperm.slane %v3870_v19, %v10866_v38  ;;  %v13037_v45 = vperm.slane %v3882_v52, %v11005_v51  ;;  %v3893_v57 = vrot.slane %v13007_v23, 4  ;;  %vm13040_vm15 = vcmp.eq.f32.partialorder %v3274_v24, 8.507059e+37  ;;  %v13047_v46 = vpop.eup %9087  ;;  %v13065_v52 = vpop.xlane.xlu0 %2073  ;;  %vm13074_vm3 = vmor %vm3270_vm1, %vm3271_vm14 }
 0x408   : > { %v3277_v17 = vor.u32 1.1754944e-38, %v3276_v10  ;;  %v3551_v7 = vmul.f32 %v13009_v6, %v12921_v62  ;;  %9091 = vrcp.f32 %v13023_v58  ;;  %v13051_v27 = vsel %vm12960_vm7, %v3532_v30, %v3528_v18 }
 0x409   : > { %19221 = vst [vmem:[#allocation63_spill] sm:$0xff] %v13034_v16  ;;  %v3574_v24 = vand.u32 2147483647, %v12879_v20  ;;  %v3576_v10 = vand.u32 2147483648, %v12879_v20  ;;  %v3894_v19 = vsel %vm2142_vm11, %v3893_v57, %v13034_v16  ;;  %v3513_v30 = vsel %vm13057_vm0, %v12866_v3, %v3509_v35 }
 0x40a   : > { %19222 = vst [vmem:[#allocation60_spill] sm:$0xff] %v13037_v45  ;;  %v3561_v4 = vand.u32 2147483648, %v12921_v62  ;;  %v13080_v18 = vperm.slane %v3894_v19, %v11005_v51  ;;  %v3907_v57 = vrot.slane %v13037_v45, 4  ;;  %v13083_v23 = vpop.eup %9089  ;;  %v3273_v3 = vsel %vm13074_vm3, %v12881_v49, %v3269_v47 }
 0x40b   : > { %19225 = vst [vmem:[#allocation59_spill] sm:$0xff] %v13051_v27  ;;  %v3568_v35 = vmul.f32 %v12948_v25, %v3567_v36  ;;  %vm3570_vm4 = vweird.f32 %v12879_v20  ;;  %9093 = vrcp.f32 %v12957_v37  ;;  %v3552_v9 = vsub.f32 1.0, %v3551_v7 }
 0x40c   : > { %19230 = vst [vmem:[#allocation61_spill] sm:$0xff] %v13080_v18  ;;  %v3311_v0 = vmul.f32 %v13047_v46, %v12864_v43  ;;  %v3321_v19 = vand.u32 2147483648, %v12864_v43  ;;  %v3908_v45 = vsel %vm2142_vm11, %v13080_v18, %v3907_v57  ;;  %v13098_v16 = vsel %vm12996_vm10, %v3517_v32, %v3513_v30 }
 0x40d   : > { %19231 = vst [vmem:[#allocation65_spill] sm:$0xff] %v13098_v16  ;;  %vm13100_vm5 = vcmp.eq.f32.partialorder %v3574_v24, 8.507059e+37  ;;  %v3577_v47 = vor.u32 1.1754944e-38, %v3576_v10  ;;  %4205 = vrot.lane.b32.xlu0 %v3908_v45, %s9652_s26  ;;  %v3611_v36 = vmul.f32 %v13083_v23, %v12985_v60  ;;  %vm3571_vm6 = vweird.f32 %v12948_v25  ;;  %v13130_v48 = vpop.f32.mrf.mxu0 }
 0x40e   : > { %v13107_v7 = vpop.eup %9091  ;;  %vm3555_vm8 = vweird.f32 %v12921_v62  ;;  %v3559_v5 = vand.u32 2147483647, %v12921_v62  ;;  %v13112_v32 = vor.u32 1.1754944e-38, %v3561_v4  ;;  %v3319_v24 = vand.u32 2147483647, %v12864_v43  ;;  %vm13149_vm9 = vmor %vm3570_vm4, %vm3571_vm6 }
 0x40f   : > { %v13117_v10 = vsel %vm13040_vm15, %v3277_v17, %v3273_v3  ;;  %v3569_v45 = vadd.f32 %v12948_v25, %v3568_v35  ;;  %v3596_v30 = vmul.f32 %v13107_v7, %v13023_v58  ;;  %v19234_v29 = vrot.slane %v12856_v39, 4  ;;  %v13132_v17 = vpop.xlane.xlu1 %2124 }
 0x410   : > { %v3553_v18 = vmul.f32 %v13009_v6, %v3552_v9  ;;  %vm3556_vm7 = vweird.f32 %v13009_v6  ;;  %v3312_v4 = vsub.f32 1.0, %v3311_v0  ;;  %v13128_v27 = vor.u32 1.1754944e-38, %v3321_v19  ;;  %v13183_v19 = vpop.xlane.xlu2 %2121 }
 0x411   : > { %v3914_v57 = vsel %vm2142_vm11, %v19234_v29, %v12152_v26  ;;  %v13134_v3 = vpop.eup %9093  ;;  %v3612_v35 = vsub.f32 1.0, %v3611_v36  ;;  %v3619_v16 = vand.u32 2147483647, %v12985_v60  ;;  %v19235_v39 = vrot.slane %v12187_v41, 4  ;;  %v13166_v36 = vpop.xlane.xlu0 %2082  ;;  %vm13202_vm14 = vmor %vm3555_vm8, %vm3556_vm7 }
 0x412   : > { %v19236_v9 = vrot.slane %v12316_v14, 4  ;;  %vm3315_vm1 = vweird.f32 %v12864_v43  ;;  %v3356_v41 = vmul.f32 %v13134_v3, %v12957_v37  ;;  %v3573_v29 = vsel %vm13149_vm9, %v12948_v25, %v3569_v45 }
 0x413   : > { %v3920_v26 = vsel %vm2142_vm11, %v19235_v39, %v12147_v34  ;;  %v13157_v34 = vperm.slane %v3914_v57, %v10866_v38  ;;  %vm13171_vm10 = vcmp.eq.f32.partialorder %v3559_v5, 8.507059e+37  ;;  %v3597_v57 = vsub.f32 1.0, %v3596_v30 }
 0x414   : > { %v3932_v0 = vsel %vm2142_vm11, %v19236_v9, %v12969_v59  ;;  %v13160_v14 = vperm.slane %v3920_v26, %v10866_v38  ;;  %v19241_v59 = vrot.slane %v12322_v54, 4  ;;  %9095 = vrcp.f32 %v13132_v17 }
 0x415   : > { %19239 = vst [vmem:[#allocation62_spill] sm:$0xff] %v13157_v34  ;;  %v13176_v9 = vperm.slane %v3932_v0, %v10866_v38  ;;  %v3554_v54 = vadd.f32 %v13009_v6, %v3553_v18  ;;  %vm3615_vm13 = vweird.f32 %v12985_v60  ;;  %v3613_v25 = vmul.f32 %v13083_v23, %v3612_v35  ;;  %v13239_v35 = vpop.f32.mrf.mxu0 }
 0x416   : > { %19240 = vst [vmem:[#allocation78_spill] sm:$0xff] %v13160_v14  ;;  %v3926_v20 = vsel %vm2142_vm11, %v19241_v59, %v12183_v50  ;;  %v3313_v50 = vmul.f32 %v13047_v46, %v3312_v4  ;;  %v3937_v26 = vrot.slane %v13160_v14, 4  ;;  %v3357_v5 = vsub.f32 1.0, %v3356_v41 }
 0x417   : > { %19244 = vst [vmem:[#allocation79_spill] sm:$0xff] %v13176_v9  ;;  %v13187_v45 = vperm.slane %v3926_v20, %v10866_v38  ;;  %v3949_v30 = vrot.slane %v13176_v9, 4  ;;  %v13192_v0 = vsel %vm13100_vm5, %v3577_v47, %v3573_v29  ;;  %vm3316_vm12 = vweird.f32 %v13047_v46  ;;  %v13254_v9 = vpop.xlane.xlu1 %2133 }
 0x418   : > { %v3621_v18 = vand.u32 2147483648, %v12985_v60  ;;  %v3938_v4 = vsel %vm2142_vm11, %v3937_v26, %v13157_v34  ;;  %vm13206_vm15 = vcmp.eq.f32.partialorder %v3319_v24, 8.507059e+37  ;;  %vm13210_vm0 = vcmp.eq.f32.partialorder %v3619_v16, 8.507059e+37  ;;  %vm13245_vm5 = vmor %vm3315_vm1, %vm3316_vm12 }
 0x419   : > { %19245 = vst [vmem:[#allocation80_spill] sm:$0xff] %v13187_v45  ;;  %v3598_v47 = vmul.f32 %v13107_v7, %v3597_v57  ;;  %vm3600_vm3 = vweird.f32 %v13023_v58  ;;  %v13217_v59 = vperm.slane %v3938_v4, %v11005_v51  ;;  %v3950_v62 = vsel %vm2142_vm11, %v3949_v30, %v13187_v45 }
 0x41a   : > { %v3558_v24 = vsel %vm13202_vm14, %v13009_v6, %v3554_v54  ;;  %v3314_v20 = vadd.f32 %v13047_v46, %v3313_v50  ;;  %vm3616_vm4 = vweird.f32 %v13083_v23  ;;  %v13227_v16 = vperm.slane %v3950_v62, %v11005_v51  ;;  %v13229_v29 = vpop.eup %9095  ;;  %v577_v62 = vld [vmem:[#allocation8 + $0x78] sm:$0xff] }
 0x41b   : > { %19252 = vst [vmem:[#allocation81_spill] sm:$0xff] %v13217_v59  ;;  %v3614_v57 = vadd.f32 %v13083_v23, %v3613_v25  ;;  %v3358_v26 = vmul.f32 %v13134_v3, %v3357_v5  ;;  %v3963_v4 = vrot.slane %v13217_v59, 4  ;;  %9097 = vrcp.f32 %v13183_v19  ;;  %v576_v59 = vld [vmem:[#allocation8 + $0x70] sm:$0xff]  ;;  %vm13268_vm8 = vmor %vm3615_vm13, %vm3616_vm4 }
 0x41c   : > { %19253 = vst [vmem:[#allocation82_spill] sm:$0xff] %v13227_v16  ;;  %v3622_v30 = vor.u32 1.1754944e-38, %v3621_v18  ;;  %v3604_v6 = vand.u32 2147483647, %v13023_v58  ;;  %v3606_v54 = vand.u32 2147483648, %v13023_v58  ;;  %v3656_v50 = vmul.f32 %v13229_v29, %v13132_v17 }
 0x41d   : > { %v3599_v5 = vadd.f32 %v13107_v7, %v3598_v47  ;;  %vm3601_vm6 = vweird.f32 %v13107_v7  ;;  %v3964_v18 = vsel %vm2142_vm11, %v13227_v16, %v3963_v4  ;;  %9099 = vrcp.f32 %v13065_v52 }
 0x41e   : > { %v13259_v43 = vsel %vm13171_vm10, %v13112_v32, %v3558_v24  ;;  %v3318_v14 = vsel %vm13245_vm5, %v13047_v46, %v3314_v20  ;;  %vm3361_vm7 = vweird.f32 %v13134_v3  ;;  %v3364_v4 = vand.u32 2147483647, %v12957_v37  ;;  %4207 = vrot.lane.b32.xlu2 %v3964_v18, %s9652_s26  ;;  %v13275_v32 = vpop.xlane.xlu0 %2091  ;;  %vm13286_vm9 = vmor %vm3600_vm3, %vm3601_vm6 }
 0x41f   : > { %v3618_v46 = vsel %vm13268_vm8, %v13083_v23, %v3614_v57  ;;  %v3359_v39 = vadd.f32 %v13134_v3, %v3358_v26  ;;  %v3657_v24 = vsub.f32 1.0, %v3656_v50  ;;  %v2686_v60 = vmul.f32 %v577_v62, %v13239_v35  ;;  %v13297_v57 = vpop.xlane.xlu2 %2130 }
 0x420   : > { %vm13290_vm1 = vcmp.eq.f32.partialorder %v3604_v6, 8.507059e+37  ;;  %v3366_v18 = vand.u32 2147483648, %v12957_v37  ;;  %v2685_v23 = vmul.f32 %v576_v59, %v13130_v48  ;;  %9101 = vrcp.f32 %v13254_v9 }
 0x421   : > { %v13299_v26 = vpop.eup %9097  ;;  %v3603_v58 = vsel %vm13286_vm9, %v13107_v7, %v3599_v5  ;;  %v3607_v50 = vor.u32 1.1754944e-38, %v3606_v54  ;;  %vm3360_vm10 = vweird.f32 %v12957_v37  ;;  %v3664_v6 = vand.u32 2147483647, %v13132_v17  ;;  %2703 = vmatpush.msra.mxu2 %v2686_v60 }
 0x422   : > { %v13309_v59 = vsel %vm13206_vm15, %v13128_v27, %v3318_v14  ;;  %v13313_v62 = vsel %vm13210_vm0, %v3622_v30, %v3618_v46  ;;  %vm13317_vm13 = vmor %vm3360_vm10, %vm3361_vm7  ;;  %v3666_v37 = vand.u32 2147483648, %v13132_v17  ;;  %v3641_v7 = vmul.f32 %v13299_v26, %v13183_v19 }
 0x423   : > { %19262 = vst [vmem:[#allocation83_spill] sm:$0xff] %v13313_v62  ;;  %v13324_v54 = vpop.eup %9099  ;;  %v3363_v14 = vsel %vm13317_vm13, %v13134_v3, %v3359_v39  ;;  %vm3365_vm12 = vcmp.eq.f32.partialorder %v3364_v4, 8.507059e+37  ;;  %v3658_v41 = vmul.f32 %v13229_v29, %v3657_v24  ;;  %2704 = vmatpush.msra.mxu2 %v2685_v23  ;;  %v13333_v49 = vsel %vm13290_vm1, %v3607_v50, %v3603_v58  ;;  %v575_v4 = vld [vmem:[#allocation8 + $0x68] sm:$0xff]  ;;  %v572_v58 = vld [vmem:[#allocation8 + $0x50] sm:$0xff] }
 0x424   : > { %v3367_v30 = vor.u32 1.1754944e-38, %v3366_v18  ;;  %v3642_v5 = vsub.f32 1.0, %v3641_v7  ;;  %v3401_v46 = vmul.f32 %v13324_v54, %v13065_v52  ;;  %vm3660_vm14 = vweird.f32 %v13132_v17 }
 0x425   : > { %vm13340_vm15 = vcmp.eq.f32.partialorder %v3664_v6, 8.507059e+37  ;;  %v3667_v25 = vor.u32 1.1754944e-38, %v3666_v37  ;;  %v3649_v18 = vand.u32 2147483647, %v13183_v19  ;;  %v3659_v50 = vadd.f32 %v13229_v29, %v3658_v41  ;;  %v574_v6 = vld [vmem:[#allocation8 + $0x60] sm:$0xff] }
 0x426   : > { %v13344_v39 = vpop.eup %9101  ;;  %v13346_v24 = vsel %vm3365_vm12, %v3367_v30, %v3363_v14  ;;  %v3402_v23 = vsub.f32 1.0, %v3401_v46  ;;  %vm3661_vm0 = vweird.f32 %v13229_v29  ;;  %9103 = vrcp.f32 %v13297_v57  ;;  %v13353_v47 = vpop.xlane.xlu0 %2100  ;;  %v573_v30 = vld [vmem:[#allocation8 + $0x58] sm:$0xff] }
 0x427   : > { %v3643_v7 = vmul.f32 %v13299_v26, %v3642_v5  ;;  %v3701_v14 = vmul.f32 %v13344_v39, %v13254_v9  ;;  %9105 = vrcp.f32 %v13166_v36  ;;  %v2684_v37 = vmul.f32 %v575_v4, %v13031_v31  ;;  %vm13366_vm4 = vmor %vm3660_vm14, %vm3661_vm0  ;;  %v13377_v16 = vpop.xlane.xlu2 %2139 }
 0x428   : > { %vm3645_vm3 = vweird.f32 %v13183_v19  ;;  %v3651_v41 = vand.u32 2147483648, %v13183_v19  ;;  %v3403_v20 = vmul.f32 %v13324_v54, %v3402_v23  ;;  %vm13370_vm5 = vcmp.eq.f32.partialorder %v3649_v18, 8.507059e+37 }
 0x429   : > { %v3409_v4 = vand.u32 2147483647, %v13065_v52  ;;  %v3411_v46 = vand.u32 2147483648, %v13065_v52  ;;  %2705 = vmatpush.msra.mxu2 %v2684_v37  ;;  %v2683_v60 = vmul.f32 %v574_v6, %v12931_v44  ;;  %v3663_v17 = vsel %vm13366_vm4, %v13229_v29, %v3659_v50 }
 0x42a   : > { %vm3405_vm6 = vweird.f32 %v13065_v52  ;;  %v3711_v18 = vand.u32 2147483648, %v13254_v9  ;;  %v2682_v23 = vmul.f32 %v573_v30, %v12836_v12  ;;  %v3644_v45 = vadd.f32 %v13299_v26, %v3643_v7  ;;  %v571_v30 = vld [vmem:[#allocation8 + $0x48] sm:$0xff] }
 0x42b   : > { %vm3646_vm8 = vweird.f32 %v13299_v26  ;;  %v3702_v34 = vsub.f32 1.0, %v3701_v14  ;;  %2706 = vmatpush.msra.mxu2 %v2683_v60  ;;  %v2681_v6 = vmul.f32 %v572_v58, %v12733_v13  ;;  %v3652_v62 = vor.u32 1.1754944e-38, %v3651_v41 }
 0x42c   : > { %v13388_v37 = vpop.eup %9103  ;;  %v3404_v5 = vadd.f32 %v13324_v54, %v3403_v20  ;;  %vm3406_vm7 = vweird.f32 %v13324_v54  ;;  %9107 = vrcp.f32 %v13377_v16  ;;  %v13397_v50 = vsel %vm13340_vm15, %v3667_v25, %v3663_v17  ;;  %vm13408_vm1 = vmor %vm3645_vm3, %vm3646_vm8 }
 0x42d   : > { %v13393_v29 = vpop.eup %9105  ;;  %19271 = vst [vmem:[#allocation84_spill] sm:$0xff] %v13397_v50  ;;  %vm13399_vm9 = vcmp.eq.f32.partialorder %v3409_v4, 8.507059e+37  ;;  %v3412_v60 = vor.u32 1.1754944e-38, %v3411_v46  ;;  %v3696_v58 = vand.u32 2147483648, %v13297_v57  ;;  %2707 = vmatpush.msra.mxu2 %v2682_v23  ;;  %v3709_v3 = vand.u32 2147483647, %v13254_v9  ;;  %vm13424_vm10 = vmor %vm3405_vm6, %vm3406_vm7 }
 0x42e   : > { %v13413_v25 = vor.u32 1.1754944e-38, %v3711_v18  ;;  %v3456_v14 = vand.u32 2147483648, %v13166_v36  ;;  %9109 = vrcp.f32 %v13275_v32  ;;  %v570_v46 = vld [vmem:[#allocation8 + $0x40] sm:$0xff]  ;;  %v3648_v41 = vsel %vm13408_vm1, %v13299_v26, %v3644_v45 }
 0x42f   : > { %v3703_v4 = vmul.f32 %v13344_v39, %v3702_v34  ;;  %vm3705_vm13 = vweird.f32 %v13254_v9  ;;  %v3686_v17 = vmul.f32 %v13388_v37, %v13297_v57  ;;  %2708 = vmatpush.msra.mxu2 %v2681_v6  ;;  %v3408_v52 = vsel %vm13424_vm10, %v13324_v54, %v3404_v5  ;;  %v13440_v34 = vpop.xlane.xlu0 %2109 }
 0x430   : > { %vm3706_vm12 = vweird.f32 %v13344_v39  ;;  %v3446_v26 = vmul.f32 %v13393_v29, %v13166_v36  ;;  %v13442_v23 = vor.u32 1.1754944e-38, %v3696_v58  ;;  %v3454_v20 = vand.u32 2147483647, %v13166_v36 }
 0x431   : > { %v2680_v18 = vmul.f32 %v571_v30, %v12645_v8  ;;  %v2679_v6 = vmul.f32 %v570_v46, %v12524_v56  ;;  %v13451_v54 = vsel %vm13370_vm5, %v3652_v62, %v3648_v41  ;;  %v13453_v5 = vor.u32 1.1754944e-38, %v3456_v14  ;;  %v569_v14 = vld [vmem:[#allocation8 + $0x38] sm:$0xff]  ;;  %v568_v41 = vld [vmem:[#allocation8 + $0x30] sm:$0xff]  ;;  %vm13511_vm3 = vmor %vm3705_vm13, %vm3706_vm12 }
 0x432   : > { %19278 = vst [vmem:[#allocation85_spill] sm:$0xff] %v13442_v23  ;;  %v13447_v45 = vpop.eup %9107  ;;  %v19279_v19 = vrot.slane %v12372_v63, 4  ;;  %v19280_v50 = vrot.slane %v13309_v59, 4  ;;  %v3413_v46 = vsel %vm13399_vm9, %v3412_v60, %v3408_v52  ;;  %v3704_v23 = vadd.f32 %v13344_v39, %v3703_v4 }
 0x433   : > { %v3687_v27 = vsub.f32 1.0, %v3686_v17  ;;  %v3731_v62 = vmul.f32 %v13447_v45, %v13377_v16  ;;  %2709 = vmatpush.msra.mxu2 %v2680_v18  ;;  %vm13470_vm14 = vcmp.eq.f32.partialorder %v3709_v3, 8.507059e+37  ;;  %v3447_v59 = vsub.f32 1.0, %v3446_v26 }
 0x434   : > { %v3970_v58 = vsel %vm2142_vm11, %v19279_v19, %v13117_v10  ;;  %v3976_v30 = vsel %vm2142_vm11, %v19280_v50, %v12434_v22  ;;  %v13468_v63 = vpop.eup %9109  ;;  %v19283_v50 = vrot.slane %v13346_v24, 4  ;;  %v19284_v60 = vrot.slane %v12682_v55, 4  ;;  %v563_v10 = vld [vmem:[#allocation8 + $0x8] sm:$0xff] }
 0x435   : > { %v13475_v22 = vperm.slane %v3976_v30, %v10866_v38  ;;  %v3732_v17 = vsub.f32 1.0, %v3731_v62  ;;  %v3491_v3 = vmul.f32 %v13468_v63, %v13275_v32  ;;  %2710 = vmatpush.msra.mxu2 %v2679_v6  ;;  %v13488_v18 = vperm.slane %v3970_v58, %v10866_v38  ;;  %v567_v30 = vld [vmem:[#allocation8 + $0x28] sm:$0xff]  ;;  %v566_v62 = vld [vmem:[#allocation8 + $0x20] sm:$0xff] }
 0x436   : > { %v3982_v7 = vsel %vm2142_vm11, %v19283_v50, %v12620_v1  ;;  %v3988_v4 = vsel %vm2142_vm11, %v19284_v60, %v12517_v40  ;;  %v2678_v55 = vmul.f32 %v569_v14, %v13239_v35  ;;  %v2677_v40 = vmul.f32 %v568_v41, %v13130_v48  ;;  %v565_v60 = vld [vmem:[#allocation8 + $0x18] sm:$0xff] }
 0x437   : > { %v13491_v52 = vperm.slane %v3982_v7, %v10866_v38  ;;  %v13494_v24 = vperm.slane %v3988_v4, %v10866_v38  ;;  %v3993_v1 = vrot.slane %v13475_v22, 4  ;;  %v19285_v26 = vrot.slane %v12792_v61, 4 }
 0x438   : > { %v3688_v6 = vmul.f32 %v13388_v37, %v3687_v27  ;;  %vm3450_vm15 = vweird.f32 %v13166_v36  ;;  %vm3451_vm0 = vweird.f32 %v13393_v29  ;;  %v3492_v58 = vsub.f32 1.0, %v3491_v3  ;;  %2711 = vmatpush.msra.mxu2 %v2678_v55 }
 0x439   : > { %v13502_v19 = vsel %vm2142_vm11, %v19285_v26, %v3413_v46  ;;  %vm3691_vm4 = vweird.f32 %v13388_v37  ;;  %vm3735_vm5 = vweird.f32 %v13377_v16  ;;  %v3739_v61 = vand.u32 2147483647, %v13377_v16 }
 0x43a   : > { %v3994_v46 = vsel %vm2142_vm11, %v3993_v1, %v13488_v18  ;;  %v4005_v27 = vrot.slane %v13494_v24, 4  ;;  %9111 = vrcp.f32 %v13353_v47  ;;  %v3708_v9 = vsel %vm13511_vm3, %v13344_v39, %v3704_v23  ;;  %2712 = vmatpush.msra.mxu2 %v2677_v40  ;;  %v13536_v23 = vpop.xlane.xlu0 %2118 }
 0x43b   : > { %v3448_v41 = vmul.f32 %v13393_v29, %v3447_v59  ;;  %v3493_v50 = vmul.f32 %v13468_v63, %v3492_v58  ;;  %v13528_v7 = vperm.slane %v3994_v46, %v11005_v51  ;;  %vm3690_vm6 = vweird.f32 %v13297_v57 }
 0x43c   : > { %v3733_v4 = vmul.f32 %v13447_v45, %v3732_v17  ;;  %v4006_v3 = vsel %vm2142_vm11, %v4005_v27, %v13491_v52  ;;  %v2676_v1 = vmul.f32 %v567_v30, %v13031_v31  ;;  %v2675_v39 = vmul.f32 %v566_v62, %v12931_v44  ;;  %v564_v17 = vld [vmem:[#allocation8 + $0x10] sm:$0xff] }
 0x43d   : > { %19288 = vst [vmem:[#allocation86_spill] sm:$0xff] %v13528_v7  ;;  %v3741_v59 = vand.u32 2147483648, %v13377_v16  ;;  %v3499_v55 = vand.u32 2147483647, %v13275_v32  ;;  %v13541_v26 = vperm.slane %v4006_v3, %v11005_v51  ;;  %v4019_v58 = vrot.slane %v13528_v7, 4  ;;  %v13563_v3 = vpop.permute.xlu1 %8784 }
 0x43e   : > { %vm13544_vm8 = vcmp.eq.f32.partialorder %v3454_v20, 8.507059e+37  ;;  %v3494_v40 = vadd.f32 %v13468_v63, %v3493_v50  ;;  %vm3496_vm7 = vweird.f32 %v13468_v63  ;;  %v3501_v30 = vand.u32 2147483648, %v13275_v32  ;;  %2713 = vmatpush.msra.mxu2 %v2676_v1 }
 0x43f   : > { %v2674_v62 = vmul.f32 %v565_v60, %v12836_v12  ;;  %v13555_v46 = vsel %vm13470_vm14, %v13413_v25, %v3708_v9  ;;  %v13558_v27 = vadd.f32 %v13388_v37, %v3688_v6  ;;  %v3449_v20 = vadd.f32 %v13393_v29, %v3448_v41  ;;  %vm13592_vm14 = vmor %vm3450_vm15, %vm3451_vm0 }
 0x440   : > { %v4020_v50 = vsel %vm2142_vm11, %v13541_v26, %v4019_v58  ;;  %v13565_v7 = vpop.eup %9111  ;;  %v3734_v1 = vadd.f32 %v13447_v45, %v3733_v4  ;;  %vm3736_vm9 = vweird.f32 %v13447_v45  ;;  %vm3495_vm1 = vweird.f32 %v13275_v32  ;;  %2714 = vmatpush.msra.mxu2 %v2675_v39  ;;  %v562_v4 = vld [vmem:[#allocation8] sm:$0xff]  ;;  %vm13624_vm0 = vmor %vm3690_vm6, %vm3691_vm4 }
 0x441   : > { %4209 = vrot.lane.b32.xlu1 %v4020_v50, %s9652_s26  ;;  %v2673_v25 = vmul.f32 %v564_v17, %v12733_v13  ;;  %vm13572_vm10 = vcmp.eq.f32.partialorder %v3739_v61, 8.507059e+37  ;;  %v3742_v9 = vor.u32 1.1754944e-38, %v3741_v59  ;;  %vm13578_vm13 = vmor %vm3495_vm1, %vm3496_vm7  ;;  %vm13582_vm12 = vcmp.eq.f32.partialorder %v3499_v55, 8.507059e+37 }
 0x442   : > { %v3536_v32 = vmul.f32 %v13565_v7, %v13353_v47  ;;  %v3498_v39 = vsel %vm13578_vm13, %v13468_v63, %v3494_v40  ;;  %v3502_v59 = vor.u32 1.1754944e-38, %v3501_v30  ;;  %2715 = vmatpush.msra.mxu2 %v2674_v62  ;;  %v8786_v55 = vunpack.i.l.bf16 %v13563_v3  ;;  %vm13608_vm15 = vmor %vm3735_vm5, %vm3736_vm9  ;;  %v19301_v40 = vld [vmem:[#allocation51_spill] sm:$0xff]  ;;  %v13640_v60 = vpop.xlane.xlu0 %2127 }
 0x443   : > { %9113 = vrcp.f32 %v13440_v34  ;;  %v3453_v58 = vsel %vm13592_vm14, %v13393_v29, %v3449_v20  ;;  %v2672_v63 = vmul.f32 %v563_v10, %v12645_v8  ;;  %v2190_v30 = vrot.slane %v19301_v40, 4  ;;  %v19349_v20 = vld [vmem:[#allocation74_spill] sm:$0xff] }
 0x444   : > { %v3537_v17 = vsub.f32 1.0, %v3536_v32  ;;  %v3738_v62 = vsel %vm13608_vm15, %v13447_v45, %v3734_v1  ;;  %v3544_v50 = vand.u32 2147483647, %v13353_v47  ;;  %v3546_v29 = vand.u32 2147483648, %v13353_v47  ;;  %2716 = vmatpush.msra.mxu2 %v2673_v25  ;;  %v19304_v1 = vld [vmem:[#allocation46_spill] sm:$0xff] }
 0x445   : > { %v2671_v16 = vmul.f32 %v562_v4, %v12524_v56  ;;  %v3503_v10 = vsel %vm13582_vm12, %v3502_v59, %v3498_v39  ;;  %v2191_v41 = vsel %vm2142_vm11, %v2190_v30, %v19304_v1  ;;  %vm2654_vm3 = vcmask 523264  }
 0x446   : > { %v3538_v45 = vmul.f32 %v13565_v7, %v3537_v17  ;;  %vm3541_vm5 = vweird.f32 %v13565_v7  ;;  %2717 = vmatpush.msra.mxu2 %v2672_v63  ;;  %v2655_v32 = vsel %vm2654_vm3, %v2191_v41, %v8786_v55  ;;  %9115 = vrcp.f32 %v13536_v23 }
 0x447   : > { %v3458_v4 = vsel %vm13544_vm8, %v13453_v5, %v3453_v58  ;;  %v13647_v61 = vsel %vm13572_vm10, %v3742_v9, %v3738_v62  ;;  %v3591_v59 = vand.u32 2147483648, %v13440_v34  ;;  %v4043_v17 = vrot.slane %v3503_v10, 4  ;;  %v19310_v62 = vld [vmem:[#allocation33_spill] sm:$0xff] }
 0x448   : > { %v3539_v39 = vadd.f32 %v13565_v7, %v3538_v45  ;;  %vm3540_vm4 = vweird.f32 %v13353_v47  ;;  %vm13654_vm6 = vcmp.eq.f32.partialorder %v3544_v50, 8.507059e+37  ;;  %2718 = vmatpush.msra.mxu2 %v2671_v16  ;;  %v13660_v5 = vperm.slane %v13502_v19, %v10866_v38  ;;  %v589_v19 = vld [vmem:[#allocation8 + $0xd8] sm:$0xff] }
 0x449   : > { %v13651_v36 = vpop.eup %9113  ;;  %vm13664_vm8 = vmor %vm3540_vm4, %vm3541_vm5  ;;  %v3547_v6 = vor.u32 1.1754944e-38, %v3546_v29  ;;  %v3589_v47 = vand.u32 2147483647, %v13440_v34  ;;  %2719 = vmatmul.f32.vlgmr.msra.gmra.mxu2 %v2655_v32  ;;  %v19309_v58 = vrot.slane %v12805_v11, 4  ;;  %v8787_v30 = vunpack.i.h.bf16 %v13563_v3 }
 0x44a   : > { %v3581_v9 = vmul.f32 %v13651_v36, %v13440_v34  ;;  %v3543_v40 = vsel %vm13664_vm8, %v13565_v7, %v3539_v39  ;;  %v2246_v50 = vrot.slane %v19310_v62, 4  ;;  %vm3585_vm7 = vweird.f32 %v13440_v34  ;;  %v19314_v39 = vld [vmem:[#allocation52_spill] sm:$0xff] }
 0x44b   : > { %v4026_v63 = vsel %vm2142_vm11, %v19309_v58, %v12697_v15  ;;  %v3592_v16 = vor.u32 1.1754944e-38, %v3591_v59  ;;  %v19311_v10 = vrot.slane %v12885_v33, 4  ;;  %vm3586_vm9 = vweird.f32 %v13651_v36  ;;  %v19321_v33 = vld [vmem:[#allocation65_spill] sm:$0xff] }
 0x44c   : > { %v3582_v29 = vsub.f32 1.0, %v3581_v9  ;;  %v13685_v45 = vpop.eup %9115  ;;  %v13689_v15 = vperm.slane %v4026_v63, %v10866_v38  ;;  %v4044_v7 = vsel %vm2142_vm11, %v4043_v17, %v12952_v28  ;;  %v4049_v3 = vrot.slane %v13660_v5, 4  ;;  %vm13734_vm13 = vmor %vm3585_vm7, %vm3586_vm9 }
 0x44d   : > { %v4038_v11 = vsel %vm2142_vm11, %v19311_v10, %v3458_v4  ;;  %v3548_v1 = vsel %vm13654_vm6, %v3547_v6, %v3543_v40  ;;  %vm13697_vm1 = vcmp.eq.f32.partialorder %v3589_v47, 8.507059e+37  ;;  %v3626_v32 = vmul.f32 %v13685_v45, %v13536_v23  ;;  %v13723_v40 = vpop.xlane.xlu0 %2136  ;;  %v19334_v47 = vld [vmem:[#allocation79_spill] sm:$0xff] }
 0x44e   : > { %v3583_v41 = vmul.f32 %v13651_v36, %v3582_v29  ;;  %v13704_v4 = vperm.slane %v4044_v7, %v10866_v38  ;;  %v2247_v28 = vsel %vm2142_vm11, %v2246_v50, %v19314_v39  ;;  %v13709_v59 = vperm.slane %v4038_v11, %v10866_v38 }
 0x44f   : > { %v4050_v17 = vsel %vm2142_vm11, %v4049_v3, %v13689_v15  ;;  %9117 = vrcp.f32 %v13640_v60  ;;  %v3627_v14 = vsub.f32 1.0, %v3626_v32  ;;  %vm3630_vm10 = vweird.f32 %v13536_v23 }
 0x450   : > { %v3584_v55 = vadd.f32 %v13651_v36, %v3583_v41  ;;  %v13716_v6 = vperm.slane %v4050_v17, %v11005_v51  ;;  %v4061_v9 = vrot.slane %v13704_v4, 4  ;;  %v2656_v58 = vsel %vm2654_vm3, %v2247_v28, %v8787_v30  ;;  %v592_v17 = vld [vmem:[#allocation8 + $0xf0] sm:$0xff] }
 0x451   : > { %v3771_v63 = vrot.slane %v12217_v53, 4  ;;  %v3628_v62 = vmul.f32 %v13685_v45, %v3627_v14  ;;  %v3636_v50 = vand.u32 2147483648, %v13536_v23  ;;  %2722 = vmatmul.f32.gmra.mxu2 %v2656_v58  ;;  %v3783_v10 = vrot.slane %v12268_v2, 4 }
 0x452   : > { %19315 = vst [vmem:[#allocation51_spill] sm:$0xff] %v13716_v6  ;;  %v4062_v29 = vsel %vm2142_vm11, %v4061_v9, %v13709_v59  ;;  %v4081_v11 = vrot.slane %v3548_v1, 4  ;;  %v4075_v7 = vrot.slane %v13716_v6, 4  ;;  %v3681_v3 = vand.u32 2147483648, %v13640_v60  ;;  %v593_v1 = vld [vmem:[#allocation8 + $0xf8] sm:$0xff] }
 0x453   : > { %v13739_v53 = vperm.slane %v4062_v29, %v11005_v51  ;;  %v3588_v2 = vsel %vm13734_vm13, %v13651_v36, %v3584_v55  ;;  %vm3631_vm12 = vweird.f32 %v13685_v45  ;;  %v3784_v34 = vsel %vm2142_vm11, %v12250_v21, %v3783_v10 }
 0x454   : > { %9119 = vrcp.f32 %v13723_v40  ;;  %v13753_v32 = vadd.f32 %v13685_v45, %v3628_v62  ;;  %v3772_v28 = vsel %vm2142_vm11, %v12220_v42, %v3771_v63  ;;  %v13760_v36 = vperm.slane %v3784_v34, %v11005_v51  ;;  %vm13779_vm15 = vmor %vm3630_vm10, %vm3631_vm12  ;;  %v582_v62 = vld [vmem:[#allocation8 + $0xa0] sm:$0xff] }
 0x455   : > { %19318 = vst [vmem:[#allocation46_spill] sm:$0xff] %v13739_v53  ;;  %v13750_v41 = vpop.eup %9117  ;;  %v4076_v39 = vsel %vm2142_vm11, %v13739_v53, %v4075_v7  ;;  %v13762_v55 = vor.u32 1.1754944e-38, %v3636_v50  ;;  %vm3675_vm14 = vweird.f32 %v13640_v60  ;;  %v3679_v14 = vand.u32 2147483647, %v13640_v60 }
 0x456   : > { %4211 = vrot.lane.b32.xlu0 %v4076_v39, %s9652_s26  ;;  %v3671_v21 = vmul.f32 %v13750_v41, %v13640_v60  ;;  %v3593_v9 = vsel %vm13697_vm1, %v3592_v16, %v3588_v2  ;;  %v13771_v58 = vor.u32 1.1754944e-38, %v3681_v3  ;;  %v3797_v42 = vrot.slane %v13760_v36, 4  ;;  %v19322_v3 = vld [vmem:[#allocation59_spill] sm:$0xff] }
 0x457   : > { %v2702_v63 = vmul.f32 %v593_v1, %v13239_v35  ;;  %v13784_v29 = vperm.slane %v3772_v28, %v11005_v51  ;;  %v2701_v16 = vmul.f32 %v592_v17, %v13130_v48  ;;  %v4082_v10 = vsel %vm2142_vm11, %v4081_v11, %v19321_v33  ;;  %v591_v1 = vld [vmem:[#allocation8 + $0xe8] sm:$0xff] }
 0x458   : > { %v3672_v50 = vsub.f32 1.0, %v3671_v21  ;;  %vm3720_vm5 = vweird.f32 %v13723_v40  ;;  %v13795_v7 = vperm.slane %v4082_v10, %v10866_v38  ;;  %v19323_v2 = vrot.slane %v13259_v43, 4  ;;  %v590_v43 = vld [vmem:[#allocation8 + $0xe0] sm:$0xff] }
 0x459   : > { %2744 = vmatpush.msra.mxu3 %v2702_v63  ;;  %v19324_v17 = vrot.slane %v13333_v49, 4  ;;  %v19325_v63 = vld [vmem:[#allocation83_spill] sm:$0xff]  ;;  %vm3676_vm4 = vweird.f32 %v13750_v41  ;;  %vm13826_vm6 = vcmp.eq.f32.partialorder %v3679_v14, 8.507059e+37  ;;  %v19330_v14 = vld [vmem:[#allocation80_spill] sm:$0xff]  ;;  %v3726_v60 = vand.u32 2147483648, %v13723_v40 }
 0x45a   : > { %v4088_v34 = vsel %vm2142_vm11, %v19323_v2, %v19322_v3  ;;  %v13801_v39 = vpop.eup %9119  ;;  %v3673_v11 = vmul.f32 %v13750_v41, %v3672_v50  ;;  %v19326_v33 = vrot.slane %v19325_v63, 4  ;;  %v3798_v3 = vsel %vm2142_vm11, %v3797_v42, %v13784_v29  ;;  %vm13843_vm7 = vmor %vm3675_vm14, %vm3676_vm4 }
 0x45b   : > { %v13805_v28 = vperm.slane %v4088_v34, %v10866_v38  ;;  %v4094_v21 = vsel %vm2142_vm11, %v19324_v17, %v13192_v0  ;;  %v3716_v50 = vmul.f32 %v13801_v39, %v13723_v40  ;;  %2745 = vmatpush.msra.mxu3 %v2701_v16  ;;  %v2700_v34 = vmul.f32 %v591_v1, %v13031_v31 }
 0x45c   : > { %v4100_v10 = vsel %vm2142_vm11, %v19326_v33, %v3593_v9  ;;  %v3674_v49 = vadd.f32 %v13750_v41, %v3673_v11  ;;  %v19327_v9 = vld [vmem:[#allocation62_spill] sm:$0xff]  ;;  %v4098_v33 = vperm.slane %v4094_v21, %v10866_v38  ;;  %vm3721_vm8 = vweird.f32 %v13801_v39 }
 0x45d   : > { %v13820_v2 = vperm.slane %v4100_v10, %v10866_v38  ;;  %v4105_v0 = vrot.slane %v13805_v28, 4  ;;  %v3939_v17 = vrot.slane %v19327_v9, 4  ;;  %v3717_v42 = vsub.f32 1.0, %v3716_v50  ;;  %2746 = vmatpush.msra.mxu3 %v2700_v34  ;;  %vm13873_vm9 = vmor %vm3720_vm5, %vm3721_vm8 }
 0x45e   : > { %v2699_v10 = vmul.f32 %v590_v43, %v12931_v44  ;;  %4233 = vrot.lane.b32.xlu0 %v3798_v3, %s9651_s27  ;;  %v3724_v11 = vand.u32 2147483647, %v13723_v40  ;;  %v3951_v9 = vrot.slane %v19330_v14, 4  ;;  %v588_v14 = vld [vmem:[#allocation8 + $0xd0] sm:$0xff]  ;;  %v3678_v25 = vsel %vm13843_vm7, %v13750_v41, %v3674_v49  ;;  %v585_v41 = vld [vmem:[#allocation8 + $0xb8] sm:$0xff] }
 0x45f   : > { %v4117_v16 = vrot.slane %v13820_v2, 4  ;;  %v4106_v1 = vsel %vm2142_vm11, %v4105_v0, %v13795_v7  ;;  %v3718_v43 = vmul.f32 %v13801_v39, %v3717_v42  ;;  %v19333_v0 = vld [vmem:[#allocation78_spill] sm:$0xff]  ;;  %v2698_v21 = vmul.f32 %v589_v19, %v12836_v12 }
 0x460   : > { %v13849_v3 = vperm.slane %v4106_v1, %v11005_v51  ;;  %v3940_v34 = vsel %vm2142_vm11, %v19333_v0, %v3939_v17  ;;  %v3952_v42 = vsel %vm2142_vm11, %v19334_v47, %v3951_v9  ;;  %2747 = vmatpush.msra.mxu3 %v2699_v10  ;;  %v587_v1 = vld [vmem:[#allocation8 + $0xc8] sm:$0xff]  ;;  %v2697_v49 = vmul.f32 %v588_v14, %v12733_v13  ;;  %v19337_v10 = vld [vmem:[#allocation49_spill] sm:$0xff] }
 0x461   : > { %v4118_v50 = vsel %vm2142_vm11, %v4117_v16, %v4098_v33  ;;  %v3719_v16 = vadd.f32 %v13801_v39, %v3718_v43  ;;  %v13866_v17 = vperm.slane %v3952_v42, %v11005_v51  ;;  %v13878_v47 = vperm.slane %v3940_v34, %v11005_v51  ;;  %v19338_v43 = vld [vmem:[#allocation32_spill] sm:$0xff] }
 0x462   : > { %v13859_v30 = vperm.slane %v4118_v50, %v11005_v51  ;;  %v4131_v6 = vrot.slane %v13849_v3, 4  ;;  %v3827_v9 = vrot.slane %v19337_v10, 4  ;;  %v3839_v50 = vrot.slane %v19338_v43, 4  ;;  %2748 = vmatpush.msra.mxu3 %v2698_v21  ;;  %v586_v10 = vld [vmem:[#allocation8 + $0xc0] sm:$0xff] }
 0x463   : > { %v19339_v0 = vand.u32 2147483647, %v13297_v57  ;;  %v3723_v40 = vsel %vm13873_vm9, %v13801_v39, %v3719_v16  ;;  %v3965_v42 = vrot.slane %v13866_v17, 4  ;;  %v2696_v14 = vmul.f32 %v587_v1, %v12645_v8  ;;  %v19342_v57 = vld [vmem:[#allocation55_spill] sm:$0xff] }
 0x464   : > { %v4132_v34 = vsel %vm2142_vm11, %v13859_v30, %v4131_v6  ;;  %vm3725_vm10 = vcmp.eq.f32.partialorder %v3724_v11, 8.507059e+37  ;;  %v3727_v43 = vor.u32 1.1754944e-38, %v3726_v60  ;;  %v4107_v53 = vrot.slane %v13795_v7, 4  ;;  %2749 = vmatpush.msra.mxu3 %v2697_v49  ;;  %v19343_v6 = vld [vmem:[#allocation42_spill] sm:$0xff]  ;;  %v584_v49 = vld [vmem:[#allocation8 + $0xb0] sm:$0xff] }
 0x465   : > { %vm13885_vm1 = vcmp.eq.f32.partialorder %v19339_v0, 8.507059e+37  ;;  %4213 = vrot.lane.b32.xlu2 %v4132_v34, %s9652_s26  ;;  %v3840_v0 = vsel %vm2142_vm11, %v19342_v57, %v3839_v50  ;;  %v3966_v39 = vsel %vm2142_vm11, %v3965_v42, %v13878_v47  ;;  %v3828_v16 = vsel %vm2142_vm11, %v19343_v6, %v3827_v9  ;;  %v13914_v34 = vpop.permute.xlu0 %8789  ;;  %v583_v42 = vld [vmem:[#allocation8 + $0xa8] sm:$0xff] }
 0x466   : > { %v13905_v1 = vperm.slane %v3840_v0, %v11005_v51  ;;  %v4119_v11 = vrot.slane %v4098_v33, 4  ;;  %v3683_v60 = vsel %vm13826_vm6, %v13771_v58, %v3678_v25  ;;  %v3728_v21 = vsel %vm3725_vm10, %v3727_v43, %v3723_v40  ;;  %4239 = vrot.lane.b32.xlu0 %v3966_v39, %s9651_s27  ;;  %2750 = vmatpush.msra.mxu3 %v2696_v14  ;;  %v19348_v39 = vld [vmem:[#allocation85_spill] sm:$0xff] }
 0x467   : > { %v4108_v7 = vsel %vm2142_vm11, %v13805_v28, %v4107_v53  ;;  %v2695_v50 = vmul.f32 %v586_v10, %v12524_v56  ;;  %v19344_v9 = vand.u32 2147483647, %v13536_v23  ;;  %v2694_v58 = vmul.f32 %v585_v41, %v13239_v35  ;;  %v19346_v41 = vld [vmem:[#allocation75_spill] sm:$0xff] }
 0x468   : > { %v3853_v33 = vrot.slane %v13905_v1, 4  ;;  %v4120_v25 = vsel %vm2142_vm11, %v13820_v2, %v4119_v11  ;;  %v19345_v53 = vsel %vm13779_vm15, %v13685_v45, %v13753_v32  ;;  %v3836_v63 = vperm.slane %v3828_v16, %v11005_v51 }
 0x469   : > { %vm3635_vm13 = vcmp.eq.f32.partialorder %v19344_v9, 8.507059e+37  ;;  %v13930_v23 = vperm.slane %v4120_v25, %v11005_v51  ;;  %v4007_v40 = vrot.slane %v13491_v52, 4  ;;  %v4143_v14 = vrot.slane %v3683_v60, 4  ;;  %2751 = vmatpush.msra.mxu3 %v2695_v50 }
 0x46a   : > { %v3638_v28 = vsel %vm3635_vm13, %v13762_v55, %v19345_v53  ;;  %v4149_v10 = vrot.slane %v3728_v21, 4  ;;  %v13934_v2 = vperm.slane %v4108_v7, %v11005_v51  ;;  %v2693_v35 = vmul.f32 %v584_v49, %v13130_v48 }
 0x46b   : > { %v4133_v45 = vrot.slane %v13930_v23, 4  ;;  %v3995_v32 = vrot.slane %v13488_v18, 4  ;;  %v4008_v55 = vsel %vm2142_vm11, %v13494_v24, %v4007_v40  ;;  %v8791_v43 = vunpack.i.l.bf16 %v13914_v34  ;;  %2752 = vmatpush.msra.mxu3 %v2694_v58 }
 0x46c   : > { %v3854_v52 = vsel %vm2142_vm11, %v3853_v33, %v3836_v63  ;;  %v13944_v57 = vperm.slane %v4008_v55, %v11005_v51  ;;  %v2692_v0 = vmul.f32 %v583_v42, %v13031_v31  ;;  %v2302_v48 = vrot.slane %v19346_v41, 4  ;;  %v581_v31 = vld [vmem:[#allocation8 + $0x98] sm:$0xff] }
 0x46d   : > { %v19347_v18 = vsel %vm13624_vm0, %v13388_v37, %v13558_v27  ;;  %4235 = vrot.lane.b32.xlu2 %v3854_v52, %s9651_s27  ;;  %v3996_v6 = vsel %vm2142_vm11, %v13475_v22, %v3995_v32  ;;  %v3855_v16 = vrot.slane %v3836_v63, 4  ;;  %v2691_v11 = vmul.f32 %v582_v62, %v12931_v44  ;;  %2753 = vmatpush.msra.mxu3 %v2693_v35  ;;  %v19350_v27 = vld [vmem:[#allocation84_spill] sm:$0xff]  ;;  %v13983_v42 = vpop.permute.xlu0 %8804  ;;  %v578_v62 = vld [vmem:[#allocation8 + $0x80] sm:$0xff]  ;;  %v19353_v32 = vld [vmem:[#allocation77_spill] sm:$0xff] }
 0x46e   : > { %v3698_v24 = vsel %vm13885_vm1, %v19348_v39, %v19347_v18  ;;  %v4134_v60 = vsel %vm2142_vm11, %v4133_v45, %v13934_v2  ;;  %v2303_v37 = vsel %vm2142_vm11, %v2302_v48, %v19349_v20  ;;  %v19351_v21 = vrot.slane %v19350_v27, 4  ;;  %v580_v44 = vld [vmem:[#allocation8 + $0x90] sm:$0xff] }
 0x46f   : > { %v4144_v7 = vsel %vm2142_vm11, %v4143_v14, %v13451_v54  ;;  %4245 = vrot.lane.b32.xlu0 %v4134_v60, %s9651_s27  ;;  %v2657_v22 = vsel %vm2654_vm3, %v2303_v37, %v8791_v43  ;;  %v4150_v9 = vsel %vm2142_vm11, %v4149_v10, %v3698_v24  ;;  %v4021_v33 = vrot.slane %v13944_v57, 4  ;;  %2754 = vmatpush.msra.mxu3 %v2692_v0  ;;  %v579_v14 = vld [vmem:[#allocation8 + $0x88] sm:$0xff]  ;;  %v8795_v37 = vpop.permute.xlu2 %8794 }
 0x470   : > { %v4138_v19 = vsel %vm2142_vm11, %v19351_v21, %v3638_v28  ;;  %v4148_v49 = vperm.slane %v4144_v7, %v10866_v38  ;;  %2725 = vmatmul.f32.gmra.mxu2 %v2657_v22  ;;  %v2690_v25 = vmul.f32 %v581_v31, %v12836_v12  ;;  %v4154_v58 = vperm.slane %v4150_v9, %v10866_v38  ;;  %v19356_v60 = vld [vmem:[#allocation63_spill] sm:$0xff]  ;;  %v19357_v7 = vld [vmem:[#allocation40_spill] sm:$0xff] }
 0x471   : > { %v4142_v50 = vperm.slane %v4138_v19, %v10866_v38  ;;  %v19352_v54 = vrot.slane %v13647_v61, 4  ;;  %v8792_v28 = vunpack.i.h.bf16 %v13914_v34  ;;  %v4004_v10 = vperm.slane %v3996_v6, %v11005_v51  ;;  %2755 = vmatpush.msra.mxu3 %v2691_v11  ;;  %v19355_v11 = vld [vmem:[#allocation37_spill] sm:$0xff] }
 0x472   : > { %v4161_v40 = vrot.slane %v4148_v49, 4  ;;  %v3856_v12 = vsel %vm2142_vm11, %v13905_v1, %v3855_v16  ;;  %v2689_v35 = vmul.f32 %v580_v44, %v12733_v13  ;;  %v4175_v34 = vrot.slane %v4154_v58, 4  ;;  %v19354_v16 = vld [vmem:[#allocation76_spill] sm:$0xff]  ;;  %v19358_v44 = vld [vmem:[#allocation53_spill] sm:$0xff] }
 0x473   : > { %v4156_v53 = vsel %vm2142_vm11, %v19352_v54, %v13555_v46  ;;  %v4163_v61 = vrot.slane %v4142_v50, 4  ;;  %v2358_v55 = vrot.slane %v19353_v32, 4  ;;  %v4022_v43 = vsel %vm2142_vm11, %v4021_v33, %v4004_v10  ;;  %2756 = vmatpush.msra.mxu3 %v2690_v25  ;;  %v19360_v54 = vld [vmem:[#allocation43_spill] sm:$0xff]  ;;  %v19363_v32 = vld [vmem:[#allocation69_spill] sm:$0xff] }
 0x474   : > { %v4160_v63 = vperm.slane %v4156_v53, %v10866_v38  ;;  %v4162_v46 = vsel %vm2142_vm11, %v4161_v40, %v4142_v50  ;;  %v8806_v0 = vunpack.i.l.bf16 %v13983_v42  ;;  %v2688_v1 = vmul.f32 %v579_v14, %v12645_v8 }
 0x475   : > { %v13993_v52 = vperm.slane %v4162_v46, %v11005_v51  ;;  %4241 = vrot.lane.b32.xlu2 %v4022_v43, %s9651_s27  ;;  %v2687_v41 = vmul.f32 %v578_v62, %v12524_v56  ;;  %v4164_v48 = vsel %vm2142_vm11, %v4148_v49, %v4163_v61  ;;  %2757 = vmatpush.msra.mxu3 %v2689_v35  ;;  %v2194_v31 = vrot.slane %v19355_v11, 4  ;;  %v19359_v49 = vld [vmem:[#allocation58_spill] sm:$0xff]  ;;  %v19362_v35 = vld [vmem:[#allocation29_spill] sm:$0xff] }
 0x476   : > { %v4173_v45 = vrot.slane %v4160_v63, 4  ;;  %v4176_v18 = vsel %vm2142_vm11, %v4160_v63, %v4175_v34  ;;  %v2359_v8 = vsel %vm2142_vm11, %v2358_v55, %v19354_v16  ;;  %v3895_v20 = vrot.slane %v19356_v60, 4  ;;  %v19361_v63 = vld [vmem:[#allocation54_spill] sm:$0xff] }
 0x477   : > { %v4187_v24 = vrot.slane %v13993_v52, 4  ;;  %v4184_v6 = vperm.slane %v4176_v18, %v11005_v51  ;;  %4267 = vrot.lane.b32.xlu0 %v3856_v12, %s9653_s19  ;;  %v2658_v56 = vsel %vm2654_vm3, %v2359_v8, %v8792_v28  ;;  %2758 = vmatpush.msra.mxu3 %v2688_v1  ;;  %v4172_v21 = vperm.slane %v4164_v48, %v11005_v51  ;;  %v19365_v48 = vld [vmem:[#allocation48_spill] sm:$0xff]  ;;  %v8810_v16 = vpop.permute.xlu2 %8809 }
 0x478   : > { %v4174_v13 = vsel %vm2142_vm11, %v4173_v45, %v4154_v58  ;;  %2728 = vmatmul.f32.gmra.mxu2 %v2658_v56  ;;  %v2195_v22 = vsel %vm2142_vm11, %v2194_v31, %v19357_v7  ;;  %v3883_v50 = vrot.slane %v19358_v44, 4  ;;  %v3896_v9 = vsel %vm2142_vm11, %v19359_v49, %v3895_v20  ;;  %v19366_v31 = vld [vmem:[#allocation47_spill] sm:$0xff]  ;;  %v19369_v49 = vld [vmem:[#allocation66_spill] sm:$0xff] }
 0x479   : > { %v14003_v39 = vperm.slane %v4174_v13, %v11005_v51  ;;  %v4189_v19 = vrot.slane %v4184_v6, 4  ;;  %2759 = vmatpush.msra.mxu3 %v2687_v41  ;;  %v2663_v25 = vsel %vm2654_vm3, %v2195_v22, %v8806_v0  ;;  %v3904_v58 = vperm.slane %v3896_v9, %v11005_v51  ;;  %v19368_v22 = vld [vmem:[#allocation35_spill] sm:$0xff] }
 0x47a   : > { %v2414_v53 = vrot.slane %v19360_v54, 4  ;;  %v8796_v28 = vunpack.i.l.bf16 %v8795_v37  ;;  %2760 = vmatmul.f32.vlgmr.msra.gmra.mxu3 %v2663_v25  ;;  %v3884_v40 = vsel %vm2142_vm11, %v19361_v63, %v3883_v50  ;;  %v4023_v14 = vrot.slane %v4004_v10, 4 }
 0x47b   : > { %v4188_v27 = vsel %vm2142_vm11, %v14003_v39, %v4187_v24  ;;  %v4190_v33 = vsel %vm2142_vm11, %v4189_v19, %v4172_v21  ;;  %v3909_v12 = vrot.slane %v3904_v58, 4  ;;  %v2250_v62 = vrot.slane %v19362_v35, 4  ;;  %v19367_v19 = vld [vmem:[#allocation34_spill] sm:$0xff] }
 0x47c   : > { %4215 = vrot.lane.b32.xlu1 %v4188_v27, %s9652_s26  ;;  %v4063_v61 = vrot.slane %v13709_v59, 4  ;;  %v8807_v46 = vunpack.i.h.bf16 %v13983_v42  ;;  %v4024_v45 = vsel %vm2142_vm11, %v13944_v57, %v4023_v14  ;;  %v3892_v34 = vperm.slane %v3884_v40, %v11005_v51  ;;  %v19364_v57 = vld [vmem:[#allocation31_spill] sm:$0xff]  ;;  %v19372_v14 = vld [vmem:[#allocation64_spill] sm:$0xff] }
 0x47d   : > { %4247 = vrot.lane.b32.xlu2 %v4190_v33, %s9651_s27  ;;  %v2415_v55 = vsel %vm2142_vm11, %v2414_v53, %v19363_v32  ;;  %v2251_v42 = vsel %vm2142_vm11, %v2250_v62, %v19364_v57  ;;  %v4051_v1 = vrot.slane %v13689_v15, 4  ;;  %v2470_v18 = vrot.slane %v19365_v48, 4  ;;  %v19371_v53 = vld [vmem:[#allocation41_spill] sm:$0xff]  ;;  %v19377_v48 = vld [vmem:[#allocation70_spill] sm:$0xff] }
 0x47e   : > { %v2659_v10 = vsel %vm2654_vm3, %v2415_v55, %v8796_v28  ;;  %v4064_v43 = vsel %vm2142_vm11, %v13704_v4, %v4063_v61  ;;  %v3910_v0 = vsel %vm2142_vm11, %v3909_v12, %v3892_v34  ;;  %v3911_v13 = vrot.slane %v3892_v34, 4  ;;  %v19373_v61 = vld [vmem:[#allocation36_spill] sm:$0xff] }
 0x47f   : > { %4273 = vrot.lane.b32.xlu0 %v4024_v45, %s9653_s19  ;;  %v4072_v59 = vperm.slane %v4064_v43, %v11005_v51  ;;  %v2664_v41 = vsel %vm2654_vm3, %v2251_v42, %v8807_v46  ;;  %v8797_v24 = vunpack.i.h.bf16 %v8795_v37  ;;  %v4052_v4 = vsel %vm2142_vm11, %v13660_v5, %v4051_v1  ;;  %v19374_v34 = vld [vmem:[#allocation68_spill] sm:$0xff]  ;;  %v19376_v42 = vld [vmem:[#allocation67_spill] sm:$0xff] }
 0x480   : > { %2731 = vmatmul.f32.gmra.mxu2 %v2659_v10  ;;  %v4191_v8 = vrot.slane %v4172_v21, 4  ;;  %v3912_v56 = vsel %vm2142_vm11, %v3904_v58, %v3911_v13  ;;  %v2306_v60 = vrot.slane %v19366_v31, 4  ;;  %v8811_v15 = vunpack.i.l.bf16 %v8810_v16  ;;  %v8800_v21 = vpop.permute.xlu1 %8799  ;;  %v19370_v58 = vld [vmem:[#allocation18_spill] sm:$0xff] }
 0x481   : > { %v4077_v11 = vrot.slane %v4072_v59, 4  ;;  %v4060_v27 = vperm.slane %v4052_v4, %v11005_v51  ;;  %v2471_v37 = vsel %vm2142_vm11, %v2470_v18, %v19367_v19  ;;  %v2526_v9 = vrot.slane %v19369_v49, 4  ;;  %v19383_v49 = vld [vmem:[#allocation38_spill] sm:$0xff] }
 0x482   : > { %2763 = vmatmul.f32.gmra.mxu3 %v2664_v41  ;;  %v4192_v20 = vsel %vm2142_vm11, %v4184_v6, %v4191_v8  ;;  %v2660_v5 = vsel %vm2654_vm3, %v2471_v37, %v8797_v24  ;;  %v2307_v44 = vsel %vm2142_vm11, %v2306_v60, %v19368_v22  ;;  %v8801_v33 = vunpack.i.l.bf16 %v8800_v21  ;;  %v19379_v8 = vld [vmem:[#allocation73_spill] sm:$0xff]  ;;  %v8820_v37 = vpop.permute.xlu0 %8819  ;;  %v19382_v22 = vld [vmem:[#allocation30_spill] sm:$0xff] }
 0x483   : > { %v4078_v7 = vsel %vm2142_vm11, %v4077_v11, %v4060_v27  ;;  %v4079_v50 = vrot.slane %v4060_v27, 4  ;;  %v2665_v6 = vsel %vm2654_vm3, %v2307_v44, %v8811_v15  ;;  %v4392_v54 = vperm.slane %v19370_v58, 2  ;;  %v19380_v15 = vld [vmem:[#allocation71_spill] sm:$0xff] }
 0x484   : > { %4237 = vrot.lane.b32.xlu1 %v3910_v0, %s9651_s27  ;;  %v2362_v28 = vrot.slane %v19371_v53, 4  ;;  %v8812_v63 = vunpack.i.h.bf16 %v8810_v16  ;;  %v3799_v40 = vrot.slane %v13784_v29, 4  ;;  %v2527_v12 = vsel %vm2142_vm11, %v2526_v9, %v19372_v14  ;;  %v19375_v0 = vld [vmem:[#allocation72_spill] sm:$0xff]  ;;  %v19384_v53 = vld [vmem:[#allocation27_spill] sm:$0xff] }
 0x485   : > { %4269 = vrot.lane.b32.xlu2 %v3912_v56, %s9653_s19  ;;  %v4080_v25 = vsel %vm2142_vm11, %v4072_v59, %v4079_v50  ;;  %v2661_v35 = vsel %vm2654_vm3, %v2527_v12, %v8801_v33  ;;  %v2582_v32 = vrot.slane %v19374_v34, 4  ;;  %v8802_v29 = vunpack.i.h.bf16 %v8800_v21  ;;  %v19385_v14 = vld [vmem:[#allocation20_spill] sm:$0xff] }
 0x486   : > { %v3800_v62 = vsel %vm2142_vm11, %v13760_v36, %v3799_v40  ;;  %v2363_v46 = vsel %vm2142_vm11, %v2362_v28, %v19373_v61  ;;  %v4378_v10 = vperm.slane %v19370_v58, 0  ;;  %v4413_v43 = vperm.slane %v19370_v58, 5 }
 0x487   : > { %4279 = vrot.lane.b32.xlu0 %v4192_v20, %s9653_s19  ;;  %v2666_v45 = vsel %vm2654_vm3, %v2363_v46, %v8812_v63  ;;  %v2418_v36 = vrot.slane %v19375_v0, 4  ;;  %v3967_v57 = vrot.slane %v13878_v47, 4  ;;  %v2583_v1 = vsel %vm2142_vm11, %v2582_v32, %v19376_v42  ;;  %v19378_v47 = vld [vmem:[#allocation19_spill] sm:$0xff] }
 0x488   : > { %2734 = vmatmul.f32.gmra.mxu2 %v2660_v5  ;;  %v8815_v55 = vpop.permute.xlu1 %8814  ;;  %v2662_v13 = vsel %vm2654_vm3, %v2583_v1, %v8802_v29  ;;  %v4399_v16 = vperm.slane %v19370_v58, 3  ;;  %v4434_v4 = vperm.slane %v19378_v47, 0  ;;  %v2474_v56 = vrot.slane %v19379_v8, 4  ;;  %v19381_v5 = vld [vmem:[#allocation39_spill] sm:$0xff] }
 0x489   : > { %v8816_v59 = vunpack.i.l.bf16 %v8815_v55  ;;  %v3968_v41 = vsel %vm2142_vm11, %v13866_v17, %v3967_v57  ;;  %v2419_v18 = vsel %vm2142_vm11, %v2418_v36, %v19377_v48  ;;  %v8817_v11 = vunpack.i.h.bf16 %v8815_v55  ;;  %v19386_v36 = vld [vmem:[#allocation21_spill] sm:$0xff] }
 0x48a   : > { %2766 = vmatmul.f32.gmra.mxu3 %v2665_v6  ;;  %v4135_v31 = vrot.slane %v13934_v2, 4  ;;  %v4129_v17 = vrot.slane %v13859_v30, 4  ;;  %v2475_v20 = vsel %vm2142_vm11, %v2474_v56, %v19380_v15  ;;  %v4420_v2 = vperm.slane %v19370_v58, 6  ;;  %v14135_v32 = vpop.permute.xlu0 %4205 }
 0x48b   : > { %v2667_v24 = vsel %vm2654_vm3, %v2419_v18, %v8816_v59  ;;  %v2668_v19 = vsel %vm2654_vm3, %v2475_v20, %v8817_v11  ;;  %v4455_v30 = vperm.slane %v19378_v47, 3  ;;  %v8821_v21 = vunpack.i.l.bf16 %v8820_v37 }
 0x48c   : > { %4243 = vrot.lane.b32.xlu1 %v4078_v7, %s9651_s27  ;;  %v4136_v60 = vsel %vm2142_vm11, %v13930_v23, %v4135_v31  ;;  %v14106_v27 = vsel %vm2142_vm11, %v4129_v17, %v13849_v3  ;;  %v2530_v23 = vrot.slane %v19381_v5, 4  ;;  %v4385_v7 = vperm.slane %v19370_v58, 1 }
 0x48d   : > { %4275 = vrot.lane.b32.xlu2 %v4080_v25, %s9653_s19  ;;  %v4441_v50 = vperm.slane %v19378_v47, 1  ;;  %v4476_v6 = vperm.slane %v19378_v47, 6  ;;  %v2586_v9 = vrot.slane %v19383_v49, 4  ;;  %v8822_v33 = vunpack.i.h.bf16 %v8820_v37  ;;  %v14119_v25 = vpop.permute.xlu2 %4201 }
 0x48e   : > { %v2531_v3 = vsel %vm2142_vm11, %v2530_v23, %v19382_v22  ;;  %v4462_v40 = vperm.slane %v19378_v47, 4  ;;  %v4497_v12 = vperm.slane %v19385_v14, 1  ;;  %v4483_v61 = vperm.slane %v19378_v47, 7 }
 0x48f   : > { %4397 = vperm.xlu0 %8782, %v4392_v54   ;;  %v2669_v44 = vsel %vm2654_vm3, %v2531_v3, %v8821_v21  ;;  %v4406_v54 = vperm.slane %v19370_v58, 4  ;;  %v2587_v28 = vsel %vm2142_vm11, %v2586_v9, %v19384_v53  ;;  %v4518_v46 = vperm.slane %v19385_v14, 4 }
 0x490   : > { %2737 = vmatmul.f32.gmra.mxu2 %v2661_v35  ;;  %v2670_v63 = vsel %vm2654_vm3, %v2587_v28, %v8822_v33  ;;  %v4448_v34 = vperm.slane %v19378_v47, 2  ;;  %v4504_v29 = vperm.slane %v19385_v14, 2  ;;  %v4539_v55 = vperm.slane %v19385_v14, 7 }
 0x491   : > { %v4525_v0 = vperm.slane %v19385_v14, 5  ;;  %v4560_v59 = vperm.slane %v19386_v36, 2  ;;  %v4490_v42 = vperm.slane %v19385_v14, 0  ;;  %v4511_v18 = vperm.slane %v19385_v14, 3 }
 0x492   : > { %2769 = vmatmul.f32.gmra.mxu3 %v2666_v45  ;;  %v4532_v11 = vperm.slane %v19385_v14, 6  ;;  %v4574_v21 = vperm.slane %v19386_v36, 4  ;;  %v4595_v9 = vperm.slane %v19386_v36, 7  ;;  %vm18821_vm0 = vcmask 261120  }
 0x493   : > { %vm18820_vm12 = vcmask 785408   ;;  %vm5466_vm15 = vcmask 1043968  }
 0x494   : > { %4265 = vrot.lane.b32.xlu1 %v3800_v62, %s9653_s19  ;;  %v4427_v62 = vperm.slane %v19370_v58, 7 }
 0x495   : > { %4383 = vperm.xlu2 %8781, %v4378_v10   ;;  %v14127_v35 = vpop.permute.xlu2 %4207  ;;  %v4469_v10 = vperm.slane %v19378_v47, 5  ;;  %v4567_v47 = vperm.slane %v19386_v36, 3 }
 0x497   : > { %4418 = vperm.xlu0 %8782, %v4413_v43  }
 0x498   : > { %2740 = vmatmul.f32.gmra.mxu2 %v2662_v13  ;;  %v4546_v13 = vperm.slane %v19386_v36, 0 }
 0x49a   : > { %2772 = vmatmul.f32.gmra.mxu3 %v2667_v24 }
 0x49c   : > { %4271 = vrot.lane.b32.xlu1 %v3968_v41, %s9653_s19  ;;  %v4581_v41 = vperm.slane %v19386_v36, 5 }
 0x49d   : > { %4404 = vperm.xlu2 %8781, %v4399_v16   ;;  %v14158_v16 = vpop.permute.xlu1 %4203 }
 0x49f   : > { %4439 = vperm.xlu0 %8782, %v4434_v4   ;;  %v19387_v4 = vld [vmem:[#allocation22_spill] sm:$0xff] }
 0x4a0   : > { %v4602_v8 = vperm.slane %v19387_v4, 0  ;;  %v4623_v15 = vperm.slane %v19387_v4, 3  ;;  %v4644_v5 = vperm.slane %v19387_v4, 6  ;;  %v4651_v53 = vperm.slane %v19387_v4, 7 }
 0x4a2   : > { %2775 = vmatmul.f32.gmra.mxu3 %v2668_v19  ;;  %v4553_v19 = vperm.slane %v19386_v36, 1 }
 0x4a4   : > { %4277 = vrot.lane.b32.xlu1 %v4136_v60, %s9653_s19  ;;  %v4588_v60 = vperm.slane %v19386_v36, 6 }
 0x4a5   : > { %4425 = vperm.xlu2 %8781, %v4420_v2  }
 0x4a7   : > { %4460 = vperm.xlu0 %8782, %v4455_v30   ;;  %v4609_v30 = vperm.slane %v19387_v4, 1 }
 0x4aa   : > { %2778 = vmatmul.f32.gmra.mxu3 %v2669_v44  ;;  %v4630_v44 = vperm.slane %v19387_v4, 4 }
 0x4ac   : > { %4390 = vperm.xlu1 %8780, %v4385_v7  }
 0x4ad   : > { %4446 = vperm.xlu2 %8781, %v4441_v50   ;;  %v19388_v50 = vld [vmem:[#allocation23_spill] sm:$0xff] }
 0x4ae   : > { %v4686_v14 = vperm.slane %v19388_v50, 4 }
 0x4af   : > { %4481 = vperm.xlu0 %8782, %v4476_v6   ;;  %v4665_v6 = vperm.slane %v19388_v50, 1 }
 0x4b2   : > { %2781 = vmatmul.f32.gmra.mxu3 %v2670_v63  ;;  %v19389_v63 = vld [vmem:[#allocation44_spill] sm:$0xff] }
 0x4b3   : > { %v14167_v17 = vpop.permute.xlu1 %4209 }
 0x4b4   : > { %4411 = vperm.xlu1 %8780, %v4406_v54  }
 0x4b5   : > { %4467 = vperm.xlu2 %8781, %v4462_v40   ;;  %v3793_v40 = vrot.slane %v19389_v63, 4 }
 0x4b7   : > { %4502 = vperm.xlu0 %8782, %v4497_v12  }
 0x4bc   : > { %4432 = vperm.xlu1 %8780, %v4427_v62  }
 0x4bd   : > { %4488 = vperm.xlu2 %8781, %v4483_v61   ;;  %v4616_v61 = vperm.slane %v19387_v4, 2 }
 0x4bf   : > { %v14132_v45 = vpop.permute.xlu2 %4213  ;;  %4523 = vperm.xlu0 %8782, %v4518_v46   ;;  %v19390_v46 = vld [vmem:[#allocation50_spill] sm:$0xff] }
 0x4c4   : > { %4453 = vperm.xlu1 %8780, %v4448_v34   ;;  %v3794_v34 = vsel %vm2142_vm11, %v3793_v40, %v19390_v46 }
 0x4c5   : > { %4509 = vperm.xlu2 %8781, %v4504_v29   ;;  %v19391_v29 = vld [vmem:[#allocation57_spill] sm:$0xff] }
 0x4c7   : > { %v14139_v58 = vpop.permute.xlu2 %4235  ;;  %4544 = vperm.xlu0 %8782, %v4539_v55   ;;  %v3849_v55 = vrot.slane %v19391_v29, 4 }
 0x4c8   : > { %v14142_v43 = vpop.permute.xlu0 %4211 }
 0x4cc   : > { %4474 = vperm.xlu1 %8780, %v4469_v10   ;;  %v2720_v22 = vpop.f32.mrf.mxu2 }
 0x4cd   : > { %4530 = vperm.xlu2 %8781, %v4525_v0   ;;  %v4290_v0 = vsel %vm18821_vm0, %v3794_v34, %v14119_v25  ;;  %v4707_v25 = vperm.slane %v19388_v50, 7  ;;  %v9393_v34 = vld [vmem:[%s9825_s16] sm:$0xff] }
 0x4cf   : > { %v14146_v57 = vpop.permute.xlu2 %4241  ;;  %4565 = vperm.xlu0 %8782, %v4560_v59  }
 0x4d0   : > { %v14149_v1 = vpop.permute.xlu0 %4233 }
 0x4d1   : > { %v4298_v36 = vsel %vm2654_vm3, %v4290_v0, %v14149_v1  ;;  %v14220_v1 = vld [vmem:[%s18596_s5] ss:$0 sm:$0xff]  ;;  %v19395_v0 = vld [vmem:[#allocation24_spill] sm:$0xff] }
 0x4d4   : > { %4495 = vperm.xlu1 %8780, %v4490_v42   ;;  %v2723_v28 = vpop.f32.mrf.mxu2  ;;  %v14210_v42 = vld [vmem:[%s18595_s4] ss:$0 sm:$0xff] }
 0x4d5   : > { %4551 = vperm.xlu2 %8781, %v4546_v13  }
 0x4d7   : > { %4586 = vperm.xlu0 %8782, %v4581_v41   ;;  %v14153_v48 = vpop.permute.xlu2 %4247  ;;  %v4672_v41 = vperm.slane %v19388_v50, 2 }
 0x4d8   : > { %v14156_v24 = vpop.permute.xlu0 %4239 }
 0x4dc   : > { %4516 = vperm.xlu1 %8780, %v4511_v18  }
 0x4dd   : > { %4572 = vperm.xlu2 %8781, %v4567_v47  }
 0x4df   : > { %4607 = vperm.xlu0 %8782, %v4602_v8   ;;  %v14162_v56 = vpop.permute.xlu2 %4269  ;;  %v19392_v8 = vld [vmem:[#allocation56_spill] sm:$0xff] }
 0x4e1   : > { %v14165_v31 = vpop.permute.xlu0 %4245 }
 0x4e4   : > { %4537 = vperm.xlu1 %8780, %v4532_v11   ;;  %v3850_v11 = vsel %vm2142_vm11, %v3849_v55, %v19392_v8 }
 0x4e5   : > { %4593 = vperm.xlu2 %8781, %v4588_v60  }
 0x4e7   : > { %4628 = vperm.xlu0 %8782, %v4623_v15   ;;  %v14171_v20 = vpop.permute.xlu2 %4275  ;;  %v4291_v15 = vsel %vm18821_vm0, %v3850_v11, %v14158_v16  ;;  %v19396_v11 = vld [vmem:[#allocation82_spill] sm:$0xff] }
 0x4e9   : > { %v4268_v37 = vpop.permute.xlu0 %4267 }
 0x4ec   : > { %4558 = vperm.xlu1 %8780, %v4553_v19   ;;  %v19393_v19 = vld [vmem:[#allocation61_spill] sm:$0xff] }
 0x4ed   : > { %4614 = vperm.xlu2 %8781, %v4609_v30   ;;  %v3905_v30 = vrot.slane %v19393_v19, 4 }
 0x4ee   : > { %v14174_v2 = vpop.permute.xlu1 %4215 }
 0x4ef   : > { %4649 = vperm.xlu0 %8782, %v4644_v5   ;;  %v14178_v23 = vpop.permute.xlu2 %4383 }
 0x4f1   : > { %v14181_v7 = vpop.permute.xlu0 %4273 }
 0x4f3   : > { %v2726_v18 = vpop.f32.mrf.mxu2 }
 0x4f4   : > { %4579 = vperm.xlu1 %8780, %v4574_v21   ;;  %v4299_v21 = vsel %vm2654_vm3, %v4291_v15, %v14139_v58 }
 0x4f5   : > { %4635 = vperm.xlu2 %8781, %v4630_v44  }
 0x4f6   : > { %v4238_v3 = vpop.permute.xlu1 %4237 }
 0x4f7   : > { %4670 = vperm.xlu0 %8782, %v4665_v6   ;;  %v14185_v49 = vpop.permute.xlu2 %4404 }
 0x4f9   : > { %v14188_v33 = vpop.permute.xlu0 %4279 }
 0x4fc   : > { %4600 = vperm.xlu1 %8780, %v4595_v9   ;;  %v4637_v9 = vperm.slane %v19387_v4, 5 }
 0x4fd   : > { %4656 = vperm.xlu2 %8781, %v4651_v53   ;;  %v2761_v12 = vpop.f32.mrf.mxu3  ;;  %v4308_v53 = vsel %vm18820_vm12, %v4299_v21, %v4268_v37 }
 0x4fe   : > { %v14190_v54 = vpop.permute.xlu1 %4243  ;;  %v2762_v59 = vadd.f32 %v2761_v12, %v2720_v22 }
 0x4ff   : > { %4691 = vperm.xlu0 %8782, %v4686_v14   ;;  %v14195_v62 = vpop.permute.xlu2 %4425  ;;  %v19394_v14 = vld [vmem:[#allocation60_spill] sm:$0xff] }
 0x500   : > { %v3906_v58 = vsel %vm2142_vm11, %v3905_v30, %v19394_v14 }
 0x501   : > { %v14201_v10 = vpop.permute.xlu0 %4397  ;;  %v4292_v4 = vsel %vm18821_vm0, %v3906_v58, %v14135_v32 }
 0x502   : > { %v4300_v37 = vsel %vm2654_vm3, %v4292_v4, %v4238_v3 }
 0x503   : > { %v4309_v8 = vsel %vm18820_vm12, %v4300_v37, %v14162_v56  ;;  %v4017_v37 = vrot.slane %v13541_v26, 4  ;;  %v19399_v26 = vld [vmem:[#allocation25_spill] sm:$0xff] }
 0x504   : > { %4621 = vperm.xlu1 %8780, %v4616_v61  }
 0x505   : > { %4677 = vperm.xlu2 %8781, %v4672_v41   ;;  %v2764_v5 = vpop.f32.mrf.mxu3 }
 0x506   : > { %v4266_v13 = vpop.permute.xlu1 %4265  ;;  %v2765_v6 = vadd.f32 %v2764_v5, %v2723_v28  ;;  %v4693_v28 = vperm.slane %v19388_v50, 5 }
 0x507   : > { %v4307_v47 = vsel %vm18820_vm12, %v4298_v36, %v4266_v13  ;;  %4712 = vperm.xlu0 %8782, %v4707_v25   ;;  %v14228_v44 = vpop.permute.xlu2 %4446  ;;  %v4728_v36 = vperm.slane %v19395_v0, 2  ;;  %v3961_v25 = vrot.slane %v19396_v11, 4  ;;  %v4700_v11 = vperm.slane %v19388_v50, 6 }
 0x508   : > { %v4315_v60 = vmul.f32 %v4307_v47, %v2762_v59  ;;  %v4316_v40 = vmul.f32 %v4308_v53, %v2765_v6  ;;  %v2729_v59 = vpop.f32.mrf.mxu2  ;;  %v4658_v47 = vperm.slane %v19388_v50, 0 }
 0x509   : > { %v14233_v16 = vpop.permute.xlu0 %4418 }
 0x50a   : > { %v4326_v22 = vmul.f32 %v14210_v42, %v4315_v60  ;;  %v4327_v61 = vmul.f32 %v14210_v42, %v4316_v40  ;;  %v9394_v60 = vld [vmem:[%s9825_s16 + $0x8] sm:$0xff] }
 0x50c   : > { %v4337_v63 = vadd.f32 %v14220_v1, %v4326_v22  ;;  %4642 = vperm.xlu1 %8780, %v4637_v9   ;;  %v4338_v55 = vadd.f32 %v14220_v1, %v4327_v61  ;;  %v19397_v22 = vld [vmem:[#allocation81_spill] sm:$0xff]  ;;  %v4749_v9 = vperm.slane %v19395_v0, 5  ;;  %v4679_v61 = vperm.slane %v19388_v50, 3 }
 0x50d   : > { %4698 = vperm.xlu2 %8781, %v4693_v28   ;;  %v2767_v13 = vpop.f32.mrf.mxu3  ;;  %v3962_v6 = vsel %vm2142_vm11, %v3961_v25, %v19397_v22  ;;  %v19400_v25 = vld [vmem:[#allocation46_spill] sm:$0xff] }
 0x50e   : > { %v4345_v12 = vmax.f32 %v4337_v63, 0.0  ;;  %v4272_v46 = vpop.permute.xlu1 %4271  ;;  %v4346_v41 = vmax.f32 %v4338_v55, 0.0  ;;  %v2768_v3 = vadd.f32 %v2767_v13, %v2726_v18  ;;  %v4714_v18 = vperm.slane %v19395_v0, 0  ;;  %v19398_v13 = vld [vmem:[#allocation86_spill] sm:$0xff] }
 0x50f   : > { %4733 = vperm.xlu0 %8782, %v4728_v36   ;;  %v14249_v32 = vpop.permute.xlu2 %4467  ;;  %v4293_v53 = vsel %vm18821_vm0, %v3962_v6, %v14127_v35  ;;  %v9396_v6 = vld [vmem:[%s9825_s16 + $0x18] sm:$0xff] }
 0x510   : > { %v4353_v29 = vadd.f32 %v9393_v34, %v4345_v12  ;;  %v4354_v15 = vadd.f32 %v9394_v60, %v4346_v41  ;;  %v4317_v30 = vmul.f32 %v4309_v8, %v2768_v3  ;;  %v4301_v40 = vsel %vm2654_vm3, %v4293_v53, %v14156_v24  ;;  %v2732_v28 = vpop.f32.mrf.mxu2  ;;  %v9395_v34 = vld [vmem:[%s9825_s16 + $0x10] sm:$0xff]  ;;  %v19401_v53 = vld [vmem:[#allocation51_spill] sm:$0xff] }
 0x511   : > { %v14256_v19 = vpop.permute.xlu0 %4439  ;;  %v4310_v4 = vsel %vm18820_vm12, %v4301_v40, %v4272_v46  ;;  %v4018_v41 = vsel %vm2142_vm11, %v4017_v37, %v19398_v13  ;;  %v4770_v3 = vperm.slane %v19399_v26, 0  ;;  %v4073_v60 = vrot.slane %v19400_v25, 4 }
 0x512   : > { %4361 = vst [vmem:[%s14246_s18] sm:$0xff] %v4353_v29  ;;  %v4328_v5 = vmul.f32 %v14210_v42, %v4317_v30  ;;  %v4296_v25 = vsel %vm18821_vm0, %v14106_v27, %v14132_v45  ;;  %v9398_v27 = vld [vmem:[%s9825_s16 + $0x28] sm:$0xff] }
 0x513   : > { %4362 = vst [vmem:[%s14246_s18 + $0x8] sm:$0xff] %v4354_v15 }
 0x514   : > { %4663 = vperm.xlu1 %8780, %v4658_v47   ;;  %v4339_v56 = vadd.f32 %v14220_v1, %v4328_v5  ;;  %v4294_v47 = vsel %vm18821_vm0, %v4018_v41, %v14167_v17 }
 0x515   : > { %4719 = vperm.xlu2 %8781, %v4714_v18   ;;  %v2770_v63 = vpop.f32.mrf.mxu3  ;;  %v4302_v15 = vsel %vm2654_vm3, %v4294_v47, %v14146_v57 }
 0x516   : > { %v14260_v21 = vpop.permute.xlu1 %4277  ;;  %v4347_v14 = vmax.f32 %v4339_v56, 0.0  ;;  %v2771_v12 = vadd.f32 %v2770_v63, %v2729_v59  ;;  %v4735_v59 = vperm.slane %v19395_v0, 3  ;;  %v4311_v22 = vsel %vm18820_vm12, %v4302_v15, %v14181_v7 }
 0x517   : > { %4754 = vperm.xlu0 %8782, %v4749_v9   ;;  %v14271_v58 = vpop.permute.xlu2 %4488  ;;  %v4074_v63 = vsel %vm2142_vm11, %v4073_v60, %v19401_v53  ;;  %v4185_v60 = vrot.slane %v14003_v39, 4 }
 0x518   : > { %v4355_v29 = vadd.f32 %v9395_v34, %v4347_v14  ;;  %v4318_v55 = vmul.f32 %v4310_v4, %v2771_v12  ;;  %v2735_v50 = vpop.f32.mrf.mxu2  ;;  %v4756_v14 = vperm.slane %v19395_v0, 6  ;;  %v4295_v7 = vsel %vm18821_vm0, %v4074_v63, %v14142_v43 }
 0x519   : > { %v14277_v35 = vpop.permute.xlu0 %4460  ;;  %v4303_v12 = vsel %vm2654_vm3, %v4295_v7, %v14190_v54  ;;  %v4186_v63 = vsel %vm2142_vm11, %v4185_v60, %v13993_v52  ;;  %v4798_v7 = vperm.slane %v19399_v26, 4  ;;  %v4763_v52 = vperm.slane %v19395_v0, 7 }
 0x51a   : > { %4363 = vst [vmem:[%s14246_s18 + $0x10] sm:$0xff] %v4355_v29  ;;  %v4329_v24 = vmul.f32 %v14210_v42, %v4318_v55  ;;  %v4721_v55 = vperm.slane %v19395_v0, 1  ;;  %v4312_v43 = vsel %vm18820_vm12, %v4303_v12, %v14171_v20  ;;  %v4812_v20 = vperm.slane %v19399_v26, 6 }
 0x51b   : > { %v4784_v60 = vperm.slane %v19399_v26, 2 }
 0x51c   : > { %4684 = vperm.xlu1 %8780, %v4679_v61   ;;  %v4340_v46 = vadd.f32 %v14220_v1, %v4329_v24  ;;  %v9397_v24 = vld [vmem:[%s9825_s16 + $0x20] sm:$0xff] }
 0x51d   : > { %4740 = vperm.xlu2 %8781, %v4735_v59   ;;  %v2773_v8 = vpop.f32.mrf.mxu3 }
 0x51e   : > { %v14281_v36 = vpop.permute.xlu1 %4390  ;;  %v4348_v30 = vmax.f32 %v4340_v46, 0.0  ;;  %v2774_v18 = vadd.f32 %v2773_v8, %v2732_v28  ;;  %v4791_v28 = vperm.slane %v19399_v26, 3  ;;  %v14328_v8 = vld [vmem:[%s9833_s17 + $0x40] sm:$0xff] }
 0x51f   : > { %4775 = vperm.xlu0 %8782, %v4770_v3   ;;  %v14294_v5 = vpop.permute.xlu2 %4509  ;;  %v4777_v3 = vperm.slane %v19399_v26, 1 }
 0x520   : > { %v4356_v56 = vadd.f32 %v9396_v6, %v4348_v30  ;;  %v4319_v9 = vmul.f32 %v4311_v22, %v2774_v18  ;;  %v2738_v47 = vpop.f32.mrf.mxu2  ;;  %v4742_v30 = vperm.slane %v19395_v0, 4  ;;  %v4304_v18 = vsel %vm2654_vm3, %v4296_v25, %v14165_v31 }
 0x521   : > { %v14299_v17 = vpop.permute.xlu0 %4481 }
 0x522   : > { %4364 = vst [vmem:[%s14246_s18 + $0x18] sm:$0xff] %v4356_v56  ;;  %v4330_v57 = vmul.f32 %v14210_v42, %v4319_v9  ;;  %v5090_v9 = vrot.slane %v14328_v8, 1 }
 0x524   : > { %4705 = vperm.xlu1 %8780, %v4700_v11   ;;  %v4341_v61 = vadd.f32 %v14220_v1, %v4330_v57 }
 0x525   : > { %4761 = vperm.xlu2 %8781, %v4756_v14   ;;  %v2776_v4 = vpop.f32.mrf.mxu3  ;;  %v5147_v14 = vperm.slane %v5090_v9, 0  ;;  %v14388_v9 = vld [vmem:[%s9833_s17 + $0x48] sm:$0xff] }
 0x526   : > { %v14305_v40 = vpop.permute.xlu1 %4411  ;;  %v4349_v37 = vmax.f32 %v4341_v61, 0.0  ;;  %v2777_v29 = vadd.f32 %v2776_v4, %v2735_v50  ;;  %v4313_v50 = vsel %vm18820_vm12, %v4304_v18, %v14260_v21  ;;  %v4297_v21 = vsel %vm18821_vm0, %v4186_v63, %v14174_v2 }
 0x527   : > { %4796 = vperm.xlu0 %8782, %v4791_v28   ;;  %v14314_v34 = vpop.permute.xlu2 %4530  ;;  %v4305_v4 = vsel %vm2654_vm3, %v4297_v21, %v14153_v48  ;;  %v5146_v21 = vperm.slane %v14328_v8, 0 }
 0x528   : > { %v4357_v54 = vadd.f32 %v9397_v24, %v4349_v37  ;;  %v4320_v13 = vmul.f32 %v4312_v43, %v2777_v29  ;;  %v2741_v61 = vpop.f32.mrf.mxu2  ;;  %v5093_v43 = vrot.slane %v14328_v8, 4  ;;  %v4314_v2 = vsel %vm18820_vm12, %v4305_v4, %v14188_v33  ;;  %v9399_v24 = vld [vmem:[%s9825_s16 + $0x30] sm:$0xff] }
 0x529   : > { %v14320_v59 = vpop.permute.xlu0 %4502  ;;  %v5091_v33 = vrot.slane %v14328_v8, 2 }
 0x52a   : > { %4365 = vst [vmem:[%s14246_s18 + $0x20] sm:$0xff] %v4357_v54  ;;  %v4331_v41 = vmul.f32 %v14210_v42, %v4320_v13 }
 0x52c   : > { %4726 = vperm.xlu1 %8780, %v4721_v55   ;;  %v4342_v11 = vadd.f32 %v14220_v1, %v4331_v41 }
 0x52d   : > { %4782 = vperm.xlu2 %8781, %v4777_v3   ;;  %v2779_v15 = vpop.f32.mrf.mxu3  ;;  %v5150_v3 = vperm.slane %v5093_v43, 0  ;;  %v5099_v43 = vrot.slane %v14388_v9, 3 }
 0x52e   : > { %v14324_v46 = vpop.permute.xlu1 %4432  ;;  %v4350_v22 = vmax.f32 %v4342_v11, 0.0  ;;  %v2780_v56 = vadd.f32 %v2779_v15, %v2738_v47  ;;  %v4819_v47 = vperm.slane %v19399_v26, 7  ;;  %v9400_v15 = vld [vmem:[%s9825_s16 + $0x38] sm:$0xff] }
 0x52f   : > { %4817 = vperm.xlu0 %8782, %v4812_v20   ;;  %v14339_v6 = vpop.permute.xlu2 %4551 }
 0x530   : > { %v4358_v45 = vadd.f32 %v9398_v27, %v4350_v22  ;;  %v4321_v53 = vmul.f32 %v4313_v50, %v2780_v56  ;;  %v5148_v22 = vperm.slane %v5091_v33, 0  ;;  %v5094_v50 = vrot.slane %v14328_v8, 5 }
 0x531   : > { %v14345_v39 = vpop.permute.xlu0 %4523  ;;  %v5102_v33 = vrot.slane %v14388_v9, 6 }
 0x532   : > { %4366 = vst [vmem:[%s14246_s18 + $0x28] sm:$0xff] %v4358_v45  ;;  %v4332_v31 = vmul.f32 %v14210_v42, %v4321_v53  ;;  %v4805_v45 = vperm.slane %v19399_v26, 5  ;;  %v5098_v53 = vrot.slane %v14388_v9, 2  ;;  %v5101_v26 = vrot.slane %v14388_v9, 5 }
 0x534   : > { %4747 = vperm.xlu1 %8780, %v4742_v30   ;;  %v4343_v12 = vadd.f32 %v14220_v1, %v4332_v31  ;;  %v5151_v31 = vperm.slane %v5094_v50, 0 }
 0x535   : > { %4803 = vperm.xlu2 %8781, %v4798_v7   ;;  %v2782_v28 = vpop.f32.mrf.mxu3  ;;  %v5156_v7 = vperm.slane %v5098_v53, 0 }
 0x536   : > { %v14351_v57 = vpop.permute.xlu1 %4453  ;;  %v4351_v37 = vmax.f32 %v4343_v12, 0.0  ;;  %v2783_v55 = vadd.f32 %v2782_v28, %v2741_v61  ;;  %v5154_v28 = vperm.slane %v14388_v9, 0 }
 0x537   : > { %5212 = vrot.lane.b32.xlu0 %v5147_v14, %s9651_s27  ;;  %v14361_v29 = vpop.permute.xlu2 %4572 }
 0x538   : > { %v4359_v54 = vadd.f32 %v9399_v24, %v4351_v37  ;;  %v4322_v0 = vmul.f32 %v4314_v2, %v2783_v55  ;;  %v5159_v37 = vperm.slane %v5101_v26, 0  ;;  %v14420_v24 = vld [vmem:[%s9833_s17 + $0x50] sm:$0xff] }
 0x539   : > { %v14367_v13 = vpop.permute.xlu0 %4544  ;;  %v5104_v50 = vrot.slane %v14420_v24, 1 }
 0x53a   : > { %4367 = vst [vmem:[%s14246_s18 + $0x30] sm:$0xff] %v4359_v54  ;;  %v4333_v48 = vmul.f32 %v14210_v42, %v4322_v0  ;;  %v5096_v42 = vrot.slane %v14328_v8, 7  ;;  %v5157_v0 = vperm.slane %v5099_v43, 0 }
 0x53c   : > { %4768 = vperm.xlu1 %8780, %v4763_v52   ;;  %v4344_v11 = vadd.f32 %v14220_v1, %v4333_v48  ;;  %v5153_v56 = vperm.slane %v5096_v42, 0  ;;  %v5092_v52 = vrot.slane %v14328_v8, 3  ;;  %v5095_v48 = vrot.slane %v14328_v8, 6 }
 0x53d   : > { %4824 = vperm.xlu2 %8781, %v4819_v47   ;;  %v5162_v47 = vperm.slane %v14420_v24, 0  ;;  %v5160_v8 = vperm.slane %v5102_v33, 0 }
 0x53e   : > { %v14371_v41 = vpop.permute.xlu1 %4474  ;;  %v4352_v20 = vmax.f32 %v4344_v11, 0.0  ;;  %v5149_v55 = vperm.slane %v5092_v52, 0  ;;  %v5152_v11 = vperm.slane %v5095_v48, 0  ;;  %v14454_v52 = vld [vmem:[%s9833_s17 + $0x58] sm:$0xff] }
 0x53f   : > { %5218 = vrot.lane.b32.xlu0 %v5150_v3, %s9651_s27  ;;  %v14377_v25 = vpop.permute.xlu2 %4593  ;;  %v5111_v43 = vrot.slane %v14454_v52, 1 }
 0x540   : > { %v4360_v30 = vadd.f32 %v9400_v15, %v4352_v20  ;;  %v5106_v20 = vrot.slane %v14420_v24, 3  ;;  %v5097_v15 = vrot.slane %v14388_v9, 1 }
 0x541   : > { %v14382_v18 = vpop.permute.xlu0 %4565  ;;  %v5171_v33 = vperm.slane %v5111_v43, 0 }
 0x542   : > { %19402 = vst [vmem:[#allocation33_spill] sm:$0xff] %v14382_v18 }
 0x543   : > { %4368 = vst [vmem:[%s14246_s18 + $0x38] sm:$0xff] %v4360_v30 }
 0x544   : > { %4789 = vperm.xlu1 %8780, %v4784_v60  }
 0x545   : > { %5214 = vrot.lane.b32.xlu2 %v5148_v22, %s9651_s27  ;;  %v5165_v22 = vperm.slane %v5106_v20, 0 }
 0x546   : > { %v14385_v1 = vpop.permute.xlu1 %4495 }
 0x547   : > { %5224 = vrot.lane.b32.xlu0 %v5153_v56, %s9651_s27  ;;  %v14393_v27 = vpop.permute.xlu2 %4614  ;;  %v5155_v56 = vperm.slane %v5097_v15, 0  ;;  %v5110_v15 = vrot.slane %v14420_v24, 7 }
 0x549   : > { %v14397_v63 = vpop.permute.xlu0 %4586 }
 0x54a   : > { %19403 = vst [vmem:[#allocation52_spill] sm:$0xff] %v14397_v63 }
 0x54c   : > { %4810 = vperm.xlu1 %8780, %v4805_v45   ;;  %v5109_v45 = vrot.slane %v14420_v24, 6 }
 0x54d   : > { %5220 = vrot.lane.b32.xlu2 %v5151_v31, %s9651_s27  ;;  %v5163_v31 = vperm.slane %v5104_v50, 0  ;;  %v5169_v50 = vperm.slane %v5110_v15, 0  ;;  %v14491_v15 = vld [vmem:[%s9833_s17 + $0x60] sm:$0xff] }
 0x54e   : > { %v14399_v14 = vpop.permute.xlu1 %4516  ;;  %v5178_v51 = vperm.slane %v14491_v15, 0 }
 0x54f   : > { %5230 = vrot.lane.b32.xlu0 %v5156_v7, %s9651_s27  ;;  %v14404_v12 = vpop.permute.xlu2 %4635  ;;  %v5100_v7 = vrot.slane %v14388_v9, 4 }
 0x550   : > { %19404 = vst [vmem:[#allocation65_spill] sm:$0xff] %v14404_v12 }
 0x551   : > { %v14407_v61 = vpop.permute.xlu0 %4607 }
 0x552   : > { %19405 = vst [vmem:[#allocation59_spill] sm:$0xff] %v14407_v61 }
 0x554   : > { %5210 = vrot.lane.b32.xlu1 %v5146_v21, %s9651_s27 }
 0x555   : > { %5226 = vrot.lane.b32.xlu2 %v5154_v28, %s9651_s27  ;;  %v5168_v28 = vperm.slane %v5109_v45, 0 }
 0x556   : > { %v14412_v4 = vpop.permute.xlu1 %4537 }
 0x557   : > { %5236 = vrot.lane.b32.xlu0 %v5159_v37, %s9651_s27  ;;  %v14417_v2 = vpop.permute.xlu2 %4656  ;;  %v5158_v37 = vperm.slane %v5100_v7, 0 }
 0x558   : > { %19406 = vst [vmem:[#allocation83_spill] sm:$0xff] %v14417_v2 }
 0x559   : > { %v14422_v54 = vpop.permute.xlu0 %4628 }
 0x55a   : > { %19407 = vst [vmem:[#allocation62_spill] sm:$0xff] %v14422_v54 }
 0x55c   : > { %5216 = vrot.lane.b32.xlu1 %v5149_v55, %s9651_s27  ;;  %v5107_v55 = vrot.slane %v14420_v24, 4 }
 0x55d   : > { %5232 = vrot.lane.b32.xlu2 %v5157_v0, %s9651_s27 }
 0x55e   : > { %v14426_v3 = vpop.permute.xlu1 %4558  ;;  %v5166_v48 = vperm.slane %v5107_v55, 0  ;;  %v5117_v55 = vrot.slane %v14454_v52, 7 }
 0x55f   : > { %5242 = vrot.lane.b32.xlu0 %v5162_v47, %s9651_s27  ;;  %v14435_v42 = vpop.permute.xlu2 %4677  ;;  %v5103_v47 = vrot.slane %v14388_v9, 7  ;;  %v5105_v9 = vrot.slane %v14420_v24, 2 }
 0x560   : > { %19409 = vst [vmem:[#allocation78_spill] sm:$0xff] %v14435_v42 }
 0x561   : > { %v14433_v60 = vpop.permute.xlu0 %4649  ;;  %v5164_v7 = vperm.slane %v5105_v9, 0  ;;  %v5119_v9 = vrot.slane %v14491_v15, 2 }
 0x562   : > { %19408 = vst [vmem:[#allocation80_spill] sm:$0xff] %v14433_v60 }
 0x564   : > { %5222 = vrot.lane.b32.xlu1 %v5152_v11, %s9651_s27 }
 0x565   : > { %5238 = vrot.lane.b32.xlu2 %v5160_v8, %s9651_s27  ;;  %v5161_v8 = vperm.slane %v5103_v47, 0  ;;  %v5108_v47 = vrot.slane %v14420_v24, 5 }
 0x566   : > { %v14439_v30 = vpop.permute.xlu1 %4579 }
 0x567   : > { %5248 = vrot.lane.b32.xlu0 %v5165_v22, %s9651_s27  ;;  %v14449_v21 = vpop.permute.xlu2 %4698  ;;  %v5114_v22 = vrot.slane %v14454_v52, 4 }
 0x568   : > { %19411 = vst [vmem:[#allocation49_spill] sm:$0xff] %v14449_v21 }
 0x569   : > { %v14445_v53 = vpop.permute.xlu0 %4670 }
 0x56a   : > { %19410 = vst [vmem:[#allocation79_spill] sm:$0xff] %v14445_v53 }
 0x56c   : > { %5228 = vrot.lane.b32.xlu1 %v5155_v56, %s9651_s27 }
 0x56d   : > { %5244 = vrot.lane.b32.xlu2 %v5163_v31, %s9651_s27  ;;  %v5174_v31 = vperm.slane %v5114_v22, 0  ;;  %v5167_v22 = vperm.slane %v5108_v47, 0  ;;  %v5122_v47 = vrot.slane %v14491_v15, 5 }
 0x56e   : > { %v14451_v26 = vpop.permute.xlu1 %4600 }
 0x56f   : > { %19412 = vst [vmem:[#allocation32_spill] sm:$0xff] %v14451_v26  ;;  %5254 = vrot.lane.b32.xlu0 %v5168_v28, %s9651_s27  ;;  %v14466_v20 = vpop.permute.xlu2 %4719  ;;  %v5112_v28 = vrot.slane %v14454_v52, 2  ;;  %v5183_v38 = vperm.slane %v5122_v47, 0 }
 0x570   : > { %19415 = vst [vmem:[#allocation75_spill] sm:$0xff] %v14466_v20 }
 0x571   : > { %v14460_v0 = vpop.permute.xlu0 %4691 }
 0x572   : > { %19413 = vst [vmem:[#allocation55_spill] sm:$0xff] %v14460_v0 }
 0x574   : > { %5234 = vrot.lane.b32.xlu1 %v5158_v37, %s9651_s27 }
 0x575   : > { %5250 = vrot.lane.b32.xlu2 %v5166_v48, %s9651_s27  ;;  %v5172_v48 = vperm.slane %v5112_v28, 0 }
 0x576   : > { %v14464_v11 = vpop.permute.xlu1 %4621 }
 0x577   : > { %19414 = vst [vmem:[#allocation42_spill] sm:$0xff] %v14464_v11  ;;  %5260 = vrot.lane.b32.xlu0 %v5171_v33, %s9651_s27  ;;  %v14480_v37 = vpop.permute.xlu2 %4740 }
 0x578   : > { %19418 = vst [vmem:[#allocation84_spill] sm:$0xff] %v14480_v37 }
 0x579   : > { %v14472_v56 = vpop.permute.xlu0 %4712 }
 0x57a   : > { %19416 = vst [vmem:[#allocation85_spill] sm:$0xff] %v14472_v56 }
 0x57c   : > { %5240 = vrot.lane.b32.xlu1 %v5161_v8, %s9651_s27  ;;  %v5177_v8 = vperm.slane %v5117_v55, 0  ;;  %v5180_v55 = vperm.slane %v5119_v9, 0 }
 0x57d   : > { %5256 = vrot.lane.b32.xlu2 %v5169_v50, %s9651_s27  ;;  %v5115_v50 = vrot.slane %v14454_v52, 5 }
 0x57e   : > { %v14476_v45 = vpop.permute.xlu1 %4642 }
 0x57f   : > { %19417 = vst [vmem:[#allocation74_spill] sm:$0xff] %v14476_v45  ;;  %5266 = vrot.lane.b32.xlu0 %v5174_v31, %s9651_s27  ;;  %v14497_v31 = vpop.permute.xlu2 %4761  ;;  %v5175_v24 = vperm.slane %v5115_v50, 0 }
 0x580   : > { %19421 = vst [vmem:[#allocation37_spill] sm:$0xff] %v14497_v31 }
 0x581   : > { %v14484_v43 = vpop.permute.xlu0 %4733 }
 0x582   : > { %19419 = vst [vmem:[#allocation77_spill] sm:$0xff] %v14484_v43  ;;  %v5116_v43 = vrot.slane %v14454_v52, 6 }
 0x584   : > { %5246 = vrot.lane.b32.xlu1 %v5164_v7, %s9651_s27 }
 0x585   : > { %5262 = vrot.lane.b32.xlu2 %v5172_v48, %s9651_s27  ;;  %v5170_v48 = vperm.slane %v14454_v52, 0 }
 0x586   : > { %v14488_v33 = vpop.permute.xlu1 %4663 }
 0x587   : > { %19420 = vst [vmem:[#allocation76_spill] sm:$0xff] %v14488_v33  ;;  %5272 = vrot.lane.b32.xlu0 %v5177_v8, %s9651_s27  ;;  %v14513_v50 = vpop.permute.xlu2 %4782 }
 0x588   : > { %19425 = vst [vmem:[#allocation58_spill] sm:$0xff] %v14513_v50 }
 0x589   : > { %v14499_v7 = vpop.permute.xlu0 %4754 }
 0x58a   : > { %19422 = vst [vmem:[#allocation63_spill] sm:$0xff] %v14499_v7  ;;  %v14521_v7 = vld [vmem:[%s9833_s17 + $0x68] sm:$0xff] }
 0x58b   : > { %v5186_v47 = vperm.slane %v14521_v7, 0 }
 0x58c   : > { %5252 = vrot.lane.b32.xlu1 %v5167_v22, %s9651_s27  ;;  %v5113_v22 = vrot.slane %v14454_v52, 3 }
 0x58d   : > { %5268 = vrot.lane.b32.xlu2 %v5175_v24, %s9651_s27 }
 0x58e   : > { %v14502_v28 = vpop.permute.xlu1 %4684  ;;  %v5173_v24 = vperm.slane %v5113_v22, 0  ;;  %v5127_v22 = vrot.slane %v14521_v7, 3 }
 0x58f   : > { %19423 = vst [vmem:[#allocation40_spill] sm:$0xff] %v14502_v28  ;;  %5278 = vrot.lane.b32.xlu0 %v5180_v55, %s9651_s27  ;;  %v5120_v55 = vrot.slane %v14491_v15, 3  ;;  %v14530_v50 = vpop.permute.xlu2 %4803 }
 0x590   : > { %19429 = vst [vmem:[#allocation69_spill] sm:$0xff] %v14530_v50  ;;  %v5189_v50 = vperm.slane %v5127_v22, 0 }
 0x591   : > { %v14508_v8 = vpop.permute.xlu0 %4775 }
 0x592   : > { %19424 = vst [vmem:[#allocation53_spill] sm:$0xff] %v14508_v8 }
 0x594   : > { %5258 = vrot.lane.b32.xlu1 %v5170_v48, %s9651_s27  ;;  %v5181_v48 = vperm.slane %v5120_v55, 0 }
 0x595   : > { %5274 = vrot.lane.b32.xlu2 %v5178_v51, %s9651_s27  ;;  %v5176_v51 = vperm.slane %v5116_v43, 0 }
 0x596   : > { %v14515_v9 = vpop.permute.xlu1 %4705 }
 0x597   : > { %19426 = vst [vmem:[#allocation43_spill] sm:$0xff] %v14515_v9  ;;  %5284 = vrot.lane.b32.xlu0 %v5183_v38, %s9651_s27  ;;  %v5123_v38 = vrot.slane %v14491_v15, 6  ;;  %v14544_v0 = vpop.permute.xlu2 %4824 }
 0x598   : > { %19432 = vst [vmem:[#allocation47_spill] sm:$0xff] %v14544_v0  ;;  %v5128_v0 = vrot.slane %v14521_v7, 4 }
 0x599   : > { %v14523_v8 = vpop.permute.xlu0 %4796  ;;  %v5184_v52 = vperm.slane %v5123_v38, 0  ;;  %v5121_v38 = vrot.slane %v14491_v15, 4 }
 0x59a   : > { %19427 = vst [vmem:[#allocation54_spill] sm:$0xff] %v14523_v8 }
 0x59c   : > { %5264 = vrot.lane.b32.xlu1 %v5173_v24, %s9651_s27  ;;  %v5118_v24 = vrot.slane %v14491_v15, 1 }
 0x59d   : > { %5280 = vrot.lane.b32.xlu2 %v5181_v48, %s9651_s27  ;;  %v5125_v48 = vrot.slane %v14521_v7, 1 }
 0x59e   : > { %v14527_v56 = vpop.permute.xlu1 %4726  ;;  %v5179_v43 = vperm.slane %v5118_v24, 0  ;;  %v5182_v24 = vperm.slane %v5121_v38, 0  ;;  %v5131_v38 = vrot.slane %v14521_v7, 7 }
 0x59f   : > { %19428 = vst [vmem:[#allocation29_spill] sm:$0xff] %v14527_v56  ;;  %5290 = vrot.lane.b32.xlu0 %v5186_v47, %s9651_s27  ;;  %v5130_v47 = vrot.slane %v14521_v7, 6  ;;  %v14561_v31 = vpop.permute.xlu2 %5214 }
 0x5a1   : > { %v14536_v8 = vpop.permute.xlu0 %4817  ;;  %v5192_v22 = vperm.slane %v5130_v47, 0  ;;  %v5124_v47 = vrot.slane %v14491_v15, 7 }
 0x5a2   : > { %19430 = vst [vmem:[#allocation31_spill] sm:$0xff] %v14536_v8 }
 0x5a4   : > { %5270 = vrot.lane.b32.xlu1 %v5176_v51, %s9651_s27  ;;  %v5187_v51 = vperm.slane %v5125_v48, 0  ;;  %v5190_v48 = vperm.slane %v5128_v0, 0  ;;  %v5126_v0 = vrot.slane %v14521_v7, 2 }
 0x5a5   : > { %5286 = vrot.lane.b32.xlu2 %v5184_v52, %s9651_s27  ;;  %v14555_v52 = vld [vmem:[%s9833_s17 + $0x70] sm:$0xff] }
 0x5a6   : > { %v14540_v55 = vpop.permute.xlu1 %4747 }
 0x5a7   : > { %19431 = vst [vmem:[#allocation48_spill] sm:$0xff] %v14540_v55  ;;  %5296 = vrot.lane.b32.xlu0 %v5189_v50, %s9651_s27  ;;  %v5132_v50 = vrot.slane %v14555_v52, 1  ;;  %v14577_v15 = vpop.permute.xlu2 %5220 }
 0x5a9   : > { %v14548_v8 = vpop.permute.xlu0 %5212  ;;  %v5195_v56 = vperm.slane %v5132_v50, 0 }
 0x5ac   : > { %5276 = vrot.lane.b32.xlu1 %v5179_v43, %s9651_s27 }
 0x5ad   : > { %5292 = vrot.lane.b32.xlu2 %v5187_v51, %s9651_s27  ;;  %v5185_v51 = vperm.slane %v5124_v47, 0  ;;  %v5188_v47 = vperm.slane %v5126_v0, 0  ;;  %v5136_v0 = vrot.slane %v14555_v52, 5 }
 0x5ae   : > { %v14552_v55 = vpop.permute.xlu1 %4768 }
 0x5af   : > { %19433 = vst [vmem:[#allocation34_spill] sm:$0xff] %v14552_v55  ;;  %5302 = vrot.lane.b32.xlu0 %v5192_v22, %s9651_s27  ;;  %v5135_v22 = vrot.slane %v14555_v52, 4  ;;  %v14592_v60 = vpop.permute.xlu2 %5226 }
 0x5b1   : > { %v14563_v43 = vpop.permute.xlu0 %5218 }
 0x5b4   : > { %5282 = vrot.lane.b32.xlu1 %v5182_v24, %s9651_s27  ;;  %v5193_v24 = vperm.slane %v5131_v38, 0  ;;  %v5129_v38 = vrot.slane %v14521_v7, 5 }
 0x5b5   : > { %5298 = vrot.lane.b32.xlu2 %v5190_v48, %s9651_s27  ;;  %v5198_v48 = vperm.slane %v5135_v22, 0  ;;  %v8676_v22 = vld [vmem:[%s9833_s17 + $0x78] sm:$0xff]  ;;  %s8534_s17 = sshll.u32 %s8531_s2, 4  ;;  %s8535_s17 = int_to_ptr.hbm [resolvable:$true] %s8534_s17 }
 0x5b6   : > { %v14567_v55 = vpop.permute.xlu1 %4789  ;;  %v5141_v54 = vrot.slane %v8676_v22, 3  ;;  %v5144_v61 = vrot.slane %v8676_v22, 6  ;;  %v5139_v42 = vrot.slane %v8676_v22, 1 }
 0x5b7   : > { %19434 = vst [vmem:[#allocation35_spill] sm:$0xff] %v14567_v55  ;;  %5308 = vrot.lane.b32.xlu0 %v5195_v56, %s9651_s27  ;;  %v5133_v56 = vrot.slane %v14555_v52, 2  ;;  %v5138_v55 = vrot.slane %v14555_v52, 7  ;;  %v14604_v28 = vpop.permute.xlu2 %5232 }
 0x5b9   : > { %v14573_v53 = vpop.permute.xlu0 %5224 }
 0x5bc   : > { %5288 = vrot.lane.b32.xlu1 %v5185_v51, %s9651_s27  ;;  %v5196_v51 = vperm.slane %v5133_v56, 0 }
 0x5bd   : > { %5304 = vrot.lane.b32.xlu2 %v5193_v24, %s9651_s27  ;;  %v5191_v24 = vperm.slane %v5129_v38, 0  ;;  %v5134_v38 = vrot.slane %v14555_v52, 3 }
 0x5be   : > { %v14579_v50 = vpop.permute.xlu1 %4810 }
 0x5bf   : > { %19435 = vst [vmem:[#allocation66_spill] sm:$0xff] %v14579_v50  ;;  %5314 = vrot.lane.b32.xlu0 %v5198_v48, %s9651_s27  ;;  %v5201_v50 = vperm.slane %v5138_v55, 0  ;;  %v5140_v48 = vrot.slane %v8676_v22, 2  ;;  %v5194_v55 = vperm.slane %v14555_v52, 0  ;;  %v14615_v21 = vpop.permute.xlu2 %5238 }
 0x5c1   : > { %v14587_v37 = vpop.permute.xlu0 %5230  ;;  %v5204_v56 = vperm.slane %v5140_v48, 0  ;;  %v5197_v48 = vperm.slane %v5134_v38, 0  ;;  %v5208_v38 = vperm.slane %v5144_v61, 0  ;;  %v5145_v61 = vrot.slane %v8676_v22, 7 }
 0x5c4   : > { %5294 = vrot.lane.b32.xlu1 %v5188_v47, %s9651_s27  ;;  %v5199_v47 = vperm.slane %v5136_v0, 0 }
 0x5c5   : > { %5310 = vrot.lane.b32.xlu2 %v5196_v51, %s9651_s27  ;;  %v5143_v51 = vrot.slane %v8676_v22, 5 }
 0x5c6   : > { %v14589_v9 = vpop.permute.xlu1 %5210 }
 0x5c7   : > { %5320 = vrot.lane.b32.xlu0 %v5201_v50, %s9651_s27  ;;  %v5202_v50 = vperm.slane %v8676_v22, 0  ;;  %v5207_v0 = vperm.slane %v5143_v51, 0 }
 0x5c9   : > { %v14600_v20 = vpop.permute.xlu0 %5236 }
 0x5cc   : > { %5300 = vrot.lane.b32.xlu1 %v5191_v24, %s9651_s27 }
 0x5cd   : > { %5316 = vrot.lane.b32.xlu2 %v5199_v47, %s9651_s27 }
 0x5ce   : > { %v14598_v7 = vpop.permute.xlu1 %5216 }
 0x5cf   : > { %5326 = vrot.lane.b32.xlu0 %v5204_v56, %s9651_s27  ;;  %v5205_v56 = vperm.slane %v5141_v54, 0  ;;  %v5203_v54 = vperm.slane %v5139_v42, 0 }
 0x5d1   : > { %v14612_v47 = vpop.permute.xlu0 %5242 }
 0x5d4   : > { %5306 = vrot.lane.b32.xlu1 %v5194_v55, %s9651_s27  ;;  %v5137_v55 = vrot.slane %v14555_v52, 6  ;;  %v5142_v52 = vrot.slane %v8676_v22, 4 }
 0x5d5   : > { %5322 = vrot.lane.b32.xlu2 %v5202_v50, %s9651_s27 }
 0x5d6   : > { %v14609_v24 = vpop.permute.xlu1 %5222  ;;  %v5200_v51 = vperm.slane %v5137_v55, 0  ;;  %v5206_v55 = vperm.slane %v5142_v52, 0 }
 0x5d7   : > { %5332 = vrot.lane.b32.xlu0 %v5207_v0, %s9651_s27  ;;  %v14625_v0 = vpop.permute.xlu2 %5244 }
 0x5d9   : > { %v14622_v50 = vpop.permute.xlu0 %5248 }
 0x5dc   : > { %5312 = vrot.lane.b32.xlu1 %v5197_v48, %s9651_s27 }
 0x5dd   : > { %5328 = vrot.lane.b32.xlu2 %v5205_v56, %s9651_s27 }
 0x5de   : > { %v14619_v33 = vpop.permute.xlu1 %5228 }
 0x5df   : > { %v14633_v56 = vpop.permute.xlu2 %5250 }
 0x5e1   : > { %v14631_v48 = vpop.permute.xlu0 %5254 }
 0x5e4   : > { %5318 = vrot.lane.b32.xlu1 %v5200_v51, %s9651_s27  ;;  %v19436_v51 = vld [vmem:[#allocation26_spill] sm:$0xff] }
 0x5e5   : > { %5334 = vrot.lane.b32.xlu2 %v5208_v38, %s9651_s27  ;;  %v4826_v2 = vadd.f32 %v14178_v23, %v19436_v51  ;;  %v5209_v38 = vperm.slane %v5145_v61, 0  ;;  %v4829_v52 = vadd.f32 %v14185_v49, %v19436_v51  ;;  %v4827_v61 = vadd.f32 %v14281_v36, %v19436_v51 }
 0x5e6   : > { %v14627_v45 = vpop.permute.xlu1 %5234  ;;  %v4832_v49 = vadd.f32 %v14195_v62, %v19436_v51  ;;  %v4830_v36 = vadd.f32 %v14305_v40, %v19436_v51  ;;  %v4835_v62 = vadd.f32 %v14228_v44, %v19436_v51 }
 0x5e7   : > { %v4954_v42 = vmul.f32 0.2, %v4826_v2  ;;  %v14642_v18 = vpop.permute.xlu2 %5256  ;;  %vm4890_vm14 = vcmp.gt.f32.partialorder %v4826_v2, 0.0  ;;  %v4957_v23 = vmul.f32 0.2, %v4829_v52  ;;  %vm4893_vm5 = vcmp.gt.f32.partialorder %v4829_v52, 0.0 }
 0x5e8   : > { %19437 = vst [vmem:[#allocation18_spill] sm:$0xff] %v14642_v18  ;;  %vm4891_vm4 = vcmp.gt.f32.partialorder %v4827_v61, 0.0  ;;  %vm4896_vm6 = vcmp.gt.f32.partialorder %v4832_v49, 0.0  ;;  %vm4894_vm8 = vcmp.gt.f32.partialorder %v4830_v36, 0.0  ;;  %vm4899_vm7 = vcmp.gt.f32.partialorder %v4835_v62, 0.0 }
 0x5e9   : > { %v14640_v11 = vpop.permute.xlu0 %5260  ;;  %v5018_v12 = vsel %vm4890_vm14, %v4826_v2, %v4954_v42  ;;  %v4955_v2 = vmul.f32 0.2, %v4827_v61  ;;  %v4960_v42 = vmul.f32 0.2, %v4832_v49 }
 0x5ea   : > { %v14650_v22 = vadd.f32 %v14589_v9, %v5018_v12  ;;  %v5021_v12 = vsel %vm4893_vm5, %v4829_v52, %v4957_v23  ;;  %v4958_v23 = vmul.f32 0.2, %v4830_v36 }
 0x5eb   : > { %v14665_v9 = vadd.f32 %v14598_v7, %v5021_v12  ;;  %v5024_v7 = vsel %vm4896_vm6, %v4832_v49, %v4960_v42  ;;  %v4838_v42 = vadd.f32 %v14249_v32, %v19436_v51  ;;  %v4836_v32 = vadd.f32 %v14351_v57, %v19436_v51 }
 0x5ec   : > { %5324 = vrot.lane.b32.xlu1 %v5203_v54, %s9651_s27  ;;  %19438 = vst [vmem:[#allocation41_spill] sm:$0xff] %v14650_v22  ;;  %v5467_v18 = vsel %vm5466_vm15, %v14650_v22, -inf  ;;  %v14681_v40 = vadd.f32 %v14609_v24, %v5024_v7 }
 0x5ed   : > { %vm4902_vm1 = vcmp.gt.f32.partialorder %v4838_v42, 0.0  ;;  %vm4900_vm13 = vcmp.gt.f32.partialorder %v4836_v32, 0.0 }
 0x5ee   : > { %v14635_v63 = vpop.permute.xlu1 %5240  ;;  %v5485_v44 = vsel %vm5466_vm15, %v14681_v40, -inf }
 0x5ef   : > { %v14658_v26 = vpop.permute.xlu2 %5262 }
 0x5f0   : > { %19440 = vst [vmem:[#allocation36_spill] sm:$0xff] %v14658_v26 }
 0x5f4   : > { %5330 = vrot.lane.b32.xlu1 %v5206_v55, %s9651_s27  ;;  %v14652_v55 = vpop.permute.xlu0 %5266 }
 0x5f5   : > { %19439 = vst [vmem:[#allocation64_spill] sm:$0xff] %v14652_v55  ;;  %v5019_v55 = vsel %vm4891_vm4, %v4827_v61, %v4955_v2  ;;  %v5022_v2 = vsel %vm4894_vm8, %v4830_v36, %v4958_v23 }
 0x5f6   : > { %v14644_v54 = vpop.permute.xlu1 %5246  ;;  %v14674_v26 = vadd.f32 %v14548_v8, %v5019_v55  ;;  %v4963_v8 = vmul.f32 0.2, %v4835_v62  ;;  %v4833_v55 = vadd.f32 %v14324_v46, %v19436_v51  ;;  %v14692_v49 = vadd.f32 %v14563_v43, %v5022_v2 }
 0x5f7   : > { %v14678_v52 = vpop.permute.xlu2 %5268  ;;  %v4828_v46 = vadd.f32 %v14201_v10, %v19436_v51  ;;  %v4966_v2 = vmul.f32 0.2, %v4838_v42 }
 0x5f8   : > { %19441 = vst [vmem:[#allocation68_spill] sm:$0xff] %v14674_v26  ;;  %v5470_v12 = vsel %vm5466_vm15, %v14674_v26, -inf  ;;  %v4961_v7 = vmul.f32 0.2, %v4833_v55  ;;  %vm4897_vm9 = vcmp.gt.f32.partialorder %v4833_v55, 0.0  ;;  %v5479_v43 = vsel %vm5466_vm15, %v14692_v49, -inf }
 0x5f9   : > { %vm4892_vm10 = vcmp.gt.f32.partialorder %v4828_v46, 0.0 }
 0x5fc   : > { %5336 = vrot.lane.b32.xlu1 %v5209_v38, %s9651_s27  ;;  %v14669_v22 = vpop.permute.xlu0 %5272 }
 0x5fe   : > { %v14660_v38 = vpop.permute.xlu1 %5252 }
 0x5ff   : > { %v14703_v36 = vpop.permute.xlu2 %5274 }
 0x601   : > { %5468 = vmax.xlane.f32.xlu0 %v5467_v18  ;;  %v5476_v18 = vsel %vm5466_vm15, %v14665_v9, -inf }
 0x604   : > { %v14694_v24 = vpop.permute.xlu0 %5278 }
 0x606   : > { %v14683_v61 = vpop.permute.xlu1 %5258 }
 0x609   : > { %5477 = vmax.xlane.f32.xlu0 %v5476_v18  ;;  %v5027_v18 = vsel %vm4899_vm7, %v4835_v62, %v4963_v8  ;;  %v5025_v62 = vsel %vm4897_vm9, %v4833_v55, %v4961_v7  ;;  %v4956_v8 = vmul.f32 0.2, %v4828_v46  ;;  %v4831_v55 = vadd.f32 %v14233_v16, %v19436_v51 }
 0x60a   : > { %v14714_v10 = vadd.f32 %v14573_v53, %v5025_v62 }
 0x60b   : > { %v5020_v7 = vsel %vm4892_vm10, %v4828_v46, %v4956_v8  ;;  %v4959_v46 = vmul.f32 0.2, %v4831_v55  ;;  %vm4895_vm5 = vcmp.gt.f32.partialorder %v4831_v55, 0.0 }
 0x60c   : > { %v14721_v57 = vpop.permute.xlu0 %5284  ;;  %v5488_v53 = vsel %vm5466_vm15, %v14714_v10, -inf  ;;  %v14728_v62 = vadd.f32 %v14561_v31, %v5020_v7  ;;  %v4834_v7 = vadd.f32 %v14256_v19, %v19436_v51 }
 0x60e   : > { %5471 = vmax.xlane.f32.xlu2 %v5470_v12  ;;  %v14699_v12 = vadd.f32 %v14619_v33, %v5027_v18  ;;  %v14707_v23 = vpop.permute.xlu1 %5264  ;;  %v5030_v18 = vsel %vm4902_vm1, %v4838_v42, %v4966_v2  ;;  %v14730_v42 = vpop.permute.xlu2 %5280  ;;  %v5473_v31 = vsel %vm5466_vm15, %v14728_v62, -inf  ;;  %vm4898_vm8 = vcmp.gt.f32.partialorder %v4834_v7, 0.0 }
 0x60f   : > { %v14719_v26 = vadd.f32 %v14627_v45, %v5030_v18  ;;  %v4839_v45 = vadd.f32 %v14371_v41, %v19436_v51  ;;  %v4844_v18 = vadd.f32 %v14294_v5, %v19436_v51 }
 0x610   : > { %v5494_v33 = vsel %vm5466_vm15, %v14699_v12, -inf }
 0x611   : > { %5486 = vmax.xlane.f32.xlu0 %v5485_v44  ;;  %v4841_v44 = vadd.f32 %v14271_v58, %v19436_v51  ;;  %v5503_v16 = vsel %vm5466_vm15, %v14719_v26, -inf  ;;  %vm4903_vm4 = vcmp.gt.f32.partialorder %v4839_v45, 0.0  ;;  %v4972_v5 = vmul.f32 0.2, %v4844_v18 }
 0x612   : > { %vm4908_vm6 = vcmp.gt.f32.partialorder %v4844_v18, 0.0 }
 0x613   : > { %v4969_v58 = vmul.f32 0.2, %v4841_v44  ;;  %vm4905_vm14 = vcmp.gt.f32.partialorder %v4841_v44, 0.0 }
 0x615   : > { %v5033_v41 = vsel %vm4905_vm14, %v4841_v44, %v4969_v58  ;;  %v4842_v44 = vadd.f32 %v14385_v1, %v19436_v51  ;;  %v4847_v1 = vadd.f32 %v14314_v34, %v19436_v51  ;;  %v4845_v34 = vadd.f32 %v14399_v14, %v19436_v51 }
 0x616   : > { %5480 = vmax.xlane.f32.xlu2 %v5479_v43  ;;  %v4964_v43 = vmul.f32 0.2, %v4836_v32 }
 0x617   : > { %vm4906_vm7 = vcmp.gt.f32.partialorder %v4842_v44, 0.0  ;;  %vm4911_vm9 = vcmp.gt.f32.partialorder %v4847_v1, 0.0  ;;  %vm4909_vm10 = vcmp.gt.f32.partialorder %v4845_v34, 0.0 }
 0x618   : > { %v5028_v2 = vsel %vm4900_vm13, %v4836_v32, %v4964_v43  ;;  %v4967_v32 = vmul.f32 0.2, %v4839_v45  ;;  %v14746_v43 = vadd.f32 %v14635_v63, %v5033_v41  ;;  %v4970_v41 = vmul.f32 0.2, %v4842_v44 }
 0x619   : > { %5495 = vmax.xlane.f32.xlu0 %v5494_v33  ;;  %v14734_v33 = vpop.permute.xlu1 %5270  ;;  %v14739_v8 = vadd.f32 %v14587_v37, %v5028_v2 }
 0x61a   : > { %v5031_v63 = vsel %vm4903_vm4, %v4839_v45, %v4967_v32  ;;  %v5512_v19 = vsel %vm5466_vm15, %v14746_v43, -inf  ;;  %v5036_v45 = vsel %vm4908_vm6, %v4844_v18, %v4972_v5  ;;  %v5034_v18 = vsel %vm4906_vm7, %v4842_v44, %v4970_v41 }
 0x61b   : > { %v5497_v37 = vsel %vm5466_vm15, %v14739_v8, -inf  ;;  %v14762_v58 = vadd.f32 %v14600_v20, %v5031_v63  ;;  %v14773_v32 = vadd.f32 %v14644_v54, %v5036_v45  ;;  %v4837_v20 = vadd.f32 %v14277_v35, %v19436_v51 }
 0x61c   : > { %v14789_v5 = vadd.f32 %v14612_v47, %v5034_v18  ;;  %v4840_v47 = vadd.f32 %v14299_v17, %v19436_v51 }
 0x61d   : > { %v5521_v35 = vsel %vm5466_vm15, %v14773_v32, -inf  ;;  %vm4901_vm1 = vcmp.gt.f32.partialorder %v4837_v20, 0.0 }
 0x61e   : > { %5489 = vmax.xlane.f32.xlu2 %v5488_v53  ;;  %v5023_v53 = vsel %vm4895_vm5, %v4831_v55, %v4959_v46  ;;  %v4962_v55 = vmul.f32 0.2, %v4834_v7  ;;  %v14764_v46 = vpop.permute.xlu2 %5286  ;;  %vm4904_vm14 = vcmp.gt.f32.partialorder %v4840_v47, 0.0 }
 0x61f   : > { %v14753_v2 = vadd.f32 %v14577_v15, %v5023_v53 }
 0x620   : > { %v5026_v53 = vsel %vm4898_vm8, %v4834_v7, %v4962_v55  ;;  %v4965_v7 = vmul.f32 0.2, %v4837_v20  ;;  %v4850_v55 = vadd.f32 %v14339_v6, %v19436_v51 }
 0x621   : > { %5504 = vmax.xlane.f32.xlu0 %v5503_v16  ;;  %v14755_v16 = vpop.permute.xlu0 %5290  ;;  %v14766_v15 = vpop.permute.xlu1 %5276  ;;  %v14780_v63 = vadd.f32 %v14592_v60, %v5026_v53 }
 0x622   : > { %v5029_v53 = vsel %vm4901_vm1, %v4837_v20, %v4965_v7  ;;  %vm4914_vm13 = vcmp.gt.f32.partialorder %v4850_v55, 0.0  ;;  %v4853_v7 = vadd.f32 %v14361_v29, %v19436_v51 }
 0x623   : > { %v5491_v60 = vsel %vm5466_vm15, %v14780_v63, -inf  ;;  %v14807_v6 = vadd.f32 %v14604_v28, %v5029_v53 }
 0x624   : > { %vm4917_vm4 = vcmp.gt.f32.partialorder %v4853_v7, 0.0 }
 0x625   : > { %v5500_v28 = vsel %vm5466_vm15, %v14807_v6, -inf }
 0x626   : > { %5474 = vmax.xlane.f32.xlu1 %v5473_v31  ;;  %5498 = vmax.xlane.f32.xlu2 %v5497_v37  ;;  %v5482_v31 = vsel %vm5466_vm15, %v14753_v2, -inf  ;;  %v5506_v37 = vsel %vm5466_vm15, %v14762_v58, -inf  ;;  %v14795_v44 = vpop.permute.xlu2 %5292 }
 0x629   : > { %5513 = vmax.xlane.f32.xlu0 %v5512_v19  ;;  %v4975_v19 = vmul.f32 0.2, %v4847_v1  ;;  %v14784_v54 = vpop.permute.xlu0 %5296  ;;  %v14800_v41 = vpop.permute.xlu1 %5282 }
 0x62b   : > { %v5039_v14 = vsel %vm4911_vm9, %v4847_v1, %v4975_v19  ;;  %v4978_v1 = vmul.f32 0.2, %v4850_v55  ;;  %v4848_v19 = vadd.f32 %v14412_v4, %v19436_v51 }
 0x62c   : > { %v14798_v45 = vadd.f32 %v14660_v38, %v5039_v14 }
 0x62d   : > { %v5042_v4 = vsel %vm4914_vm13, %v4850_v55, %v4978_v1  ;;  %vm4912_vm5 = vcmp.gt.f32.partialorder %v4848_v19, 0.0  ;;  %v4981_v55 = vmul.f32 0.2, %v4853_v7 }
 0x62e   : > { %5483 = vmax.xlane.f32.xlu1 %v5482_v31  ;;  %5507 = vmax.xlane.f32.xlu2 %v5506_v37  ;;  %v4973_v31 = vmul.f32 0.2, %v4845_v34  ;;  %v5515_v37 = vsel %vm5466_vm15, %v14789_v5, -inf  ;;  %v5530_v18 = vsel %vm5466_vm15, %v14798_v45, -inf }
 0x630   : > { %v5037_v38 = vsel %vm4909_vm10, %v4845_v34, %v4973_v31  ;;  %v4976_v34 = vmul.f32 0.2, %v4848_v19  ;;  %v14827_v31 = vpop.permute.xlu2 %5298 }
 0x631   : > { %5522 = vmax.xlane.f32.xlu0 %v5521_v35  ;;  %v4968_v35 = vmul.f32 0.2, %v4840_v47  ;;  %v14814_v17 = vadd.f32 %v14622_v50, %v5037_v38  ;;  %v14816_v20 = vpop.permute.xlu0 %5302  ;;  %v4843_v50 = vadd.f32 %v14320_v59, %v19436_v51  ;;  %v14834_v29 = vpop.permute.xlu1 %5288 }
 0x632   : > { %v5040_v1 = vsel %vm4912_vm5, %v4848_v19, %v4976_v34 }
 0x633   : > { %v5032_v14 = vsel %vm4904_vm14, %v4840_v47, %v4968_v35  ;;  %v5524_v53 = vsel %vm5466_vm15, %v14814_v17, -inf  ;;  %v4971_v47 = vmul.f32 0.2, %v4843_v50  ;;  %v14841_v38 = vadd.f32 %v14631_v48, %v5040_v1 }
 0x634   : > { %vm4907_vm6 = vcmp.gt.f32.partialorder %v4843_v50, 0.0  ;;  %v5045_v35 = vsel %vm4917_vm4, %v4853_v7, %v4981_v55  ;;  %v4846_v48 = vadd.f32 %v14345_v39, %v19436_v51 }
 0x635   : > { %v14848_v19 = vadd.f32 %v14707_v23, %v5045_v35  ;;  %v5533_v34 = vsel %vm5466_vm15, %v14841_v38, -inf  ;;  %v4854_v23 = vadd.f32 %v14439_v30, %v19436_v51 }
 0x636   : > { %5492 = vmax.xlane.f32.xlu1 %v5491_v60  ;;  %5516 = vmax.xlane.f32.xlu2 %v5515_v37  ;;  %v14823_v60 = vadd.f32 %v14683_v61, %v5042_v4  ;;  %v14832_v37 = vadd.f32 %v14615_v21, %v5032_v14  ;;  %v4851_v61 = vadd.f32 %v14426_v3, %v19436_v51  ;;  %vm4910_vm9 = vcmp.gt.f32.partialorder %v4846_v48, 0.0 }
 0x637   : > { %v5035_v4 = vsel %vm4907_vm6, %v4843_v50, %v4971_v47  ;;  %v5548_v39 = vsel %vm5466_vm15, %v14848_v19, -inf  ;;  %v4974_v50 = vmul.f32 0.2, %v4846_v48  ;;  %vm4918_vm1 = vcmp.gt.f32.partialorder %v4854_v23, 0.0 }
 0x638   : > { %v5539_v59 = vsel %vm5466_vm15, %v14823_v60, -inf  ;;  %v5509_v21 = vsel %vm5466_vm15, %v14832_v37, -inf  ;;  %v4979_v3 = vmul.f32 0.2, %v4851_v61  ;;  %vm4915_vm8 = vcmp.gt.f32.partialorder %v4851_v61, 0.0  ;;  %v14859_v7 = vpop.permute.xlu2 %5304 }
 0x639   : > { %5531 = vmax.xlane.f32.xlu0 %v5530_v18  ;;  %v4856_v18 = vadd.f32 %v14377_v25, %v19436_v51  ;;  %v14857_v14 = vadd.f32 %v14625_v0, %v5035_v4  ;;  %v14863_v55 = vpop.permute.xlu1 %5294  ;;  %v5038_v35 = vsel %vm4910_vm9, %v4846_v48, %v4974_v50 }
 0x63b   : > { %v4984_v25 = vmul.f32 0.2, %v4856_v18  ;;  %vm4920_vm7 = vcmp.gt.f32.partialorder %v4856_v18, 0.0  ;;  %v5518_v0 = vsel %vm5466_vm15, %v14857_v14, -inf }
 0x63d   : > { %v5048_v30 = vsel %vm4920_vm7, %v4856_v18, %v4984_v25  ;;  %v19444_v18 = vld [vmem:[#allocation32_spill] sm:$0xff] }
 0x63e   : > { %5501 = vmax.xlane.f32.xlu1 %v5500_v28  ;;  %5525 = vmax.xlane.f32.xlu2 %v5524_v53  ;;  %v14850_v28 = vpop.permute.xlu0 %5308  ;;  %v5043_v53 = vsel %vm4915_vm8, %v4851_v61, %v4979_v3  ;;  %v4982_v61 = vmul.f32 0.2, %v4854_v23  ;;  %v14875_v47 = vadd.f32 %v14734_v33, %v5048_v30  ;;  %v14882_v3 = vadd.f32 %v14633_v56, %v5038_v35  ;;  %v19445_v25 = vld [vmem:[#allocation64_spill] sm:$0xff] }
 0x63f   : > { %v14868_v1 = vadd.f32 %v14640_v11, %v5043_v53 }
 0x640   : > { %19442 = vst [vmem:[#allocation72_spill] sm:$0xff] %v14875_v47  ;;  %v5046_v33 = vsel %vm4918_vm1, %v4854_v23, %v4982_v61  ;;  %v5527_v50 = vsel %vm5466_vm15, %v14882_v3, -inf }
 0x641   : > { %5540 = vmax.xlane.f32.xlu0 %v5539_v59  ;;  %v4859_v59 = vadd.f32 %v14393_v27, %v19436_v51  ;;  %v5542_v11 = vsel %vm5466_vm15, %v14868_v1, -inf  ;;  %19443 = vst [vmem:[#allocation67_spill] sm:$0xff] %v14882_v3  ;;  %v14891_v53 = vadd.f32 %v19445_v25, %v5046_v33  ;;  %v14895_v56 = vpop.permute.xlu1 %5300  ;;  %v19450_v25 = vld [vmem:[#allocation18_spill] sm:$0xff] }
 0x643   : > { %v4987_v27 = vmul.f32 0.2, %v4859_v59  ;;  %vm4923_vm10 = vcmp.gt.f32.partialorder %v4859_v59, 0.0  ;;  %19446 = vst [vmem:[#allocation70_spill] sm:$0xff] %v14891_v53 }
 0x645   : > { %v5051_v30 = vsel %vm4923_vm10, %v4859_v59, %v4987_v27  ;;  %v19452_v59 = vld [vmem:[#allocation42_spill] sm:$0xff] }
 0x646   : > { %5510 = vmax.xlane.f32.xlu1 %v5509_v21  ;;  %5534 = vmax.xlane.f32.xlu2 %v5533_v34  ;;  %v4849_v21 = vadd.f32 %v14367_v13, %v19436_v51  ;;  %v14884_v4 = vpop.permute.xlu0 %5314  ;;  %v4857_v34 = vadd.f32 %v19444_v18, %v19436_v51  ;;  %v5557_v13 = vsel %vm5466_vm15, %v14875_v47, -inf  ;;  %v14902_v35 = vadd.f32 %v14766_v15, %v5051_v30 }
 0x647   : > { %v4860_v27 = vadd.f32 %v19452_v59, %v19436_v51 }
 0x648   : > { %v4977_v48 = vmul.f32 0.2, %v4849_v21  ;;  %vm4913_vm13 = vcmp.gt.f32.partialorder %v4849_v21, 0.0  ;;  %v4985_v61 = vmul.f32 0.2, %v4857_v34  ;;  %19448 = vst [vmem:[#allocation19_spill] sm:$0xff] %v14902_v35 }
 0x649   : > { %5549 = vmax.xlane.f32.xlu0 %v5548_v39  ;;  %v14893_v39 = vpop.permute.xlu2 %5310  ;;  %vm4921_vm14 = vcmp.gt.f32.partialorder %v4857_v34, 0.0  ;;  %v14929_v59 = vpop.permute.xlu1 %5306  ;;  %vm4924_vm6 = vcmp.gt.f32.partialorder %v4860_v27, 0.0 }
 0x64a   : > { %v5041_v33 = vsel %vm4913_vm13, %v4849_v21, %v4977_v48 }
 0x64b   : > { %v14909_v47 = vadd.f32 %v19450_v25, %v5041_v33 }
 0x64d   : > { %19451 = vst [vmem:[#allocation73_spill] sm:$0xff] %v14909_v47  ;;  %v5536_v30 = vsel %vm5466_vm15, %v14909_v47, -inf  ;;  %v19456_v47 = vld [vmem:[#allocation36_spill] sm:$0xff] }
 0x64e   : > { %5519 = vmax.xlane.f32.xlu1 %v5518_v0  ;;  %5543 = vmax.xlane.f32.xlu2 %v5542_v11  ;;  %v19447_v0 = vld [vmem:[#allocation65_spill] sm:$0xff]  ;;  %v14913_v15 = vpop.permute.xlu0 %5320 }
 0x64f   : > { %v4862_v23 = vadd.f32 %v19447_v0, %v19436_v51  ;;  %v19449_v11 = vld [vmem:[#allocation33_spill] sm:$0xff]  ;;  %v5566_v0 = vsel %vm5466_vm15, %v14902_v35, -inf }
 0x650   : > { %v4852_v18 = vadd.f32 %v19449_v11, %v19436_v51  ;;  %v19453_v11 = vld [vmem:[#allocation83_spill] sm:$0xff] }
 0x651   : > { %5558 = vmax.xlane.f32.xlu0 %v5557_v13  ;;  %v5551_v13 = vsel %vm5466_vm15, %v14891_v53, -inf  ;;  %v4990_v3 = vmul.f32 0.2, %v4862_v23  ;;  %vm4926_vm5 = vcmp.gt.f32.partialorder %v4862_v23, 0.0  ;;  %v4865_v33 = vadd.f32 %v19453_v11, %v19436_v51 }
 0x652   : > { %v4980_v21 = vmul.f32 0.2, %v4852_v18  ;;  %vm4916_vm4 = vcmp.gt.f32.partialorder %v4852_v18, 0.0 }
 0x653   : > { %vm4929_vm8 = vcmp.gt.f32.partialorder %v4865_v33, 0.0 }
 0x656   : > { %5528 = vmax.xlane.f32.xlu1 %v5527_v50  ;;  %5552 = vmax.xlane.f32.xlu2 %v5551_v13  ;;  %v5049_v50 = vsel %vm4921_vm14, %v4857_v34, %v4985_v61  ;;  %v5054_v13 = vsel %vm4926_vm5, %v4862_v23, %v4990_v3  ;;  %v14924_v34 = vpop.permute.xlu2 %5316  ;;  %v4988_v61 = vmul.f32 0.2, %v4860_v27  ;;  %v4993_v3 = vmul.f32 0.2, %v4865_v33  ;;  %v19458_v23 = vld [vmem:[#allocation74_spill] sm:$0xff] }
 0x657   : > { %v14918_v48 = vadd.f32 %v14669_v22, %v5049_v50  ;;  %v14927_v25 = vadd.f32 %v14800_v41, %v5054_v13  ;;  %v19455_v22 = vld [vmem:[#allocation52_spill] sm:$0xff] }
 0x658   : > { %v4855_v50 = vadd.f32 %v19455_v22, %v19436_v51  ;;  %v5052_v41 = vsel %vm4924_vm6, %v4860_v27, %v4988_v61 }
 0x659   : > { %5567 = vmax.xlane.f32.xlu0 %v5566_v0  ;;  %19454 = vst [vmem:[#allocation71_spill] sm:$0xff] %v14927_v25  ;;  %v5044_v0 = vsel %vm4916_vm4, %v4852_v18, %v4980_v21  ;;  %v5560_v35 = vsel %vm5466_vm15, %v14918_v48, -inf  ;;  %v5575_v13 = vsel %vm5466_vm15, %v14927_v25, -inf  ;;  %v14943_v18 = vadd.f32 %v14694_v24, %v5052_v41  ;;  %v14945_v21 = vpop.permute.xlu0 %5326 }
 0x65a   : > { %v14936_v11 = vadd.f32 %v19456_v47, %v5044_v0  ;;  %v4983_v53 = vmul.f32 0.2, %v4855_v50  ;;  %vm4919_vm7 = vcmp.gt.f32.partialorder %v4855_v50, 0.0  ;;  %v5057_v0 = vsel %vm4929_vm8, %v4865_v33, %v4993_v3 }
 0x65b   : > { %v14952_v61 = vadd.f32 %v14834_v29, %v5057_v0  ;;  %v5569_v25 = vsel %vm5466_vm15, %v14943_v18, -inf  ;;  %v19463_v29 = vld [vmem:[#allocation76_spill] sm:$0xff] }
 0x65c   : > { %19457 = vst [vmem:[#allocation39_spill] sm:$0xff] %v14936_v11  ;;  %v5545_v47 = vsel %vm5466_vm15, %v14936_v11, -inf  ;;  %v5047_v41 = vsel %vm4919_vm7, %v4855_v50, %v4983_v53  ;;  %v4866_v3 = vadd.f32 %v19463_v29, %v19436_v51 }
 0x65d   : > { %19460 = vst [vmem:[#allocation30_spill] sm:$0xff] %v14952_v61  ;;  %v14961_v11 = vadd.f32 %v14678_v52, %v5047_v41  ;;  %v5584_v53 = vsel %vm5466_vm15, %v14952_v61, -inf  ;;  %v19467_v61 = vld [vmem:[#allocation62_spill] sm:$0xff] }
 0x65e   : > { %5537 = vmax.xlane.f32.xlu1 %v5536_v30  ;;  %5561 = vmax.xlane.f32.xlu2 %v5560_v35  ;;  %v4863_v30 = vadd.f32 %v19458_v23, %v19436_v51  ;;  %v19459_v35 = vld [vmem:[#allocation78_spill] sm:$0xff]  ;;  %v19461_v23 = vld [vmem:[#allocation59_spill] sm:$0xff]  ;;  %v4994_v29 = vmul.f32 0.2, %v4866_v3  ;;  %vm4930_vm13 = vcmp.gt.f32.partialorder %v4866_v3, 0.0 }
 0x65f   : > { %v4868_v22 = vadd.f32 %v19459_v35, %v19436_v51  ;;  %v4858_v24 = vadd.f32 %v19461_v23, %v19436_v51  ;;  %19462 = vst [vmem:[#allocation38_spill] sm:$0xff] %v14961_v11  ;;  %v14963_v35 = vpop.permute.xlu1 %5312  ;;  %v5554_v52 = vsel %vm5466_vm15, %v14961_v11, -inf }
 0x660   : > { %v4991_v27 = vmul.f32 0.2, %v4863_v30  ;;  %vm4927_vm9 = vcmp.gt.f32.partialorder %v4863_v30, 0.0 }
 0x661   : > { %5576 = vmax.xlane.f32.xlu0 %v5575_v13  ;;  %v14956_v13 = vpop.permute.xlu2 %5322  ;;  %v4996_v33 = vmul.f32 0.2, %v4868_v22  ;;  %vm4932_vm1 = vcmp.gt.f32.partialorder %v4868_v22, 0.0  ;;  %v4986_v50 = vmul.f32 0.2, %v4858_v24  ;;  %vm4922_vm10 = vcmp.gt.f32.partialorder %v4858_v24, 0.0 }
 0x663   : > { %v5060_v41 = vsel %vm4932_vm1, %v4868_v22, %v4996_v33 }
 0x666   : > { %5546 = vmax.xlane.f32.xlu1 %v5545_v47  ;;  %5570 = vmax.xlane.f32.xlu2 %v5569_v25  ;;  %v5055_v47 = vsel %vm4927_vm9, %v4863_v30, %v4991_v27  ;;  %v19465_v25 = vld [vmem:[#allocation49_spill] sm:$0xff]  ;;  %v14977_v30 = vadd.f32 %v14863_v55, %v5060_v41  ;;  %v14979_v27 = vpop.permute.xlu0 %5332  ;;  %v19469_v55 = vld [vmem:[#allocation40_spill] sm:$0xff] }
 0x667   : > { %v14970_v0 = vadd.f32 %v14721_v57, %v5055_v47  ;;  %v4871_v23 = vadd.f32 %v19465_v25, %v19436_v51  ;;  %v4861_v57 = vadd.f32 %v19467_v61, %v19436_v51  ;;  %v5050_v47 = vsel %vm4922_vm10, %v4858_v24, %v4986_v50  ;;  %v14992_v41 = vpop.permute.xlu1 %5318 }
 0x668   : > { %19466 = vst [vmem:[#allocation20_spill] sm:$0xff] %v14977_v30  ;;  %v14986_v11 = vadd.f32 %v14703_v36, %v5050_v47  ;;  %v5058_v25 = vsel %vm4930_vm13, %v4866_v3, %v4994_v29  ;;  %v5593_v61 = vsel %vm5466_vm15, %v14977_v30, -inf  ;;  %v19471_v47 = vld [vmem:[#allocation75_spill] sm:$0xff]  ;;  %v19473_v30 = vld [vmem:[#allocation80_spill] sm:$0xff] }
 0x669   : > { %19464 = vst [vmem:[#allocation27_spill] sm:$0xff] %v14970_v0  ;;  %5585 = vmax.xlane.f32.xlu0 %v5584_v53  ;;  %v5578_v53 = vsel %vm5466_vm15, %v14970_v0, -inf  ;;  %v4999_v22 = vmul.f32 0.2, %v4871_v23  ;;  %v14988_v33 = vpop.permute.xlu2 %5328  ;;  %vm4935_vm14 = vcmp.gt.f32.partialorder %v4871_v23, 0.0  ;;  %v14997_v50 = vadd.f32 %v14755_v16, %v5058_v25 }
 0x66a   : > { %19468 = vst [vmem:[#allocation21_spill] sm:$0xff] %v14986_v11  ;;  %v4989_v24 = vmul.f32 0.2, %v4861_v57  ;;  %vm4925_vm5 = vcmp.gt.f32.partialorder %v4861_v57, 0.0  ;;  %v5563_v36 = vsel %vm5466_vm15, %v14986_v11, -inf  ;;  %v4864_v16 = vadd.f32 %v19473_v30, %v19436_v51 }
 0x66b   : > { %19470 = vst [vmem:[#allocation22_spill] sm:$0xff] %v14997_v50 }
 0x66c   : > { %v5053_v25 = vsel %vm4925_vm5, %v4861_v57, %v4989_v24  ;;  %vm4928_vm8 = vcmp.gt.f32.partialorder %v4864_v16, 0.0 }
 0x66d   : > { %v15013_v11 = vadd.f32 %v14730_v42, %v5053_v25  ;;  %v19477_v25 = vld [vmem:[#allocation84_spill] sm:$0xff] }
 0x66e   : > { %5555 = vmax.xlane.f32.xlu1 %v5554_v52  ;;  %5579 = vmax.xlane.f32.xlu2 %v5578_v53  ;;  %v4869_v52 = vadd.f32 %v19469_v55, %v19436_v51  ;;  %v4874_v53 = vadd.f32 %v19471_v47, %v19436_v51  ;;  %v5063_v55 = vsel %vm4935_vm14, %v4871_v23, %v4999_v22  ;;  %v19475_v22 = vld [vmem:[#allocation43_spill] sm:$0xff] }
 0x66f   : > { %v15004_v29 = vadd.f32 %v14895_v56, %v5063_v55  ;;  %19474 = vst [vmem:[#allocation44_spill] sm:$0xff] %v15013_v11  ;;  %v4992_v55 = vmul.f32 0.2, %v4864_v16  ;;  %v15024_v42 = vpop.permute.xlu1 %5324  ;;  %v5572_v24 = vsel %vm5466_vm15, %v15013_v11, -inf }
 0x670   : > { %v4997_v3 = vmul.f32 0.2, %v4869_v52  ;;  %vm4933_vm4 = vcmp.gt.f32.partialorder %v4869_v52, 0.0  ;;  %v5002_v23 = vmul.f32 0.2, %v4874_v53  ;;  %vm4938_vm6 = vcmp.gt.f32.partialorder %v4874_v53, 0.0 }
 0x671   : > { %5594 = vmax.xlane.f32.xlu0 %v5593_v61  ;;  %19472 = vst [vmem:[#allocation23_spill] sm:$0xff] %v15004_v29  ;;  %v5587_v61 = vsel %vm5466_vm15, %v14997_v50, -inf  ;;  %v5602_v47 = vsel %vm5466_vm15, %v15004_v29, -inf  ;;  %v15022_v57 = vpop.permute.xlu2 %5334  ;;  %v5056_v29 = vsel %vm4928_vm8, %v4864_v16, %v4992_v55 }
 0x672   : > { %v5061_v56 = vsel %vm4933_vm4, %v4869_v52, %v4997_v3  ;;  %v4877_v52 = vadd.f32 %v19477_v25, %v19436_v51  ;;  %v5066_v3 = vsel %vm4938_vm6, %v4874_v53, %v5002_v23  ;;  %v15040_v11 = vadd.f32 %v14764_v46, %v5056_v29  ;;  %v19481_v23 = vld [vmem:[#allocation29_spill] sm:$0xff] }
 0x673   : > { %v15020_v30 = vadd.f32 %v14784_v54, %v5061_v56  ;;  %v19479_v56 = vld [vmem:[#allocation79_spill] sm:$0xff] }
 0x674   : > { %v15006_v0 = vpop.xlane.xlu0 %5468  ;;  %19480 = vst [vmem:[#allocation56_spill] sm:$0xff] %v15040_v11  ;;  %v5005_v53 = vmul.f32 0.2, %v4877_v52  ;;  %vm4941_vm9 = vcmp.gt.f32.partialorder %v4877_v52, 0.0  ;;  %v5581_v46 = vsel %vm5466_vm15, %v15040_v11, -inf }
 0x675   : > { %19476 = vst [vmem:[#allocation50_spill] sm:$0xff] %v15020_v30  ;;  %v5596_v50 = vsel %vm5466_vm15, %v15020_v30, -inf }
 0x676   : > { %5564 = vmax.xlane.f32.xlu1 %v5563_v36  ;;  %5588 = vmax.xlane.f32.xlu2 %v5587_v61  ;;  %v4872_v36 = vadd.f32 %v19475_v22, %v19436_v51  ;;  %v15031_v22 = vadd.f32 %v14929_v59, %v5066_v3 }
 0x678   : > { %v5000_v61 = vmul.f32 0.2, %v4872_v36  ;;  %19478 = vst [vmem:[#allocation57_spill] sm:$0xff] %v15031_v22  ;;  %vm4936_vm7 = vcmp.gt.f32.partialorder %v4872_v36, 0.0  ;;  %v5611_v25 = vsel %vm5466_vm15, %v15031_v22, -inf }
 0x679   : > { %5603 = vmax.xlane.f32.xlu0 %v5602_v47  ;;  %v4867_v47 = vadd.f32 %v19479_v56, %v19436_v51  ;;  %v5069_v56 = vsel %vm4941_vm9, %v4877_v52, %v5005_v53 }
 0x67a   : > { %v5064_v59 = vsel %vm4936_vm7, %v4872_v36, %v5000_v61  ;;  %v15056_v61 = vadd.f32 %v14963_v35, %v5069_v56  ;;  %v19486_v35 = vld [vmem:[#allocation48_spill] sm:$0xff] }
 0x67b   : > { %v4995_v3 = vmul.f32 0.2, %v4867_v47  ;;  %v15047_v16 = vadd.f32 %v14816_v20, %v5064_v59  ;;  %vm4931_vm1 = vcmp.gt.f32.partialorder %v4867_v47, 0.0  ;;  %v19484_v59 = vld [vmem:[#allocation55_spill] sm:$0xff]  ;;  %v4878_v53 = vadd.f32 %v19486_v35, %v19436_v51 }
 0x67c   : > { %v15033_v54 = vpop.xlane.xlu0 %5477  ;;  %19483 = vst [vmem:[#allocation61_spill] sm:$0xff] %v15056_v61  ;;  %v5620_v56 = vsel %vm5466_vm15, %v15056_v61, -inf }
 0x67d   : > { %v5059_v22 = vsel %vm4931_vm1, %v4867_v47, %v4995_v3  ;;  %v5605_v11 = vsel %vm5466_vm15, %v15047_v16, -inf  ;;  %vm4942_vm5 = vcmp.gt.f32.partialorder %v4878_v53, 0.0 }
 0x67e   : > { %5573 = vmax.xlane.f32.xlu1 %v5572_v24  ;;  %5597 = vmax.xlane.f32.xlu2 %v5596_v50  ;;  %v4875_v24 = vadd.f32 %v19481_v23, %v19436_v51  ;;  %v19482_v50 = vld [vmem:[#allocation37_spill] sm:$0xff]  ;;  %v15058_v23 = vpop.permute.xlu1 %5330 }
 0x67f   : > { %v4880_v29 = vadd.f32 %v19482_v50, %v19436_v51  ;;  %v15067_v50 = vadd.f32 %v14795_v44, %v5059_v22 }
 0x680   : > { %v5003_v36 = vmul.f32 0.2, %v4875_v24  ;;  %vm4939_vm10 = vcmp.gt.f32.partialorder %v4875_v24, 0.0 }
 0x681   : > { %5612 = vmax.xlane.f32.xlu0 %v5611_v25  ;;  %v15049_v55 = vpop.xlane.xlu2 %5471  ;;  %v4870_v25 = vadd.f32 %v19484_v59, %v19436_v51  ;;  %19485 = vst [vmem:[#allocation60_spill] sm:$0xff] %v15067_v50  ;;  %v5008_v52 = vmul.f32 0.2, %v4880_v29  ;;  %vm4944_vm13 = vcmp.gt.f32.partialorder %v4880_v29, 0.0  ;;  %v5590_v44 = vsel %vm5466_vm15, %v15067_v50, -inf }
 0x683   : > { %v4998_v30 = vmul.f32 0.2, %v4870_v25  ;;  %vm4934_vm14 = vcmp.gt.f32.partialorder %v4870_v25, 0.0  ;;  %v5072_v59 = vsel %vm4944_vm13, %v4880_v29, %v5008_v52 }
 0x684   : > { %v15060_v20 = vpop.xlane.xlu0 %5486 }
 0x686   : > { %5582 = vmax.xlane.f32.xlu1 %v5581_v46  ;;  %5606 = vmax.xlane.f32.xlu2 %v5605_v11  ;;  %v5067_v46 = vsel %vm4939_vm10, %v4875_v24, %v5003_v36  ;;  %v19488_v11 = vld [vmem:[#allocation58_spill] sm:$0xff]  ;;  %v5006_v24 = vmul.f32 0.2, %v4878_v53  ;;  %v15083_v36 = vadd.f32 %v14992_v41, %v5072_v59 }
 0x687   : > { %v15074_v47 = vadd.f32 %v14850_v28, %v5067_v46  ;;  %v4883_v22 = vadd.f32 %v19488_v11, %v19436_v51  ;;  %v19490_v28 = vld [vmem:[#allocation85_spill] sm:$0xff]  ;;  %v15094_v11 = vpop.permute.xlu1 %5336  ;;  %v19492_v41 = vld [vmem:[#allocation34_spill] sm:$0xff] }
 0x688   : > { %19489 = vst [vmem:[#allocation82_spill] sm:$0xff] %v15083_v36  ;;  %v4873_v46 = vadd.f32 %v19490_v28, %v19436_v51  ;;  %v4881_v52 = vadd.f32 %v19492_v41, %v19436_v51  ;;  %v5629_v59 = vsel %vm5466_vm15, %v15083_v36, -inf }
 0x689   : > { %19487 = vst [vmem:[#allocation24_spill] sm:$0xff] %v15074_v47  ;;  %5621 = vmax.xlane.f32.xlu0 %v5620_v56  ;;  %v15076_v3 = vpop.xlane.xlu2 %5480  ;;  %v5062_v56 = vsel %vm4934_vm14, %v4870_v25, %v4998_v30  ;;  %v5614_v61 = vsel %vm5466_vm15, %v15074_v47, -inf  ;;  %v5011_v29 = vmul.f32 0.2, %v4883_v22  ;;  %vm4947_vm4 = vcmp.gt.f32.partialorder %v4883_v22, 0.0 }
 0x68a   : > { %v15092_v50 = vadd.f32 %v14827_v31, %v5062_v56  ;;  %v5001_v30 = vmul.f32 0.2, %v4873_v46  ;;  %vm4937_vm6 = vcmp.gt.f32.partialorder %v4873_v46, 0.0  ;;  %vm4945_vm8 = vcmp.gt.f32.partialorder %v4881_v52, 0.0 }
 0x68b   : > { %v5075_v41 = vsel %vm4947_vm4, %v4883_v22, %v5011_v29 }
 0x68c   : > { %v15085_v35 = vpop.xlane.xlu0 %5495  ;;  %19491 = vst [vmem:[#allocation81_spill] sm:$0xff] %v15092_v50  ;;  %v5599_v31 = vsel %vm5466_vm15, %v15092_v50, -inf }
 0x68e   : > { %5591 = vmax.xlane.f32.xlu1 %v5590_v44  ;;  %5615 = vmax.xlane.f32.xlu2 %v5614_v61  ;;  %v5070_v44 = vsel %vm4942_vm5, %v4878_v53, %v5006_v24  ;;  %v19494_v61 = vld [vmem:[#allocation69_spill] sm:$0xff]  ;;  %v5009_v53 = vmul.f32 0.2, %v4881_v52  ;;  %v15110_v24 = vadd.f32 %v15024_v42, %v5075_v41  ;;  %v19498_v42 = vld [vmem:[#allocation35_spill] sm:$0xff] }
 0x68f   : > { %v15101_v25 = vadd.f32 %v14884_v4, %v5070_v44  ;;  %v4886_v56 = vadd.f32 %v19494_v61, %v19436_v51  ;;  %v19496_v4 = vld [vmem:[#allocation77_spill] sm:$0xff]  ;;  %v4884_v29 = vadd.f32 %v19498_v42, %v19436_v51 }
 0x690   : > { %19495 = vst [vmem:[#allocation25_spill] sm:$0xff] %v15110_v24  ;;  %v4876_v44 = vadd.f32 %v19496_v4, %v19436_v51  ;;  %v5638_v41 = vsel %vm5466_vm15, %v15110_v24, -inf }
 0x691   : > { %19493 = vst [vmem:[#allocation86_spill] sm:$0xff] %v15101_v25  ;;  %5630 = vmax.xlane.f32.xlu0 %v5629_v59  ;;  %v15103_v28 = vpop.xlane.xlu2 %5489  ;;  %v5065_v59 = vsel %vm4937_vm6, %v4873_v46, %v5001_v30  ;;  %v5623_v47 = vsel %vm5466_vm15, %v15101_v25, -inf  ;;  %v5014_v22 = vmul.f32 0.2, %v4886_v56  ;;  %vm4950_vm7 = vcmp.gt.f32.partialorder %v4886_v56, 0.0 }
 0x692   : > { %v15119_v50 = vadd.f32 %v14859_v7, %v5065_v59  ;;  %v5004_v46 = vmul.f32 0.2, %v4876_v44  ;;  %vm4940_vm9 = vcmp.gt.f32.partialorder %v4876_v44, 0.0  ;;  %vm4948_vm1 = vcmp.gt.f32.partialorder %v4884_v29, 0.0 }
 0x693   : > { %v5078_v42 = vsel %vm4950_vm7, %v4886_v56, %v5014_v22 }
 0x694   : > { %v15112_v36 = vpop.xlane.xlu0 %5504  ;;  %19497 = vst [vmem:[#allocation46_spill] sm:$0xff] %v15119_v50  ;;  %v5608_v7 = vsel %vm5466_vm15, %v15119_v50, -inf }
 0x696   : > { %5600 = vmax.xlane.f32.xlu1 %v5599_v31  ;;  %5624 = vmax.xlane.f32.xlu2 %v5623_v47  ;;  %v5073_v31 = vsel %vm4945_vm8, %v4881_v52, %v5009_v53  ;;  %v19499_v47 = vld [vmem:[#allocation47_spill] sm:$0xff]  ;;  %v5012_v52 = vmul.f32 0.2, %v4884_v29  ;;  %v15137_v53 = vadd.f32 %v15058_v23, %v5078_v42  ;;  %v19503_v23 = vld [vmem:[#allocation66_spill] sm:$0xff] }
 0x697   : > { %v15128_v30 = vadd.f32 %v14913_v15, %v5073_v31  ;;  %v4889_v59 = vadd.f32 %v19499_v47, %v19436_v51  ;;  %v19501_v15 = vld [vmem:[#allocation63_spill] sm:$0xff]  ;;  %v4887_v22 = vadd.f32 %v19503_v23, %v19436_v51  ;;  %v19505_v23 = vld [vmem:[#allocation53_spill] sm:$0xff] }
 0x698   : > { %19500 = vst [vmem:[#allocation51_spill] sm:$0xff] %v15137_v53  ;;  %v4879_v31 = vadd.f32 %v19501_v15, %v19436_v51  ;;  %v5647_v42 = vsel %vm5466_vm15, %v15137_v53, -inf  ;;  %v4882_v53 = vadd.f32 %v19505_v23, %v19436_v51 }
 0x699   : > { %v15121_v61 = vpop.xlane.xlu1 %5474  ;;  %5639 = vmax.xlane.f32.xlu0 %v5638_v41  ;;  %v15130_v4 = vpop.xlane.xlu2 %5498  ;;  %v5068_v41 = vsel %vm4940_vm9, %v4876_v44, %v5004_v46  ;;  %v5632_v25 = vsel %vm5466_vm15, %v15128_v30, -inf  ;;  %v5017_v56 = vmul.f32 0.2, %v4889_v59  ;;  %vm4953_vm10 = vcmp.gt.f32.partialorder %v4889_v59, 0.0 }
 0x69a   : > { %v15146_v50 = vadd.f32 %v14893_v39, %v5068_v41  ;;  %v5007_v44 = vmul.f32 0.2, %v4879_v31  ;;  %vm4943_vm13 = vcmp.gt.f32.partialorder %v4879_v31, 0.0  ;;  %v5015_v41 = vmul.f32 0.2, %v4887_v22 }
 0x69b   : > { %vm4951_vm14 = vcmp.gt.f32.partialorder %v4887_v22, 0.0  ;;  %vm4946_vm5 = vcmp.gt.f32.partialorder %v4882_v53, 0.0 }
 0x69c   : > { %v15139_v24 = vpop.xlane.xlu0 %5513  ;;  %19502 = vst [vmem:[#allocation26_spill] sm:$0xff] %v15146_v50  ;;  %v5617_v39 = vsel %vm5466_vm15, %v15146_v50, -inf }
 0x69e   : > { %5609 = vmax.xlane.f32.xlu1 %v5608_v7  ;;  %5633 = vmax.xlane.f32.xlu2 %v5632_v25  ;;  %v5076_v7 = vsel %vm4948_vm1, %v4884_v29, %v5012_v52  ;;  %v5081_v25 = vsel %vm4953_vm10, %v4889_v59, %v5017_v56  ;;  %v5079_v59 = vsel %vm4951_vm14, %v4887_v22, %v5015_v41  ;;  %v5010_v56 = vmul.f32 0.2, %v4882_v53 }
 0x69f   : > { %v15155_v46 = vadd.f32 %v14945_v21, %v5076_v7  ;;  %v15162_v29 = vadd.f32 %v15094_v11, %v5081_v25  ;;  %v5071_v21 = vsel %vm4943_vm13, %v4879_v31, %v5007_v44  ;;  %v19507_v25 = vld [vmem:[#allocation54_spill] sm:$0xff] }
 0x6a0   : > { %v4885_v22 = vadd.f32 %v19507_v25, %v19436_v51  ;;  %v5074_v41 = vsel %vm4946_vm5, %v4882_v53, %v5010_v56 }
 0x6a1   : > { %v15148_v47 = vpop.xlane.xlu1 %5483  ;;  %5648 = vmax.xlane.f32.xlu0 %v5647_v42  ;;  %v15157_v15 = vpop.xlane.xlu2 %5507  ;;  %19504 = vst [vmem:[#allocation32_spill] sm:$0xff] %v15162_v29  ;;  %v5641_v7 = vsel %vm5466_vm15, %v15155_v46, -inf  ;;  %v15171_v42 = vadd.f32 %v14924_v34, %v5071_v21  ;;  %v5656_v11 = vsel %vm5466_vm15, %v15162_v29, -inf  ;;  %v5661_v21 = vsub.f32 %v14728_v62, %v15121_v61 }
 0x6a2   : > { %vm4949_vm4 = vcmp.gt.f32.partialorder %v4885_v22, 0.0  ;;  %v5662_v61 = vsub.f32 %v14665_v9, %v15033_v54 }
 0x6a3   : > { %v5626_v44 = vsel %vm5466_vm15, %v15171_v42, -inf }
 0x6a4   : > { %v15164_v52 = vpop.xlane.xlu0 %5522  ;;  %v5729_v29 = vmul.f32 1.442695, %v5662_v61 }
 0x6a6   : > { %5618 = vmax.xlane.f32.xlu1 %v5617_v39  ;;  %5642 = vmax.xlane.f32.xlu2 %v5641_v7  ;;  %v15178_v39 = vadd.f32 %v14979_v27, %v5079_v59  ;;  %v15191_v27 = vadd.f32 %v14956_v13, %v5074_v41  ;;  %v5013_v59 = vmul.f32 0.2, %v4885_v22  ;;  %v19509_v13 = vld [vmem:[#allocation31_spill] sm:$0xff] }
 0x6a7   : > { %v4888_v25 = vadd.f32 %v19509_v13, %v19436_v51 }
 0x6a8   : > { %19506 = vst [vmem:[#allocation64_spill] sm:$0xff] %v15178_v39  ;;  %v5650_v23 = vsel %vm5466_vm15, %v15178_v39, -inf  ;;  %v5635_v53 = vsel %vm5466_vm15, %v15191_v27, -inf  ;;  %v5077_v41 = vsel %vm4949_vm4, %v4885_v22, %v5013_v59 }
 0x6a9   : > { %v15173_v50 = vpop.xlane.xlu1 %5492  ;;  %5657 = vmax.xlane.f32.xlu0 %v5656_v11  ;;  %v15180_v31 = vpop.xlane.xlu2 %5516  ;;  %19508 = vst [vmem:[#allocation65_spill] sm:$0xff] %v15191_v27  ;;  %v15206_v62 = vadd.f32 %v14988_v33, %v5077_v41  ;;  %v5016_v27 = vmul.f32 0.2, %v4888_v25  ;;  %vm4952_vm6 = vcmp.gt.f32.partialorder %v4888_v25, 0.0 }
 0x6ab   : > { %v5644_v51 = vsel %vm5466_vm15, %v15206_v62, -inf  ;;  %v5080_v9 = vsel %vm4952_vm6, %v4888_v25, %v5016_v27 }
 0x6ac   : > { %v15184_v34 = vpop.xlane.xlu0 %5531  ;;  %v15222_v54 = vadd.f32 %v15022_v57, %v5080_v9 }
 0x6ae   : > { %5627 = vmax.xlane.f32.xlu1 %v5626_v44  ;;  %5651 = vmax.xlane.f32.xlu2 %v5650_v23  ;;  %v5727_v44 = vmul.f32 1.442695, %v5661_v21  ;;  %v19510_v21 = vld [vmem:[#allocation41_spill] sm:$0xff]  ;;  %v5653_v27 = vsel %vm5466_vm15, %v15222_v54, -inf }
 0x6af   : > { %v5659_v39 = vsub.f32 %v19510_v21, %v15006_v0  ;;  %v5665_v0 = vsub.f32 %v14681_v40, %v15060_v20  ;;  %v5668_v40 = vsub.f32 %v14699_v12, %v15085_v35  ;;  %v5671_v12 = vsub.f32 %v14719_v26, %v15112_v36 }
 0x6b0   : > { %9121 = vpow2.f32 %v5727_v44  ;;  %v5664_v26 = vsub.f32 %v14753_v2, %v15148_v47  ;;  %v5674_v36 = vsub.f32 %v14746_v43, %v15139_v24  ;;  %v5667_v24 = vsub.f32 %v14780_v63, %v15173_v50 }
 0x6b1   : > { %v15195_v7 = vpop.xlane.xlu1 %5501  ;;  %v15197_v11 = vpop.xlane.xlu2 %5525  ;;  %v5723_v22 = vmul.f32 1.442695, %v5659_v39  ;;  %9123 = vpow2.f32 %v5729_v29  ;;  %v5663_v39 = vsub.f32 %v14692_v49, %v15076_v3  ;;  %v5735_v41 = vmul.f32 1.442695, %v5665_v0  ;;  %v19511_v0 = vld [vmem:[#allocation68_spill] sm:$0xff] }
 0x6b2   : > { %v5666_v49 = vsub.f32 %v14714_v10, %v15103_v28  ;;  %v5741_v21 = vmul.f32 1.442695, %v5668_v40  ;;  %v5669_v10 = vsub.f32 %v14739_v8, %v15130_v4  ;;  %v5672_v4 = vsub.f32 %v14762_v58, %v15157_v15 }
 0x6b3   : > { %9125 = vpow2.f32 %v5723_v22  ;;  %v5731_v25 = vmul.f32 1.442695, %v5663_v39  ;;  %v5660_v39 = vsub.f32 %v19511_v0, %v15049_v55  ;;  %v5733_v40 = vmul.f32 1.442695, %v5664_v26 }
 0x6b4   : > { %v15201_v56 = vpop.xlane.xlu0 %5540  ;;  %9127 = vpow2.f32 %v5735_v41  ;;  %v5749_v2 = vmul.f32 1.442695, %v5672_v4  ;;  %v5677_v58 = vsub.f32 %v14773_v32, %v15164_v52  ;;  %v5739_v0 = vmul.f32 1.442695, %v5667_v24 }
 0x6b5   : > { %9129 = vpow2.f32 %v5731_v25  ;;  %v5725_v28 = vmul.f32 1.442695, %v5660_v39  ;;  %v5743_v25 = vmul.f32 1.442695, %v5669_v10  ;;  %v5670_v52 = vsub.f32 %v14807_v6, %v15195_v7 }
 0x6b6   : > { %5636 = vmax.xlane.f32.xlu1 %v5635_v53  ;;  %v9122_v33 = vpop.eup %9121  ;;  %9131 = vpow2.f32 %v5741_v21  ;;  %v5753_v21 = vmul.f32 1.442695, %v5674_v36 }
 0x6b7   : > { %v9124_v57 = vpop.eup %9123 }
 0x6b9   : > { %v15210_v23 = vpop.xlane.xlu1 %5510  ;;  %v15214_v53 = vpop.xlane.xlu2 %5534 }
 0x6ba   : > { %v9126_v29 = vpop.eup %9125  ;;  %v5681_v4 = vsub.f32 %v14841_v38, %v15214_v53 }
 0x6bb   : > { %v9128_v22 = vpop.eup %9127 }
 0x6bc   : > { %v15218_v59 = vpop.xlane.xlu0 %5549  ;;  %v9130_v9 = vpop.eup %9129 }
 0x6bd   : > { %5919 = vrot.lane.b32.xlu0 %v9122_v33, %s9651_s27  ;;  %v9132_v55 = vpop.eup %9131  ;;  %v5686_v38 = vsub.f32 %v14848_v19, %v15218_v59  ;;  %v19512_v19 = vld [vmem:[#allocation67_spill] sm:$0xff] }
 0x6be   : > { %5645 = vmax.xlane.f32.xlu1 %v5644_v51  ;;  %v5737_v51 = vmul.f32 1.442695, %v5666_v49 }
 0x6c0   : > { %9133 = vpow2.f32 %v5737_v51 }
 0x6c1   : > { %v15226_v44 = vpop.xlane.xlu1 %5519  ;;  %v15230_v13 = vpop.xlane.xlu2 %5543  ;;  %9135 = vpow2.f32 %v5725_v28 }
 0x6c4   : > { %v15234_v61 = vpop.xlane.xlu0 %5558 }
 0x6c5   : > { %5921 = vrot.lane.b32.xlu0 %v9124_v57, %s9651_s27 }
 0x6c6   : > { %5654 = vmax.xlane.f32.xlu1 %v5653_v27  ;;  %5915 = vrot.lane.b32.xlu2 %v9126_v29, %s9651_s27  ;;  %v5747_v27 = vmul.f32 1.442695, %v5671_v12  ;;  %v9134_v29 = vpop.eup %9133  ;;  %v5759_v12 = vmul.f32 1.442695, %v5677_v58 }
 0x6c7   : > { %v9136_v51 = vpop.eup %9135 }
 0x6c8   : > { %9137 = vpow2.f32 %v5747_v27  ;;  %v5678_v27 = vsub.f32 %v14814_v17, %v15197_v11  ;;  %v5683_v17 = vsub.f32 %v14823_v60, %v15201_v56  ;;  %v5676_v60 = vsub.f32 %v14857_v14, %v15226_v44 }
 0x6c9   : > { %v15239_v20 = vpop.xlane.xlu1 %5528  ;;  %v15244_v3 = vpop.xlane.xlu2 %5552  ;;  %9139 = vpow2.f32 %v5743_v25  ;;  %v5745_v25 = vmul.f32 1.442695, %v5670_v52  ;;  %v5777_v14 = vmul.f32 1.442695, %v5686_v38 }
 0x6ca   : > { %9141 = vpow2.f32 %v5733_v40  ;;  %v5761_v6 = vmul.f32 1.442695, %v5678_v27  ;;  %v5757_v24 = vmul.f32 1.442695, %v5676_v60  ;;  %v5679_v59 = vsub.f32 %v19512_v19, %v15239_v20 }
 0x6cb   : > { %9143 = vpow2.f32 %v5753_v21 }
 0x6cc   : > { %v15246_v33 = vpop.xlane.xlu0 %5567  ;;  %9145 = vpow2.f32 %v5749_v2  ;;  %v5763_v52 = vmul.f32 1.442695, %v5679_v59  ;;  %v19521_v59 = vld [vmem:[#allocation27_spill] sm:$0xff] }
 0x6cd   : > { %5927 = vrot.lane.b32.xlu0 %v9128_v22, %s9651_s27  ;;  %9147 = vpow2.f32 %v5739_v0 }
 0x6ce   : > { %5923 = vrot.lane.b32.xlu2 %v9130_v9, %s9651_s27  ;;  %v9138_v47 = vpop.eup %9137  ;;  %v5675_v9 = vsub.f32 %v14789_v5, %v15180_v31  ;;  %9149 = vpow2.f32 %v5759_v12  ;;  %v5680_v5 = vsub.f32 %v14798_v45, %v15184_v34  ;;  %v5673_v34 = vsub.f32 %v14832_v37, %v15210_v23 }
 0x6cf   : > { %v9140_v43 = vpop.eup %9139  ;;  %v5767_v37 = vmul.f32 1.442695, %v5681_v4 }
 0x6d0   : > { %v9142_v10 = vpop.eup %9141  ;;  %v5755_v63 = vmul.f32 1.442695, %v5675_v9  ;;  %v5751_v40 = vmul.f32 1.442695, %v5673_v34 }
 0x6d1   : > { %v15253_v35 = vpop.xlane.xlu1 %5537  ;;  %v15258_v41 = vpop.xlane.xlu2 %5561 }
 0x6d2   : > { %v9144_v50 = vpop.eup %9143  ;;  %9151 = vpow2.f32 %v5755_v63 }
 0x6d3   : > { %v9146_v32 = vpop.eup %9145  ;;  %9153 = vpow2.f32 %v5745_v25 }
 0x6d4   : > { %v15260_v57 = vpop.xlane.xlu0 %5576  ;;  %v9148_v26 = vpop.eup %9147 }
 0x6d5   : > { %5933 = vrot.lane.b32.xlu0 %v9132_v55, %s9651_s27  ;;  %v9150_v7 = vpop.eup %9149 }
 0x6d6   : > { %5929 = vrot.lane.b32.xlu2 %v9134_v29, %s9651_s27  ;;  %v5765_v29 = vmul.f32 1.442695, %v5680_v5 }
 0x6d8   : > { %v9152_v45 = vpop.eup %9151  ;;  %9155 = vpow2.f32 %v5765_v29 }
 0x6d9   : > { %v15267_v8 = vpop.xlane.xlu1 %5546  ;;  %v15272_v49 = vpop.xlane.xlu2 %5570  ;;  %9157 = vpow2.f32 %v5761_v6 }
 0x6da   : > { %v9154_v2 = vpop.eup %9153  ;;  %9159 = vpow2.f32 %v5751_v40  ;;  %v5693_v60 = vsub.f32 %v14943_v18, %v15272_v49  ;;  %v19520_v18 = vld [vmem:[#allocation30_spill] sm:$0xff] }
 0x6dc   : > { %v15274_v22 = vpop.xlane.xlu0 %5585 }
 0x6dd   : > { %5939 = vrot.lane.b32.xlu0 %v9138_v47, %s9651_s27  ;;  %v5698_v49 = vsub.f32 %v19520_v18, %v15274_v22 }
 0x6de   : > { %5935 = vrot.lane.b32.xlu2 %v9140_v43, %s9651_s27  ;;  %v9156_v23 = vpop.eup %9155  ;;  %v5684_v43 = vsub.f32 %v14868_v1, %v15230_v13  ;;  %v19514_v13 = vld [vmem:[#allocation70_spill] sm:$0xff] }
 0x6df   : > { %5917 = vrot.lane.b32.xlu1 %v9136_v51, %s9651_s27  ;;  %v5771_v51 = vmul.f32 1.442695, %v5683_v17  ;;  %v9158_v47 = vpop.eup %9157  ;;  %v5687_v63 = vsub.f32 %v19514_v13, %v15244_v3  ;;  %v19516_v3 = vld [vmem:[#allocation19_spill] sm:$0xff] }
 0x6e0   : > { %v9160_v44 = vpop.eup %9159  ;;  %v5773_v9 = vmul.f32 1.442695, %v5684_v43 }
 0x6e1   : > { %v15282_v15 = vpop.xlane.xlu1 %5555  ;;  %v15287_v39 = vpop.xlane.xlu2 %5579  ;;  %9161 = vpow2.f32 %v5771_v51  ;;  %v5779_v25 = vmul.f32 1.442695, %v5687_v63  ;;  %v5801_v63 = vmul.f32 1.442695, %v5698_v49 }
 0x6e2   : > { %9163 = vpow2.f32 %v5767_v37 }
 0x6e3   : > { %9165 = vpow2.f32 %v5757_v24 }
 0x6e4   : > { %v15289_v28 = vpop.xlane.xlu0 %5594  ;;  %9167 = vpow2.f32 %v5777_v14 }
 0x6e5   : > { %5945 = vrot.lane.b32.xlu0 %v9144_v50, %s9651_s27  ;;  %9169 = vpow2.f32 %v5773_v9 }
 0x6e6   : > { %5941 = vrot.lane.b32.xlu2 %v9146_v32, %s9651_s27  ;;  %9171 = vpow2.f32 %v5763_v52 }
 0x6e7   : > { %5925 = vrot.lane.b32.xlu1 %v9142_v10, %s9651_s27  ;;  %v9162_v0 = vpop.eup %9161  ;;  %v19513_v10 = vld [vmem:[#allocation72_spill] sm:$0xff] }
 0x6e8   : > { %v9164_v12 = vpop.eup %9163  ;;  %v5689_v1 = vsub.f32 %v19513_v10, %v15234_v61  ;;  %v5696_v10 = vsub.f32 %v19521_v59, %v15287_v39  ;;  %v19523_v39 = vld [vmem:[#allocation20_spill] sm:$0xff] }
 0x6e9   : > { %v15297_v31 = vpop.xlane.xlu1 %5564  ;;  %v15302_v55 = vpop.xlane.xlu2 %5588 }
 0x6ea   : > { %v5783_v20 = vmul.f32 1.442695, %v5689_v1  ;;  %v9166_v27 = vpop.eup %9165 }
 0x6eb   : > { %v9168_v29 = vpop.eup %9167 }
 0x6ec   : > { %v15304_v36 = vpop.xlane.xlu0 %5603  ;;  %v9170_v61 = vpop.eup %9169  ;;  %9173 = vpow2.f32 %v5783_v20  ;;  %v5797_v20 = vmul.f32 1.442695, %v5696_v10 }
 0x6ed   : > { %5951 = vrot.lane.b32.xlu0 %v9150_v7, %s9651_s27  ;;  %v5692_v7 = vsub.f32 %v19516_v3, %v15246_v33  ;;  %9175 = vpow2.f32 %v5779_v25  ;;  %v19522_v25 = vld [vmem:[#allocation21_spill] sm:$0xff] }
 0x6ee   : > { %5947 = vrot.lane.b32.xlu2 %v9152_v45, %s9651_s27  ;;  %v5690_v45 = vsub.f32 %v14918_v48, %v15258_v41  ;;  %v19518_v48 = vld [vmem:[#allocation71_spill] sm:$0xff]  ;;  %v5691_v22 = vsub.f32 %v19522_v25, %v15297_v31 }
 0x6ef   : > { %5931 = vrot.lane.b32.xlu1 %v9148_v26, %s9651_s27  ;;  %v19515_v26 = vld [vmem:[#allocation73_spill] sm:$0xff]  ;;  %v5789_v40 = vmul.f32 1.442695, %v5692_v7  ;;  %v5695_v41 = vsub.f32 %v19518_v48, %v15260_v57 }
 0x6f0   : > { %v5682_v6 = vsub.f32 %v19515_v26, %v15253_v35  ;;  %v9172_v35 = vpop.eup %9171  ;;  %v5787_v7 = vmul.f32 1.442695, %v5691_v22 }
 0x6f1   : > { %v15312_v11 = vpop.xlane.xlu1 %5573  ;;  %v15317_v21 = vpop.xlane.xlu2 %5597  ;;  %v5795_v24 = vmul.f32 1.442695, %v5695_v41 }
 0x6f2   : > { %v5769_v34 = vmul.f32 1.442695, %v5682_v6  ;;  %v9174_v37 = vpop.eup %9173  ;;  %v19524_v6 = vld [vmem:[#allocation22_spill] sm:$0xff] }
 0x6f3   : > { %v9176_v33 = vpop.eup %9175  ;;  %v5699_v3 = vsub.f32 %v19524_v6, %v15302_v55 }
 0x6f4   : > { %v15322_v56 = vpop.xlane.xlu0 %5612  ;;  %9177 = vpow2.f32 %v5769_v34 }
 0x6f5   : > { %5957 = vrot.lane.b32.xlu0 %v9156_v23, %s9651_s27  ;;  %v19517_v23 = vld [vmem:[#allocation39_spill] sm:$0xff]  ;;  %9179 = vpow2.f32 %v5789_v40  ;;  %v5803_v40 = vmul.f32 1.442695, %v5699_v3 }
 0x6f6   : > { %5953 = vrot.lane.b32.xlu2 %v9158_v47, %s9651_s27  ;;  %v5685_v47 = vsub.f32 %v19517_v23, %v15267_v8  ;;  %v19527_v23 = vld [vmem:[#allocation50_spill] sm:$0xff] }
 0x6f7   : > { %5937 = vrot.lane.b32.xlu1 %v9154_v2, %s9651_s27  ;;  %v5785_v2 = vmul.f32 1.442695, %v5690_v45 }
 0x6f8   : > { %v5775_v38 = vmul.f32 1.442695, %v5685_v47  ;;  %v5702_v47 = vsub.f32 %v19527_v23, %v15317_v21  ;;  %v19529_v21 = vld [vmem:[#allocation57_spill] sm:$0xff] }
 0x6f9   : > { %v15327_v53 = vpop.xlane.xlu1 %5582  ;;  %v15332_v58 = vpop.xlane.xlu2 %5606  ;;  %9181 = vpow2.f32 %v5785_v2 }
 0x6fa   : > { %v9178_v14 = vpop.eup %9177  ;;  %9183 = vpow2.f32 %v5775_v38 }
 0x6fb   : > { %v9180_v8 = vpop.eup %9179  ;;  %9185 = vpow2.f32 %v5795_v24 }
 0x6fc   : > { %v15343_v50 = vpop.xlane.xlu0 %5621 }
 0x6fd   : > { %5963 = vrot.lane.b32.xlu0 %v9162_v0, %s9651_s27 }
 0x6fe   : > { %5959 = vrot.lane.b32.xlu2 %v9164_v12, %s9651_s27  ;;  %v19519_v12 = vld [vmem:[#allocation38_spill] sm:$0xff] }
 0x6ff   : > { %5943 = vrot.lane.b32.xlu1 %v9160_v44, %s9651_s27  ;;  %v5791_v44 = vmul.f32 1.442695, %v5693_v60  ;;  %v9182_v57 = vpop.eup %9181  ;;  %v5688_v19 = vsub.f32 %v19519_v12, %v15282_v15  ;;  %v5707_v12 = vsub.f32 %v19529_v21, %v15322_v56 }
 0x700   : > { %v9184_v52 = vpop.eup %9183 }
 0x701   : > { %v15345_v32 = vpop.xlane.xlu1 %5591  ;;  %v15347_v5 = vpop.xlane.xlu2 %5615  ;;  %9187 = vpow2.f32 %v5791_v44  ;;  %v5781_v1 = vmul.f32 1.442695, %v5688_v19  ;;  %v5705_v19 = vsub.f32 %v15047_v16, %v15332_v58  ;;  %v5819_v10 = vmul.f32 1.442695, %v5707_v12  ;;  %v19531_v16 = vld [vmem:[#allocation61_spill] sm:$0xff] }
 0x702   : > { %v5710_v58 = vsub.f32 %v19531_v16, %v15343_v50 }
 0x703   : > { %9189 = vpow2.f32 %v5781_v1 }
 0x704   : > { %v15358_v17 = vpop.xlane.xlu0 %5630  ;;  %9191 = vpow2.f32 %v5801_v63  ;;  %v5815_v63 = vmul.f32 1.442695, %v5705_v19 }
 0x705   : > { %5969 = vrot.lane.b32.xlu0 %v9168_v29, %s9651_s27  ;;  %9193 = vpow2.f32 %v5797_v20  ;;  %v19530_v20 = vld [vmem:[#allocation60_spill] sm:$0xff] }
 0x706   : > { %5965 = vrot.lane.b32.xlu2 %v9170_v61, %s9651_s27  ;;  %v5701_v61 = vsub.f32 %v19523_v39, %v15289_v28  ;;  %9195 = vpow2.f32 %v5787_v7  ;;  %v19525_v28 = vld [vmem:[#allocation44_spill] sm:$0xff] }
 0x707   : > { %5949 = vrot.lane.b32.xlu1 %v9166_v27, %s9651_s27  ;;  %v9186_v27 = vpop.eup %9185 }
 0x708   : > { %v9188_v15 = vpop.eup %9187  ;;  %v5807_v31 = vmul.f32 1.442695, %v5701_v61  ;;  %v5825_v61 = vmul.f32 1.442695, %v5710_v58 }
 0x709   : > { %v15360_v4 = vpop.xlane.xlu2 %5624  ;;  %v15362_v51 = vpop.xlane.xlu1 %5600 }
 0x70a   : > { %v9190_v34 = vpop.eup %9189  ;;  %9197 = vpow2.f32 %v5807_v31 }
 0x70b   : > { %9199 = vpow2.f32 %v5803_v40 }
 0x70c   : > { %v15375_v9 = vpop.xlane.xlu0 %5639 }
 0x70d   : > { %5975 = vrot.lane.b32.xlu0 %v9174_v37, %s9651_s27  ;;  %v5694_v37 = vsub.f32 %v19525_v28, %v15312_v11 }
 0x70e   : > { %5971 = vrot.lane.b32.xlu2 %v9176_v33, %s9651_s27  ;;  %v19526_v33 = vld [vmem:[#allocation23_spill] sm:$0xff] }
 0x70f   : > { %5955 = vrot.lane.b32.xlu1 %v9172_v35, %s9651_s27  ;;  %v9192_v35 = vpop.eup %9191  ;;  %v5704_v55 = vsub.f32 %v19526_v33, %v15304_v36  ;;  %v5793_v60 = vmul.f32 1.442695, %v5694_v37 }
 0x710   : > { %v9194_v2 = vpop.eup %9193 }
 0x711   : > { %v15373_v43 = vpop.xlane.xlu2 %5633  ;;  %v15377_v0 = vpop.xlane.xlu1 %5609  ;;  %v5813_v11 = vmul.f32 1.442695, %v5704_v55  ;;  %9201 = vpow2.f32 %v5793_v60 }
 0x712   : > { %v9196_v24 = vpop.eup %9195 }
 0x713   : > { %v9198_v44 = vpop.eup %9197  ;;  %9203 = vpow2.f32 %v5813_v11  ;;  %v19536_v11 = vld [vmem:[#allocation46_spill] sm:$0xff] }
 0x714   : > { %v15393_v29 = vpop.xlane.xlu0 %5648  ;;  %v9200_v36 = vpop.eup %9199 }
 0x715   : > { %5981 = vrot.lane.b32.xlu0 %v9180_v8, %s9651_s27  ;;  %v19528_v8 = vld [vmem:[#allocation56_spill] sm:$0xff] }
 0x716   : > { %5977 = vrot.lane.b32.xlu2 %v9182_v57, %s9651_s27  ;;  %v5697_v57 = vsub.f32 %v19528_v8, %v15327_v53 }
 0x717   : > { %5961 = vrot.lane.b32.xlu1 %v9178_v14, %s9651_s27  ;;  %v5809_v14 = vmul.f32 1.442695, %v5702_v47  ;;  %v9202_v53 = vpop.eup %9201 }
 0x718   : > { %v5799_v49 = vmul.f32 1.442695, %v5697_v57 }
 0x719   : > { %v15388_v13 = vpop.xlane.xlu2 %5642  ;;  %v15398_v26 = vpop.xlane.xlu1 %5618  ;;  %9205 = vpow2.f32 %v5809_v14 }
 0x71a   : > { %9207 = vpow2.f32 %v5799_v49 }
 0x71b   : > { %9209 = vpow2.f32 %v5819_v10 }
 0x71c   : > { %v15414_v48 = vpop.xlane.xlu0 %5657  ;;  %9211 = vpow2.f32 %v5815_v63  ;;  %v5717_v63 = vsub.f32 %v15155_v46, %v15388_v13  ;;  %v19540_v46 = vld [vmem:[#allocation32_spill] sm:$0xff] }
 0x71d   : > { %5987 = vrot.lane.b32.xlu0 %v9186_v27, %s9651_s27  ;;  %v5700_v27 = vsub.f32 %v19530_v20, %v15345_v32  ;;  %v5722_v13 = vsub.f32 %v19540_v46, %v15414_v48 }
 0x71e   : > { %5983 = vrot.lane.b32.xlu2 %v9188_v15, %s9651_s27  ;;  %v19532_v15 = vld [vmem:[#allocation24_spill] sm:$0xff]  ;;  %v5839_v16 = vmul.f32 1.442695, %v5717_v63 }
 0x71f   : > { %5967 = vrot.lane.b32.xlu1 %v9184_v52, %s9651_s27  ;;  %v9204_v52 = vpop.eup %9203  ;;  %v5708_v25 = vsub.f32 %v19532_v15, %v15347_v5  ;;  %v5805_v39 = vmul.f32 1.442695, %v5700_v27  ;;  %v19534_v5 = vld [vmem:[#allocation82_spill] sm:$0xff] }
 0x720   : > { %v9206_v56 = vpop.eup %9205 }
 0x721   : > { %v15403_v45 = vpop.xlane.xlu2 %5651  ;;  %v15416_v41 = vpop.xlane.xlu1 %5627  ;;  %v5821_v3 = vmul.f32 1.442695, %v5708_v25  ;;  %9213 = vpow2.f32 %v5805_v39  ;;  %v19541_v39 = vld [vmem:[#allocation64_spill] sm:$0xff] }
 0x722   : > { %v9208_v6 = vpop.eup %9207  ;;  %9215 = vpow2.f32 %v5825_v61  ;;  %v5712_v15 = vsub.f32 %v15171_v42, %v15416_v41  ;;  %v5720_v61 = vsub.f32 %v19541_v39, %v15403_v45  ;;  %v5849_v42 = vmul.f32 1.442695, %v5722_v13 }
 0x723   : > { %v9210_v32 = vpop.eup %9209  ;;  %9217 = vpow2.f32 %v5821_v3 }
 0x724   : > { %v9212_v50 = vpop.eup %9211  ;;  %v5829_v3 = vmul.f32 1.442695, %v5712_v15 }
 0x725   : > { %5993 = vrot.lane.b32.xlu0 %v9192_v35, %s9651_s27  ;;  %v5713_v35 = vsub.f32 %v19534_v5, %v15358_v17  ;;  %v5706_v17 = vsub.f32 %v19536_v11, %v15377_v0 }
 0x726   : > { %5989 = vrot.lane.b32.xlu2 %v9194_v2, %s9651_s27  ;;  %v19535_v2 = vld [vmem:[#allocation86_spill] sm:$0xff] }
 0x727   : > { %5973 = vrot.lane.b32.xlu1 %v9190_v34, %s9651_s27  ;;  %v19533_v34 = vld [vmem:[#allocation81_spill] sm:$0xff]  ;;  %v5711_v28 = vsub.f32 %v19535_v2, %v15360_v4  ;;  %v5831_v55 = vmul.f32 1.442695, %v5713_v35  ;;  %v9214_v23 = vpop.eup %9213  ;;  %v5817_v57 = vmul.f32 1.442695, %v5706_v17 }
 0x728   : > { %v5703_v40 = vsub.f32 %v19533_v34, %v15362_v51  ;;  %v9216_v60 = vpop.eup %9215  ;;  %v19537_v4 = vld [vmem:[#allocation25_spill] sm:$0xff] }
 0x729   : > { %v15418_v38 = vpop.permute.xlu2 %5915  ;;  %v15433_v1 = vpop.xlane.xlu1 %5636  ;;  %v5827_v47 = vmul.f32 1.442695, %v5711_v28  ;;  %v5716_v14 = vsub.f32 %v19537_v4, %v15375_v9  ;;  %v19538_v9 = vld [vmem:[#allocation26_spill] sm:$0xff] }
 0x72a   : > { %v5811_v33 = vmul.f32 1.442695, %v5703_v40  ;;  %v9218_v51 = vpop.eup %9217  ;;  %v5709_v10 = vsub.f32 %v19538_v9, %v15398_v26  ;;  %v19542_v40 = vld [vmem:[#allocation65_spill] sm:$0xff] }
 0x72b   : > { %v5837_v0 = vmul.f32 1.442695, %v5716_v14  ;;  %v5715_v5 = vsub.f32 %v19542_v40, %v15433_v1 }
 0x72c   : > { %9219 = vpow2.f32 %v5811_v33  ;;  %v5823_v20 = vmul.f32 1.442695, %v5709_v10 }
 0x72d   : > { %5999 = vrot.lane.b32.xlu0 %v9198_v44, %s9651_s27  ;;  %9221 = vpow2.f32 %v5831_v55  ;;  %v5835_v2 = vmul.f32 1.442695, %v5715_v5 }
 0x72e   : > { %5995 = vrot.lane.b32.xlu2 %v9200_v36, %s9651_s27  ;;  %9223 = vpow2.f32 %v5827_v47  ;;  %v5714_v36 = vsub.f32 %v15128_v30, %v15373_v43 }
 0x72f   : > { %5979 = vrot.lane.b32.xlu1 %v9196_v24, %s9651_s27  ;;  %v15429_v18 = vpop.permute.xlu0 %5919  ;;  %9225 = vpow2.f32 %v5817_v57 }
 0x730   : > { %v5833_v12 = vmul.f32 1.442695, %v5714_v36  ;;  %9227 = vpow2.f32 %v5837_v0  ;;  %v19543_v36 = vld [vmem:[#allocation28_spill] sm:$0xff]  ;;  %v6113_v40 = vsel %vm1564_vm2, %v15429_v18, 0.0 }
 0x731   : > { %v15431_v59 = vpop.permute.xlu2 %5923  ;;  %v15448_v31 = vpop.xlane.xlu1 %5645 }
 0x732   : > { %v9220_v21 = vpop.eup %9219  ;;  %9229 = vpow2.f32 %v5833_v12  ;;  %v5718_v1 = vsub.f32 %v15206_v62, %v15448_v31 }
 0x733   : > { %v9222_v19 = vpop.eup %9221  ;;  %9231 = vpow2.f32 %v5823_v20 }
 0x734   : > { %v9224_v49 = vpop.eup %9223  ;;  %v5841_v11 = vmul.f32 1.442695, %v5718_v1 }
 0x735   : > { %6005 = vrot.lane.b32.xlu0 %v9204_v52, %s9651_s27  ;;  %v9226_v27 = vpop.eup %9225 }
 0x736   : > { %6001 = vrot.lane.b32.xlu2 %v9206_v56, %s9651_s27  ;;  %v9228_v58 = vpop.eup %9227 }
 0x737   : > { %5985 = vrot.lane.b32.xlu1 %v9202_v53, %s9651_s27  ;;  %v15444_v22 = vpop.permute.xlu0 %5921  ;;  %v19539_v53 = vld [vmem:[#allocation51_spill] sm:$0xff] }
 0x738   : > { %v5719_v30 = vsub.f32 %v19539_v53, %v15393_v29  ;;  %v9230_v29 = vpop.eup %9229 }
 0x739   : > { %v15446_v7 = vpop.permute.xlu2 %5929  ;;  %v15469_v44 = vpop.xlane.xlu1 %5654 }
 0x73a   : > { %v5843_v26 = vmul.f32 1.442695, %v5719_v30  ;;  %v9232_v41 = vpop.eup %9231  ;;  %v5721_v62 = vsub.f32 %v15222_v54, %v15469_v44 }
 0x73c   : > { %9233 = vpow2.f32 %v5843_v26  ;;  %v5847_v12 = vmul.f32 1.442695, %v5721_v62 }
 0x73d   : > { %6011 = vrot.lane.b32.xlu0 %v9210_v32, %s9651_s27  ;;  %9235 = vpow2.f32 %v5839_v16 }
 0x73e   : > { %6007 = vrot.lane.b32.xlu2 %v9212_v50, %s9651_s27  ;;  %v5845_v50 = vmul.f32 1.442695, %v5720_v61  ;;  %9237 = vpow2.f32 %v5829_v3 }
 0x73f   : > { %5991 = vrot.lane.b32.xlu1 %v9208_v6, %s9651_s27  ;;  %v15459_v37 = vpop.permute.xlu0 %5927  ;;  %9239 = vpow2.f32 %v5849_v42 }
 0x740   : > { %9241 = vpow2.f32 %v5845_v50 }
 0x741   : > { %v15464_v24 = vpop.permute.xlu2 %5935  ;;  %9243 = vpow2.f32 %v5835_v2  ;;  %v6107_v2 = vsel %vm1564_vm2, %v15418_v38, 0.0 }
 0x742   : > { %v9234_v34 = vpop.eup %9233  ;;  %9245 = vpow2.f32 %v5841_v11 }
 0x743   : > { %v9236_v48 = vpop.eup %9235  ;;  %9247 = vpow2.f32 %v5847_v12 }
 0x744   : > { %v9238_v28 = vpop.eup %9237 }
 0x745   : > { %6017 = vrot.lane.b32.xlu0 %v9216_v60, %s9651_s27  ;;  %v9240_v55 = vpop.eup %9239 }
 0x746   : > { %6013 = vrot.lane.b32.xlu2 %v9218_v51, %s9651_s27 }
 0x747   : > { %5997 = vrot.lane.b32.xlu1 %v9214_v23, %s9651_s27  ;;  %v15474_v8 = vpop.permute.xlu0 %5933  ;;  %v9242_v23 = vpop.eup %9241 }
 0x748   : > { %v9244_v17 = vpop.eup %9243 }
 0x749   : > { %v15487_v52 = vpop.permute.xlu2 %5941  ;;  %v9246_v44 = vpop.eup %9245 }
 0x74a   : > { %v9248_v39 = vpop.eup %9247 }
 0x74d   : > { %6023 = vrot.lane.b32.xlu0 %v9222_v19, %s9651_s27 }
 0x74e   : > { %6019 = vrot.lane.b32.xlu2 %v9224_v49, %s9651_s27 }
 0x74f   : > { %6003 = vrot.lane.b32.xlu1 %v9220_v21, %s9651_s27  ;;  %v15489_v56 = vpop.permute.xlu0 %5939 }
 0x750   : > { %v6143_v12 = vsel %vm1564_vm2, %v15489_v56, 0.0 }
 0x751   : > { %v15482_v43 = vpop.permute.xlu1 %5917  ;;  %v15504_v32 = vpop.permute.xlu2 %5947 }
 0x755   : > { %6029 = vrot.lane.b32.xlu0 %v9228_v58, %s9651_s27 }
 0x756   : > { %6025 = vrot.lane.b32.xlu2 %v9230_v29, %s9651_s27 }
 0x757   : > { %6009 = vrot.lane.b32.xlu1 %v9226_v27, %s9651_s27  ;;  %v15502_v6 = vpop.permute.xlu0 %5945 }
 0x758   : > { %v6373_v60 = vrot.slane %v15502_v6, 4 }
 0x759   : > { %v15497_v25 = vpop.permute.xlu1 %5925  ;;  %v15515_v33 = vpop.permute.xlu2 %5953 }
 0x75a   : > { %v6374_v4 = vsel %vm2142_vm11, %v6373_v60, %v15487_v52  ;;  %v6417_v20 = vrot.slane %v15515_v33, 4  ;;  %v6116_v60 = vsel %vm1564_vm2, %v15444_v22, 0.0  ;;  %v6122_v62 = vsel %vm1564_vm2, %v15497_v25, 0.0 }
 0x75b   : > { %v6378_v57 = vperm.slane %v6374_v4, %v19543_v36 }
 0x75d   : > { %6035 = vrot.lane.b32.xlu0 %v9234_v34, %s9651_s27  ;;  %v6391_v9 = vrot.slane %v6378_v57, 4 }
 0x75e   : > { %6031 = vrot.lane.b32.xlu2 %v9236_v48, %s9651_s27 }
 0x75f   : > { %6015 = vrot.lane.b32.xlu1 %v9232_v41, %s9651_s27  ;;  %v15513_v35 = vpop.permute.xlu0 %5951 }
 0x760   : > { %v6411_v31 = vrot.slane %v15513_v35, 4 }
 0x761   : > { %v15510_v45 = vpop.permute.xlu1 %5931  ;;  %v15533_v14 = vpop.permute.xlu2 %5959 }
 0x762   : > { %v6412_v19 = vsel %vm2142_vm11, %v6411_v31, %v15504_v32 }
 0x763   : > { %v6416_v53 = vperm.slane %v6412_v19, %v19543_v36 }
 0x765   : > { %6041 = vrot.lane.b32.xlu0 %v9240_v55, %s9651_s27  ;;  %v6437_v29 = vrot.slane %v6416_v53, 4 }
 0x766   : > { %6037 = vrot.lane.b32.xlu2 %v9242_v23, %s9651_s27  ;;  %v6125_v23 = vsel %vm1564_vm2, %v15459_v37, 0.0 }
 0x767   : > { %6021 = vrot.lane.b32.xlu1 %v9238_v28, %s9651_s27  ;;  %v15525_v51 = vpop.permute.xlu0 %5957 }
 0x769   : > { %v15521_v47 = vpop.permute.xlu1 %5937  ;;  %v15557_v16 = vpop.permute.xlu2 %5965 }
 0x76f   : > { %6027 = vrot.lane.b32.xlu1 %v9244_v17, %s9651_s27  ;;  %v15543_v10 = vpop.permute.xlu0 %5963  ;;  %v6134_v17 = vsel %vm1564_vm2, %v15474_v8, 0.0 }
 0x771   : > { %v15536_v0 = vpop.permute.xlu1 %5943  ;;  %v15573_v41 = vpop.permute.xlu2 %5971 }
 0x772   : > { %v6367_v21 = vrot.slane %v15536_v0, 4 }
 0x774   : > { %v6368_v49 = vsel %vm2142_vm11, %v6367_v21, %v15489_v56  ;;  %v6110_v21 = vsel %vm1564_vm2, %v15482_v43, 0.0  ;;  %v6140_v56 = vsel %vm1564_vm2, %v15521_v47, 0.0 }
 0x775   : > { %v6372_v54 = vperm.slane %v6368_v49, %v19543_v36  ;;  %v6131_v49 = vsel %vm1564_vm2, %v15510_v45, 0.0 }
 0x777   : > { %v15548_v30 = vsel %vm2142_vm11, %v6391_v9, %v6372_v54  ;;  %v6393_v63 = vrot.slane %v6372_v54, 4  ;;  %6033 = vrot.lane.b32.xlu1 %v9246_v44, %s9651_s27  ;;  %v15565_v61 = vpop.permute.xlu0 %5969  ;;  %v6119_v54 = vsel %vm1564_vm2, %v15431_v59, 0.0 }
 0x779   : > { %v15553_v26 = vsel %vm2142_vm11, %v6378_v57, %v6393_v63  ;;  %v15555_v27 = vpop.permute.xlu1 %5949  ;;  %v15579_v48 = vpop.permute.xlu2 %5977 }
 0x77a   : > { %v6418_v58 = vsel %vm2142_vm11, %v6417_v20, %v15555_v27 }
 0x77b   : > { %v6422_v15 = vperm.slane %v6418_v58, %v19543_v36  ;;  %v6128_v58 = vsel %vm1564_vm2, %v15446_v7, 0.0 }
 0x77d   : > { %v6435_v46 = vrot.slane %v6422_v15, 4  ;;  %v15563_v13 = vsel %vm2142_vm11, %v6422_v15, %v6437_v29  ;;  %v6161_v29 = vsel %vm1564_vm2, %v15513_v35, 0.0  ;;  %v6158_v35 = vsel %vm1564_vm2, %v15555_v27, 0.0 }
 0x77f   : > { %v15568_v3 = vsel %vm2142_vm11, %v6435_v46, %v6416_v53  ;;  %6039 = vrot.lane.b32.xlu1 %v9248_v39, %s9651_s27  ;;  %v15575_v50 = vpop.permute.xlu0 %5975  ;;  %v6152_v53 = vsel %vm1564_vm2, %v15502_v6, 0.0  ;;  %v6149_v6 = vsel %vm1564_vm2, %v15536_v0, 0.0 }
 0x781   : > { %v15571_v42 = vpop.permute.xlu1 %5955  ;;  %v15589_v55 = vpop.permute.xlu2 %5983 }
 0x782   : > { %v6167_v27 = vsel %vm1564_vm2, %v15571_v42, 0.0 }
 0x787   : > { %v15587_v28 = vpop.permute.xlu0 %5981 }
 0x789   : > { %v15577_v34 = vpop.permute.xlu1 %5961  ;;  %v15605_v31 = vpop.permute.xlu2 %5989 }
 0x78a   : > { %v6429_v0 = vrot.slane %v15577_v34, 4 }
 0x78f   : > { %6114 = vadd.xlane.f32.xlu0 %v6113_v40  ;;  %6108 = vadd.xlane.f32.xlu2 %v6107_v2  ;;  %v15597_v11 = vpop.permute.xlu0 %5987  ;;  %v6137_v40 = vsel %vm1564_vm2, %v15464_v24, 0.0  ;;  %v6170_v2 = vsel %vm1564_vm2, %v15525_v51, 0.0 }
 0x791   : > { %v15583_v5 = vpop.permute.xlu1 %5967  ;;  %v15617_v9 = vpop.permute.xlu2 %5995 }
 0x792   : > { %19545 = vst [vmem:[#allocation18_spill] sm:$0xff] %v15617_v9 }
 0x797   : > { %6126 = vadd.xlane.f32.xlu0 %v6125_v23  ;;  %6117 = vadd.xlane.f32.xlu2 %v6116_v60  ;;  %v15607_v57 = vpop.permute.xlu0 %5993 }
 0x798   : > { %19544 = vst [vmem:[#allocation33_spill] sm:$0xff] %v15607_v57 }
 0x799   : > { %v15593_v1 = vpop.permute.xlu1 %5973  ;;  %v15629_v20 = vpop.permute.xlu2 %6001 }
 0x79f   : > { %6135 = vadd.xlane.f32.xlu0 %v6134_v17  ;;  %6123 = vadd.xlane.f32.xlu2 %v6122_v62  ;;  %v15621_v44 = vpop.permute.xlu0 %5999  ;;  %v6430_v17 = vsel %vm2142_vm11, %v6429_v0, %v15525_v51  ;;  %v6146_v62 = vsel %vm1564_vm2, %v15487_v52, 0.0  ;;  %v6299_v51 = vrot.slane %v15429_v18, 4  ;;  %v6311_v0 = vrot.slane %v15459_v37, 4 }
 0x7a1   : > { %v15601_v4 = vpop.permute.xlu1 %5979  ;;  %v15641_v39 = vpop.permute.xlu2 %6007 }
 0x7a7   : > { %6144 = vadd.xlane.f32.xlu0 %v6143_v12  ;;  %6132 = vadd.xlane.f32.xlu2 %v6131_v49  ;;  %v15639_v46 = vpop.permute.xlu0 %6005  ;;  %v6179_v12 = vsel %vm1564_vm2, %v15543_v10, 0.0 }
 0x7a9   : > { %6111 = vadd.xlane.f32.xlu1 %v6110_v21  ;;  %v15613_v19 = vpop.permute.xlu1 %5985  ;;  %v6423_v21 = vrot.slane %v15533_v14, 4 }
 0x7ab   : > { %v6424_v52 = vsel %vm2142_vm11, %v6423_v21, %v15571_v42  ;;  %v6355_v42 = vrot.slane %v15464_v24, 4 }
 0x7ad   : > { %v6356_v37 = vsel %vm2142_vm11, %v6355_v42, %v15510_v45  ;;  %v6541_v42 = vrot.slane %v15607_v57, 4 }
 0x7af   : > { %6153 = vadd.xlane.f32.xlu0 %v6152_v53  ;;  %6141 = vadd.xlane.f32.xlu2 %v6140_v56  ;;  %v15652_v60 = vpop.permute.xlu0 %6011  ;;  %v15666_v53 = vpop.permute.xlu2 %6013  ;;  %v6428_v56 = vperm.slane %v6424_v52, %v19543_v36 }
 0x7b0   : > { %19546 = vst [vmem:[#allocation42_spill] sm:$0xff] %v15652_v60 }
 0x7b1   : > { %v15625_v63 = vpop.permute.xlu1 %5991  ;;  %6120 = vadd.xlane.f32.xlu1 %v6119_v54  ;;  %v6434_v54 = vperm.slane %v6430_v17, %v19543_v36  ;;  %19547 = vst [vmem:[#allocation83_spill] sm:$0xff] %v15666_v53 }
 0x7b7   : > { %6162 = vadd.xlane.f32.xlu0 %v6161_v29  ;;  %6150 = vadd.xlane.f32.xlu2 %v6149_v6  ;;  %v6305_v29 = vrot.slane %v15444_v22, 4  ;;  %v6361_v6 = vrot.slane %v15521_v47, 4  ;;  %v6176_v22 = vsel %vm1564_vm2, %v15577_v34, 0.0  ;;  %v6449_v47 = vrot.slane %v6428_v56, 4 }
 0x7b9   : > { %v15635_v15 = vpop.permute.xlu1 %5997  ;;  %6129 = vadd.xlane.f32.xlu1 %v6128_v58  ;;  %v6447_v58 = vrot.slane %v6434_v54, 4  ;;  %v6306_v18 = vsel %vm2142_vm11, %v6305_v29, %v15482_v43  ;;  %v6362_v24 = vsel %vm2142_vm11, %v6361_v6, %v15474_v8  ;;  %v6450_v34 = vsel %vm2142_vm11, %v6434_v54, %v6449_v47 }
 0x7ba   : > { %v6310_v21 = vperm.slane %v6306_v18, %v19543_v36  ;;  %v6317_v8 = vrot.slane %v15446_v7, 4  ;;  %v6529_v54 = vrot.slane %v15613_v19, 4 }
 0x7bc   : > { %v6323_v6 = vrot.slane %v6310_v21, 4  ;;  %v6318_v7 = vsel %vm2142_vm11, %v6317_v8, %v15497_v25  ;;  %v6530_v25 = vsel %vm2142_vm11, %v6529_v54, %v15587_v28 }
 0x7bf   : > { %6171 = vadd.xlane.f32.xlu0 %v6170_v2  ;;  %6159 = vadd.xlane.f32.xlu2 %v6158_v35  ;;  %v6300_v2 = vsel %vm2142_vm11, %v6299_v51, %v15418_v38  ;;  %v6155_v35 = vsel %vm1564_vm2, %v15504_v32, 0.0  ;;  %v19548_v32 = vld [vmem:[#allocation45_spill] sm:$0xff]  ;;  %v6366_v51 = vperm.slane %v6362_v24, %v19543_v36 }
 0x7c0   : > { %v6304_v38 = vperm.slane %v6300_v2, %v19543_v36  ;;  %v15696_v43 = vperm.slane %v15568_v3, %v19548_v32  ;;  %v15706_v52 = vperm.slane %v15563_v13, %v19548_v32  ;;  %v6360_v3 = vperm.slane %v6356_v37, %v19543_v36 }
 0x7c1   : > { %v15647_v23 = vpop.permute.xlu1 %6003  ;;  %6138 = vadd.xlane.f32.xlu1 %v6137_v40  ;;  %v15674_v40 = vpop.permute.xlu0 %6017  ;;  %v6535_v13 = vrot.slane %v15625_v63, 4  ;;  %v6164_v2 = vsel %vm1564_vm2, %v15515_v33, 0.0  ;;  %v6379_v37 = vrot.slane %v6366_v51, 4 }
 0x7c2   : > { %19549 = vst [vmem:[#allocation52_spill] sm:$0xff] %v15696_v43  ;;  %v6324_v8 = vsel %vm2142_vm11, %v6323_v6, %v6304_v38 }
 0x7c3   : > { %19550 = vst [vmem:[#allocation36_spill] sm:$0xff] %v15706_v52 }
 0x7c7   : > { %6180 = vadd.xlane.f32.xlu0 %v6179_v12  ;;  %6168 = vadd.xlane.f32.xlu2 %v6167_v27  ;;  %v15700_v12 = vpop.permute.xlu2 %6019  ;;  %v6312_v27 = vsel %vm2142_vm11, %v6311_v0, %v15431_v59  ;;  %v15717_v59 = vperm.slane %v6450_v34, %v19548_v32  ;;  %v6523_v0 = vrot.slane %v15589_v55, 4  ;;  %v6536_v34 = vsel %vm2142_vm11, %v6535_v13, %v15597_v11 }
 0x7c8   : > { %v15721_v29 = vperm.slane %v6312_v27, %v19543_v36  ;;  %v6380_v13 = vsel %vm2142_vm11, %v6379_v37, %v6360_v3 }
 0x7c9   : > { %v15661_v49 = vpop.permute.xlu1 %6009  ;;  %6147 = vadd.xlane.f32.xlu1 %v6146_v62  ;;  %v6448_v62 = vsel %vm2142_vm11, %v6447_v58, %v6428_v56  ;;  %v6325_v56 = vrot.slane %v6304_v38, 4  ;;  %v6461_v58 = vrot.slane %v15696_v43, 4  ;;  %19552 = vst [vmem:[#allocation78_spill] sm:$0xff] %v15717_v59  ;;  %v15730_v18 = vpop.permute.xlu0 %6023  ;;  %v6524_v24 = vsel %vm2142_vm11, %v6523_v0, %v15601_v4 }
 0x7ca   : > { %v15709_v45 = vperm.slane %v6448_v62, %v19548_v32  ;;  %v6381_v62 = vrot.slane %v6360_v3, 4  ;;  %v6528_v0 = vperm.slane %v6524_v24, %v19543_v36  ;;  %v6641_v38 = vrot.slane %v15674_v40, 4 }
 0x7cb   : > { %v6326_v33 = vsel %vm2142_vm11, %v6310_v21, %v6325_v56  ;;  %v6542_v21 = vsel %vm2142_vm11, %v6541_v42, %v15605_v31  ;;  %v6534_v56 = vperm.slane %v6530_v25, %v19543_v36  ;;  %v6647_v54 = vrot.slane %v15730_v18, 4 }
 0x7cc   : > { %19551 = vst [vmem:[#allocation74_spill] sm:$0xff] %v15709_v45  ;;  %v6462_v47 = vsel %vm2142_vm11, %v15709_v45, %v6461_v58  ;;  %v15747_v58 = vperm.slane %v6318_v7, %v19543_v36  ;;  %v15765_v7 = vperm.slane %v6326_v33, %v19548_v32  ;;  %v6546_v37 = vperm.slane %v6542_v21, %v19543_v36 }
 0x7cd   : > { %v6547_v25 = vrot.slane %v6534_v56, 4  ;;  %v15780_v33 = vperm.slane %v6380_v13, %v19548_v32  ;;  %v6467_v45 = vrot.slane %v15583_v5, 4 }
 0x7ce   : > { %19555 = vst [vmem:[#allocation49_spill] sm:$0xff] %v15765_v7 }
 0x7cf   : > { %6177 = vadd.xlane.f32.xlu2 %v6176_v22  ;;  %v15758_v6 = vpop.permute.xlu2 %6025  ;;  %19558 = vst [vmem:[#allocation75_spill] sm:$0xff] %v15780_v33  ;;  %v6548_v57 = vsel %vm2142_vm11, %v6547_v25, %v6528_v0 }
 0x7d0   : > { %19554 = vst [vmem:[#allocation76_spill] sm:$0xff] %v15758_v6  ;;  %v6653_v24 = vrot.slane %v15758_v6, 4  ;;  %v6559_v6 = vrot.slane %v6546_v37, 4 }
 0x7d1   : > { %v15684_v17 = vpop.permute.xlu1 %6015  ;;  %6156 = vadd.xlane.f32.xlu1 %v6155_v35  ;;  %v6465_v35 = vrot.slane %v15706_v52, 4  ;;  %v15793_v43 = vpop.permute.xlu0 %6029 }
 0x7d2   : > { %v6635_v3 = vrot.slane %v15684_v17, 4 }
 0x7d3   : > { %v6466_v27 = vsel %vm2142_vm11, %v15717_v59, %v6465_v35  ;;  %v6540_v35 = vperm.slane %v6536_v34, %v19543_v36  ;;  %v6479_v59 = vrot.slane %v15575_v50, 4 }
 0x7d4   : > { %v8833_v52 = vpack.i.bf16 %v6466_v27, %v6462_v47  ;;  %v6335_v47 = vrot.slane %v15747_v58, 4  ;;  %v15784_v27 = vperm.slane %v15553_v26, %v19548_v32  ;;  %v6636_v13 = vsel %vm2142_vm11, %v6635_v3, %v15652_v60 }
 0x7d5   : > { %v6561_v21 = vrot.slane %v6540_v35, 4 }
 0x7d6   : > { %19559 = vst [vmem:[#allocation80_spill] sm:$0xff] %v15784_v27 }
 0x7d9   : > { %v15732_v22 = vpop.permute.xlu1 %6021  ;;  %6165 = vadd.xlane.f32.xlu1 %v6164_v2  ;;  %v6382_v2 = vsel %vm2142_vm11, %v6366_v51, %v6381_v62  ;;  %v15762_v51 = vperm.slane %v6324_v8, %v19548_v32  ;;  %v6473_v62 = vrot.slane %v15565_v61, 4  ;;  %v15788_v8 = vperm.slane %v15548_v30, %v19548_v32 }
 0x7da   : > { %19553 = vst [vmem:[#allocation59_spill] sm:$0xff] %v15732_v22  ;;  %v15768_v42 = vperm.slane %v6382_v2, %v19548_v32  ;;  %v6549_v2 = vrot.slane %v6528_v0, 4  ;;  %v6654_v26 = vsel %vm2142_vm11, %v6653_v24, %v15732_v22  ;;  %v6562_v24 = vsel %vm2142_vm11, %v6546_v37, %v6561_v21 }
 0x7db   : > { %8834 = vrot.lane.b32.xlu0 %v8833_v52, %s9651_s27  ;;  %v6173_v52 = vsel %vm1564_vm2, %v15533_v14, 0.0  ;;  %19560 = vst [vmem:[#allocation43_spill] sm:$0xff] %v15788_v8  ;;  %v6642_v14 = vsel %vm2142_vm11, %v6641_v38, %v15666_v53  ;;  %v6474_v30 = vsel %vm2142_vm11, %v6473_v62, %v15557_v16  ;;  %v6405_v53 = vrot.slane %v15780_v33, 4 }
 0x7dc   : > { %19556 = vst [vmem:[#allocation62_spill] sm:$0xff] %v15768_v42  ;;  %v6550_v38 = vsel %vm2142_vm11, %v6534_v56, %v6549_v2  ;;  %v6646_v60 = vperm.slane %v6642_v14, %v19543_v36  ;;  %v6640_v62 = vperm.slane %v6636_v13, %v19543_v36  ;;  %v6658_v22 = vperm.slane %v6654_v26, %v19543_v36 }
 0x7dd   : > { %v15815_v56 = vperm.slane %v6550_v38, %v19548_v32  ;;  %v6648_v0 = vsel %vm2142_vm11, %v6647_v54, %v15700_v12  ;;  %v6406_v25 = vsel %vm2142_vm11, %v15788_v8, %v6405_v53  ;;  %v6478_v2 = vperm.slane %v6474_v30, %v19543_v36 }
 0x7de   : > { %v6480_v37 = vsel %vm2142_vm11, %v6479_v59, %v15573_v41  ;;  %v6560_v21 = vsel %vm2142_vm11, %v6559_v6, %v6540_v35  ;;  %v6468_v13 = vsel %vm2142_vm11, %v6467_v45, %v15543_v10  ;;  %v15833_v54 = vperm.slane %v6562_v24, %v19548_v32 }
 0x7df   : > { %19561 = vst [vmem:[#allocation84_spill] sm:$0xff] %v15815_v56  ;;  %v6659_v53 = vrot.slane %v6646_v60, 4  ;;  %v6652_v30 = vperm.slane %v6648_v0, %v19543_v36  ;;  %v6661_v38 = vrot.slane %v6640_v62, 4  ;;  %v6671_v59 = vrot.slane %v6658_v22, 4 }
 0x7e0   : > { %19563 = vst [vmem:[#allocation29_spill] sm:$0xff] %v15833_v54  ;;  %v6353_v10 = vrot.slane %v15765_v7, 4  ;;  %v19564_v45 = vrot.slane %v15721_v29, 4  ;;  %v15845_v35 = vperm.slane %v6560_v21, %v19548_v32  ;;  %v6577_v6 = vrot.slane %v15815_v56, 4 }
 0x7e1   : > { %v15777_v34 = vpop.permute.xlu1 %6027  ;;  %6174 = vadd.xlane.f32.xlu1 %v6173_v52  ;;  %v6409_v52 = vrot.slane %v15768_v42, 4  ;;  %v6485_v42 = vrot.slane %v15579_v48, 4  ;;  %v6472_v24 = vperm.slane %v6468_v13, %v19543_v36  ;;  %v6660_v0 = vsel %vm2142_vm11, %v6659_v53, %v6640_v62 }
 0x7e2   : > { %19557 = vst [vmem:[#allocation40_spill] sm:$0xff] %v15777_v34  ;;  %v6578_v21 = vsel %vm2142_vm11, %v15833_v54, %v6577_v6  ;;  %v6673_v56 = vrot.slane %v6652_v30, 4  ;;  %v6585_v62 = vrot.slane %v15629_v20, 4  ;;  %v15865_v13 = vperm.slane %v6660_v0, %v19548_v32 }
 0x7e3   : > { %v6410_v3 = vsel %vm2142_vm11, %v15784_v27, %v6409_v52  ;;  %v6486_v26 = vsel %vm2142_vm11, %v6485_v42, %v15593_v1  ;;  %v15830_v52 = vperm.slane %v6548_v57, %v19548_v32  ;;  %v6338_v57 = vsel %vm2142_vm11, %v15747_v58, %v19564_v45  ;;  %19565 = vst [vmem:[#allocation37_spill] sm:$0xff] %v15845_v35  ;;  %v15854_v27 = vpop.permute.xlu0 %6035 }
 0x7e4   : > { %v8828_v14 = vpack.i.bf16 %v6410_v3, %v6406_v25  ;;  %v6336_v42 = vsel %vm2142_vm11, %v6335_v47, %v15721_v29  ;;  %v6491_v3 = vrot.slane %v6478_v2, 4  ;;  %v6484_v25 = vperm.slane %v6480_v37, %v19543_v36  ;;  %19566 = vst [vmem:[#allocation55_spill] sm:$0xff] %v15854_v27 }
 0x7e5   : > { %19562 = vst [vmem:[#allocation79_spill] sm:$0xff] %v15830_v52  ;;  %v6573_v58 = vrot.slane %v15830_v52, 4  ;;  %v6579_v45 = vrot.slane %v15621_v44, 4  ;;  %v6662_v29 = vsel %vm2142_vm11, %v6646_v60, %v6661_v38  ;;  %v6672_v47 = vsel %vm2142_vm11, %v6671_v59, %v6652_v30 }
 0x7e6   : > { %v6597_v37 = vrot.slane %v15661_v49, 4  ;;  %19567 = vst [vmem:[#allocation48_spill] sm:$0xff] %v15865_v13  ;;  %v15870_v53 = vperm.slane %v6336_v42, %v19548_v32  ;;  %v6493_v6 = vrot.slane %v6472_v24, 4  ;;  %v6674_v52 = vsel %vm2142_vm11, %v6658_v22, %v6673_v56  ;;  %v15888_v56 = vpop.permute.xlu2 %6031 }
 0x7e7   : > { %8829 = vrot.lane.b32.xlu2 %v8828_v14, %s9651_s27  ;;  %v6490_v14 = vperm.slane %v6486_v26, %v19543_v36  ;;  %v6574_v26 = vsel %vm2142_vm11, %v15845_v35, %v6573_v58  ;;  %v6492_v60 = vsel %vm2142_vm11, %v6491_v3, %v6472_v24  ;;  %v6586_v30 = vsel %vm2142_vm11, %v6585_v62, %v15635_v15 }
 0x7e8   : > { %v8843_v54 = vpack.i.bf16 %v6578_v21, %v6574_v26  ;;  %v15877_v38 = vperm.slane %v6662_v29, %v19548_v32  ;;  %v15880_v59 = vperm.slane %v6672_v47, %v19548_v32  ;;  %v15883_v0 = vperm.slane %v6338_v57, %v19548_v32 }
 0x7e9   : > { %v15836_v33 = vpop.permute.xlu1 %6033  ;;  %v6505_v42 = vrot.slane %v6484_v25, 4  ;;  %v6503_v58 = vrot.slane %v6490_v14, 4  ;;  %v6580_v22 = vsel %vm2142_vm11, %v6579_v45, %v15617_v9  ;;  %v6598_v3 = vsel %vm2142_vm11, %v6597_v37, %v15639_v46 }
 0x7ea   : > { %19568 = vst [vmem:[#allocation58_spill] sm:$0xff] %v15877_v38  ;;  %v15893_v24 = vperm.slane %v6674_v52, %v19548_v32  ;;  %v6349_v21 = vrot.slane %v15762_v51, 4  ;;  %v6685_v57 = vrot.slane %v15865_v13, 4  ;;  %v6494_v29 = vsel %vm2142_vm11, %v6478_v2, %v6493_v6 }
 0x7eb   : > { %19569 = vst [vmem:[#allocation85_spill] sm:$0xff] %v15880_v59  ;;  %v15899_v47 = vperm.slane %v6492_v60, %v19548_v32  ;;  %v6591_v45 = vrot.slane %v15641_v39, 4  ;;  %v6506_v37 = vsel %vm2142_vm11, %v6490_v14, %v6505_v42  ;;  %v6689_v13 = vrot.slane %v15877_v38, 4  ;;  %v15916_v35 = vpop.permute.xlu0 %6041 }
 0x7ec   : > { %19570 = vst [vmem:[#allocation34_spill] sm:$0xff] %v15893_v24  ;;  %v6350_v52 = vsel %vm2142_vm11, %v15870_v53, %v6349_v21  ;;  %v6686_v26 = vsel %vm2142_vm11, %v15880_v59, %v6685_v57  ;;  %v6504_v2 = vsel %vm2142_vm11, %v6503_v58, %v6484_v25  ;;  %v6584_v6 = vperm.slane %v6580_v22, %v19543_v36 }
 0x7ed   : > { %19571 = vst [vmem:[#allocation69_spill] sm:$0xff] %v15899_v47  ;;  %v6592_v60 = vsel %vm2142_vm11, %v6591_v45, %v15647_v23  ;;  %v6697_v14 = vrot.slane %v15836_v33, 4  ;;  %v6354_v21 = vsel %vm2142_vm11, %v15883_v0, %v6353_v10  ;;  %v6690_v57 = vsel %vm2142_vm11, %v15893_v24, %v6689_v13 }
 0x7ee   : > { %19572 = vst [vmem:[#allocation77_spill] sm:$0xff] %v15916_v35  ;;  %v8823_v58 = vpack.i.bf16 %v6354_v21, %v6350_v52  ;;  %v8853_v22 = vpack.i.bf16 %v6690_v57, %v6686_v26  ;;  %v15925_v38 = vperm.slane %v6494_v29, %v19548_v32  ;;  %v6596_v45 = vperm.slane %v6592_v60, %v19543_v36  ;;  %v15947_v57 = vpop.permute.xlu2 %6037 }
 0x7ef   : > { %8844 = vrot.lane.b32.xlu2 %v8843_v54, %s9651_s27  ;;  %v6590_v54 = vperm.slane %v6586_v30, %v19543_v36  ;;  %v6602_v30 = vperm.slane %v6598_v3, %v19543_v36  ;;  %v15928_v3 = vperm.slane %v6504_v2, %v19548_v32  ;;  %v6691_v59 = vrot.slane %v15888_v56, 4  ;;  %19576 = vst [vmem:[#allocation66_spill] sm:$0xff] %v15947_v57 }
 0x7f0   : > { %19573 = vst [vmem:[#allocation35_spill] sm:$0xff] %v15925_v38  ;;  %v15933_v8 = vperm.slane %v6506_v37, %v19548_v32  ;;  %v6605_v10 = vrot.slane %v6584_v6, 4  ;;  %v6709_v13 = vrot.slane %v15916_v35, 4  ;;  %v6698_v52 = vsel %vm2142_vm11, %v6697_v14, %v15793_v43 }
 0x7f1   : > { %v15903_v62 = vpop.permute.xlu1 %6039  ;;  %v6603_v25 = vrot.slane %v6590_v54, 4  ;;  %19574 = vst [vmem:[#allocation47_spill] sm:$0xff] %v15928_v3  ;;  %v6615_v9 = vrot.slane %v6602_v30, 4  ;;  %v6692_v29 = vsel %vm2142_vm11, %v6691_v59, %v15777_v34  ;;  %v6517_v37 = vrot.slane %v15899_v47, 4 }
 0x7f2   : > { %v6703_v42 = vrot.slane %v15903_v62, 4  ;;  %19575 = vst [vmem:[#allocation63_spill] sm:$0xff] %v15933_v8  ;;  %v6606_v60 = vsel %vm2142_vm11, %v6590_v54, %v6605_v10  ;;  %v6617_v21 = vrot.slane %v6596_v45, 4  ;;  %v6521_v59 = vrot.slane %v15925_v38, 4 }
 0x7f3   : > { %v6604_v2 = vsel %vm2142_vm11, %v6603_v25, %v6584_v6  ;;  %v6696_v14 = vperm.slane %v6692_v29, %v19543_v36  ;;  %v6710_v54 = vsel %vm2142_vm11, %v6709_v13, %v15947_v57 }
 0x7f4   : > { %v6704_v26 = vsel %vm2142_vm11, %v6703_v42, %v15854_v27  ;;  %v6702_v42 = vperm.slane %v6698_v52, %v19543_v36  ;;  %v15957_v6 = vperm.slane %v6604_v2, %v19548_v32  ;;  %v6522_v25 = vsel %vm2142_vm11, %v15933_v8, %v6521_v59 }
 0x7f5   : > { %v6708_v24 = vperm.slane %v6704_v26, %v19543_v36  ;;  %v6618_v10 = vsel %vm2142_vm11, %v6602_v30, %v6617_v21  ;;  %v6714_v29 = vperm.slane %v6710_v54, %v19543_v36  ;;  %v6717_v52 = vrot.slane %v6696_v14, 4 }
 0x7f6   : > { %19577 = vst [vmem:[#allocation53_spill] sm:$0xff] %v15957_v6  ;;  %v6715_v26 = vrot.slane %v6702_v42, 4  ;;  %v6629_v13 = vrot.slane %v15957_v6, 4  ;;  %v15974_v59 = vperm.slane %v6618_v10, %v19548_v32  ;;  %v6182_v10 = vsel %vm1564_vm2, %v15557_v16, 0.0 }
 0x7f7   : > { %8854 = vrot.lane.b32.xlu2 %v8853_v22, %s9651_s27  ;;  %v6616_v22 = vsel %vm2142_vm11, %v6615_v9, %v6596_v45  ;;  %v15965_v9 = vperm.slane %v6606_v60, %v19548_v32  ;;  %v6729_v2 = vrot.slane %v6708_v24, 4  ;;  %v6718_v30 = vsel %vm2142_vm11, %v6702_v42, %v6717_v52 }
 0x7f8   : > { %v15968_v45 = vperm.slane %v6616_v22, %v19548_v32  ;;  %19580 = vst [vmem:[#allocation41_spill] sm:$0xff] %v15974_v59  ;;  %v6727_v54 = vrot.slane %v6714_v29, 4 }
 0x7f9   : > { %19578 = vst [vmem:[#allocation54_spill] sm:$0xff] %v15965_v9  ;;  %v6633_v60 = vrot.slane %v15965_v9, 4  ;;  %v6730_v57 = vsel %vm2142_vm11, %v6714_v29, %v6729_v2 }
 0x7fa   : > { %8824 = vrot.lane.b32.xlu1 %v8823_v58, %s9651_s27  ;;  %v6518_v58 = vsel %vm2142_vm11, %v15928_v3, %v6517_v37  ;;  %19579 = vst [vmem:[#allocation31_spill] sm:$0xff] %v15968_v45  ;;  %v6630_v22 = vsel %vm2142_vm11, %v15968_v45, %v6629_v13  ;;  %v6728_v52 = vsel %vm2142_vm11, %v6727_v54, %v6708_v24 }
 0x7fb   : > { %v8838_v37 = vpack.i.bf16 %v6522_v25, %v6518_v58  ;;  %v6716_v25 = vsel %vm2142_vm11, %v6715_v26, %v6696_v14  ;;  %v6634_v42 = vsel %vm2142_vm11, %v15974_v59, %v6633_v60  ;;  %v15994_v14 = vperm.slane %v6730_v57, %v19548_v32 }
 0x7fc   : > { %v8848_v13 = vpack.i.bf16 %v6634_v42, %v6630_v22  ;;  %v15991_v9 = vperm.slane %v6716_v25, %v19548_v32  ;;  %v15998_v29 = vperm.slane %v6728_v52, %v19548_v32  ;;  %v6191_v25 = vsel %vm1564_vm2, %v15573_v41, 0.0 }
 0x7fd   : > { %19583 = vst [vmem:[#allocation72_spill] sm:$0xff] %v15994_v14 }
 0x7fe   : > { %19582 = vst [vmem:[#allocation67_spill] sm:$0xff] %v15991_v9  ;;  %v6741_v24 = vrot.slane %v15991_v9, 4 }
 0x7ff   : > { %19584 = vst [vmem:[#allocation70_spill] sm:$0xff] %v15998_v29 }
 0x802   : > { %8839 = vrot.lane.b32.xlu1 %v8838_v37, %s9651_s27  ;;  %v6115_v21 = vpop.xlane.xlu0 %6114  ;;  %v6109_v58 = vpop.xlane.xlu2 %6108  ;;  %v15983_v37 = vperm.slane %v6718_v30, %v19548_v32 }
 0x803   : > { %9249 = vrcp.f32 %v6115_v21  ;;  %v6982_v42 = vand.u32 2147483648, %v6115_v21  ;;  %v6980_v9 = vand.u32 2147483647, %v6115_v21  ;;  %v6952_v6 = vand.u32 2147483648, %v6109_v58 }
 0x804   : > { %19581 = vst [vmem:[#allocation68_spill] sm:$0xff] %v15983_v37  ;;  %9251 = vrcp.f32 %v6109_v58  ;;  %v6745_v16 = vrot.slane %v15983_v37, 4  ;;  %vm6976_vm7 = vweird.f32 %v6115_v21  ;;  %vm6946_vm1 = vweird.f32 %v6109_v58 }
 0x805   : > { %6183 = vadd.xlane.f32.xlu0 %v6182_v10  ;;  %v6742_v10 = vsel %vm2142_vm11, %v15998_v29, %v6741_v24  ;;  %v6983_v41 = vor.u32 1.1754944e-38, %v6982_v42  ;;  %vm6981_vm10 = vcmp.eq.f32.partialorder %v6980_v9, 8.507059e+37 }
 0x806   : > { %v6746_v22 = vsel %vm2142_vm11, %v15994_v14, %v6745_v16  ;;  %v6950_v16 = vand.u32 2147483647, %v6109_v58 }
 0x808   : > { %vm6951_vm14 = vcmp.eq.f32.partialorder %v6950_v16, 8.507059e+37 }
 0x809   : > { %v9250_v26 = vpop.eup %9249 }
 0x80a   : > { %8849 = vrot.lane.b32.xlu1 %v8848_v13, %s9651_s27  ;;  %v9252_v2 = vpop.eup %9251  ;;  %v6972_v30 = vmul.f32 %v9250_v26, %v6115_v21  ;;  %v16001_v60 = vpop.xlane.xlu2 %6117  ;;  %v8858_v13 = vpack.i.bf16 %v6746_v22, %v6742_v10  ;;  %vm6977_vm15 = vweird.f32 %v9250_v26  ;;  %v6953_v22 = vor.u32 1.1754944e-38, %v6952_v6 }
 0x80b   : > { %v6942_v54 = vmul.f32 %v9252_v2, %v6109_v58  ;;  %9253 = vrcp.f32 %v16001_v60  ;;  %vm6947_vm8 = vweird.f32 %v9252_v2  ;;  %vm6978_vm9 = vmor %vm6976_vm7, %vm6977_vm15  ;;  %v6997_v42 = vand.u32 2147483648, %v16001_v60 }
 0x80c   : > { %v6973_v57 = vsub.f32 1.0, %v6972_v30  ;;  %vm6948_vm13 = vmor %vm6946_vm1, %vm6947_vm8  ;;  %vm6991_vm4 = vweird.f32 %v16001_v60 }
 0x80d   : > { %v6943_v52 = vsub.f32 1.0, %v6942_v54  ;;  %6192 = vadd.xlane.f32.xlu0 %v6191_v25 }
 0x80e   : > { %v6974_v37 = vmul.f32 %v9250_v26, %v6973_v57 }
 0x80f   : > { %v6944_v59 = vmul.f32 %v9252_v2, %v6943_v52 }
 0x810   : > { %v6975_v30 = vadd.f32 %v9250_v26, %v6974_v37  ;;  %v6194_v37 = vsel %vm1564_vm2, %v15593_v1, 0.0  ;;  %v16024_v1 = vpop.xlane.xlu0 %6126 }
 0x811   : > { %v6945_v14 = vadd.f32 %v9252_v2, %v6944_v59  ;;  %v9254_v24 = vpop.eup %9253  ;;  %v16018_v59 = vpop.f32.mrf.mxu0 }
 0x812   : > { %8859 = vrot.lane.b32.xlu1 %v8858_v13, %s9651_s27  ;;  %v6979_v29 = vsel %vm6978_vm9, %v9250_v26, %v6975_v30  ;;  %v6987_v52 = vmul.f32 %v9254_v24, %v16001_v60  ;;  %vm6992_vm5 = vweird.f32 %v9254_v24  ;;  %v6995_v30 = vand.u32 2147483647, %v16001_v60 }
 0x813   : > { %v6984_v54 = vsel %vm6981_vm10, %v6983_v41, %v6979_v29  ;;  %v6949_v57 = vsel %vm6948_vm13, %v9252_v2, %v6945_v14  ;;  %v6197_v14 = vsel %vm1564_vm2, %v15575_v50, 0.0  ;;  %v6185_v29 = vsel %vm1564_vm2, %v15583_v5, 0.0  ;;  %vm6993_vm6 = vmor %vm6991_vm4, %vm6992_vm5 }
 0x814   : > { %v7901_v25 = vrot.slane %v6984_v54, 4  ;;  %v6954_v10 = vsel %vm6951_vm14, %v6953_v22, %v6949_v57  ;;  %v6988_v58 = vsub.f32 1.0, %v6987_v52  ;;  %v6203_v5 = vsel %vm1564_vm2, %v15601_v4, 0.0  ;;  %v16033_v54 = vpop.xlane.xlu2 %6123 }
 0x815   : > { %6195 = vadd.xlane.f32.xlu0 %v6194_v37  ;;  %v6998_v22 = vor.u32 1.1754944e-38, %v6997_v42  ;;  %vm6996_vm15 = vcmp.eq.f32.partialorder %v6995_v30, 8.507059e+37  ;;  %vm7021_vm14 = vweird.f32 %v16033_v54 }
 0x816   : > { %v16016_v21 = vsel %vm2142_vm11, %v7901_v25, %v6954_v10  ;;  %v6989_v6 = vmul.f32 %v9254_v24, %v6988_v58 }
 0x818   : > { %v6990_v2 = vadd.f32 %v9254_v24, %v6989_v6  ;;  %v16038_v6 = vpop.xlane.xlu0 %6135 }
 0x819   : > { %v16027_v16 = vpop.f32.mrf.mxu0 }
 0x81a   : > { %v6994_v50 = vsel %vm6993_vm6, %v9254_v24, %v6990_v2 }
 0x81b   : > { %v6999_v37 = vsel %vm6996_vm15, %v6998_v22, %v6994_v50 }
 0x81c   : > { %v6112_v9 = vpop.xlane.xlu1 %6111  ;;  %v7907_v58 = vrot.slane %v6999_v37, 4 }
 0x81d   : > { %9255 = vrcp.f32 %v6112_v9  ;;  %6198 = vadd.xlane.f32.xlu0 %v6197_v14  ;;  %v6967_v57 = vand.u32 2147483648, %v6112_v9  ;;  %v6965_v52 = vand.u32 2147483647, %v6112_v9  ;;  %vm6961_vm7 = vweird.f32 %v6112_v9 }
 0x81e   : > { %9257 = vrcp.f32 %v16033_v54 }
 0x81f   : > { %v6968_v24 = vor.u32 1.1754944e-38, %v6967_v57  ;;  %vm6966_vm1 = vcmp.eq.f32.partialorder %v6965_v52, 8.507059e+37  ;;  %9259 = vrcp.f32 %v16024_v1 }
 0x820   : > { %6186 = vadd.xlane.f32.xlu2 %v6185_v29 }
 0x821   : > { %v16040_v29 = vpop.f32.mrf.mxu0 }
 0x823   : > { %v9256_v26 = vpop.eup %9255 }
 0x824   : > { %v6957_v13 = vmul.f32 %v9256_v26, %v6112_v9  ;;  %v16035_v25 = vpop.xlane.xlu1 %6120  ;;  %vm6962_vm8 = vweird.f32 %v9256_v26  ;;  %v9258_v42 = vpop.eup %9257  ;;  %v6200_v9 = vsel %vm1564_vm2, %v15579_v48, 0.0 }
 0x825   : > { %6204 = vadd.xlane.f32.xlu0 %v6203_v5  ;;  %vm6963_vm9 = vmor %vm6961_vm7, %vm6962_vm8  ;;  %v7017_v30 = vmul.f32 %v9258_v42, %v16033_v54  ;;  %v6212_v5 = vsel %vm1564_vm2, %v15613_v19, 0.0  ;;  %vm7022_vm10 = vweird.f32 %v9258_v42 }
 0x826   : > { %v6958_v41 = vsub.f32 1.0, %v6957_v13  ;;  %vm16071_vm5 = vmor %vm7021_vm14, %vm7022_vm10  ;;  %vm7081_vm14 = vweird.f32 %v16038_v6 }
 0x827   : > { %v7018_v50 = vsub.f32 1.0, %v7017_v30 }
 0x828   : > { %v6959_v10 = vmul.f32 %v9256_v26, %v6958_v41  ;;  %6201 = vadd.xlane.f32.xlu2 %v6200_v9  ;;  %v16052_v41 = vpop.xlane.xlu0 %6144 }
 0x829   : > { %v16056_v22 = vpop.f32.mrf.mxu0  ;;  %v7019_v52 = vmul.f32 %v9258_v42, %v7018_v50  ;;  %v7027_v50 = vand.u32 2147483648, %v16033_v54 }
 0x82a   : > { %v6960_v60 = vadd.f32 %v9256_v26, %v6959_v10 }
 0x82b   : > { %v7020_v30 = vadd.f32 %v9258_v42, %v7019_v52  ;;  %v7028_v8 = vor.u32 1.1754944e-38, %v7027_v50 }
 0x82c   : > { %v6964_v4 = vsel %vm6963_vm9, %v9256_v26, %v6960_v60  ;;  %v6130_v13 = vpop.xlane.xlu1 %6129  ;;  %v16050_v26 = vpop.eup %9259  ;;  %vm7036_vm9 = vweird.f32 %v16024_v1 }
 0x82d   : > { %v6969_v14 = vsel %vm6966_vm1, %v6968_v24, %v6964_v4  ;;  %9261 = vrcp.f32 %v6130_v13  ;;  %6213 = vadd.xlane.f32.xlu0 %v6212_v5  ;;  %v7032_v10 = vmul.f32 %v16050_v26, %v16024_v1  ;;  %v16062_v60 = vpop.xlane.xlu2 %6132  ;;  %v7055_v5 = vand.u32 2147483647, %v6130_v13 }
 0x82e   : > { %v16043_v2 = vsel %vm2142_vm11, %v7907_v58, %v6969_v14  ;;  %9263 = vrcp.f32 %v16038_v6  ;;  %v6209_v58 = vsel %vm1564_vm2, %v15589_v55, 0.0  ;;  %v7057_v14 = vand.u32 2147483648, %v6130_v13 }
 0x82f   : > { %v7033_v4 = vsub.f32 1.0, %v7032_v10  ;;  %9265 = vrcp.f32 %v16052_v41  ;;  %v7025_v55 = vand.u32 2147483647, %v16033_v54  ;;  %vm7051_vm4 = vweird.f32 %v6130_v13 }
 0x830   : > { %6210 = vadd.xlane.f32.xlu2 %v6209_v58  ;;  %9267 = vrcp.f32 %v16062_v60  ;;  %v16077_v10 = vpop.xlane.xlu0 %6153  ;;  %v7058_v45 = vor.u32 1.1754944e-38, %v7057_v14  ;;  %v7024_v47 = vsel %vm16071_vm5, %v9258_v42, %v7020_v30  ;;  %vm7056_vm15 = vcmp.eq.f32.partialorder %v7055_v5, 8.507059e+37 }
 0x831   : > { %v7034_v58 = vmul.f32 %v16050_v26, %v7033_v4  ;;  %9269 = vrcp.f32 %v16035_v25  ;;  %v7042_v54 = vand.u32 2147483648, %v16024_v1  ;;  %vm7026_vm8 = vcmp.eq.f32.partialorder %v7025_v55, 8.507059e+37 }
 0x832   : > { %9271 = vrcp.f32 %v16077_v10  ;;  %v6221_v4 = vsel %vm1564_vm2, %v15625_v63, 0.0  ;;  %vm7037_vm7 = vweird.f32 %v16050_v26  ;;  %v7029_v42 = vsel %vm7026_vm8, %v7028_v8, %v7024_v47 }
 0x833   : > { %v9262_v57 = vpop.eup %9261  ;;  %v7040_v63 = vand.u32 2147483647, %v16024_v1  ;;  %vm16105_vm1 = vmor %vm7036_vm9, %vm7037_vm7  ;;  %v7043_v8 = vor.u32 1.1754944e-38, %v7042_v54  ;;  %v7085_v5 = vand.u32 2147483647, %v16038_v6 }
 0x834   : > { %v16060_v48 = vpop.eup %9263  ;;  %v7047_v37 = vmul.f32 %v9262_v57, %v6130_v13  ;;  %vm7052_vm13 = vweird.f32 %v9262_v57  ;;  %v16118_v1 = vpop.xlane.xlu1 %6138 }
 0x835   : > { %v7077_v19 = vmul.f32 %v16060_v48, %v16038_v6  ;;  %vm7053_vm6 = vmor %vm7051_vm4, %vm7052_vm13  ;;  %6222 = vadd.xlane.f32.xlu0 %v6221_v4  ;;  %vm7082_vm10 = vweird.f32 %v16060_v48  ;;  %vm7041_vm13 = vcmp.eq.f32.partialorder %v7040_v63, 8.507059e+37  ;;  %v7087_v4 = vand.u32 2147483648, %v16038_v6 }
 0x836   : > { %v7048_v24 = vsub.f32 1.0, %v7047_v37  ;;  %vm16143_vm5 = vmor %vm7081_vm14, %vm7082_vm10  ;;  %v6188_v6 = vsel %vm1564_vm2, %v15565_v61, 0.0  ;;  %vm7086_vm4 = vcmp.eq.f32.partialorder %v7085_v5, 8.507059e+37  ;;  %vm7171_vm14 = vweird.f32 %v16077_v10 }
 0x837   : > { %v7078_v38 = vsub.f32 1.0, %v7077_v19  ;;  %v7035_v19 = vadd.f32 %v16050_v26, %v7034_v58 }
 0x838   : > { %v7049_v9 = vmul.f32 %v9262_v57, %v7048_v24  ;;  %v16079_v24 = vpop.f32.mrf.mxu0  ;;  %v16126_v58 = vpop.xlane.xlu0 %6162 }
 0x83a   : > { %v7050_v52 = vadd.f32 %v9262_v57, %v7049_v9  ;;  %v16089_v9 = vpop.eup %9265 }
 0x83b   : > { %v16095_v14 = vpop.eup %9267  ;;  %v7122_v47 = vmul.f32 %v16089_v9, %v16052_v41  ;;  %vm7127_vm8 = vweird.f32 %v16089_v9 }
 0x83c   : > { %v7054_v27 = vsel %vm7053_vm6, %v9262_v57, %v7050_v52  ;;  %v16093_v57 = vpop.xlane.xlu2 %6141  ;;  %v7062_v50 = vmul.f32 %v16095_v14, %v16062_v60  ;;  %6189 = vadd.xlane.f32.xlu1 %v6188_v6  ;;  %vm7126_vm6 = vweird.f32 %v16052_v41 }
 0x83d   : > { %v7059_v3 = vsel %vm7056_vm15, %v7058_v45, %v7054_v27  ;;  %v7079_v27 = vmul.f32 %v16060_v48, %v7078_v38  ;;  %v7039_v38 = vsel %vm16105_vm1, %v16050_v26, %v7035_v19  ;;  %9273 = vrcp.f32 %v16093_v57 }
 0x83e   : > { %v7919_v13 = vrot.slane %v7059_v3, 4  ;;  %v16101_v3 = vpop.eup %9269  ;;  %v6218_v26 = vsel %vm1564_vm2, %v15605_v31, 0.0  ;;  %v16138_v19 = vsel %vm7041_vm13, %v7043_v8, %v7039_v38  ;;  %v6284_v31 = vsel %vm1564_vm2, %v15836_v33, 0.0  ;;  %vm16212_vm13 = vmor %vm7126_vm6, %vm7127_vm8 }
 0x83f   : > { %v16120_v37 = vpop.eup %9271  ;;  %v7080_v55 = vadd.f32 %v16060_v48, %v7079_v27  ;;  %v7002_v52 = vmul.f32 %v16101_v3, %v16035_v25  ;;  %6219 = vadd.xlane.f32.xlu2 %v6218_v26  ;;  %v7132_v27 = vand.u32 2147483648, %v16052_v41  ;;  %9275 = vrcp.f32 %v16126_v58  ;;  %6285 = vadd.xlane.f32.xlu0 %v6284_v31 }
 0x840   : > { %v16099_v45 = vsel %vm2142_vm11, %v7919_v13, %v7029_v42  ;;  %v16130_v54 = vpop.f32.mrf.mxu0  ;;  %v16134_v13 = vperm.slane %v16016_v21, %v19543_v36  ;;  %v7123_v42 = vsub.f32 1.0, %v7122_v47  ;;  %v7063_v21 = vsub.f32 1.0, %v7062_v50  ;;  %v16200_v34 = vpop.xlane.xlu0 %6171 }
 0x841   : > { %19587 = vst [vmem:[#allocation73_spill] sm:$0xff] %v16099_v45  ;;  %v7167_v63 = vmul.f32 %v16120_v37, %v16077_v10  ;;  %v7084_v8 = vsel %vm16143_vm5, %v16060_v48, %v7080_v55  ;;  %v7130_v33 = vand.u32 2147483647, %v16052_v41  ;;  %v7003_v47 = vsub.f32 1.0, %v7002_v52 }
 0x842   : > { %19590 = vst [vmem:[#allocation19_spill] sm:$0xff] %v16134_v13  ;;  %v7088_v26 = vor.u32 1.1754944e-38, %v7087_v4  ;;  %v7070_v13 = vand.u32 2147483647, %v16062_v60  ;;  %v7072_v31 = vand.u32 2147483648, %v16062_v60  ;;  %v7124_v61 = vmul.f32 %v16089_v9, %v7123_v42 }
 0x843   : > { %v16156_v38 = vpop.eup %9273  ;;  %v7133_v48 = vor.u32 1.1754944e-38, %v7132_v27  ;;  %vm7066_vm15 = vweird.f32 %v16062_v60  ;;  %v7064_v55 = vmul.f32 %v16095_v14, %v7063_v21  ;;  %v7168_v52 = vsub.f32 1.0, %v7167_v63 }
 0x844   : > { %v16161_v45 = vpop.xlane.xlu2 %6150  ;;  %v16166_v5 = vsel %vm7086_vm4, %v7088_v26, %v7084_v8  ;;  %vm16170_vm7 = vcmp.eq.f32.partialorder %v7130_v33, 8.507059e+37  ;;  %v7004_v30 = vmul.f32 %v16101_v3, %v7003_v47  ;;  %v7107_v42 = vmul.f32 %v16156_v38, %v16093_v57  ;;  %v16188_v47 = vpop.xlane.xlu1 %6147 }
 0x845   : > { %9277 = vrcp.f32 %v16161_v45  ;;  %v6260_v27 = vsel %vm1564_vm2, %v15674_v40, 0.0  ;;  %v16180_v6 = vpop.eup %9275  ;;  %vm16182_vm9 = vcmp.eq.f32.partialorder %v7070_v13, 8.507059e+37  ;;  %v7073_v21 = vor.u32 1.1754944e-38, %v7072_v31 }
 0x846   : > { %v7175_v63 = vand.u32 2147483647, %v16077_v10  ;;  %v7177_v33 = vand.u32 2147483648, %v16077_v10  ;;  %v7125_v26 = vadd.f32 %v16089_v9, %v7124_v61  ;;  %v7010_v50 = vand.u32 2147483647, %v16035_v25 }
 0x847   : > { %6261 = vadd.xlane.f32.xlu2 %v6260_v27  ;;  %v7012_v40 = vand.u32 2147483648, %v16035_v25  ;;  %v6293_v13 = vsel %vm1564_vm2, %v15903_v62, 0.0  ;;  %v7065_v31 = vadd.f32 %v16095_v14, %v7064_v55  ;;  %vm7067_vm1 = vweird.f32 %v16095_v14 }
 0x848   : > { %v16195_v32 = vpop.f32.mrf.mxu0  ;;  %v7169_v35 = vmul.f32 %v16120_v37, %v7168_v52  ;;  %6294 = vadd.xlane.f32.xlu0 %v6293_v13  ;;  %v6206_v61 = vsel %vm1564_vm2, %v15587_v28, 0.0  ;;  %v7005_v27 = vadd.f32 %v16101_v3, %v7004_v30  ;;  %vm7007_vm10 = vweird.f32 %v16101_v3  ;;  %vm16231_vm6 = vmor %vm7066_vm15, %vm7067_vm1 }
 0x849   : > { %v7108_v7 = vsub.f32 1.0, %v7107_v42  ;;  %v7212_v62 = vmul.f32 %v16180_v6, %v16126_v58  ;;  %6207 = vadd.xlane.f32.xlu1 %v6206_v61  ;;  %vm16217_vm5 = vcmp.eq.f32.partialorder %v7175_v63, 8.507059e+37  ;;  %v7178_v52 = vor.u32 1.1754944e-38, %v7177_v33 }
 0x84a   : > { %vm7006_vm4 = vweird.f32 %v16035_v25  ;;  %v7129_v42 = vsel %vm16212_vm13, %v16089_v9, %v7125_v26  ;;  %vm16235_vm8 = vcmp.eq.f32.partialorder %v7010_v50, 8.507059e+37  ;;  %v7013_v33 = vor.u32 1.1754944e-38, %v7012_v40 }
 0x84b   : > { %v16222_v30 = vpop.eup %9277  ;;  %9279 = vrcp.f32 %v16200_v34  ;;  %v7069_v25 = vsel %vm16231_vm6, %v16095_v14, %v7065_v31  ;;  %v7170_v9 = vadd.f32 %v16120_v37, %v7169_v35  ;;  %vm7172_vm13 = vweird.f32 %v16120_v37  ;;  %vm16247_vm15 = vmor %vm7006_vm4, %vm7007_vm10 }
 0x84c   : > { %9281 = vrcp.f32 %v16118_v1  ;;  %v7009_v50 = vsel %vm16247_vm15, %v16101_v3, %v7005_v27  ;;  %v7109_v26 = vmul.f32 %v16156_v38, %v7108_v7  ;;  %v7213_v40 = vsub.f32 1.0, %v7212_v62 }
 0x84d   : > { %v6269_v35 = vsel %vm1564_vm2, %v15730_v18, 0.0  ;;  %v16260_v14 = vsel %vm16170_vm7, %v7133_v48, %v7129_v42  ;;  %v7115_v13 = vand.u32 2147483647, %v16093_v57  ;;  %v7117_v31 = vand.u32 2147483648, %v16093_v57  ;;  %vm16276_vm7 = vmor %vm7171_vm14, %vm7172_vm13  ;;  %v16343_v18 = vpop.xlane.xlu2 %6159 }
 0x84e   : > { %v7152_v61 = vmul.f32 %v16222_v30, %v16161_v45  ;;  %v16268_v3 = vperm.slane %v16043_v2, %v19543_v36  ;;  %v16272_v7 = vsel %vm16182_vm9, %v7073_v21, %v7069_v25  ;;  %vm7111_vm1 = vweird.f32 %v16093_v57  ;;  %v16288_v21 = vpop.xlane.xlu1 %6156 }
 0x84f   : > { %6270 = vadd.xlane.f32.xlu2 %v6269_v35  ;;  %v7222_v48 = vand.u32 2147483648, %v16126_v58  ;;  %v7174_v4 = vsel %vm16276_vm7, %v16120_v37, %v7170_v9  ;;  %v7014_v2 = vsel %vm16235_vm8, %v7013_v33, %v7009_v50  ;;  %v7220_v8 = vand.u32 2147483647, %v16126_v58  ;;  %v9402_v35 = vld [vmem:[#allocation8 + $0xf8] sm:$0xff] }
 0x850   : > { %v6233_v10 = vsel %vm1564_vm2, %v15621_v44, 0.0  ;;  %v7110_v62 = vadd.f32 %v16156_v38, %v7109_v26  ;;  %vm7112_vm9 = vweird.f32 %v16156_v38  ;;  %v7214_v55 = vmul.f32 %v16180_v6, %v7213_v40  ;;  %v16299_v42 = vpop.f32.mrf.mxu0  ;;  %v9401_v26 = vld [vmem:[#allocation8 + $0x78] sm:$0xff] }
 0x851   : > { %v16292_v27 = vpop.eup %9279  ;;  %6234 = vadd.xlane.f32.xlu0 %v6233_v10  ;;  %v6215_v37 = vsel %vm1564_vm2, %v15597_v11, 0.0  ;;  %vm16303_vm10 = vcmp.eq.f32.partialorder %v7115_v13, 8.507059e+37  ;;  %v7118_v44 = vor.u32 1.1754944e-38, %v7117_v31  ;;  %vm7216_vm14 = vweird.f32 %v16126_v58  ;;  %vm16324_vm6 = vmor %vm7111_vm1, %vm7112_vm9 }
 0x852   : > { %v16301_v41 = vpop.eup %9281  ;;  %v7153_v33 = vsub.f32 1.0, %v7152_v61  ;;  %6216 = vadd.xlane.f32.xlu1 %v6215_v37  ;;  %v16310_v25 = vsel %vm16217_vm5, %v7178_v52, %v7174_v4  ;;  %v19611_v9 = vrot.slane %v16138_v19, 4  ;;  %vm7217_vm4 = vweird.f32 %v16180_v6 }
 0x853   : > { %v16318_v60 = vor.u32 1.1754944e-38, %v7222_v48  ;;  %vm16328_vm8 = vcmp.eq.f32.partialorder %v7220_v8, 8.507059e+37  ;;  %v7160_v19 = vand.u32 2147483647, %v16161_v45  ;;  %v7257_v52 = vmul.f32 %v16292_v27, %v16200_v34  ;;  %v9403_v48 = vld [vmem:[#allocation8 + $0x70] sm:$0xff]  ;;  %vm16361_vm13 = vmor %vm7216_vm14, %vm7217_vm4 }
 0x854   : > { %v16315_v11 = vsel %vm2142_vm11, %v19611_v9, %v7014_v2  ;;  %v6842_v40 = vmul.f32 %v9401_v26, %v16299_v42  ;;  %v6858_v13 = vmul.f32 %v9402_v35, %v16299_v42  ;;  %v7114_v57 = vsel %vm16324_vm6, %v16156_v38, %v7110_v62  ;;  %v9404_v38 = vld [vmem:[#allocation8 + $0xf0] sm:$0xff] }
 0x855   : > { %v7215_v31 = vadd.f32 %v16180_v6, %v7214_v55  ;;  %v7092_v61 = vmul.f32 %v16301_v41, %v16118_v1  ;;  %v6841_v4 = vmul.f32 %v9403_v48, %v16195_v32  ;;  %v7975_v2 = vrot.slane %v16310_v25, 4  ;;  %v19646_v25 = vld [vmem:[#allocation80_spill] sm:$0xff] }
 0x856   : > { %v7154_v8 = vmul.f32 %v16222_v30, %v7153_v33  ;;  %6859 = vmatpush.msrb.mxu2 %v6842_v40  ;;  %6900 = vmatpush.msrb.mxu3 %v6858_v13  ;;  %v6230_v10 = vsel %vm1564_vm2, %v15635_v15, 0.0  ;;  %v6857_v62 = vmul.f32 %v9404_v38, %v16195_v32  ;;  %vm7156_vm5 = vweird.f32 %v16161_v45  ;;  %v16375_v40 = vpop.xlane.xlu0 %6180  ;;  %v16382_v35 = vpop.xlane.xlu1 %6165  ;;  %v9409_v38 = vld [vmem:[#allocation8 + $0x58] sm:$0xff] }
 0x857   : > { %v7162_v55 = vand.u32 2147483648, %v16161_v45  ;;  %v7265_v37 = vand.u32 2147483647, %v16200_v34  ;;  %v7267_v9 = vand.u32 2147483648, %v16200_v34  ;;  %6231 = vadd.xlane.f32.xlu2 %v6230_v10  ;;  %v7119_v33 = vsel %vm16303_vm10, %v7118_v44, %v7114_v57  ;;  %v9410_v15 = vld [vmem:[#allocation8 + $0xd8] sm:$0xff]  ;;  %v19624_v45 = vld [vmem:[#allocation83_spill] sm:$0xff] }
 0x858   : > { %vm7157_vm15 = vweird.f32 %v16222_v30  ;;  %vm16366_vm7 = vcmp.eq.f32.partialorder %v7160_v19, 8.507059e+37  ;;  %v7258_v26 = vsub.f32 1.0, %v7257_v52  ;;  %6860 = vmatpush.msrb.mxu2 %v6841_v4  ;;  %6901 = vmatpush.msrb.mxu3 %v6857_v62  ;;  %v6257_v63 = vsel %vm1564_vm2, %v15684_v17, 0.0  ;;  %v9405_v17 = vld [vmem:[#allocation8 + $0x68] sm:$0xff] }
 0x859   : > { %v7219_v58 = vsel %vm16361_vm13, %v16180_v6, %v7215_v31  ;;  %v7093_v44 = vsub.f32 1.0, %v7092_v61  ;;  %9283 = vrcp.f32 %v16188_v47  ;;  %6258 = vadd.xlane.f32.xlu0 %v6257_v63  ;;  %v6236_v19 = vsel %vm1564_vm2, %v15629_v20, 0.0  ;;  %v9406_v6 = vld [vmem:[#allocation8 + $0xe8] sm:$0xff]  ;;  %v9407_v31 = vld [vmem:[#allocation8 + $0x60] sm:$0xff]  ;;  %vm16402_vm9 = vmor %vm7156_vm5, %vm7157_vm15 }
 0x85a   : > { %v7155_v52 = vadd.f32 %v16222_v30, %v7154_v8  ;;  %vm7261_vm1 = vweird.f32 %v16200_v34  ;;  %6237 = vadd.xlane.f32.xlu1 %v6236_v19  ;;  %v6840_v13 = vmul.f32 %v9405_v17, %v16130_v54  ;;  %v6856_v57 = vmul.f32 %v9406_v6, %v16130_v54  ;;  %v9408_v20 = vld [vmem:[#allocation8 + $0xe0] sm:$0xff]  ;;  %v9411_v17 = vld [vmem:[#allocation8 + $0x50] sm:$0xff] }
 0x85b   : > { %v6839_v61 = vmul.f32 %v9407_v31, %v16079_v24  ;;  %v7963_v48 = vrot.slane %v7119_v33, 4  ;;  %v7163_v4 = vor.u32 1.1754944e-38, %v7162_v55  ;;  %9285 = vrcp.f32 %v16343_v18 }
 0x85c   : > { %v6855_v8 = vmul.f32 %v9408_v20, %v16079_v24  ;;  %v7259_v10 = vmul.f32 %v16292_v27, %v7258_v26  ;;  %9287 = vrcp.f32 %v16375_v40  ;;  %6861 = vmatpush.msrb.mxu2 %v6840_v13  ;;  %6902 = vmatpush.msrb.mxu3 %v6856_v57  ;;  %v6838_v62 = vmul.f32 %v9409_v38, %v16056_v22  ;;  %v9412_v13 = vld [vmem:[#allocation8 + $0xd0] sm:$0xff]  ;;  %v16428_v57 = vpop.xlane.xlu2 %6168  ;;  %v9413_v20 = vld [vmem:[#allocation8 + $0x48] sm:$0xff] }
 0x85d   : > { %v6854_v63 = vmul.f32 %v9410_v15, %v16056_v22  ;;  %v16396_v55 = vsel %vm16328_vm8, %v16318_v60, %v7219_v58  ;;  %v16406_v26 = vor.u32 1.1754944e-38, %v7267_v9  ;;  %v7094_v19 = vmul.f32 %v16301_v41, %v7093_v44  ;;  %v9422_v60 = vld [vmem:[#allocation8 + $0xa8] sm:$0xff] }
 0x85e   : > { %vm7096_vm10 = vweird.f32 %v16118_v1  ;;  %v7159_v28 = vsel %vm16402_vm9, %v16222_v30, %v7155_v52  ;;  %vm16413_vm14 = vcmp.eq.f32.partialorder %v7265_v37, 8.507059e+37  ;;  %6862 = vmatpush.msrb.mxu2 %v6839_v61  ;;  %6903 = vmatpush.msrb.mxu3 %v6855_v8  ;;  %v6254_v58 = vsel %vm1564_vm2, %v19624_v45, 0.0  ;;  %v9415_v45 = vld [vmem:[#allocation8 + $0x40] sm:$0xff] }
 0x85f   : > { %v6837_v9 = vmul.f32 %v9411_v17, %v16040_v29  ;;  %v6853_v44 = vmul.f32 %v9412_v13, %v16040_v29  ;;  %v16421_v6 = vpop.eup %9283  ;;  %v7964_v30 = vsel %vm2142_vm11, %v7963_v48, %v16166_v5  ;;  %vm7262_vm4 = vweird.f32 %v16292_v27  ;;  %6255 = vadd.xlane.f32.xlu2 %v6254_v58  ;;  %v9414_v5 = vld [vmem:[#allocation8 + $0xc8] sm:$0xff]  ;;  %v9424_v17 = vld [vmem:[#allocation8 + $0xa0] sm:$0xff] }
 0x860   : > { %v7100_v37 = vand.u32 2147483647, %v16118_v1  ;;  %v7102_v52 = vand.u32 2147483648, %v16118_v1  ;;  %v7260_v31 = vadd.f32 %v16292_v27, %v7259_v10  ;;  %6863 = vmatpush.msrb.mxu2 %v6838_v62  ;;  %6904 = vmatpush.msrb.mxu3 %v6854_v63  ;;  %v6281_v61 = vsel %vm1564_vm2, %v15888_v56, 0.0  ;;  %vm16459_vm8 = vmor %vm7261_vm1, %vm7262_vm4 }
 0x861   : > { %v6836_v8 = vmul.f32 %v9413_v20, %v16027_v16  ;;  %v6852_v48 = vmul.f32 %v9414_v5, %v16027_v16  ;;  %v16435_v38 = vpop.eup %9285  ;;  %v8013_v15 = vrot.slane %v16396_v55, 4  ;;  %v16440_v33 = vsel %vm16366_vm7, %v7163_v4, %v7159_v28  ;;  %6282 = vadd.xlane.f32.xlu0 %v6281_v61  ;;  %v9416_v4 = vld [vmem:[#allocation8 + $0xc0] sm:$0xff] }
 0x862   : > { %v7095_v10 = vadd.f32 %v16301_v41, %v7094_v19  ;;  %vm7097_vm6 = vweird.f32 %v16301_v41  ;;  %v16444_v56 = vpop.eup %9287  ;;  %v7137_v62 = vmul.f32 %v16421_v6, %v16188_v47  ;;  %6864 = vmatpush.msrb.mxu2 %v6837_v9  ;;  %6905 = vmatpush.msrb.mxu3 %v6853_v44  ;;  %v6245_v63 = vsel %vm1564_vm2, %v15641_v39, 0.0 }
 0x863   : > { %v6835_v50 = vmul.f32 %v9415_v45, %v16018_v59  ;;  %v6851_v28 = vmul.f32 %v9416_v4, %v16018_v59  ;;  %v16453_v19 = vperm.slane %v7964_v30, %v19543_v36  ;;  %vm16463_vm5 = vcmp.eq.f32.partialorder %v7100_v37, 8.507059e+37  ;;  %6246 = vadd.xlane.f32.xlu1 %v6245_v63  ;;  %vm16475_vm13 = vmor %vm7096_vm10, %vm7097_vm6  ;;  %v16480_v30 = vpop.permute.xlu0 %8834  ;;  %v16482_v37 = vpop.xlane.xlu1 %6174  ;;  %v9419_v45 = vld [vmem:[#allocation8 + $0x30] sm:$0xff] }
 0x864   : > { %v7103_v39 = vor.u32 1.1754944e-38, %v7102_v52  ;;  %v7207_v9 = vand.u32 2147483648, %v16343_v18  ;;  %v7264_v13 = vsel %vm16459_vm8, %v16292_v27, %v7260_v31  ;;  %v7205_v44 = vand.u32 2147483647, %v16343_v18  ;;  %6865 = vmatpush.msrb.mxu2 %v6836_v8  ;;  %6906 = vmatpush.msrb.mxu3 %v6852_v48  ;;  %v9417_v52 = vld [vmem:[#allocation8 + $0x38] sm:$0xff]  ;;  %v9420_v4 = vld [vmem:[#allocation8 + $0xb0] sm:$0xff] }
 0x865   : > { %v6834_v61 = vmul.f32 %v9417_v52, %v16299_v42  ;;  %v9418_v27 = vld [vmem:[#allocation8 + $0xb8] sm:$0xff]  ;;  %v7969_v1 = vrot.slane %v16440_v33, 4  ;;  %v7099_v20 = vsel %vm16475_vm13, %v16301_v41, %v7095_v10  ;;  %v7197_v5 = vmul.f32 %v16435_v38, %v16343_v18  ;;  %v16517_v52 = vpop.xlane.xlu2 %6177 }
 0x866   : > { %v6850_v31 = vmul.f32 %v9418_v27, %v16299_v42  ;;  %v7302_v63 = vmul.f32 %v16444_v56, %v16375_v40  ;;  %v7138_v8 = vsub.f32 1.0, %v7137_v62  ;;  %6866 = vmatpush.msrb.mxu2 %v6835_v50  ;;  %6907 = vmatpush.msrb.mxu3 %v6851_v28  ;;  %v6278_v48 = vsel %vm1564_vm2, %v15793_v43, 0.0 }
 0x867   : > { %v6833_v42 = vmul.f32 %v9419_v45, %v16195_v32  ;;  %v6849_v58 = vmul.f32 %v9420_v4, %v16195_v32  ;;  %v16501_v41 = vsel %vm16413_vm14, %v16406_v26, %v7264_v13  ;;  %v16503_v10 = vor.u32 1.1754944e-38, %v7207_v9  ;;  %6279 = vadd.xlane.f32.xlu2 %v6278_v48  ;;  %v9421_v32 = vld [vmem:[#allocation8 + $0x28] sm:$0xff]  ;;  %v9426_v48 = vld [vmem:[#allocation8 + $0x98] sm:$0xff] }
 0x868   : > { %v7310_v62 = vand.u32 2147483647, %v16375_v40  ;;  %v7147_v50 = vand.u32 2147483648, %v16188_v47  ;;  %9289 = vrcp.f32 %v16288_v21  ;;  %6867 = vmatpush.msrb.mxu2 %v6834_v61  ;;  %6908 = vmatpush.msrb.mxu3 %v6850_v31  ;;  %v6263_v43 = vsel %vm1564_vm2, %v15700_v12, 0.0  ;;  %v19631_v12 = vld [vmem:[#allocation33_spill] sm:$0xff]  ;;  %v9423_v31 = vld [vmem:[#allocation8 + $0x20] sm:$0xff] }
 0x869   : > { %v6832_v28 = vmul.f32 %v9421_v32, %v16130_v54  ;;  %v6848_v26 = vmul.f32 %v9422_v60, %v16130_v54  ;;  %v16514_v9 = vsel %vm16463_vm5, %v7103_v39, %v7099_v20  ;;  %v7198_v13 = vsub.f32 1.0, %v7197_v5  ;;  %6264 = vadd.xlane.f32.xlu0 %v6263_v43 }
 0x86a   : > { %v7303_v34 = vsub.f32 1.0, %v7302_v63  ;;  %9291 = vrcp.f32 %v16428_v57  ;;  %v7139_v61 = vmul.f32 %v16421_v6, %v7138_v8  ;;  %6868 = vmatpush.msrb.mxu2 %v6833_v42  ;;  %6909 = vmatpush.msrb.mxu3 %v6849_v58  ;;  %v6224_v27 = vsel %vm1564_vm2, %v19631_v12, 0.0  ;;  %v9425_v8 = vld [vmem:[#allocation8 + $0x18] sm:$0xff] }
 0x86b   : > { %v6831_v54 = vmul.f32 %v9423_v31, %v16079_v24  ;;  %v6847_v39 = vmul.f32 %v9424_v17, %v16079_v24  ;;  %vm7202_vm15 = vweird.f32 %v16435_v38  ;;  %v7312_v20 = vand.u32 2147483648, %v16375_v40  ;;  %6225 = vadd.xlane.f32.xlu1 %v6224_v27  ;;  %v9429_v17 = vld [vmem:[#allocation8 + $0x8] sm:$0xff] }
 0x86c   : > { %vm7141_vm7 = vweird.f32 %v16188_v47  ;;  %v7145_v5 = vand.u32 2147483647, %v16188_v47  ;;  %v7957_v63 = vrot.slane %v16514_v9, 4  ;;  %vm7201_vm1 = vweird.f32 %v16343_v18  ;;  %6869 = vmatpush.msrb.mxu2 %v6832_v28  ;;  %6910 = vmatpush.msrb.mxu3 %v6848_v26  ;;  %v8825_v42 = vpop.permute.xlu1 %8824  ;;  %v9427_v26 = vld [vmem:[#allocation8 + $0x10] sm:$0xff]  ;;  %v19651_v47 = vld [vmem:[#allocation62_spill] sm:$0xff] }
 0x86d   : > { %9293 = vrcp.f32 %v16517_v52  ;;  %v6830_v24 = vmul.f32 %v9425_v8, %v16056_v22  ;;  %v6846_v45 = vmul.f32 %v9426_v48, %v16056_v22  ;;  %v7199_v58 = vmul.f32 %v16435_v38, %v7198_v13  ;;  %v9428_v13 = vld [vmem:[#allocation8 + $0x90] sm:$0xff]  ;;  %vm16616_vm13 = vmor %vm7201_vm1, %vm7202_vm15 }
 0x86e   : > { %v7304_v43 = vmul.f32 %v16444_v56, %v7303_v34  ;;  %vm7306_vm9 = vweird.f32 %v16375_v40  ;;  %vm7142_vm10 = vweird.f32 %v16421_v6  ;;  %v7148_v32 = vor.u32 1.1754944e-38, %v7147_v50  ;;  %v16539_v28 = vpop.eup %9289  ;;  %6870 = vmatpush.msrb.mxu2 %v6831_v54  ;;  %6911 = vmatpush.msrb.mxu3 %v6847_v39 }
 0x86f   : > { %v7140_v60 = vadd.f32 %v16421_v6, %v7139_v61  ;;  %v6239_v22 = vsel %vm1564_vm2, %v15647_v23, 0.0  ;;  %v6829_v12 = vmul.f32 %v9427_v26, %v16040_v29  ;;  %v6845_v34 = vmul.f32 %v9428_v13, %v16040_v29  ;;  %v9430_v29 = vld [vmem:[#allocation8 + $0x88] sm:$0xff]  ;;  %vm16563_vm4 = vmor %vm7141_vm7, %vm7142_vm10  ;;  %v9432_v26 = vld [vmem:[#allocation8 + $0x80] sm:$0xff] }
 0x870   : > { %v16546_v27 = vpop.eup %9291  ;;  %9295 = vrcp.f32 %v16382_v35  ;;  %6240 = vadd.xlane.f32.xlu2 %v6239_v22  ;;  %v8827_v50 = vunpack.i.h.bf16 %v8825_v42  ;;  %v6347_v31 = vrot.slane %v15870_v53, 4  ;;  %v6351_v61 = vrot.slane %v15883_v0, 4  ;;  %6871 = vmatpush.msrb.mxu2 %v6830_v24 }
 0x871   : > { %6912 = vmatpush.msrb.mxu3 %v6846_v45  ;;  %v8826_v54 = vunpack.i.l.bf16 %v8825_v42  ;;  %v6242_v23 = vsel %vm1564_vm2, %v15639_v46, 0.0  ;;  %v6828_v39 = vmul.f32 %v9429_v17, %v16027_v16  ;;  %v6844_v8 = vmul.f32 %v9430_v29, %v16027_v16 }
 0x872   : > { %v16556_v48 = vadd.f32 %v16435_v38, %v7199_v58  ;;  %vm7307_vm14 = vweird.f32 %v16444_v56  ;;  %v7252_v46 = vand.u32 2147483648, %v16428_v57  ;;  %v7182_v0 = vmul.f32 %v16539_v28, %v16288_v21  ;;  %6243 = vadd.xlane.f32.xlu0 %v6242_v23  ;;  %6872 = vmatpush.msrb.mxu2 %v6829_v12  ;;  %v9431_v58 = vld [vmem:[#allocation8] sm:$0xff]  ;;  %v19638_v12 = vld [vmem:[#allocation49_spill] sm:$0xff]  ;;  %v19650_v23 = vld [vmem:[#allocation75_spill] sm:$0xff] }
 0x873   : > { %v16570_v16 = vpop.eup %9293  ;;  %vm16574_vm6 = vcmp.eq.f32.partialorder %v7205_v44, 8.507059e+37  ;;  %v7144_v45 = vsel %vm16563_vm4, %v16421_v6, %v7140_v60  ;;  %6913 = vmatpush.msrb.mxu3 %v6845_v34  ;;  %v6248_v42 = vsel %vm1564_vm2, %v15661_v49, 0.0  ;;  %v6827_v22 = vmul.f32 %v9431_v58, %v16018_v59  ;;  %v16594_v60 = vpop.permute.xlu2 %8829  ;;  %vm16628_vm7 = vmor %vm7306_vm9, %vm7307_vm14 }
 0x874   : > { %v6843_v13 = vmul.f32 %v9432_v26, %v16018_v59  ;;  %v7305_v44 = vadd.f32 %v16444_v56, %v7304_v43  ;;  %vm16588_vm8 = vcmp.eq.f32.partialorder %v7310_v62, 8.507059e+37  ;;  %v7242_v6 = vmul.f32 %v16546_v27, %v16428_v57  ;;  %6249 = vadd.xlane.f32.xlu1 %v6248_v42  ;;  %6873 = vmatpush.msrb.mxu2 %v6828_v39  ;;  %v19643_v39 = vld [vmem:[#allocation18_spill] sm:$0xff]  ;;  %v19647_v26 = vld [vmem:[#allocation76_spill] sm:$0xff] }
 0x875   : > { %v6348_v49 = vsel %vm2142_vm11, %v6347_v31, %v15762_v51  ;;  %v6352_v59 = vsel %vm2142_vm11, %v6351_v61, %v19638_v12  ;;  %v7313_v43 = vor.u32 1.1754944e-38, %v7312_v20  ;;  %vm7146_vm5 = vcmp.eq.f32.partialorder %v7145_v5, 8.507059e+37  ;;  %6914 = vmatpush.msrb.mxu3 %v6844_v8 }
 0x876   : > { %v6811_v62 = vsel %vm2654_vm3, %v6348_v49, %v8826_v54  ;;  %v6819_v34 = vsel %vm2654_vm3, %v6352_v59, %v8827_v50  ;;  %v16606_v17 = vpop.eup %9295  ;;  %v7958_v51 = vsel %vm2142_vm11, %v7957_v63, %v16272_v7  ;;  %v7149_v20 = vsel %vm7146_vm5, %v7148_v32, %v7144_v45  ;;  %6874 = vmatpush.msrb.mxu2 %v6827_v22  ;;  %v19645_v45 = vld [vmem:[#allocation43_spill] sm:$0xff] }
 0x877   : > { %v7183_v5 = vsub.f32 1.0, %v7182_v0  ;;  %v7287_v50 = vmul.f32 %v16570_v16, %v16517_v52  ;;  %v7250_v18 = vand.u32 2147483647, %v16428_v57  ;;  %v16633_v9 = vor.u32 1.1754944e-38, %v7252_v46  ;;  %6915 = vmatpush.msrb.mxu3 %v6843_v13  ;;  %6875 = vmatmul.f32.vlgmr.msrb.gmra.mxu2 %v6811_v62 }
 0x878   : > { %v16533_v4 = vpop.xlane.xlu0 %6183  ;;  %v7190_v63 = vand.u32 2147483647, %v16288_v21  ;;  %v7192_v32 = vand.u32 2147483648, %v16288_v21  ;;  %v7204_v61 = vsel %vm16616_vm13, %v16435_v38, %v16556_v48  ;;  %v7309_v40 = vsel %vm16628_vm7, %v16444_v56, %v7305_v44  ;;  %6916 = vmatmul.f32.vlgmr.msrb.gmra.mxu3 %v6819_v34  ;;  %v19644_v48 = vld [vmem:[#allocation40_spill] sm:$0xff] }
 0x879   : > { %v7243_v54 = vsub.f32 1.0, %v7242_v6  ;;  %v6227_v29 = vsel %vm1564_vm2, %v19643_v39, 0.0  ;;  %v7976_v8 = vsel %vm2142_vm11, %v7975_v2, %v7149_v20  ;;  %vm7186_vm15 = vweird.f32 %v16288_v21 }
 0x87a   : > { %v7297_v53 = vand.u32 2147483648, %v16517_v52  ;;  %v7227_v38 = vmul.f32 %v16606_v17, %v16382_v35  ;;  %6228 = vadd.xlane.f32.xlu2 %v6227_v29  ;;  %v6275_v56 = vsel %vm1564_vm2, %v19644_v48, 0.0  ;;  %v7184_v46 = vmul.f32 %v16539_v28, %v7183_v5 }
 0x87b   : > { %v7288_v0 = vsub.f32 1.0, %v7287_v50  ;;  %6276 = vadd.xlane.f32.xlu0 %v6275_v56  ;;  %v6403_v42 = vrot.slane %v19645_v45, 4  ;;  %v6407_v58 = vrot.slane %v19646_v25, 4  ;;  %vm7246_vm1 = vweird.f32 %v16428_v57  ;;  %v16687_v34 = vpop.permute.xlu2 %8844  ;;  %v19657_v56 = vld [vmem:[#allocation74_spill] sm:$0xff] }
 0x87c   : > { %v8832_v2 = vunpack.i.h.bf16 %v16594_v60  ;;  %v8831_v22 = vunpack.i.l.bf16 %v16594_v60  ;;  %9297 = vrcp.f32 %v16482_v37  ;;  %v6272_v13 = vsel %vm1564_vm2, %v19647_v26, 0.0 }
 0x87d   : > { %v16667_v44 = vsel %vm16574_vm6, %v16503_v10, %v7204_v61  ;;  %v7244_v6 = vmul.f32 %v16546_v27, %v7243_v54  ;;  %vm7247_vm9 = vweird.f32 %v16546_v27  ;;  %v7193_v49 = vor.u32 1.1754944e-38, %v7192_v32  ;;  %6273 = vadd.xlane.f32.xlu1 %v6272_v13  ;;  %v19654_v54 = vld [vmem:[#allocation59_spill] sm:$0xff] }
 0x87e   : > { %v16673_v12 = vsel %vm16588_vm8, %v7313_v43, %v7309_v40  ;;  %vm7187_vm10 = vweird.f32 %v16539_v28  ;;  %v7295_v60 = vand.u32 2147483647, %v16517_v52  ;;  %v7228_v59 = vsub.f32 1.0, %v7227_v38  ;;  %vm16746_vm7 = vmor %vm7246_vm1, %vm7247_vm9 }
 0x87f   : > { %v16678_v62 = vperm.slane %v7976_v8, %v19543_v36  ;;  %vm16680_vm14 = vcmp.eq.f32.partialorder %v7190_v63, 8.507059e+37  ;;  %vm7291_vm4 = vweird.f32 %v16517_v52  ;;  %v16685_v24 = vor.u32 1.1754944e-38, %v7297_v53  ;;  %vm16723_vm5 = vmor %vm7186_vm15, %vm7187_vm10 }
 0x880   : > { %v16622_v31 = vpop.xlane.xlu0 %6192  ;;  %v6404_v43 = vsel %vm2142_vm11, %v6403_v42, %v19650_v23  ;;  %v6408_v20 = vsel %vm2142_vm11, %v6407_v58, %v19651_v47  ;;  %vm16693_vm6 = vcmp.eq.f32.partialorder %v7250_v18, 8.507059e+37  ;;  %v7185_v50 = vadd.f32 %v16539_v28, %v7184_v46  ;;  %v19661_v58 = vld [vmem:[#allocation77_spill] sm:$0xff] }
 0x881   : > { %v7289_v7 = vmul.f32 %v16570_v16, %v7288_v0  ;;  %v6812_v63 = vsel %vm2654_vm3, %v6404_v43, %v8831_v22  ;;  %v6820_v32 = vsel %vm2654_vm3, %v6408_v20, %v8832_v2  ;;  %v7245_v61 = vadd.f32 %v16546_v27, %v7244_v6  ;;  %v19658_v0 = vld [vmem:[#allocation78_spill] sm:$0xff]  ;;  %v19665_v43 = vld [vmem:[#allocation36_spill] sm:$0xff] }
 0x882   : > { %v7235_v40 = vand.u32 2147483647, %v16382_v35  ;;  %6878 = vmatmul.f32.gmra.mxu2 %v6812_v63  ;;  %6919 = vmatmul.f32.gmra.mxu3 %v6820_v32  ;;  %v6266_v18 = vsel %vm1564_vm2, %v19654_v54, 0.0  ;;  %v16708_v29 = vperm.slane %v7958_v51, %v19543_v36  ;;  %v16710_v8 = vpop.eup %9297  ;;  %vm7292_vm8 = vweird.f32 %v16570_v16  ;;  %v19668_v63 = vld [vmem:[#allocation45_spill] sm:$0xff] }
 0x883   : > { %v7229_v53 = vmul.f32 %v16606_v17, %v7228_v59  ;;  %v8837_v38 = vunpack.i.h.bf16 %v16480_v30  ;;  %6267 = vadd.xlane.f32.xlu2 %v6266_v18  ;;  %v7970_v48 = vsel %vm2142_vm11, %v7969_v1, %v16260_v14  ;;  %v6459_v46 = vrot.slane %v19657_v56, 4  ;;  %v19664_v59 = vld [vmem:[#allocation52_spill] sm:$0xff]  ;;  %vm16777_vm9 = vmor %vm7291_vm4, %vm7292_vm8  ;;  %v16802_v18 = vpop.permute.xlu2 %8854 }
 0x884   : > { %v6463_v45 = vrot.slane %v19658_v0, 4  ;;  %v7981_v42 = vrot.slane %v16453_v19, 4  ;;  %v7993_v25 = vrot.slane %v16678_v62, 4  ;;  %v7189_v14 = vsel %vm16723_vm5, %v16539_v28, %v7185_v50  ;;  %v19677_v0 = vld [vmem:[#allocation63_spill] sm:$0xff] }
 0x885   : > { %v7290_v33 = vadd.f32 %v16570_v16, %v7289_v7  ;;  %vm16735_vm13 = vcmp.eq.f32.partialorder %v7295_v60, 8.507059e+37  ;;  %v8836_v1 = vunpack.i.l.bf16 %v16480_v30  ;;  %v6296_v2 = vsel %vm1564_vm2, %v19661_v58, 0.0  ;;  %v8840_v60 = vpop.permute.xlu1 %8839 }
 0x886   : > { %v7272_v28 = vmul.f32 %v16710_v8, %v16482_v37  ;;  %9299 = vrcp.f32 %v16533_v4  ;;  %6297 = vadd.xlane.f32.xlu1 %v6296_v2  ;;  %v16754_v26 = vperm.slane %v7970_v48, %v19543_v36  ;;  %v7982_v30 = vsel %vm2142_vm11, %v7981_v42, %v16708_v29 }
 0x887   : > { %v7249_v57 = vsel %vm16746_vm7, %v16546_v27, %v7245_v61  ;;  %v7230_v13 = vadd.f32 %v16606_v17, %v7229_v53  ;;  %vm7231_vm15 = vweird.f32 %v16382_v35  ;;  %vm7232_vm1 = vweird.f32 %v16606_v17 }
 0x888   : > { %v16705_v39 = vpop.xlane.xlu0 %6195  ;;  %v7237_v6 = vand.u32 2147483648, %v16382_v35  ;;  %v6460_v23 = vsel %vm2142_vm11, %v6459_v46, %v19664_v59  ;;  %v6464_v47 = vsel %vm2142_vm11, %v6463_v45, %v19665_v43  ;;  %v7994_v20 = vsel %vm2142_vm11, %v7993_v25, %v16754_v26  ;;  %vm16794_vm10 = vmor %vm7231_vm15, %vm7232_vm1  ;;  %v19678_v25 = vld [vmem:[#allocation55_spill] sm:$0xff] }
 0x889   : > { %v7194_v27 = vsel %vm16680_vm14, %v7193_v49, %v7189_v14  ;;  %v6813_v35 = vsel %vm2654_vm3, %v6460_v23, %v8836_v1  ;;  %v6821_v7 = vsel %vm2654_vm3, %v6464_v47, %v8837_v38  ;;  %v16784_v32 = vperm.slane %v7982_v30, %v19668_v63  ;;  %v19676_v38 = vld [vmem:[#allocation73_spill] sm:$0xff]  ;;  %v19681_v43 = vld [vmem:[#allocation19_spill] sm:$0xff] }
 0x88a   : > { %v16789_v10 = vsel %vm16693_vm6, %v16633_v9, %v7249_v57  ;;  %v7294_v52 = vsel %vm16777_vm9, %v16570_v16, %v7290_v33  ;;  %vm16798_vm14 = vcmp.eq.f32.partialorder %v7235_v40, 8.507059e+37  ;;  %v7273_v54 = vsub.f32 1.0, %v7272_v28  ;;  %6881 = vmatmul.f32.gmra.mxu2 %v6813_v35  ;;  %6922 = vmatmul.f32.gmra.mxu3 %v6821_v7  ;;  %v19675_v16 = vld [vmem:[#allocation47_spill] sm:$0xff]  ;;  %v19679_v30 = vld [vmem:[#allocation69_spill] sm:$0xff] }
 0x88b   : > { %19669 = vst [vmem:[#allocation39_spill] sm:$0xff] %v16784_v32  ;;  %v7234_v9 = vsel %vm16794_vm10, %v16606_v17, %v7230_v13  ;;  %v16808_v5 = vperm.slane %v7994_v20, %v19668_v63  ;;  %v6515_v53 = vrot.slane %v19675_v16, 4  ;;  %v16813_v40 = vperm.slane %v19676_v38, %v19543_v36  ;;  %v19683_v16 = vld [vmem:[#allocation29_spill] sm:$0xff] }
 0x88c   : > { %v16815_v48 = vpop.eup %9299  ;;  %v8014_v51 = vsel %vm2142_vm11, %v8013_v15, %v7194_v27  ;;  %v7238_v56 = vor.u32 1.1754944e-38, %v7237_v6  ;;  %v8841_v46 = vunpack.i.l.bf16 %v8840_v60  ;;  %v6519_v45 = vrot.slane %v19677_v0, 4  ;;  %v19680_v6 = vld [vmem:[#allocation35_spill] sm:$0xff]  ;;  %v19687_v0 = vld [vmem:[#allocation42_spill] sm:$0xff] }
 0x88d   : > { %19674 = vst [vmem:[#allocation71_spill] sm:$0xff] %v16808_v5  ;;  %v8842_v42 = vunpack.i.h.bf16 %v8840_v60  ;;  %v6287_v14 = vsel %vm1564_vm2, %v19678_v25, 0.0  ;;  %v8007_v33 = vrot.slane %v16784_v32, 4  ;;  %v7925_v1 = vrot.slane %v16268_v3, 4  ;;  %v16859_v35 = vpop.permute.xlu1 %8849 }
 0x88e   : > { %v7299_v55 = vsel %vm16735_vm13, %v16685_v24, %v7294_v52  ;;  %v7239_v15 = vsel %vm16798_vm14, %v7238_v56, %v7234_v9  ;;  %v7274_v58 = vmul.f32 %v16710_v8, %v7273_v54  ;;  %v7280_v2 = vand.u32 2147483647, %v16482_v37  ;;  %6288 = vadd.xlane.f32.xlu1 %v6287_v14  ;;  %v19682_v54 = vld [vmem:[#allocation37_spill] sm:$0xff] }
 0x88f   : > { %v7317_v22 = vmul.f32 %v16815_v48, %v16533_v4  ;;  %v8008_v28 = vsel %vm2142_vm11, %v16808_v5, %v8007_v33  ;;  %v6516_v57 = vsel %vm2142_vm11, %v6515_v53, %v19679_v30  ;;  %v7937_v21 = vrot.slane %v16813_v40, 4 }
 0x890   : > { %v16821_v17 = vpop.xlane.xlu0 %6198  ;;  %v7282_v24 = vand.u32 2147483648, %v16482_v37  ;;  %9301 = vrcp.f32 %v16622_v31  ;;  %8359 = vrot.lane.b32.xlu0 %v8008_v28, %s9652_s26  ;;  %v6814_v13 = vsel %vm2654_vm3, %v6516_v57, %v8841_v46  ;;  %v6520_v60 = vsel %vm2142_vm11, %v6519_v45, %v19680_v6  ;;  %v19692_v28 = vld [vmem:[#allocation84_spill] sm:$0xff] }
 0x891   : > { %9303 = vrcp.f32 %v16705_v39  ;;  %v6822_v59 = vsel %vm2654_vm3, %v6520_v60, %v8842_v42  ;;  %v16851_v23 = vperm.slane %v16315_v11, %v19543_v36  ;;  %v7926_v47 = vsel %vm2142_vm11, %v7925_v1, %v19681_v43 }
 0x892   : > { %v16856_v20 = vperm.slane %v8014_v51, %v19543_v36  ;;  %v8031_v27 = vrot.slane %v7299_v55, 4  ;;  %v8019_v50 = vrot.slane %v7239_v15, 4  ;;  %vm7276_vm4 = vweird.f32 %v16482_v37  ;;  %6884 = vmatmul.f32.gmra.mxu2 %v6814_v13  ;;  %6925 = vmatmul.f32.gmra.mxu3 %v6822_v59 }
 0x893   : > { %v16861_v7 = vpop.xlane.xlu2 %6186  ;;  %v7275_v52 = vadd.f32 %v16710_v8, %v7274_v58  ;;  %vm7277_vm6 = vweird.f32 %v16710_v8  ;;  %v7318_v11 = vsub.f32 1.0, %v7317_v22  ;;  %v7938_v49 = vsel %vm2142_vm11, %v7937_v21, %v16851_v23 }
 0x894   : > { %v8847_v61 = vunpack.i.h.bf16 %v16687_v34  ;;  %v6571_v9 = vrot.slane %v19682_v54, 4  ;;  %v6575_v53 = vrot.slane %v19683_v16, 4  ;;  %v16871_v38 = vperm.slane %v7926_v47, %v19668_v63  ;;  %vm16888_vm5 = vmor %vm7276_vm4, %vm7277_vm6 }
 0x895   : > { %vm16873_vm8 = vcmp.eq.f32.partialorder %v7280_v2, 8.507059e+37  ;;  %v7283_v56 = vor.u32 1.1754944e-38, %v7282_v24  ;;  %v8846_v46 = vunpack.i.l.bf16 %v16687_v34  ;;  %v6251_v45 = vsel %vm1564_vm2, %v19687_v0, 0.0  ;;  %v19691_v2 = vld [vmem:[#allocation79_spill] sm:$0xff] }
 0x896   : > { %19684 = vst [vmem:[#allocation38_spill] sm:$0xff] %v16871_v38  ;;  %v16880_v42 = vpop.eup %9301  ;;  %v16884_v25 = vsel %vm2142_vm11, %v8031_v27, %v16501_v41  ;;  %v8857_v33 = vunpack.i.h.bf16 %v16802_v18  ;;  %v8856_v1 = vunpack.i.l.bf16 %v16802_v18  ;;  %6252 = vadd.xlane.f32.xlu1 %v6251_v45  ;;  %v16895_v34 = vperm.slane %v7938_v49, %v19668_v63  ;;  %v19707_v18 = vld [vmem:[#allocation70_spill] sm:$0xff] }
 0x897   : > { %v16899_v15 = vpop.eup %9303  ;;  %v8020_v41 = vsel %vm2142_vm11, %v8019_v50, %v16667_v44  ;;  %v7279_v37 = vsel %vm16888_vm5, %v16710_v8, %v7275_v52  ;;  %v7319_v58 = vmul.f32 %v16815_v48, %v7318_v11  ;;  %9305 = vrcp.f32 %v16821_v17  ;;  %v16937_v52 = vpop.permute.xlu1 %8859  ;;  %v19694_v11 = vld [vmem:[#allocation31_spill] sm:$0xff] }
 0x898   : > { %19690 = vst [vmem:[#allocation30_spill] sm:$0xff] %v16895_v34  ;;  %v16897_v55 = vpop.xlane.xlu0 %6204  ;;  %v6572_v22 = vsel %vm2142_vm11, %v6571_v9, %v19691_v2  ;;  %v6576_v30 = vsel %vm2142_vm11, %v6575_v53, %v19692_v28  ;;  %v7951_v57 = vrot.slane %v16871_v38, 4  ;;  %9307 = vrcp.f32 %v16861_v7 }
 0x899   : > { %v7362_v44 = vmul.f32 %v16880_v42, %v16622_v31  ;;  %v6815_v21 = vsel %vm2654_vm3, %v6572_v22, %v8846_v46  ;;  %v6823_v8 = vsel %vm2654_vm3, %v6576_v30, %v8847_v61  ;;  %9309 = vrcp.f32 %v16897_v55  ;;  %v19695_v61 = vld [vmem:[#allocation41_spill] sm:$0xff]  ;;  %v19710_v22 = vld [vmem:[#allocation68_spill] sm:$0xff] }
 0x89a   : > { %v16920_v24 = vperm.slane %v8020_v41, %v19543_v36  ;;  %v7325_v13 = vand.u32 2147483647, %v16533_v4  ;;  %v7377_v6 = vmul.f32 %v16899_v15, %v16705_v39  ;;  %6887 = vmatmul.f32.gmra.mxu2 %v6815_v21  ;;  %6928 = vmatmul.f32.gmra.mxu3 %v6823_v8  ;;  %v7952_v60 = vsel %vm2142_vm11, %v16895_v34, %v7951_v57  ;;  %v19702_v8 = vld [vmem:[#allocation54_spill] sm:$0xff] }
 0x89b   : > { %v16929_v59 = vsel %vm16873_vm8, %v7283_v56, %v7279_v37  ;;  %v7320_v47 = vadd.f32 %v16815_v48, %v7319_v58  ;;  %vm7322_vm13 = vweird.f32 %v16815_v48  ;;  %v7327_v27 = vand.u32 2147483648, %v16533_v4  ;;  %8357 = vrot.lane.b32.xlu2 %v7952_v60, %s9652_s26  ;;  %v16941_v9 = vpop.xlane.xlu2 %6201  ;;  %v19696_v56 = vld [vmem:[#allocation66_spill] sm:$0xff] }
 0x89c   : > { %19693 = vst [vmem:[#allocation27_spill] sm:$0xff] %v16920_v24  ;;  %vm7321_vm7 = vweird.f32 %v16533_v4  ;;  %v8852_v50 = vunpack.i.h.bf16 %v16859_v35  ;;  %v6627_v49 = vrot.slane %v19694_v11, 4  ;;  %v6631_v54 = vrot.slane %v19695_v61, 4 }
 0x89d   : > { %v16943_v16 = vpop.eup %9305  ;;  %v8851_v53 = vunpack.i.l.bf16 %v16859_v35  ;;  %v7363_v51 = vsub.f32 1.0, %v7362_v44  ;;  %v6290_v46 = vsel %vm1564_vm2, %v19696_v56, 0.0  ;;  %9311 = vrcp.f32 %v16941_v9  ;;  %vm16954_vm15 = vmor %vm7321_vm7, %vm7322_vm13  ;;  %v19701_v44 = vld [vmem:[#allocation53_spill] sm:$0xff] }
 0x89e   : > { %v16949_v4 = vpop.eup %9307  ;;  %v8025_v0 = vrot.slane %v16929_v59, 4  ;;  %vm16958_vm1 = vcmp.eq.f32.partialorder %v7325_v13, 8.507059e+37  ;;  %v7372_v35 = vand.u32 2147483648, %v16622_v31  ;;  %v7378_v41 = vsub.f32 1.0, %v7377_v6  ;;  %6291 = vadd.xlane.f32.xlu1 %v6290_v46 }
 0x89f   : > { %v16963_v37 = vpop.eup %9309  ;;  %v7324_v58 = vsel %vm16954_vm15, %v16815_v48, %v7320_v47  ;;  %v7328_v2 = vor.u32 1.1754944e-38, %v7327_v27  ;;  %v7387_v30 = vand.u32 2147483648, %v16705_v39  ;;  %v7392_v57 = vmul.f32 %v16943_v16, %v16821_v17 }
 0x8a0   : > { %v6628_v21 = vsel %vm2142_vm11, %v6627_v49, %v19701_v44  ;;  %v6632_v13 = vsel %vm2142_vm11, %v6631_v54, %v19702_v8  ;;  %v16977_v6 = vpop.xlane.xlu0 %6213  ;;  %v7364_v48 = vmul.f32 %v16880_v42, %v7363_v51  ;;  %v7332_v60 = vmul.f32 %v16949_v4, %v16861_v7 }
 0x8a1   : > { %v6816_v59 = vsel %vm2654_vm3, %v6628_v21, %v8851_v53  ;;  %v6824_v47 = vsel %vm2654_vm3, %v6632_v13, %v8852_v50  ;;  %v16984_v27 = vor.u32 1.1754944e-38, %v7372_v35  ;;  %v7379_v49 = vmul.f32 %v16899_v15, %v7378_v41  ;;  %v19703_v50 = vld [vmem:[#allocation85_spill] sm:$0xff]  ;;  %v19704_v41 = vld [vmem:[#allocation34_spill] sm:$0xff] }
 0x8a2   : > { %v7422_v61 = vmul.f32 %v16963_v37, %v16897_v55  ;;  %6890 = vmatmul.f32.gmra.mxu2 %v6816_v59  ;;  %6931 = vmatmul.f32.gmra.mxu3 %v6824_v47  ;;  %v16994_v51 = vsel %vm16958_vm1, %v7328_v2, %v7324_v58  ;;  %v7342_v53 = vand.u32 2147483648, %v16861_v7  ;;  %9313 = vrcp.f32 %v16977_v6 }
 0x8a3   : > { %v16990_v54 = vpop.eup %9311  ;;  %v6683_v56 = vrot.slane %v19703_v50, 4  ;;  %v17000_v45 = vor.u32 1.1754944e-38, %v7387_v30  ;;  %v7393_v35 = vsub.f32 1.0, %v7392_v57  ;;  %v6687_v44 = vrot.slane %v19704_v41, 4  ;;  %v17014_v57 = vpop.xlane.xlu2 %6210  ;;  %v19705_v50 = vld [vmem:[#allocation48_spill] sm:$0xff] }
 0x8a4   : > { %v17004_v21 = vadd.f32 %v16880_v42, %v7364_v48  ;;  %v7333_v2 = vsub.f32 1.0, %v7332_v60  ;;  %v17009_v8 = vadd.f32 %v16899_v15, %v7379_v49  ;;  %v7340_v13 = vand.u32 2147483647, %v16861_v7 }
 0x8a5   : > { %v7423_v59 = vsub.f32 1.0, %v7422_v61  ;;  %v7407_v30 = vmul.f32 %v16990_v54, %v16941_v9  ;;  %v17016_v47 = vor.u32 1.1754944e-38, %v7342_v53  ;;  %v7432_v48 = vand.u32 2147483648, %v16897_v55  ;;  %v19706_v61 = vld [vmem:[#allocation58_spill] sm:$0xff] }
 0x8a6   : > { %v6684_v41 = vsel %vm2142_vm11, %v6683_v56, %v19705_v50  ;;  %9315 = vrcp.f32 %v17014_v57  ;;  %v7394_v60 = vmul.f32 %v16943_v16, %v7393_v35  ;;  %vm7396_vm2 = vweird.f32 %v16821_v17 }
 0x8a7   : > { %v6817_v49 = vsel %vm2654_vm3, %v6684_v41, %v8856_v1  ;;  %v6688_v14 = vsel %vm2142_vm11, %v6687_v44, %v19706_v61  ;;  %v8026_v53 = vsel %vm2142_vm11, %v8025_v0, %v16789_v10  ;;  %v7334_v56 = vmul.f32 %v16949_v4, %v7333_v2 }
 0x8a8   : > { %v17031_v58 = vpop.eup %9313  ;;  %vm7336_vm9 = vweird.f32 %v16861_v7  ;;  %v6825_v35 = vsel %vm2654_vm3, %v6688_v14, %v8857_v33  ;;  %v17040_v50 = vperm.slane %v16884_v25, %v19543_v36  ;;  %v8037_v1 = vrot.slane %v16920_v24, 4  ;;  %v19708_v33 = vld [vmem:[#allocation72_spill] sm:$0xff] }
 0x8a9   : > { %vm7397_vm10 = vweird.f32 %v16943_v16  ;;  %v7424_v10 = vmul.f32 %v16963_v37, %v7423_v59  ;;  %vm7426_vm14 = vweird.f32 %v16897_v55  ;;  %v7408_v0 = vsub.f32 1.0, %v7407_v30 }
 0x8aa   : > { %6893 = vmatmul.f32.gmra.mxu2 %v6817_v49  ;;  %6934 = vmatmul.f32.gmra.mxu3 %v6825_v35  ;;  %v7430_v44 = vand.u32 2147483647, %v16897_v55  ;;  %v6739_v2 = vrot.slane %v19707_v18, 4  ;;  %v6743_v14 = vrot.slane %v19708_v33, 4  ;;  %v17050_v25 = vperm.slane %v8026_v53, %v19543_v36  ;;  %v17077_v33 = vpop.xlane.xlu0 %6222  ;;  %vm17107_vm12 = vmor %vm7396_vm2, %vm7397_vm10 }
 0x8ab   : > { %v17053_v41 = vadd.f32 %v16943_v16, %v7394_v60  ;;  %vm7337_vm4 = vweird.f32 %v16949_v4  ;;  %v17056_v59 = vor.u32 1.1754944e-38, %v7432_v48  ;;  %v7467_v30 = vmul.f32 %v17031_v58, %v16977_v6 }
 0x8ac   : > { %v17060_v49 = vpop.eup %9315  ;;  %v17063_v61 = vadd.f32 %v16949_v4, %v7334_v56  ;;  %vm7427_vm6 = vweird.f32 %v16963_v37  ;;  %v8038_v53 = vsel %vm2142_vm11, %v8037_v1, %v16856_v20  ;;  %v8049_v60 = vrot.slane %v17040_v50, 4  ;;  %v19709_v1 = vld [vmem:[#allocation67_spill] sm:$0xff]  ;;  %vm17121_vm1 = vmor %vm7336_vm9, %vm7337_vm4 }
 0x8ad   : > { %vm7367_vm8 = vweird.f32 %v16880_v42  ;;  %v17071_v48 = vadd.f32 %v16963_v37, %v7424_v10  ;;  %v7409_v35 = vmul.f32 %v16990_v54, %v7408_v0  ;;  %v7415_v18 = vand.u32 2147483647, %v16941_v9  ;;  %vm17143_vm9 = vmor %vm7426_vm14, %vm7427_vm6 }
 0x8ae   : > { %v7452_v56 = vmul.f32 %v17060_v49, %v17014_v57  ;;  %vm7382_vm5 = vweird.f32 %v16899_v15  ;;  %9317 = vrcp.f32 %v17077_v33  ;;  %v6740_v46 = vsel %vm2142_vm11, %v6739_v2, %v19709_v1 }
 0x8af   : > { %v6744_v10 = vsel %vm2142_vm11, %v6743_v14, %v19710_v22  ;;  %v8050_v0 = vsel %vm2142_vm11, %v8049_v60, %v17050_v25  ;;  %vm7366_vm13 = vweird.f32 %v16622_v31  ;;  %vm17088_vm7 = vcmp.eq.f32.partialorder %v7340_v13, 8.507059e+37 }
 0x8b0   : > { %vm17092_vm15 = vcmp.eq.f32.partialorder %v7430_v44, 8.507059e+37  ;;  %v7468_v38 = vsub.f32 1.0, %v7467_v30  ;;  %v7453_v34 = vsub.f32 1.0, %v7452_v56  ;;  %v19715_v2 = vunpack.i.l.bf16 %v16937_v52 }
 0x8b1   : > { %v17100_v22 = vperm.slane %v8038_v53, %v19668_v63  ;;  %vm7412_vm0 = vweird.f32 %v16990_v54  ;;  %v7460_v44 = vand.u32 2147483647, %v17014_v57  ;;  %v7462_v14 = vand.u32 2147483648, %v17014_v57 }
 0x8b2   : > { %v6818_v1 = vsel %vm2654_vm3, %v6740_v46, %v19715_v2  ;;  %v19719_v46 = vunpack.i.h.bf16 %v16937_v52  ;;  %v7410_v60 = vadd.f32 %v16990_v54, %v7409_v35  ;;  %v7454_v56 = vmul.f32 %v17060_v49, %v7453_v34  ;;  %v17197_v34 = vpop.xlane.xlu1 %6189 }
 0x8b3   : > { %19716 = vst [vmem:[#allocation21_spill] sm:$0xff] %v17100_v22  ;;  %vm7457_vm2 = vweird.f32 %v17060_v49  ;;  %6896 = vmatmul.f32.gmra.mxu2 %v6818_v1  ;;  %v17129_v52 = vperm.slane %v8050_v0, %v19668_v63  ;;  %v7399_v7 = vsel %vm17107_vm12, %v16943_v16, %v17053_v41  ;;  %vm7411_vm10 = vweird.f32 %v16941_v9 }
 0x8b4   : > { %v6826_v30 = vsel %vm2654_vm3, %v6744_v10, %v19719_v46  ;;  %v7339_v10 = vsel %vm17121_vm1, %v16949_v4, %v17063_v61  ;;  %v7417_v35 = vand.u32 2147483648, %v16941_v9  ;;  %vm17151_vm12 = vmor %vm7411_vm10, %vm7412_vm0  ;;  %v7469_v4 = vmul.f32 %v17031_v58, %v7468_v38  ;;  %v17159_v61 = vpop.xlane.xlu2 %6219  ;;  %v17161_v0 = vpop.eup %9317 }
 0x8b5   : > { %6937 = vmatmul.f32.gmra.mxu3 %v6826_v30  ;;  %19722 = vst [vmem:[#allocation20_spill] sm:$0xff] %v17129_v52  ;;  %v7455_v41 = vadd.f32 %v17060_v49, %v7454_v56  ;;  %vm7456_vm4 = vweird.f32 %v17014_v57  ;;  %v8063_v55 = vrot.slane %v17100_v22, 4  ;;  %v19727_v9 = vand.u32 2147483647, %v16622_v31  ;;  %v17192_v30 = vpop.xlane.xlu0 %6285  ;;  %vm17207_vm10 = vmor %vm7366_vm13, %vm7367_vm8 }
 0x8b6   : > { %v7429_v38 = vsel %vm17143_vm9, %v16963_v37, %v17071_v48  ;;  %vm17173_vm0 = vcmp.eq.f32.partialorder %v7415_v18, 8.507059e+37  ;;  %vm7458_vm6 = vmor %vm7456_vm4, %vm7457_vm2  ;;  %v7463_v57 = vor.u32 1.1754944e-38, %v7462_v14  ;;  %9319 = vrcp.f32 %v17159_v61 }
 0x8b7   : > { %vm17165_vm14 = vcmp.eq.f32.partialorder %v19727_v9, 8.507059e+37  ;;  %v19732_v13 = vand.u32 2147483647, %v16705_v39  ;;  %v7414_v37 = vsel %vm17151_vm12, %v16990_v54, %v7410_v60  ;;  %v7459_v48 = vsel %vm7458_vm6, %v17060_v49, %v7455_v41 }
 0x8b8   : > { %vm7461_vm9 = vcmp.eq.f32.partialorder %v7460_v44, 8.507059e+37  ;;  %v8064_v18 = vsel %vm2142_vm11, %v17129_v52, %v8063_v55  ;;  %v7418_v14 = vor.u32 1.1754944e-38, %v7417_v35  ;;  %v7512_v56 = vmul.f32 %v17161_v0, %v17077_v33 }
 0x8b9   : > { %vm17182_vm1 = vcmp.eq.f32.partialorder %v19732_v13, 8.507059e+37  ;;  %v7464_v53 = vsel %vm7461_vm9, %v7463_v57, %v7459_v48  ;;  %8361 = vrot.lane.b32.xlu1 %v8064_v18, %s9652_s26  ;;  %9321 = vrcp.f32 %v17192_v30  ;;  %v7470_v54 = vadd.f32 %v17031_v58, %v7469_v4 }
 0x8ba   : > { %vm7472_vm2 = vweird.f32 %v17031_v58  ;;  %v8125_v49 = vrot.slane %v7464_v53, 4  ;;  %9323 = vrcp.f32 %v17197_v34  ;;  %v7344_v60 = vsel %vm17088_vm7, %v17016_v47, %v7339_v10 }
 0x8bb   : > { %v7434_v35 = vsel %vm17092_vm15, %v17056_v59, %v7429_v38  ;;  %v7419_v16 = vsel %vm17173_vm0, %v7418_v14, %v7414_v37  ;;  %v7477_v4 = vand.u32 2147483648, %v16977_v6  ;;  %vm19737_vm8 = vweird.f32 %v16705_v39 }
 0x8bc   : > { %vm17224_vm13 = vmor %vm19737_vm8, %vm7382_vm5  ;;  %v19740_v28 = vand.u32 2147483648, %v16821_v17  ;;  %vm7471_vm7 = vweird.f32 %v16977_v6  ;;  %v7475_v11 = vand.u32 2147483647, %v16977_v6  ;;  %v17233_v59 = vsel %vm2142_vm11, %v8125_v49, %v7434_v35  ;;  %v17235_v10 = vpop.eup %9319 }
 0x8bd   : > { %v7369_v39 = vsel %vm17207_vm10, %v16880_v42, %v17004_v21  ;;  %v7384_v41 = vsel %vm17224_vm13, %v16899_v15, %v17009_v8  ;;  %v19741_v55 = vand.u32 2147483647, %v16821_v17  ;;  %vm17249_vm15 = vmor %vm7471_vm7, %vm7472_vm2  ;;  %v7513_v9 = vsub.f32 1.0, %v7512_v56  ;;  %v17258_v21 = vpop.xlane.xlu2 %6261  ;;  %v17286_v56 = vpop.xlane.xlu0 %6294 }
 0x8be   : > { %v7403_v47 = vor.u32 1.1754944e-38, %v19740_v28  ;;  %v8069_v1 = vrot.slane %v7344_v60, 4  ;;  %v8087_v57 = vrot.slane %v7419_v16, 4  ;;  %v7474_v42 = vsel %vm17249_vm15, %v17031_v58, %v7470_v54 }
 0x8bf   : > { %vm7401_vm5 = vcmp.eq.f32.partialorder %v19741_v55, 8.507059e+37  ;;  %v17260_v15 = vpop.eup %9321  ;;  %v7478_v17 = vor.u32 1.1754944e-38, %v7477_v4  ;;  %v7520_v8 = vand.u32 2147483647, %v17077_v33  ;;  %v7522_v13 = vand.u32 2147483648, %v17077_v33 }
 0x8c0   : > { %v17253_v38 = vsel %vm7401_vm5, %v7403_v47, %v7399_v7  ;;  %9325 = vrcp.f32 %v17258_v21  ;;  %v17265_v37 = vpop.eup %9323  ;;  %v17270_v7 = vsel %vm17165_vm14, %v16984_v27, %v7369_v39  ;;  %vm7476_vm12 = vcmp.eq.f32.partialorder %v7475_v11, 8.507059e+37  ;;  %v17284_v27 = vpop.xlane.xlu1 %6207 }
 0x8c1   : > { %v7497_v58 = vmul.f32 %v17235_v10, %v17159_v61  ;;  %v7827_v48 = vmul.f32 %v17260_v15, %v17192_v30  ;;  %v7389_v18 = vsel %vm17182_vm1, %v17000_v45, %v7384_v41  ;;  %v17279_v14 = vsel %vm7476_vm12, %v7478_v17, %v7474_v42 }
 0x8c2   : > { %v7514_v53 = vmul.f32 %v17161_v0, %v7513_v9  ;;  %v7347_v2 = vmul.f32 %v17265_v37, %v17197_v34  ;;  %v17291_v49 = vsel %vm2142_vm11, %v8069_v1, %v16673_v12  ;;  %v17294_v46 = vsel %vm2142_vm11, %v8087_v57, %v7389_v18 }
 0x8c3   : > { %vm7516_vm4 = vweird.f32 %v17077_v33  ;;  %vm17297_vm14 = vcmp.eq.f32.partialorder %v7520_v8, 8.507059e+37  ;;  %v7523_v44 = vor.u32 1.1754944e-38, %v7522_v13  ;;  %v7507_v60 = vand.u32 2147483648, %v17159_v61 }
 0x8c4   : > { %v7348_v35 = vsub.f32 1.0, %v7347_v2  ;;  %9327 = vrcp.f32 %v17284_v27  ;;  %v8131_v16 = vrot.slane %v17279_v14, 4  ;;  %v7498_v4 = vsub.f32 1.0, %v7497_v58 }
 0x8c5   : > { %v7828_v12 = vsub.f32 1.0, %v7827_v48  ;;  %9329 = vrcp.f32 %v17286_v56  ;;  %v7515_v28 = vadd.f32 %v17161_v0, %v7514_v53  ;;  %vm7517_vm0 = vweird.f32 %v17161_v0  ;;  %v17316_v6 = vpop.xlane.xlu2 %6270 }
 0x8c6   : > { %v17305_v31 = vpop.eup %9325  ;;  %vm7501_vm6 = vweird.f32 %v17159_v61  ;;  %v7349_v47 = vmul.f32 %v17265_v37, %v7348_v35  ;;  %v7505_v11 = vand.u32 2147483647, %v17159_v61  ;;  %v7355_v39 = vand.u32 2147483647, %v17197_v34  ;;  %vm17325_vm2 = vmor %vm7516_vm4, %vm7517_vm0 }
 0x8c7   : > { %v7357_v41 = vand.u32 2147483648, %v17197_v34  ;;  %v7707_v55 = vmul.f32 %v17305_v31, %v17258_v21  ;;  %v17318_v9 = vor.u32 1.1754944e-38, %v7507_v60  ;;  %vm7351_vm1 = vweird.f32 %v17197_v34 }
 0x8c8   : > { %vm7831_vm9 = vweird.f32 %v17192_v30  ;;  %v7835_v1 = vand.u32 2147483647, %v17192_v30  ;;  %v7499_v42 = vmul.f32 %v17235_v10, %v7498_v4  ;;  %v7829_v17 = vmul.f32 %v17260_v15, %v7828_v12  ;;  %v17353_v35 = vpop.xlane.xlu1 %6216 }
 0x8c9   : > { %v7837_v8 = vand.u32 2147483648, %v17192_v30  ;;  %9331 = vrcp.f32 %v17316_v6  ;;  %v7519_v58 = vsel %vm17325_vm2, %v17161_v0, %v7515_v28  ;;  %v7350_v33 = vadd.f32 %v17265_v37, %v7349_v47 }
 0x8ca   : > { %v17333_v13 = vpop.eup %9327  ;;  %vm7352_vm10 = vweird.f32 %v17265_v37  ;;  %v7708_v48 = vsub.f32 1.0, %v7707_v55  ;;  %vm7502_vm8 = vweird.f32 %v17235_v10  ;;  %vm17343_vm13 = vcmp.eq.f32.partialorder %v7505_v11, 8.507059e+37 }
 0x8cb   : > { %v17340_v18 = vpop.eup %9329  ;;  %vm17347_vm7 = vcmp.eq.f32.partialorder %v7355_v39, 8.507059e+37  ;;  %v7358_v60 = vor.u32 1.1754944e-38, %v7357_v41  ;;  %v7437_v0 = vmul.f32 %v17333_v13, %v17284_v27  ;;  %vm7832_vm5 = vweird.f32 %v17260_v15  ;;  %vm17373_vm12 = vmor %vm7351_vm1, %vm7352_vm10 }
 0x8cc   : > { %vm17356_vm15 = vcmp.eq.f32.partialorder %v7835_v1, 8.507059e+37  ;;  %v7715_v12 = vand.u32 2147483647, %v17258_v21  ;;  %v7717_v28 = vand.u32 2147483648, %v17258_v21  ;;  %v7872_v47 = vmul.f32 %v17340_v18, %v17286_v56  ;;  %vm17389_vm4 = vmor %vm7501_vm6, %vm7502_vm8 }
 0x8cd   : > { %v17366_v11 = vsel %vm17297_vm14, %v7523_v44, %v7519_v58  ;;  %v7500_v39 = vadd.f32 %v17235_v10, %v7499_v42  ;;  %v7830_v55 = vadd.f32 %v17260_v15, %v7829_v17  ;;  %v7438_v1 = vsub.f32 1.0, %v7437_v0  ;;  %vm17403_vm0 = vmor %vm7831_vm9, %vm7832_vm5 }
 0x8ce   : > { %v7354_v57 = vsel %vm17373_vm12, %v17265_v37, %v7350_v33  ;;  %v7709_v45 = vmul.f32 %v17305_v31, %v7708_v48  ;;  %v7873_v44 = vsub.f32 1.0, %v7872_v47  ;;  %9333 = vrcp.f32 %v17353_v35  ;;  %v17396_v33 = vpop.xlane.xlu0 %6234 }
 0x8cf   : > { %v17383_v42 = vpop.eup %9331  ;;  %v7838_v17 = vor.u32 1.1754944e-38, %v7837_v8  ;;  %vm7711_vm14 = vweird.f32 %v17258_v21  ;;  %v7439_v37 = vmul.f32 %v17333_v13, %v7438_v1  ;;  %v7445_v58 = vand.u32 2147483647, %v17284_v27 }
 0x8d0   : > { %vm17407_vm6 = vcmp.eq.f32.partialorder %v7715_v12, 8.507059e+37  ;;  %v7718_v0 = vor.u32 1.1754944e-38, %v7717_v28  ;;  %vm7441_vm1 = vweird.f32 %v17284_v27  ;;  %v7752_v47 = vmul.f32 %v17383_v42, %v17316_v6 }
 0x8d1   : > { %v7504_v41 = vsel %vm17389_vm4, %v17235_v10, %v7500_v39  ;;  %v7359_v30 = vsel %vm17347_vm7, %v7358_v60, %v7354_v57  ;;  %v7834_v12 = vsel %vm17403_vm0, %v17260_v15, %v7830_v55  ;;  %vm7712_vm9 = vweird.f32 %v17305_v31  ;;  %v17433_v15 = vpop.xlane.xlu2 %6231  ;;  %v17435_v60 = vpop.xlane.xlu1 %6237 }
 0x8d2   : > { %v7710_v28 = vadd.f32 %v17305_v31, %v7709_v45  ;;  %v7874_v1 = vmul.f32 %v17340_v18, %v7873_v44  ;;  %v7753_v48 = vsub.f32 1.0, %v7752_v47  ;;  %9335 = vrcp.f32 %v17396_v33  ;;  %vm17455_vm7 = vmor %vm7711_vm14, %vm7712_vm9 }
 0x8d3   : > { %v7440_v54 = vadd.f32 %v17333_v13, %v7439_v37  ;;  %vm7442_vm2 = vweird.f32 %v17333_v13  ;;  %vm17428_vm10 = vcmp.eq.f32.partialorder %v7445_v58, 8.507059e+37  ;;  %v7447_v2 = vand.u32 2147483648, %v17284_v27 }
 0x8d4   : > { %v17437_v39 = vpop.eup %9333  ;;  %v17442_v55 = vsel %vm17343_vm13, %v17318_v9, %v7504_v41  ;;  %vm7876_vm8 = vweird.f32 %v17286_v56  ;;  %v7880_v57 = vand.u32 2147483647, %v17286_v56  ;;  %v7754_v45 = vmul.f32 %v17383_v42, %v7753_v48  ;;  %vm17468_vm13 = vmor %vm7441_vm1, %vm7442_vm2 }
 0x8d5   : > { %v8075_v44 = vrot.slane %v7359_v30, 4  ;;  %v17449_v34 = vsel %vm17356_vm15, %v7838_v17, %v7834_v12  ;;  %v7882_v9 = vand.u32 2147483648, %v17286_v56  ;;  %v7760_v53 = vand.u32 2147483647, %v17316_v6 }
 0x8d6   : > { %v7714_v58 = vsel %vm17455_vm7, %v17305_v31, %v7710_v28  ;;  %v7875_v21 = vadd.f32 %v17340_v18, %v7874_v1  ;;  %vm7877_vm5 = vweird.f32 %v17340_v18  ;;  %v7482_v17 = vmul.f32 %v17437_v39, %v17353_v35  ;;  %v17504_v28 = vpop.xlane.xlu0 %6258 }
 0x8d7   : > { %v7444_v48 = vsel %vm17468_vm13, %v17333_v13, %v7440_v54  ;;  %v7755_v31 = vadd.f32 %v17383_v42, %v7754_v45  ;;  %vm7757_vm15 = vweird.f32 %v17383_v42  ;;  %9337 = vrcp.f32 %v17433_v15  ;;  %vm17499_vm4 = vmor %vm7876_vm8, %vm7877_vm5 }
 0x8d8   : > { %v17482_v27 = vpop.eup %9335  ;;  %v7448_v61 = vor.u32 1.1754944e-38, %v7447_v2  ;;  %vm17484_vm12 = vcmp.eq.f32.partialorder %v7880_v57, 8.507059e+37  ;;  %v7762_v41 = vand.u32 2147483648, %v17316_v6  ;;  %9339 = vrcp.f32 %v17435_v60 }
 0x8d9   : > { %v8076_v54 = vsel %vm2142_vm11, %v8075_v44, %v16994_v51  ;;  %v17495_v30 = vsel %vm17407_vm6, %v7718_v0, %v7714_v58  ;;  %vm7756_vm14 = vweird.f32 %v17316_v6  ;;  %v7879_v51 = vsel %vm17499_vm4, %v17340_v18, %v7875_v21  ;;  %v17532_v37 = vpop.xlane.xlu1 %6246  ;;  %v17546_v21 = vpop.xlane.xlu2 %6255 }
 0x8da   : > { %v7449_v1 = vsel %vm17428_vm10, %v7448_v61, %v7444_v48  ;;  %v7883_v8 = vor.u32 1.1754944e-38, %v7882_v9  ;;  %vm17513_vm0 = vmor %vm7756_vm14, %vm7757_vm15  ;;  %v7483_v0 = vsub.f32 1.0, %v7482_v17  ;;  %vm17520_vm6 = vcmp.eq.f32.partialorder %v7760_v53, 8.507059e+37 }
 0x8db   : > { %v7759_v6 = vsel %vm17513_vm0, %v17383_v42, %v7755_v31  ;;  %v7492_v10 = vand.u32 2147483648, %v17353_v35  ;;  %v7572_v18 = vmul.f32 %v17482_v27, %v17396_v33  ;;  %v17528_v57 = vperm.slane %v8076_v54, %v19543_v36 }
 0x8dc   : > { %v7763_v44 = vor.u32 1.1754944e-38, %v7762_v41  ;;  %9341 = vrcp.f32 %v17504_v28  ;;  %v8132_v9 = vsel %vm2142_vm11, %v8131_v16, %v7449_v1  ;;  %v17541_v53 = vsel %vm17484_vm12, %v7883_v8, %v7879_v51 }
 0x8dd   : > { %v17534_v42 = vpop.eup %9337  ;;  %vm7486_vm1 = vweird.f32 %v17353_v35  ;;  %v7490_v58 = vand.u32 2147483647, %v17353_v35  ;;  %v7582_v4 = vand.u32 2147483648, %v17396_v33  ;;  %v7484_v14 = vmul.f32 %v17437_v39, %v7483_v0 }
 0x8de   : > { %v17548_v17 = vpop.eup %9339  ;;  %v17552_v48 = vsel %vm17520_vm6, %v7763_v44, %v7759_v6  ;;  %v7557_v16 = vmul.f32 %v17534_v42, %v17433_v15  ;;  %v7567_v31 = vand.u32 2147483648, %v17433_v15  ;;  %v17558_v61 = vor.u32 1.1754944e-38, %v7492_v10 }
 0x8df   : > { %v7573_v47 = vsub.f32 1.0, %v7572_v18  ;;  %v7580_v41 = vand.u32 2147483647, %v17396_v33  ;;  %v7587_v54 = vmul.f32 %v17548_v17, %v17435_v60  ;;  %v17564_v12 = vperm.slane %v8132_v9, %v19543_v36 }
 0x8e0   : > { %vm7487_vm9 = vweird.f32 %v17437_v39  ;;  %9343 = vrcp.f32 %v17546_v21  ;;  %vm7576_vm2 = vweird.f32 %v17396_v33  ;;  %vm7577_vm10 = vweird.f32 %v17482_v27 }
 0x8e1   : > { %v7565_v8 = vand.u32 2147483647, %v17433_v15  ;;  %v7588_v56 = vsub.f32 1.0, %v7587_v54  ;;  %v17576_v6 = vadd.f32 %v17437_v39, %v7484_v14  ;;  %v17578_v2 = vor.u32 1.1754944e-38, %v7582_v4  ;;  %vm17607_vm5 = vmor %vm7486_vm1, %vm7487_vm9  ;;  %v17623_v35 = vpop.xlane.xlu1 %6225 }
 0x8e2   : > { %v17573_v0 = vpop.eup %9341  ;;  %v7558_v10 = vsub.f32 1.0, %v7557_v16  ;;  %v17580_v18 = vor.u32 1.1754944e-38, %v7567_v31  ;;  %v7574_v44 = vmul.f32 %v17482_v27, %v7573_v47  ;;  %vm7591_vm8 = vweird.f32 %v17435_v60  ;;  %vm17667_vm1 = vmor %vm7576_vm2, %vm7577_vm10 }
 0x8e3   : > { %v7589_v9 = vmul.f32 %v17548_v17, %v7588_v56  ;;  %v7692_v1 = vmul.f32 %v17573_v0, %v17504_v28  ;;  %vm7561_vm7 = vweird.f32 %v17433_v15  ;;  %vm7592_vm13 = vweird.f32 %v17548_v17 }
 0x8e4   : > { %v7595_v14 = vand.u32 2147483647, %v17435_v60  ;;  %v7597_v4 = vand.u32 2147483648, %v17435_v60  ;;  %v19776_v16 = vrot.slane %v17253_v38, 4  ;;  %v7700_v56 = vand.u32 2147483647, %v17504_v28  ;;  %vm17638_vm14 = vmor %vm7591_vm8, %vm7592_vm13 }
 0x8e5   : > { %v7590_v47 = vadd.f32 %v17548_v17, %v7589_v9  ;;  %v7693_v54 = vsub.f32 1.0, %v7692_v1  ;;  %v17599_v51 = vperm.slane %v17294_v46, %v19543_v36  ;;  %vm17611_vm15 = vcmp.eq.f32.partialorder %v7490_v58, 8.507059e+37 }
 0x8e6   : > { %v8082_v31 = vsel %vm2142_vm11, %v19776_v16, %v17270_v7  ;;  %v17601_v13 = vpop.eup %9343  ;;  %v7559_v7 = vmul.f32 %v17534_v42, %v7558_v10  ;;  %vm7696_vm12 = vweird.f32 %v17504_v28  ;;  %v17619_v46 = vperm.slane %v17291_v49, %v19543_v36 }
 0x8e7   : > { %v8093_v1 = vrot.slane %v17528_v57, 4  ;;  %9345 = vrcp.f32 %v17532_v37  ;;  %v7489_v58 = vsel %vm17607_vm5, %v17437_v39, %v17576_v6  ;;  %v7575_v9 = vadd.f32 %v17482_v27, %v7574_v44  ;;  %v17647_v39 = vpop.xlane.xlu0 %6282 }
 0x8e8   : > { %vm17630_vm4 = vcmp.eq.f32.partialorder %v7580_v41, 8.507059e+37  ;;  %v7677_v16 = vmul.f32 %v17601_v13, %v17546_v21  ;;  %v17645_v45 = vperm.slane %v8082_v31, %v19543_v36  ;;  %vm17649_vm0 = vcmp.eq.f32.partialorder %v7565_v8, 8.507059e+37 }
 0x8e9   : > { %v7594_v60 = vsel %vm17638_vm14, %v17548_v17, %v7590_v47  ;;  %v7694_v6 = vmul.f32 %v17573_v0, %v7693_v54  ;;  %v8094_v44 = vsel %vm2142_vm11, %v8093_v1, %v17619_v46  ;;  %v8105_v32 = vrot.slane %v17599_v51, 4  ;;  %v17681_v1 = vpop.xlane.xlu2 %6279 }
 0x8ea   : > { %vm7596_vm6 = vcmp.eq.f32.partialorder %v7595_v14, 8.507059e+37  ;;  %v7598_v31 = vor.u32 1.1754944e-38, %v7597_v4  ;;  %v7678_v22 = vsub.f32 1.0, %v7677_v16  ;;  %v17661_v5 = vperm.slane %v8094_v44, %v19668_v63 }
 0x8eb   : > { %v7560_v17 = vadd.f32 %v17534_v42, %v7559_v7  ;;  %vm7562_vm9 = vweird.f32 %v17534_v42  ;;  %v8106_v14 = vsel %vm2142_vm11, %v8105_v32, %v17645_v45  ;;  %9347 = vrcp.f32 %v17647_v39 }
 0x8ec   : > { %19787 = vst [vmem:[#allocation22_spill] sm:$0xff] %v17661_v5  ;;  %v7579_v4 = vsel %vm17667_vm1, %v17482_v27, %v7575_v9  ;;  %v7599_v47 = vsel %vm7596_vm6, %v7598_v31, %v7594_v60  ;;  %v7702_v33 = vand.u32 2147483648, %v17504_v28  ;;  %v7679_v54 = vmul.f32 %v17601_v13, %v7678_v22  ;;  %vm17693_vm10 = vmor %vm7561_vm7, %vm7562_vm9 }
 0x8ed   : > { %v17683_v49 = vpop.eup %9345  ;;  %v7695_v7 = vadd.f32 %v17573_v0, %v7694_v6  ;;  %vm7697_vm2 = vweird.f32 %v17573_v0  ;;  %v17688_v32 = vperm.slane %v8106_v14, %v19668_v63  ;;  %v8119_v16 = vrot.slane %v17661_v5, 4 }
 0x8ee   : > { %v7680_v22 = vadd.f32 %v17601_v13, %v7679_v54  ;;  %vm7682_vm8 = vweird.f32 %v17601_v13  ;;  %v7685_v9 = vand.u32 2147483647, %v17546_v21  ;;  %v7632_v60 = vmul.f32 %v17683_v49, %v17532_v37  ;;  %vm17713_vm7 = vmor %vm7696_vm12, %vm7697_vm2 }
 0x8ef   : > { %19790 = vst [vmem:[#allocation44_spill] sm:$0xff] %v17688_v32  ;;  %v7564_v6 = vsel %vm17693_vm10, %v17534_v42, %v7560_v17  ;;  %v8187_v44 = vrot.slane %v7599_v47, 4  ;;  %v7687_v15 = vand.u32 2147483648, %v17546_v21  ;;  %v8120_v31 = vsel %vm2142_vm11, %v17688_v32, %v8119_v16 }
 0x8f0   : > { %v7494_v8 = vsel %vm17611_vm15, %v17558_v61, %v7489_v58  ;;  %vm7681_vm13 = vweird.f32 %v17546_v21  ;;  %8363 = vrot.lane.b32.xlu2 %v8120_v31, %s9652_s26  ;;  %v7633_v42 = vsub.f32 1.0, %v7632_v60  ;;  %9349 = vrcp.f32 %v17681_v1  ;;  %v17736_v58 = vpop.xlane.xlu1 %6249 }
 0x8f1   : > { %v17720_v17 = vpop.eup %9347  ;;  %v17725_v38 = vsel %vm17630_vm4, %v17578_v2, %v7579_v4  ;;  %v7699_v28 = vsel %vm17713_vm7, %v17573_v0, %v7695_v7  ;;  %vm7701_vm5 = vcmp.eq.f32.partialorder %v7700_v56, 8.507059e+37  ;;  %v7703_v61 = vor.u32 1.1754944e-38, %v7702_v33  ;;  %vm17732_vm15 = vmor %vm7681_vm13, %vm7682_vm8  ;;  %v17747_v4 = vpop.xlane.xlu0 %6264 }
 0x8f2   : > { %v7569_v10 = vsel %vm17649_vm0, %v17580_v18, %v7564_v6  ;;  %v7684_v2 = vsel %vm17732_vm15, %v17601_v13, %v7680_v22  ;;  %v7640_v0 = vand.u32 2147483647, %v17532_v37  ;;  %v7812_v56 = vmul.f32 %v17720_v17, %v17647_v39 }
 0x8f3   : > { %v8188_v47 = vsel %vm2142_vm11, %v8187_v44, %v7569_v10  ;;  %vm7686_vm12 = vcmp.eq.f32.partialorder %v7685_v9, 8.507059e+37  ;;  %v7688_v33 = vor.u32 1.1754944e-38, %v7687_v15  ;;  %v7642_v54 = vand.u32 2147483648, %v17532_v37  ;;  %v17773_v44 = vpop.xlane.xlu2 %6240 }
 0x8f4   : > { %v17751_v7 = vsel %vm7701_vm5, %v7703_v61, %v7699_v28  ;;  %v7634_v18 = vmul.f32 %v17683_v49, %v7633_v42  ;;  %v7813_v41 = vsub.f32 1.0, %v7812_v56  ;;  %9351 = vrcp.f32 %v17623_v35 }
 0x8f5   : > { %v19797_v13 = vrot.slane %v17366_v11, 4  ;;  %v7689_v22 = vsel %vm7686_vm12, %v7688_v33, %v7684_v2  ;;  %9353 = vrcp.f32 %v17747_v4  ;;  %v17765_v60 = vperm.slane %v8188_v47, %v19543_v36 }
 0x8f6   : > { %v17762_v9 = vpop.eup %9349  ;;  %vm7636_vm4 = vweird.f32 %v17532_v37  ;;  %vm17768_vm14 = vcmp.eq.f32.partialorder %v7640_v0, 8.507059e+37  ;;  %v7820_v11 = vand.u32 2147483647, %v17647_v39  ;;  %vm7637_vm0 = vweird.f32 %v17683_v49 }
 0x8f7   : > { %v17758_v16 = vsel %vm2142_vm11, %v19797_v13, %v7494_v8  ;;  %v7643_v31 = vor.u32 1.1754944e-38, %v7642_v54  ;;  %v7797_v8 = vmul.f32 %v17762_v9, %v17681_v1  ;;  %v19800_v14 = vrot.slane %v17495_v30, 4  ;;  %vm17806_vm2 = vmor %vm7636_vm4, %vm7637_vm0 }
 0x8f8   : > { %v7635_v28 = vadd.f32 %v17683_v49, %v7634_v18  ;;  %v7814_v61 = vmul.f32 %v17720_v17, %v7813_v41  ;;  %v7822_v21 = vand.u32 2147483648, %v17647_v39  ;;  %v7805_v2 = vand.u32 2147483647, %v17681_v1  ;;  %v17814_v13 = vpop.xlane.xlu1 %6273 }
 0x8f9   : > { %v8244_v42 = vsel %vm2142_vm11, %v19800_v14, %v7689_v22  ;;  %v7798_v10 = vsub.f32 1.0, %v7797_v8  ;;  %v7807_v0 = vand.u32 2147483648, %v17681_v1  ;;  %9355 = vrcp.f32 %v17773_v44  ;;  %v17822_v14 = vpop.xlane.xlu0 %6243 }
 0x8fa   : > { %v17788_v56 = vpop.eup %9351  ;;  %vm7816_vm6 = vweird.f32 %v17647_v39  ;;  %vm17791_vm1 = vcmp.eq.f32.partialorder %v7820_v11, 8.507059e+37  ;;  %vm7801_vm9 = vweird.f32 %v17681_v1  ;;  %9357 = vrcp.f32 %v17736_v58 }
 0x8fb   : > { %v17797_v47 = vpop.eup %9353  ;;  %v17800_v33 = vperm.slane %v8244_v42, %v19543_v36  ;;  %vm7817_vm10 = vweird.f32 %v17720_v17  ;;  %v7799_v18 = vmul.f32 %v17762_v9, %v7798_v10  ;;  %v7527_v41 = vmul.f32 %v17788_v56, %v17623_v35 }
 0x8fc   : > { %v7639_v22 = vsel %vm17806_vm2, %v17683_v49, %v7635_v28  ;;  %v7815_v11 = vadd.f32 %v17720_v17, %v7814_v61  ;;  %v7823_v37 = vor.u32 1.1754944e-38, %v7822_v21  ;;  %v7722_v8 = vmul.f32 %v17797_v47, %v17747_v4  ;;  %vm17842_vm5 = vmor %vm7816_vm6, %vm7817_vm10 }
 0x8fd   : > { %vm17824_vm8 = vcmp.eq.f32.partialorder %v7805_v2, 8.507059e+37  ;;  %v7808_v10 = vor.u32 1.1754944e-38, %v7807_v0  ;;  %v7528_v15 = vsub.f32 1.0, %v7527_v41  ;;  %vm7531_vm7 = vweird.f32 %v17623_v35 }
 0x8fe   : > { %v7800_v27 = vadd.f32 %v17762_v9, %v7799_v18  ;;  %vm7802_vm13 = vweird.f32 %v17762_v9  ;;  %v7535_v49 = vand.u32 2147483647, %v17623_v35  ;;  %v7723_v28 = vsub.f32 1.0, %v7722_v8 }
 0x8ff   : > { %v17832_v61 = vpop.eup %9355  ;;  %v17836_v21 = vsel %vm17768_vm14, %v7643_v31, %v7639_v22  ;;  %v7529_v0 = vmul.f32 %v17788_v56, %v7528_v15  ;;  %v7537_v54 = vand.u32 2147483648, %v17623_v35  ;;  %9359 = vrcp.f32 %v17822_v14  ;;  %v17858_v22 = vpop.xlane.xlu2 %6228  ;;  %vm17864_vm15 = vmor %vm7801_vm9, %vm7802_vm13 }
 0x900   : > { %v17849_v18 = vpop.eup %9357  ;;  %v7819_v6 = vsel %vm17842_vm5, %v17720_v17, %v7815_v11  ;;  %v7724_v31 = vmul.f32 %v17797_v47, %v7723_v28  ;;  %v7730_v39 = vand.u32 2147483647, %v17747_v4  ;;  %v7602_v41 = vmul.f32 %v17832_v61, %v17773_v44 }
 0x901   : > { %v7530_v8 = vadd.f32 %v17788_v56, %v7529_v0  ;;  %vm7532_vm12 = vweird.f32 %v17788_v56  ;;  %vm7726_vm4 = vweird.f32 %v17747_v4  ;;  %v7647_v17 = vmul.f32 %v17849_v18, %v17736_v58 }
 0x902   : > { %v7804_v28 = vsel %vm17864_vm15, %v17762_v9, %v7800_v27  ;;  %vm17877_vm14 = vcmp.eq.f32.partialorder %v7535_v49, 8.507059e+37  ;;  %v7603_v2 = vsub.f32 1.0, %v7602_v41  ;;  %v17883_v0 = vsel %vm17791_vm1, %v7823_v37, %v7819_v6  ;;  %vm17888_vm0 = vmor %vm7531_vm7, %vm7532_vm12  ;;  %v17908_v6 = vpop.xlane.xlu1 %6297 }
 0x903   : > { %v7538_v5 = vor.u32 1.1754944e-38, %v7537_v54  ;;  %v7732_v32 = vand.u32 2147483648, %v17747_v4  ;;  %v7648_v52 = vsub.f32 1.0, %v7647_v17  ;;  %v7725_v27 = vadd.f32 %v17797_v47, %v7724_v31 }
 0x904   : > { %vm7727_vm6 = vweird.f32 %v17797_v47  ;;  %vm17894_vm9 = vcmp.eq.f32.partialorder %v7730_v39, 8.507059e+37  ;;  %v7610_v30 = vand.u32 2147483647, %v17773_v44  ;;  %v7809_v49 = vsel %vm17824_vm8, %v7808_v10, %v7804_v28 }
 0x905   : > { %v17899_v37 = vpop.eup %9359  ;;  %v7534_v35 = vsel %vm17888_vm0, %v17788_v56, %v7530_v8  ;;  %vm7606_vm1 = vweird.f32 %v17773_v44  ;;  %v7649_v54 = vmul.f32 %v17849_v18, %v7648_v52  ;;  %v7604_v39 = vmul.f32 %v17832_v61, %v7603_v2  ;;  %vm17917_vm2 = vmor %vm7726_vm4, %vm7727_vm6 }
 0x906   : > { %v7612_v41 = vand.u32 2147483648, %v17773_v44  ;;  %v7617_v42 = vmul.f32 %v17899_v37, %v17822_v14  ;;  %v7733_v56 = vor.u32 1.1754944e-38, %v7732_v32  ;;  %v7655_v52 = vand.u32 2147483647, %v17736_v58 }
 0x907   : > { %v7657_v15 = vand.u32 2147483648, %v17736_v58  ;;  %9361 = vrcp.f32 %v17858_v22  ;;  %v19819_v8 = vrot.slane %v17449_v34, 4  ;;  %v7539_v11 = vsel %vm17877_vm14, %v7538_v5, %v7534_v35  ;;  %v17945_v1 = vpop.xlane.xlu2 %6267 }
 0x908   : > { %v7729_v4 = vsel %vm17917_vm2, %v17797_v47, %v7725_v27  ;;  %vm17932_vm10 = vcmp.eq.f32.partialorder %v7610_v30, 8.507059e+37  ;;  %v7618_v32 = vsub.f32 1.0, %v7617_v42  ;;  %v7650_v2 = vadd.f32 %v17849_v18, %v7649_v54 }
 0x909   : > { %v8300_v17 = vsel %vm2142_vm11, %v19819_v8, %v7809_v49  ;;  %vm7652_vm8 = vweird.f32 %v17849_v18  ;;  %v7625_v34 = vand.u32 2147483647, %v17822_v14  ;;  %9363 = vrcp.f32 %v17814_v13  ;;  %v17940_v49 = vpop.xlane.xlu0 %6276 }
 0x90a   : > { %v7605_v5 = vadd.f32 %v17832_v61, %v7604_v39  ;;  %vm7607_vm7 = vweird.f32 %v17832_v61  ;;  %v7613_v47 = vor.u32 1.1754944e-38, %v7612_v41  ;;  %vm7651_vm13 = vweird.f32 %v17736_v58 }
 0x90b   : > { %v8143_v27 = vrot.slane %v7539_v11, 4  ;;  %v7734_v30 = vsel %vm17894_vm9, %v7733_v56, %v7729_v4  ;;  %v7619_v35 = vmul.f32 %v17899_v37, %v7618_v32  ;;  %v7627_v54 = vand.u32 2147483648, %v17822_v14  ;;  %vm17954_vm5 = vmor %vm7651_vm13, %vm7652_vm8 }
 0x90c   : > { %v17952_v42 = vperm.slane %v8300_v17, %v19543_v36  ;;  %vm17958_vm15 = vcmp.eq.f32.partialorder %v7655_v52, 8.507059e+37  ;;  %vm7621_vm12 = vweird.f32 %v17822_v14  ;;  %9365 = vrcp.f32 %v17940_v49  ;;  %vm17968_vm4 = vmor %vm7606_vm1, %vm7607_vm7 }
 0x90d   : > { %v17964_v58 = vpop.eup %9361  ;;  %v7654_v10 = vsel %vm17954_vm5, %v17849_v18, %v7650_v2  ;;  %v7658_v56 = vor.u32 1.1754944e-38, %v7657_v15  ;;  %vm17975_vm14 = vcmp.eq.f32.partialorder %v7625_v34, 8.507059e+37  ;;  %9367 = vrcp.f32 %v17945_v1  ;;  %v17997_v2 = vpop.xlane.xlu1 %6288 }
 0x90e   : > { %v19830_v8 = vrot.slane %v17552_v48, 4  ;;  %v7609_v44 = vsel %vm17968_vm4, %v17832_v61, %v7605_v5  ;;  %vm7622_vm0 = vweird.f32 %v17899_v37  ;;  %v7542_v18 = vmul.f32 %v17964_v58, %v17858_v22 }
 0x90f   : > { %v17991_v15 = vpop.eup %9363  ;;  %v8144_v11 = vsel %vm2142_vm11, %v8143_v27, %v17442_v55  ;;  %v7620_v4 = vadd.f32 %v17899_v37, %v7619_v35  ;;  %v7628_v48 = vor.u32 1.1754944e-38, %v7627_v54  ;;  %v7550_v32 = vand.u32 2147483647, %v17858_v22  ;;  %vm18017_vm9 = vmor %vm7621_vm12, %vm7622_vm0 }
 0x910   : > { %v17983_v17 = vsel %vm2142_vm11, %v19830_v8, %v7734_v30  ;;  %v7659_v61 = vsel %vm17958_vm15, %v7658_v56, %v7654_v10  ;;  %v7543_v34 = vsub.f32 1.0, %v7542_v18  ;;  %v7552_v5 = vand.u32 2147483648, %v17858_v22 }
 0x911   : > { %v7767_v30 = vmul.f32 %v17991_v15, %v17814_v13  ;;  %v18006_v39 = vsel %vm17932_vm10, %v7613_v47, %v7609_v44  ;;  %vm7546_vm6 = vweird.f32 %v17858_v22  ;;  %v7777_v55 = vand.u32 2147483648, %v17814_v13 }
 0x912   : > { %9369 = vrcp.f32 %v17908_v6  ;;  %v18011_v27 = vpop.eup %9365  ;;  %v7544_v28 = vmul.f32 %v17964_v58, %v7543_v34  ;;  %v7775_v54 = vand.u32 2147483647, %v17814_v13  ;;  %v7792_v41 = vand.u32 2147483648, %v17940_v49 }
 0x913   : > { %v7768_v47 = vsub.f32 1.0, %v7767_v30  ;;  %v18024_v9 = vpop.eup %9367  ;;  %v8199_v10 = vrot.slane %v7659_v61, 4  ;;  %v7624_v56 = vsel %vm18017_vm9, %v17899_v37, %v7620_v4  ;;  %v7782_v14 = vmul.f32 %v18011_v27, %v17940_v49 }
 0x914   : > { %v7790_v8 = vand.u32 2147483647, %v17940_v49  ;;  %vm18032_vm1 = vcmp.eq.f32.partialorder %v7550_v32, 8.507059e+37  ;;  %v7553_v18 = vor.u32 1.1754944e-38, %v7552_v5  ;;  %vm7771_vm2 = vweird.f32 %v17814_v13 }
 0x915   : > { %v7769_v34 = vmul.f32 %v17991_v15, %v7768_v47  ;;  %v7737_v61 = vmul.f32 %v18024_v9, %v17945_v1  ;;  %vm7547_vm10 = vweird.f32 %v17964_v58  ;;  %v7778_v37 = vor.u32 1.1754944e-38, %v7777_v55 }
 0x916   : > { %v7783_v4 = vsub.f32 1.0, %v7782_v14  ;;  %vm7786_vm8 = vweird.f32 %v17940_v49  ;;  %v7629_v32 = vsel %vm17975_vm14, %v7628_v48, %v7624_v56  ;;  %v7545_v30 = vadd.f32 %v17964_v58, %v7544_v28  ;;  %vm18068_vm12 = vmor %vm7546_vm6, %vm7547_vm10 }
 0x917   : > { %vm18045_vm7 = vcmp.eq.f32.partialorder %v7775_v54, 8.507059e+37  ;;  %v7793_v35 = vor.u32 1.1754944e-38, %v7792_v41  ;;  %v7738_v47 = vsub.f32 1.0, %v7737_v61  ;;  %v8200_v24 = vsel %vm2142_vm11, %v8199_v10, %v7629_v32 }
 0x918   : > { %v18049_v31 = vpop.eup %9369  ;;  %vm7772_vm13 = vweird.f32 %v17991_v15  ;;  %v7784_v55 = vmul.f32 %v18011_v27, %v7783_v4  ;;  %vm18054_vm5 = vcmp.eq.f32.partialorder %v7790_v8, 8.507059e+37  ;;  %vm7741_vm15 = vweird.f32 %v17945_v1  ;;  %v18076_v8 = vpop.xlane.xlu1 %6252 }
 0x919   : > { %v7770_v52 = vadd.f32 %v17991_v15, %v7769_v34  ;;  %v7739_v48 = vmul.f32 %v18024_v9, %v7738_v47  ;;  %v7745_v28 = vand.u32 2147483647, %v17945_v1  ;;  %v7887_v54 = vmul.f32 %v18049_v31, %v17908_v6  ;;  %vm18089_vm0 = vmor %vm7771_vm2, %vm7772_vm13 }
 0x91a   : > { %v7785_v10 = vadd.f32 %v18011_v27, %v7784_v55  ;;  %vm7787_vm4 = vweird.f32 %v18011_v27  ;;  %vm7742_vm14 = vweird.f32 %v18024_v9  ;;  %v7747_v56 = vand.u32 2147483648, %v17945_v1 }
 0x91b   : > { %v7549_v34 = vsel %vm18068_vm12, %v17964_v58, %v7545_v30  ;;  %v7740_v22 = vadd.f32 %v18024_v9, %v7739_v48  ;;  %v7888_v61 = vsub.f32 1.0, %v7887_v54  ;;  %v18083_v4 = vperm.slane %v8144_v11, %v19543_v36  ;;  %vm18105_vm6 = vmor %vm7786_vm8, %vm7787_vm4 }
 0x91c   : > { %v7895_v47 = vand.u32 2147483647, %v17908_v6  ;;  %v18096_v55 = vperm.slane %v17233_v59, %v19543_v36  ;;  %v8149_v58 = vrot.slane %v17564_v12, 4  ;;  %9371 = vrcp.f32 %v17997_v2  ;;  %vm18124_vm2 = vmor %vm7741_vm15, %vm7742_vm14 }
 0x91d   : > { %v7774_v11 = vsel %vm18089_vm0, %v17991_v15, %v7770_v52  ;;  %vm18109_vm9 = vcmp.eq.f32.partialorder %v7745_v28, 8.507059e+37  ;;  %v7889_v59 = vmul.f32 %v18049_v31, %v7888_v61  ;;  %v8161_v48 = vrot.slane %v18083_v4, 4 }
 0x91e   : > { %v7554_v54 = vsel %vm18032_vm1, %v7553_v18, %v7549_v34  ;;  %v7789_v15 = vsel %vm18105_vm6, %v18011_v27, %v7785_v10  ;;  %v18130_v52 = vperm.slane %v17758_v16, %v19543_v36  ;;  %v8150_v44 = vsel %vm2142_vm11, %v8149_v58, %v18096_v55 }
 0x91f   : > { %v7744_v18 = vsel %vm18124_vm2, %v18024_v9, %v7740_v22  ;;  %v7748_v27 = vor.u32 1.1754944e-38, %v7747_v56  ;;  %v7897_v28 = vand.u32 2147483648, %v17908_v6  ;;  %v18139_v1 = vperm.slane %v8150_v44, %v19668_v63 }
 0x920   : > { %v7779_v41 = vsel %vm18045_vm7, %v7778_v37, %v7774_v11  ;;  %v7890_v10 = vadd.f32 %v18049_v31, %v7889_v59  ;;  %vm7892_vm1 = vweird.f32 %v18049_v31  ;;  %v8162_v16 = vsel %vm2142_vm11, %v8161_v48, %v18130_v52  ;;  %v18191_v30 = vpop.xlane.xlu1 %6291 }
 0x921   : > { %v19849_v34 = vrot.slane %v17725_v38, 4  ;;  %v7794_v56 = vsel %vm18054_vm5, %v7793_v35, %v7789_v15  ;;  %v18153_v22 = vperm.slane %v8162_v16, %v19668_v63  ;;  %v8175_v5 = vrot.slane %v18139_v1, 4 }
 0x922   : > { %v18156_v37 = vpop.eup %9371  ;;  %v19850_v61 = vrot.slane %v17836_v21, 4  ;;  %v18163_v58 = vperm.slane %v8200_v24, %v19543_v36  ;;  %v7749_v38 = vsel %vm18109_vm9, %v7748_v27, %v7744_v18  ;;  %vm7891_vm10 = vweird.f32 %v17908_v6 }
 0x923   : > { %v8182_v9 = vsel %vm2142_vm11, %v19849_v34, %v7554_v54  ;;  %v8255_v35 = vrot.slane %v7779_v41, 4  ;;  %vm18168_vm8 = vmor %vm7891_vm10, %vm7892_vm1  ;;  %vm18172_vm7 = vcmp.eq.f32.partialorder %v7895_v47, 8.507059e+37  ;;  %v8176_v21 = vsel %vm2142_vm11, %v18153_v22, %v8175_v5 }
 0x924   : > { %v8194_v32 = vsel %vm2142_vm11, %v19850_v61, %v18006_v39  ;;  %v7842_v24 = vmul.f32 %v18156_v37, %v17997_v2  ;;  %v18181_v39 = vperm.slane %v8182_v9, %v19543_v36  ;;  %v19855_v6 = vrot.slane %v17883_v0, 4  ;;  %8365 = vrot.lane.b32.xlu0 %v8176_v21, %s9652_s26 }
 0x925   : > { %v7894_v47 = vsel %vm18168_vm8, %v18049_v31, %v7890_v10  ;;  %9373 = vrcp.f32 %v18076_v8  ;;  %v8256_v59 = vsel %vm2142_vm11, %v8255_v35, %v7749_v38  ;;  %v7898_v48 = vor.u32 1.1754944e-38, %v7897_v28 }
 0x926   : > { %v8294_v13 = vsel %vm2142_vm11, %v19855_v6, %v7794_v56  ;;  %v7843_v54 = vsub.f32 1.0, %v7842_v24  ;;  %v7850_v15 = vand.u32 2147483647, %v17997_v2  ;;  %v7852_v0 = vand.u32 2147483648, %v17997_v2 }
 0x927   : > { %v18197_v49 = vperm.slane %v8194_v32, %v19543_v36  ;;  %v8205_v44 = vrot.slane %v17765_v60, 4  ;;  %v8217_v31 = vrot.slane %v18163_v58, 4  ;;  %v18202_v18 = vperm.slane %v8294_v13, %v19543_v36 }
 0x928   : > { %v18206_v27 = vsel %vm18172_vm7, %v7898_v48, %v7894_v47  ;;  %v7844_v28 = vmul.f32 %v18156_v37, %v7843_v54  ;;  %9375 = vrcp.f32 %v18191_v30  ;;  %v7670_v41 = vand.u32 2147483647, %v18076_v8 }
 0x929   : > { %v7672_v10 = vand.u32 2147483648, %v18076_v8  ;;  %v8206_v16 = vsel %vm2142_vm11, %v8205_v44, %v18181_v39  ;;  %v8218_v34 = vsel %vm2142_vm11, %v8217_v31, %v18197_v49  ;;  %v18217_v9 = vperm.slane %v8256_v59, %v19543_v36 }
 0x92a   : > { %v7845_v56 = vadd.f32 %v18156_v37, %v7844_v28  ;;  %vm7847_vm13 = vweird.f32 %v18156_v37  ;;  %v18222_v5 = vperm.slane %v8206_v16, %v19668_v63  ;;  %v8311_v32 = vrot.slane %v18206_v27, 4 }
 0x92b   : > { %v9374_v61 = vpop.eup %9373  ;;  %vm7846_vm5 = vweird.f32 %v17997_v2  ;;  %vm18226_vm15 = vcmp.eq.f32.partialorder %v7850_v15, 8.507059e+37  ;;  %v7853_v35 = vor.u32 1.1754944e-38, %v7852_v0  ;;  %vm7666_vm12 = vweird.f32 %v18076_v8 }
 0x92c   : > { %v7662_v14 = vmul.f32 %v9374_v61, %v18076_v8  ;;  %v18233_v11 = vperm.slane %v8218_v34, %v19668_v63  ;;  %v8231_v21 = vrot.slane %v18222_v5, 4  ;;  %vm18236_vm4 = vmor %vm7846_vm5, %vm7847_vm13  ;;  %vm18240_vm14 = vcmp.eq.f32.partialorder %v7670_v41, 8.507059e+37 }
 0x92d   : > { %v7673_v6 = vor.u32 1.1754944e-38, %v7672_v10  ;;  %vm7861_vm0 = vweird.f32 %v18191_v30  ;;  %v7939_v13 = vrot.slane %v16851_v23, 4  ;;  %v7849_v59 = vsel %vm18236_vm4, %v18156_v37, %v7845_v56 }
 0x92e   : > { %v9376_v47 = vpop.eup %9375  ;;  %v7663_v48 = vsub.f32 1.0, %v7662_v14  ;;  %v8232_v54 = vsel %vm2142_vm11, %v18233_v11, %v8231_v21  ;;  %v7865_v15 = vand.u32 2147483647, %v18191_v30  ;;  %v7867_v44 = vand.u32 2147483648, %v18191_v30 }
 0x92f   : > { %8367 = vrot.lane.b32.xlu1 %v8232_v54, %s9652_s26  ;;  %v7857_v0 = vmul.f32 %v9376_v47, %v18191_v30  ;;  %v7927_v31 = vrot.slane %v19681_v43, 4  ;;  %v7940_v23 = vsel %vm2142_vm11, %v16813_v40, %v7939_v13  ;;  %vm7667_vm6 = vweird.f32 %v9374_v61 }
 0x930   : > { %v7664_v28 = vmul.f32 %v9374_v61, %v7663_v48  ;;  %v18259_v37 = vperm.slane %v7940_v23, %v19668_v63  ;;  %v8107_v41 = vrot.slane %v17645_v45, 4  ;;  %v7854_v10 = vsel %vm18226_vm15, %v7853_v35, %v7849_v59  ;;  %vm7668_vm2 = vmor %vm7666_vm12, %vm7667_vm6 }
 0x931   : > { %v7858_v16 = vsub.f32 1.0, %v7857_v0  ;;  %v7928_v34 = vsel %vm2142_vm11, %v16268_v3, %v7927_v31  ;;  %v8254_v43 = vperm.slane %v17983_v17, %v19543_v36  ;;  %vm18268_vm9 = vcmp.eq.f32.partialorder %v7865_v15, 8.507059e+37 }
 0x932   : > { %v7665_v56 = vadd.f32 %v9374_v61, %v7664_v28  ;;  %v7953_v14 = vrot.slane %v18259_v37, 4  ;;  %v8108_v45 = vsel %vm2142_vm11, %v17599_v51, %v8107_v41  ;;  %vm7862_vm1 = vweird.f32 %v9376_v47 }
 0x933   : > { %v7859_v38 = vmul.f32 %v9376_v47, %v7858_v16  ;;  %v8095_v3 = vrot.slane %v17619_v46, 4  ;;  %v8273_v35 = vrot.slane %v18217_v9, 4  ;;  %v7868_v21 = vor.u32 1.1754944e-38, %v7867_v44  ;;  %vm7863_vm10 = vmor %vm7861_vm0, %vm7862_vm1 }
 0x934   : > { %v7669_v17 = vsel %vm7668_vm2, %v9374_v61, %v7665_v56  ;;  %v18280_v24 = vperm.slane %v7928_v34, %v19668_v63  ;;  %v8275_v13 = vrot.slane %v8254_v43, 4  ;;  %v18287_v8 = vperm.slane %v8108_v45, %v19668_v63 }
 0x935   : > { %v7674_v59 = vsel %vm18240_vm14, %v7673_v6, %v7669_v17  ;;  %v7860_v48 = vadd.f32 %v9376_v47, %v7859_v38  ;;  %v8096_v51 = vsel %vm2142_vm11, %v17528_v57, %v8095_v3  ;;  %v19864_v46 = vrot.slane %v17751_v7, 4 }
 0x936   : > { %v7954_v61 = vsel %vm2142_vm11, %v7953_v14, %v18280_v24  ;;  %v8261_v2 = vrot.slane %v17800_v33, 4  ;;  %v8276_v6 = vsel %vm2142_vm11, %v18217_v9, %v8275_v13  ;;  %v8274_v7 = vsel %vm2142_vm11, %v8273_v35, %v8254_v43 }
 0x937   : > { %v8238_v54 = vsel %vm2142_vm11, %v19864_v46, %v7674_v59  ;;  %v7864_v15 = vsel %vm7863_vm10, %v9376_v47, %v7860_v48  ;;  %8389 = vrot.lane.b32.xlu1 %v7954_v61, %s9651_s27  ;;  %v18303_v0 = vperm.slane %v8276_v6, %v19668_v63  ;;  %v19865_v30 = vrot.slane %v17541_v53, 4 }
 0x938   : > { %v8242_v57 = vperm.slane %v8238_v54, %v19543_v36  ;;  %v7869_v31 = vsel %vm18268_vm9, %v7868_v21, %v7864_v15  ;;  %v18311_v23 = vperm.slane %v8096_v51, %v19668_v63  ;;  %v7995_v9 = vrot.slane %v16754_v26, 4 }
 0x939   : > { %v8306_v44 = vsel %vm2142_vm11, %v19865_v30, %v7854_v10  ;;  %v8312_v47 = vsel %vm2142_vm11, %v8311_v32, %v7869_v31  ;;  %v8121_v28 = vrot.slane %v18287_v8, 4  ;;  %v18324_v34 = vperm.slane %v8274_v7, %v19668_v63 }
 0x93a   : > { %v8262_v41 = vsel %vm2142_vm11, %v8261_v2, %v8242_v57  ;;  %v8263_v16 = vrot.slane %v8242_v57, 4  ;;  %v8316_v53 = vperm.slane %v8312_v47, %v19543_v36  ;;  %v7996_v26 = vsel %vm2142_vm11, %v16678_v62, %v7995_v9 }
 0x93b   : > { %v18321_v10 = vperm.slane %v8262_v41, %v19668_v63  ;;  %v8289_v32 = vrot.slane %v18303_v0, 4  ;;  %v7983_v43 = vrot.slane %v16708_v29, 4  ;;  %v8310_v56 = vperm.slane %v8306_v44, %v19543_v36 }
 0x93c   : > { %v8264_v27 = vsel %vm2142_vm11, %v17800_v33, %v8263_v16  ;;  %v8317_v45 = vrot.slane %v17952_v42, 4  ;;  %v8329_v38 = vrot.slane %v8316_v53, 4  ;;  %v8122_v3 = vsel %vm2142_vm11, %v8121_v28, %v18311_v23 }
 0x93d   : > { %v8287_v40 = vrot.slane %v18321_v10, 4  ;;  %v8272_v14 = vperm.slane %v8264_v27, %v19668_v63  ;;  %v8004_v62 = vperm.slane %v7996_v26, %v19668_v63  ;;  %v7984_v21 = vsel %vm2142_vm11, %v16453_v19, %v7983_v43 }
 0x93e   : > { %v8318_v36 = vsel %vm2142_vm11, %v8317_v45, %v18202_v18  ;;  %v8330_v29 = vsel %vm2142_vm11, %v8329_v38, %v8310_v56  ;;  %v8163_v51 = vrot.slane %v18130_v52, 4  ;;  %v8051_v46 = vrot.slane %v17050_v25, 4 }
 0x93f   : > { %v8288_v33 = vsel %vm2142_vm11, %v18324_v34, %v8287_v40  ;;  %v8290_v35 = vsel %vm2142_vm11, %v8289_v32, %v8272_v14  ;;  %8395 = vrot.lane.b32.xlu1 %v8122_v3, %s9651_s27  ;;  %v18348_v17 = vperm.slane %v8318_v36, %v19668_v63  ;;  %v18353_v13 = vperm.slane %v8330_v29, %v19668_v63 }
 0x940   : > { %8369 = vrot.lane.b32.xlu2 %v8288_v33, %s9652_s26  ;;  %v8009_v59 = vrot.slane %v8004_v62, 4  ;;  %v8319_v54 = vrot.slane %v18202_v18, 4  ;;  %v7992_v61 = vperm.slane %v7984_v21, %v19668_v63  ;;  %v8164_v19 = vsel %vm2142_vm11, %v18083_v4, %v8163_v51  ;;  %v19866_v4 = vld [vmem:[#allocation27_spill] sm:$0xff]  ;;  %v18431_v51 = vpop.permute.xlu2 %8357 }
 0x941   : > { %v8343_v48 = vrot.slane %v18348_v17, 4  ;;  %v8052_v6 = vsel %vm2142_vm11, %v17040_v50, %v8051_v46  ;;  %v8039_v57 = vrot.slane %v16856_v20, 4  ;;  %v8331_v18 = vrot.slane %v8310_v56, 4 }
 0x942   : > { %v8060_v52 = vperm.slane %v8052_v6, %v19668_v63  ;;  %v8320_v25 = vsel %vm2142_vm11, %v17952_v42, %v8319_v54  ;;  %v8010_v15 = vsel %vm2142_vm11, %v8009_v59, %v7992_v61  ;;  %v8172_v30 = vperm.slane %v8164_v19, %v19668_v63 }
 0x943   : > { %v8344_v2 = vsel %vm2142_vm11, %v18353_v13, %v8343_v48  ;;  %v8328_v7 = vperm.slane %v8320_v25, %v19668_v63  ;;  %v8040_v44 = vsel %vm2142_vm11, %v19866_v4, %v8039_v57  ;;  %v8332_v50 = vsel %vm2142_vm11, %v8316_v53, %v8331_v18  ;;  %v18429_v48 = vpop.f32.mrf.mxu3  ;;  %v8360_v25 = vpop.permute.xlu0 %8359 }
 0x944   : > { %8371 = vrot.lane.b32.xlu0 %v8344_v2, %s9652_s26  ;;  %v8219_v31 = vrot.slane %v18197_v49, 4  ;;  %v8151_v20 = vrot.slane %v18096_v55, 4  ;;  %v8065_v42 = vrot.slane %v8060_v52, 4  ;;  %v8340_v9 = vperm.slane %v8332_v50, %v19668_v63 }
 0x945   : > { %v8347_v47 = vrot.slane %v8328_v7, 4  ;;  %v8207_v28 = vrot.slane %v18181_v39, 4  ;;  %v8048_v16 = vperm.slane %v8040_v44, %v19668_v63  ;;  %v8177_v26 = vrot.slane %v8172_v30, 4 }
 0x946   : > { %v8152_v41 = vsel %vm2142_vm11, %v17564_v12, %v8151_v20  ;;  %v8345_v49 = vrot.slane %v8340_v9, 4  ;;  %v8220_v27 = vsel %vm2142_vm11, %v18163_v58, %v8219_v31  ;;  %v8291_v32 = vrot.slane %v8272_v14, 4 }
 0x947   : > { %8401 = vrot.lane.b32.xlu1 %v8290_v35, %s9651_s27  ;;  %v8348_v53 = vsel %vm2142_vm11, %v8340_v9, %v8347_v47  ;;  %v8011_v55 = vrot.slane %v7992_v61, 4  ;;  %v8066_v43 = vsel %vm2142_vm11, %v8065_v42, %v8048_v16  ;;  %v8160_v39 = vperm.slane %v8152_v41, %v19668_v63  ;;  %v8362_v61 = vpop.permute.xlu1 %8361  ;;  %v19867_v9 = vld [vmem:[#allocation20_spill] sm:$0xff] }
 0x948   : > { %8391 = vrot.lane.b32.xlu2 %v8010_v15, %s9651_s27  ;;  %v8346_v56 = vsel %vm2142_vm11, %v8345_v49, %v8328_v7  ;;  %v8208_v12 = vsel %vm2142_vm11, %v17765_v60, %v8207_v28  ;;  %v8292_v40 = vsel %vm2142_vm11, %v18303_v0, %v8291_v32  ;;  %v8173_v45 = vrot.slane %v18153_v22, 4  ;;  %v19869_v49 = vld [vmem:[#allocation21_spill] sm:$0xff] }
 0x949   : > { %v8228_v58 = vperm.slane %v8220_v27, %v19668_v63  ;;  %v8012_v14 = vsel %vm2142_vm11, %v8004_v62, %v8011_v55  ;;  %v8178_v38 = vsel %vm2142_vm11, %v8177_v26, %v8160_v39  ;;  %v8216_v60 = vperm.slane %v8208_v12, %v19668_v63 }
 0x94a   : > { %v18403_v3 = vsel %vm2142_vm11, %v8173_v45, %v18139_v1  ;;  %v8179_v22 = vrot.slane %v8160_v39, 4  ;;  %v7955_v1 = vrot.slane %v18280_v24, 4  ;;  %v8067_v36 = vrot.slane %v8048_v16, 4  ;;  %v19868_v16 = vld [vmem:[#allocation71_spill] sm:$0xff] }
 0x94b   : > { %v8233_v33 = vrot.slane %v8228_v58, 4  ;;  %v8123_v29 = vrot.slane %v18311_v23, 4  ;;  %v8235_v21 = vrot.slane %v8216_v60, 4  ;;  %v18433_v23 = vpop.permute.xlu2 %8363  ;;  %v6920_v54 = vpop.f32.mrf.mxu3  ;;  %v8061_v47 = vrot.slane %v19867_v9, 4 }
 0x94c   : > { %8393 = vrot.lane.b32.xlu0 %v8066_v43, %s9651_s27  ;;  %v8180_v62 = vsel %vm2142_vm11, %v8172_v30, %v8179_v22  ;;  %v7956_v35 = vsel %vm2142_vm11, %v18259_v37, %v7955_v1  ;;  %v8068_v63 = vsel %vm2142_vm11, %v8060_v52, %v8067_v36  ;;  %v18427_v37 = vpop.f32.mrf.mxu2  ;;  %vm19870_vm8 = vcmask 261120   ;;  %v19871_v43 = vld [vmem:[#allocation39_spill] sm:$0xff]  ;;  %v18469_v1 = vld [vmem:[%s18595_s4] ss:$0 sm:$0xff] }
 0x94d   : > { %v8234_v0 = vsel %vm2142_vm11, %v8233_v33, %v8216_v60  ;;  %v8124_v59 = vsel %vm2142_vm11, %v18287_v8, %v8123_v29  ;;  %v8236_v24 = vsel %vm2142_vm11, %v8228_v58, %v8235_v21  ;;  %v8062_v26 = vsel %vm2142_vm11, %v8061_v47, %v19869_v49  ;;  %vm19872_vm7 = vmmov %vm19870_vm8  ;;  %v18480_v29 = vld [vmem:[%s18596_s5] ss:$0 sm:$0xff] }
 0x94e   : > { %v8447_v32 = vsel %vm19870_vm8, %v8062_v26, %v8362_v61  ;;  %vm19873_vm13 = vcmask 785408   ;;  %vm19875_vm15 = vmmov %vm19872_vm7  ;;  %v9436_v26 = vld [vmem:[%s9825_s16 + $0x48] sm:$0xff] }
 0x94f   : > { %8423 = vrot.lane.b32.xlu1 %v8012_v14, %s9653_s19  ;;  %v8229_v14 = vrot.slane %v18233_v11, 4  ;;  %vm19874_vm5 = vmmov %vm19873_vm13 }
 0x950   : > { %8397 = vrot.lane.b32.xlu2 %v8178_v38, %s9651_s27  ;;  %vm19876_vm12 = vmmov %vm19872_vm7 }
 0x951   : > { %v8230_v11 = vsel %vm2142_vm11, %v8229_v14, %v18222_v5  ;;  %vm19878_vm4 = vmmov %vm19874_vm5 }
 0x952   : > { %vm19879_vm14 = vmmov %vm19878_vm4 }
 0x953   : > { %v6923_v19 = vpop.f32.mrf.mxu3  ;;  %vm19881_vm0 = vmmov %vm19872_vm7 }
 0x954   : > { %8399 = vrot.lane.b32.xlu0 %v8234_v0, %s9651_s27  ;;  %v6879_v46 = vpop.f32.mrf.mxu2  ;;  %vm19882_vm6 = vmmov %vm19881_vm0 }
 0x955   : > { %v6921_v58 = vadd.f32 %v6920_v54, %v6879_v46  ;;  %vm19883_vm9 = vmmov %vm19878_vm4 }
 0x956   : > { %vm19885_vm2 = vmmov %vm19878_vm4 }
 0x957   : > { %8429 = vrot.lane.b32.xlu1 %v8180_v62, %s9653_s19  ;;  %vm19887_vm1 = vmmov %vm19881_vm0 }
 0x958   : > { %8403 = vrot.lane.b32.xlu2 %v8346_v56, %s9651_s27  ;;  %vm19888_vm10 = vmmov %vm19885_vm2  ;;  %s9577_s27 = sshra.s32 %s8535_s17, 4  ;;  %s9578_s27 = int_to_ptr.hbm [resolvable:$true] %s9577_s27 }
 0x959   : > { %vm19889_vm8 = vmmov %vm19881_vm0  ;;  %s9579_s26 = scalar_lea.hbm %s9578_s27, 128  ;;  %p9584_p9 = scmp.lt.s32.totalorder %s9578_s27, %s18597_s6 }
 0x95a   : > { %p9580_p1 = scmp.ne.s32.totalorder %s9578_s27, %s9579_s26  ;;  %p9585_p10 = scmp.lt.s32.totalorder %s9583_s11, %s9579_s26 }
 0x95b   : > { %v18439_v18 = vpop.f32.mrf.mxu3 }
 0x95c   : > { %8421 = vrot.lane.b32.xlu0 %v7956_v35, %s9653_s19  ;;  %v6882_v2 = vpop.f32.mrf.mxu2  ;;  %p9581_p4 = pnand %p9580_p1, %p9763_p5  ;;  %p9586_p2 = por %p9585_p10, %p9584_p9 }
 0x95d   : > { %v6924_v39 = vadd.f32 %v6923_v19, %v6882_v2 }
 0x95e   : > { %p9582_p8 = pneg %p9581_p4 }
 0x95f   : > { %8435 = vrot.lane.b32.xlu1 %v8348_v53, %s9653_s19  ;;  %v8005_v53 = vrot.slane %v19868_v16, 4 }
 0x960   : > { %8425 = vrot.lane.b32.xlu2 %v8068_v63, %s9653_s19  ;;  %p9587_p11 = pnand %p9586_p2, %p9582_p8 }
 0x961   : > { %v8006_v56 = vsel %vm2142_vm11, %v8005_v53, %v19871_v43 }
 0x963   : > { %v6929_v44 = vpop.f32.mrf.mxu3 }
 0x964   : > { %8427 = vrot.lane.b32.xlu0 %v8124_v59, %s9653_s19  ;;  %v18437_v52 = vpop.f32.mrf.mxu2 }
 0x968   : > { %8431 = vrot.lane.b32.xlu2 %v8236_v24, %s9653_s19 }
 0x96b   : > { %v6932_v41 = vpop.f32.mrf.mxu3 }
 0x96c   : > { %8433 = vrot.lane.b32.xlu0 %v8292_v40, %s9653_s19  ;;  %v6888_v4 = vpop.f32.mrf.mxu2  ;;  %v8446_v40 = vsel %vm19872_vm7, %v8006_v56, %v8360_v25  ;;  %vm19890_vm7 = vmmov %vm19885_vm2 }
 0x96d   : > { %v6930_v9 = vadd.f32 %v6929_v44, %v6888_v4  ;;  %v19880_v44 = vld [vmem:[#allocation38_spill] sm:$0xff] }
 0x973   : > { %v18472_v36 = vpop.f32.mrf.mxu3 }
 0x974   : > { %v6891_v42 = vpop.f32.mrf.mxu2 }
 0x975   : > { %v6933_v59 = vadd.f32 %v6932_v41, %v6891_v42  ;;  %v8341_v41 = vrot.slane %v18353_v13, 4 }
 0x977   : > { %v8342_v13 = vsel %vm2142_vm11, %v8341_v41, %v18348_v17 }
 0x97c   : > { %v18464_v22 = vpop.f32.mrf.mxu2 }
 0x984   : > { %v6897_v43 = vpop.f32.mrf.mxu2 }
 0x996   : > { %v8366_v30 = vpop.permute.xlu0 %8365 }
 0x997   : > { %v8449_v54 = vsel %vm19876_vm12, %v18403_v3, %v8366_v30  ;;  %v9435_v30 = vld [vmem:[%s9825_s16 + $0x50] sm:$0xff] }
 0x99a   : > { %v18435_v8 = vpop.permute.xlu2 %8369 }
 0x9a1   : > { %v8368_v6 = vpop.permute.xlu1 %8367 }
 0x9a2   : > { %v8392_v57 = vpop.permute.xlu2 %8391  ;;  %v8450_v24 = vsel %vm19875_vm15, %v8230_v11, %v8368_v6 }
 0x9a3   : > { %v8454_v38 = vsel %vm2654_vm3, %v8446_v40, %v8392_v57  ;;  %v19877_v57 = vld [vmem:[#allocation30_spill] sm:$0xff]  ;;  %v6938_v40 = vpop.f32.mrf.mxu3 }
 0x9a4   : > { %v7949_v25 = vrot.slane %v19877_v57, 4 }
 0x9a9   : > { %v18441_v15 = vpop.permute.xlu1 %8389 }
 0x9aa   : > { %v8398_v7 = vpop.permute.xlu2 %8397 }
 0x9ab   : > { %v8457_v47 = vsel %vm2654_vm3, %v8449_v54, %v8398_v7  ;;  %v7950_v7 = vsel %vm2142_vm11, %v7949_v25, %v19880_v44 }
 0x9b1   : > { %v18443_v50 = vpop.permute.xlu1 %8395 }
 0x9b2   : > { %v18445_v31 = vpop.permute.xlu2 %8403 }
 0x9b6   : > { %v18447_v20 = vpop.permute.xlu0 %8371 }
 0x9b9   : > { %v18450_v28 = vpop.permute.xlu1 %8401 }
 0x9ba   : > { %v8426_v27 = vpop.permute.xlu2 %8425 }
 0x9be   : > { %v8394_v55 = vpop.permute.xlu0 %8393 }
 0x9bf   : > { %v8455_v12 = vsel %vm2654_vm3, %v8447_v32, %v8394_v55  ;;  %v8445_v55 = vsel %vm19881_vm0, %v7950_v7, %v18431_v51  ;;  %v8452_v51 = vsel %vm19882_vm6, %v8342_v13, %v18447_v20 }
 0x9c0   : > { %v8463_v45 = vsel %vm19873_vm13, %v8455_v12, %v8426_v27  ;;  %v6918_v12 = vadd.f32 %v18429_v48, %v18427_v37  ;;  %v8460_v48 = vsel %vm2654_vm3, %v8452_v51, %v18445_v31 }
 0x9c1   : > { %v8424_v60 = vpop.permute.xlu1 %8423  ;;  %v8471_v33 = vmul.f32 %v8463_v45, %v6924_v39  ;;  %v8453_v45 = vsel %vm2654_vm3, %v8445_v55, %v18441_v15  ;;  %v9437_v15 = vld [vmem:[%s9825_s16 + $0x68] sm:$0xff] }
 0x9c2   : > { %v8462_v0 = vsel %vm19874_vm5, %v8454_v38, %v8424_v60  ;;  %v8432_v61 = vpop.permute.xlu2 %8431 }
 0x9c3   : > { %v8470_v62 = vmul.f32 %v8462_v0, %v6921_v58  ;;  %v8479_v35 = vmul.f32 %v18469_v1, %v8471_v33  ;;  %v6939_v33 = vadd.f32 %v6938_v40, %v6897_v43 }
 0x9c5   : > { %v8478_v63 = vmul.f32 %v18469_v1, %v8470_v62  ;;  %v8487_v21 = vadd.f32 %v18480_v29, %v8479_v35  ;;  %v19884_v35 = vld [vmem:[#allocation44_spill] sm:$0xff] }
 0x9c6   : > { %v8400_v46 = vpop.permute.xlu0 %8399  ;;  %v8117_v11 = vrot.slane %v19884_v35, 4 }
 0x9c7   : > { %v8486_v5 = vadd.f32 %v18480_v29, %v8478_v63  ;;  %v8495_v2 = vmax.f32 %v8487_v21, 0.0  ;;  %v8458_v19 = vsel %vm2654_vm3, %v8450_v24, %v8400_v46  ;;  %v9438_v21 = vld [vmem:[%s9825_s16 + $0x60] sm:$0xff] }
 0x9c8   : > { %v8466_v42 = vsel %vm19878_vm4, %v8458_v19, %v8432_v61  ;;  %v19886_v46 = vld [vmem:[#allocation22_spill] sm:$0xff] }
 0x9c9   : > { %v8494_v6 = vmax.f32 %v8486_v5, 0.0  ;;  %v8430_v3 = vpop.permute.xlu1 %8429  ;;  %v8503_v16 = vadd.f32 %v9435_v30, %v8495_v2  ;;  %v8474_v53 = vmul.f32 %v8466_v42, %v6933_v59  ;;  %v8118_v54 = vsel %vm2142_vm11, %v8117_v11, %v19886_v46  ;;  %v9439_v42 = vld [vmem:[%s9825_s16 + $0x40] sm:$0xff] }
 0x9ca   : > { %v8465_v49 = vsel %vm19879_vm14, %v8457_v47, %v8430_v3  ;;  %v8448_v31 = vsel %vm19887_vm1, %v8118_v54, %v18433_v23  ;;  %v6927_v2 = vadd.f32 %v18439_v18, %v18437_v52  ;;  %v8285_v3 = vrot.slane %v18324_v34, 4  ;;  %v9440_v18 = vld [vmem:[%s9825_s16 + $0x78] sm:$0xff] }
 0x9cb   : > { %v8502_v27 = vadd.f32 %v9436_v26, %v8494_v6  ;;  %v8473_v32 = vmul.f32 %v8465_v49, %v6930_v9  ;;  %8679 = vst [vmem:[%s14246_s18 + $0x50] sm:$0xff] %v8503_v16  ;;  %v8482_v4 = vmul.f32 %v18469_v1, %v8474_v53  ;;  %v8456_v19 = vsel %vm2654_vm3, %v8448_v31, %v18443_v50 }
 0x9cc   : > { %v8286_v30 = vsel %vm2142_vm11, %v8285_v3, %v18321_v10  ;;  %v6936_v49 = vadd.f32 %v18472_v36, %v18464_v22  ;;  %v9442_v36 = vld [vmem:[%s9825_s16 + $0x70] sm:$0xff] }
 0x9cd   : > { %8678 = vst [vmem:[%s14246_s18 + $0x48] sm:$0xff] %v8502_v27  ;;  %v8481_v56 = vmul.f32 %v18469_v1, %v8473_v32  ;;  %v8490_v39 = vadd.f32 %v18480_v29, %v8482_v4  ;;  %v8451_v53 = vsel %vm19889_vm8, %v8286_v30, %v18435_v8  ;;  %v9441_v32 = vld [vmem:[%s9825_s16 + $0x58] sm:$0xff] }
 0x9ce   : > { %v8422_v58 = vpop.permute.xlu0 %8421  ;;  %v8459_v34 = vsel %vm2654_vm3, %v8451_v53, %v18450_v28 }
 0x9cf   : > { %v8489_v14 = vadd.f32 %v18480_v29, %v8481_v56  ;;  %v8498_v17 = vmax.f32 %v8490_v39, 0.0  ;;  %v8461_v38 = vsel %vm19883_vm9, %v8453_v45, %v8422_v58 }
 0x9d0   : > { %v8469_v60 = vmul.f32 %v8461_v38, %v6918_v12 }
 0x9d1   : > { %v8497_v0 = vmax.f32 %v8489_v14, 0.0  ;;  %v8436_v37 = vpop.permute.xlu1 %8435  ;;  %v8506_v62 = vadd.f32 %v9437_v15, %v8498_v17 }
 0x9d2   : > { %v8468_v20 = vsel %vm19885_vm2, %v8460_v48, %v8436_v37  ;;  %v8477_v63 = vmul.f32 %v18469_v1, %v8469_v60 }
 0x9d3   : > { %v8505_v59 = vadd.f32 %v9438_v21, %v8497_v0  ;;  %v8476_v24 = vmul.f32 %v8468_v20, %v6939_v33  ;;  %8682 = vst [vmem:[%s14246_s18 + $0x68] sm:$0xff] %v8506_v62 }
 0x9d4   : > { %v8485_v5 = vadd.f32 %v18480_v29, %v8477_v63 }
 0x9d5   : > { %8681 = vst [vmem:[%s14246_s18 + $0x60] sm:$0xff] %v8505_v59  ;;  %v8484_v61 = vmul.f32 %v18469_v1, %v8476_v24 }
 0x9d6   : > { %v8493_v57 = vmax.f32 %v8485_v5, 0.0  ;;  %v8428_v25 = vpop.permute.xlu0 %8427 }
 0x9d7   : > { %v8492_v9 = vadd.f32 %v18480_v29, %v8484_v61  ;;  %v8464_v47 = vsel %vm19888_vm10, %v8456_v19, %v8428_v25 }
 0x9d8   : > { %v8501_v6 = vadd.f32 %v9439_v42, %v8493_v57  ;;  %v8472_v23 = vmul.f32 %v8464_v47, %v6927_v2 }
 0x9d9   : > { %v8500_v41 = vmax.f32 %v8492_v9, 0.0 }
 0x9da   : > { %8677 = vst [vmem:[%s14246_s18 + $0x40] sm:$0xff] %v8501_v6  ;;  %v8480_v52 = vmul.f32 %v18469_v1, %v8472_v23 }
 0x9db   : > { %v8508_v50 = vadd.f32 %v9440_v18, %v8500_v41 }
 0x9dc   : > { %v8488_v16 = vadd.f32 %v18480_v29, %v8480_v52 }
 0x9dd   : > { %8684 = vst [vmem:[%s14246_s18 + $0x78] sm:$0xff] %v8508_v50 }
 0x9de   : > { %v8496_v26 = vmax.f32 %v8488_v16, 0.0  ;;  %v8434_v27 = vpop.permute.xlu0 %8433 }
 0x9df   : > { %v8467_v10 = vsel %vm19890_vm7, %v8459_v34, %v8434_v27 }
 0x9e0   : > { %v8504_v4 = vadd.f32 %v9441_v32, %v8496_v26  ;;  %v8475_v44 = vmul.f32 %v8467_v10, %v6936_v49 }
 0x9e2   : > { %8680 = vst [vmem:[%s14246_s18 + $0x58] sm:$0xff] %v8504_v4  ;;  %v8483_v8 = vmul.f32 %v18469_v1, %v8475_v44 }
 0x9e4   : > { %v8491_v28 = vadd.f32 %v18480_v29, %v8483_v8 }
 0x9e6   : > { %v8499_v22 = vmax.f32 %v8491_v28, 0.0 }
 0x9e8   : > { %v8507_v7 = vadd.f32 %v9442_v36, %v8499_v22 }
 0x9ea   : > { %8683 = vst [vmem:[%s14246_s18 + $0x70] sm:$0xff] %v8507_v7 }
 0x9eb   : > { %9590 = shalt.err (!%p9587_p11)
}
 0x9ec   : > { %s9654_s10 = smov 128   ;;  %s9655_s16 = smov 8  }
 0x9ed   : > { %8709 = dma.vmem_to_hbm [thread:$0]  (%p9763_p5), %s8533_s8, 2048, %s8535_s17, %s8519_s25, %s9654_s10, %s9654_s10, %s9655_s16  }
 0x9ee PF: > { %s8549_s18 = sand.u32 1, %s9629_s21   ;;  %p19891_p12 = scmp.ge.s32.totalorder %s9641_s24, 2 }
 0x9ef   : > { %s8550_s30 = scalar_lea.sflag [#allocation4], %s8549_s18 }
 0x9f0   : > { %p8726_p13 = pnand %p19891_p12, %p9726_p6 }
 0x9f2   : > { %p8727_p0 = pneg %p8726_p13 }
 0x9f4   : > { %9624 = dma.done.wait (%p8727_p0), %s8550_s30, 2048  }
 0x9f5   : > { %9626 = vsyncadd (%p8727_p0), %s8550_s30, 4294965248  ;;  %s19892_s12 = sld [smem:[#allocation16_spill]]  ;;  %p23_p3 = scmp.ge.s32.totalorder %s9750_s20, 4  }
 0x9f6   : > { %s19893_s23 = sld [smem:[#allocation17_spill]]  ;;  %s19894_s21 = smov %s9633_s22 }
 0x9f7   : > { %s19896_s24 = smov %s9750_s20  ;;  %25 = sbr.rel (!%p23_p3) target bundleno = 12 (0xc), region = 112 }
 0x9fb   : > { %s19895_s22 = smov %s19892_s12 }
 0x9fc   :  { %8556 = vsyncpa [#allocation3], 1 }
 0x9fd   :  { %8558 = vsyncpa [#allocation3 + $0x1], 1 }
 0x9fe   :  { %8559 = vsyncpa [#allocation6], 1 }
 0x9ff   :  { %8561 = vsyncpa [#allocation6 + $0x1], 1 }
 0xa00   :  { %8562 = vsyncpa [#allocation9], 1 }
 0xa01   :  { %8563 = vsyncpa [#allocation4], 1 }
 0xa02   :  { %8565 = vsyncpa [#allocation4 + $0x1], 1 }

</bundles_post_ra>
